<compile_context>
chip_gen: v6e
topology: v6e:2x2x1
jax: 0.10.0
libtpu: 0.0.40
codegen_flags: <defaults>
</compile_context>

<pallas_src>
import jax
import jax.numpy as jnp
from jax.experimental import pallas as pl
from jax.experimental.pallas import tpu as pltpu


_VMEM_SPEC = pl.BlockSpec(memory_space=pltpu.MemorySpace.VMEM)
_EPS = 1e-5


# ------------------------------ fused kernel -------------------------------

def _bn_relu(z, ind_cp, ind_pc, gamma_row, beta_row, inv_count):
    """Training-mode BatchNorm2d + ReLU on channel-major flattened activations.

    z:         [N, C*P]  columns ordered channel-major (col = c*P + p)
    ind_cp:    [C, C*P]  0/1 channel indicator (ind_cp[c, j] = 1 iff j//P == c)
    ind_pc:    [C*P, C]  its transpose
    gamma_row: [1, C], beta_row: [1, C]
    inv_count: python float, 1 / (N*P)  (elements per channel)
    """
    col_sum = jnp.sum(z, axis=0, keepdims=True)                   # [1, C*P]
    col_sqs = jnp.sum(z * z, axis=0, keepdims=True)               # [1, C*P]
    # Channel gather on the MXU (indicator matmuls) instead of XLU lane sums.
    ch_sum = jnp.dot(col_sum, ind_pc, preferred_element_type=jnp.float32)  # [1, C]
    ch_sqs = jnp.dot(col_sqs, ind_pc, preferred_element_type=jnp.float32)  # [1, C]
    mu = ch_sum * inv_count
    var = ch_sqs * inv_count - mu * mu                            # biased var
    scale = gamma_row * jax.lax.rsqrt(var + _EPS)                 # [1, C]
    shift = beta_row - mu * scale                                 # [1, C]
    # Broadcast back to per-column via the indicator (also on the MXU).
    scale_cols = jnp.dot(scale, ind_cp, preferred_element_type=jnp.float32)  # [1, C*P]
    shift_cols = jnp.dot(shift, ind_cp, preferred_element_type=jnp.float32)  # [1, C*P]
    return jnp.maximum(z * scale_cols + shift_cols, 0.0)


def fused_net_kernel(x_ref, a1_ref, s1_ref, s1t_ref, g1_ref, bt1_ref,
                     a2_ref, s2_ref, s2t_ref, g2_ref, bt2_ref,
                     wh_ref, bh_ref,
                     logp_ref, logit_ref):
    """Entire Net forward in one kernel (all operands VMEM-resident).

    x_ref:   [N, 784]    flattened (CHW) input image
    a1_ref:  [784, 1176] unrolled conv1 matrix (padding folded in)
    s1_ref:  [6, 1176]   channel indicator for BN1;  s1t_ref: its transpose
    a2_ref:  [1176, 784] unrolled conv2 matrix
    s2_ref:  [16, 784]   channel indicator for BN2;  s2t_ref: its transpose
    g*/bt*:  [1, C]      BN affine params (row vectors)
    wh_ref:  [784, 10]   folded fc1 @ fc2
    bh_ref:  [1, 10]     folded bias
    """
    x = x_ref[...]
    n = x.shape[0]

    # conv1 (dense, lane-dense output) + BN(train) + ReLU
    z1 = jnp.dot(x, a1_ref[...], preferred_element_type=jnp.float32)   # [N,1176]
    y1 = _bn_relu(z1, s1_ref[...], s1t_ref[...], g1_ref[...], bt1_ref[...],
                  1.0 / (n * 196.0))

    # conv2 + BN(train) + ReLU
    z2 = jnp.dot(y1, a2_ref[...], preferred_element_type=jnp.float32)  # [N,784]
    y2 = _bn_relu(z2, s2_ref[...], s2t_ref[...], g2_ref[...], bt2_ref[...],
                  1.0 / (n * 49.0))

    # folded fc1·fc2 + log_softmax (dim=1)
    z = jnp.dot(y2, wh_ref[...], preferred_element_type=jnp.float32) + bh_ref[...]
    m = jnp.max(z, axis=1, keepdims=True)
    lse = jnp.log(jnp.sum(jnp.exp(z - m), axis=1, keepdims=True)) + m
    logit_ref[...] = z
    logp_ref[...] = z - lse


# ----------------------------- host-side prep ------------------------------

def _dense_conv_matrix(w, H, Ho):
    """Unroll a Conv2d(k=3, s=2, p=1) weight into a dense matrix.

    w: [O, Cin, 3, 3].  Returns A: [Cin*H*H, O*Ho*Ho] such that
    x_flat @ A == conv2d(x, w, stride=2, padding=1) flattened in CHW order
    (no bias).  Built with a tiny batch-independent gather; zero padding is
    realized by the validity mask.
    """
    O, Cin = w.shape[0], w.shape[1]
    d = jnp.arange(H)[:, None] - 2 * jnp.arange(Ho)[None, :] + 1     # [H, Ho]
    valid = (d >= 0) & (d < 3)
    dc = jnp.clip(d, 0, 2)
    # A[o, ci, h, w_, y, x] = w[o, ci, h-2y+1, w_-2x+1] if valid else 0
    A = w[:, :, dc[:, None, :, None], dc[None, :, None, :]]          # [O,Cin,H,H,Ho,Ho]
    mask = (valid[:, None, :, None] & valid[None, :, None, :]).astype(w.dtype)
    A = A * mask[None, None]
    # rows: (ci, h, w_)  — CHW of the input;  cols: (o, y, x) — CHW of output
    return A.transpose(1, 2, 3, 0, 4, 5).reshape(Cin * H * H, O * Ho * Ho)


def net_forward(params, x_nchw):
    """Net.forward(x) with ke=None, start_layer_idx=0, logit=True.

    Returns {'output': log_softmax(z, dim=1), 'logit': z}.
    """
    hi = jax.lax.Precision.HIGHEST
    N = x_nchw.shape[0]
    x_flat = x_nchw.reshape(N, -1)                                   # [N, 784] (CHW)

    # Batch-independent constant prep (tiny; folded/unrolled weights).
    a1 = _dense_conv_matrix(params["w_conv1"], 28, 14)               # [784, 1176]
    a2 = _dense_conv_matrix(params["w_conv2"], 14, 7)                # [1176, 784]
    s1 = jnp.repeat(jnp.eye(6, dtype=jnp.float32), 196, axis=1)      # [6, 1176]
    s2 = jnp.repeat(jnp.eye(16, dtype=jnp.float32), 49, axis=1)      # [16, 784]
    # fc1/fc2 fold (no nonlinearity between them in the reference forward).
    w_head = jnp.dot(params["w_fc1"], params["w_fc2"], precision=hi)           # [784,10]
    b_head = (jnp.dot(params["b_fc1"], params["w_fc2"], precision=hi)
              + params["b_fc2"]).reshape(1, -1)                                # [1,10]
    # NOTE: conv biases are NOT passed — training-mode BN cancels them exactly.

    log_probs, logits = pl.pallas_call(
        fused_net_kernel,
        out_shape=(
            jax.ShapeDtypeStruct((N, 10), jnp.float32),
            jax.ShapeDtypeStruct((N, 10), jnp.float32),
        ),
        in_specs=[_VMEM_SPEC] * 13,
        out_specs=(_VMEM_SPEC, _VMEM_SPEC),
        compiler_params=pltpu.CompilerParams(
            vmem_limit_bytes=32 * 1024 * 1024),
    )(x_flat,
      a1, s1, s1.T,
      params["g_bn1"].reshape(1, 6), params["beta_bn1"].reshape(1, 6),
      a2, s2, s2.T,
      params["g_bn2"].reshape(1, 16), params["beta_bn2"].reshape(1, 16),
      w_head, b_head)
    return {"output": log_probs, "logit": logits}


# ------------------------- parameters & reference ---------------------------

def init_params(key):
    """Deterministic synthetic parameters matching the mnist Net shapes."""
    ks = jax.random.split(key, 8)
    return {
        # encode_cnn0: Conv2d(1, 6, k=3)
        "w_conv1": jax.random.normal(ks[0], (6, 1, 3, 3), jnp.float32) * 0.2,
        "b_conv1": jax.random.normal(ks[1], (6,), jnp.float32) * 0.05,
        # encode_batchnorm0 (PyTorch default init)
        "g_bn1": jnp.ones((6,), jnp.float32),
        "beta_bn1": jnp.zeros((6,), jnp.float32),
        # encode_cnn1: Conv2d(6, 16, k=3)
        "w_conv2": jax.random.normal(ks[2], (16, 6, 3, 3), jnp.float32) * 0.1,
        "b_conv2": jax.random.normal(ks[3], (16,), jnp.float32) * 0.05,
        "g_bn2": jnp.ones((16,), jnp.float32),
        "beta_bn2": jnp.zeros((16,), jnp.float32),
        # encode_fc1: Linear(784, 32)  (stored as [in, out])
        "w_fc1": jax.random.normal(ks[4], (784, 32), jnp.float32) * 0.03,
        "b_fc1": jax.random.normal(ks[5], (32,), jnp.float32) * 0.05,
        # decode_fc2: Linear(32, 10)
        "w_fc2": jax.random.normal(ks[6], (32, 10), jnp.float32) * 0.1,
        "b_fc2": jax.random.normal(ks[7], (10,), jnp.float32) * 0.05,
    }


def _reference_forward(params, x_nchw):
    """Pure-JAX (XLA) reference of the same PyTorch forward, for validation."""
    hi = jax.lax.Precision.HIGHEST

    def conv_bn_relu(x, w, b, gamma, beta):
        y = jax.lax.conv_general_dilated(
            x, w, window_strides=(2, 2), padding=((1, 1), (1, 1)),
            dimension_numbers=("NCHW", "OIHW", "NCHW"), precision=hi)
        y = y + b.reshape(1, -1, 1, 1)
        mu = jnp.mean(y, axis=(0, 2, 3), keepdims=True)
        var = jnp.mean((y - mu) ** 2, axis=(0, 2, 3), keepdims=True)
        y = (y - mu) * jax.lax.rsqrt(var + _EPS)
        y = y * gamma.reshape(1, -1, 1, 1) + beta.reshape(1, -1, 1, 1)
        return jnp.maximum(y, 0.0)

    z = conv_bn_relu(x_nchw, params["w_conv1"], params["b_conv1"],
                     params["g_bn1"], params["beta_bn1"])
    z = conv_bn_relu(z, params["w_conv2"], params["b_conv2"],
                     params["g_bn2"], params["beta_bn2"])
    flat = z.reshape(z.shape[0], -1)
    h = jnp.dot(flat, params["w_fc1"], precision=hi) + params["b_fc1"]
    logits = jnp.dot(h, params["w_fc2"], precision=hi) + params["b_fc2"]
    m = jnp.max(logits, axis=1, keepdims=True)
    logp = logits - (jnp.log(jnp.sum(jnp.exp(logits - m), axis=1, keepdims=True)) + m)
    return logp, logits


if __name__ == "__main__":
    key = jax.random.PRNGKey(0)
    k_param, k_x = jax.random.split(key)
    params = init_params(k_param)
    # MNIST-shaped input (required by hidden_dim=784=16*7*7): [2, 1, 28, 28]
    x = jax.random.normal(k_x, (2, 1, 28, 28), jnp.float32)

    results = jax.jit(net_forward)(params, x)
    jax.block_until_ready(results)

    out, logits = results["output"], results["logit"]
    assert out.shape == (2, 10) and logits.shape == (2, 10)
    # log_softmax rows must (exp-)sum to 1
    assert bool(jnp.all(jnp.abs(jnp.sum(jnp.exp(out), axis=1) - 1.0) < 1e-4))

    # Cross-check the fused kernel against a pure-JAX reference of the module.
    ref_logp, ref_logits = _reference_forward(params, x)
    assert bool(jnp.allclose(logits, ref_logits, atol=2e-2, rtol=2e-2))
    assert bool(jnp.allclose(out, ref_logp, atol=2e-2, rtol=2e-2))

    print("KERNEL_OK")
</pallas_src>

<mosaic_0001>
module attributes {stable_mosaic.version = 11 : i64} {
  func.func @fused_net_kernel(%arg0: memref<2x784xf32, #tpu.memory_space<vmem>>, %arg1: memref<784x1176xf32, #tpu.memory_space<vmem>>, %arg2: memref<6x1176xf32, #tpu.memory_space<vmem>>, %arg3: memref<1176x6xf32, #tpu.memory_space<vmem>>, %arg4: memref<1x6xf32, #tpu.memory_space<vmem>>, %arg5: memref<1x6xf32, #tpu.memory_space<vmem>>, %arg6: memref<1176x784xf32, #tpu.memory_space<vmem>>, %arg7: memref<16x784xf32, #tpu.memory_space<vmem>>, %arg8: memref<784x16xf32, #tpu.memory_space<vmem>>, %arg9: memref<1x16xf32, #tpu.memory_space<vmem>>, %arg10: memref<1x16xf32, #tpu.memory_space<vmem>>, %arg11: memref<784x10xf32, #tpu.memory_space<vmem>>, %arg12: memref<1x10xf32, #tpu.memory_space<vmem>>, %arg13: memref<2x10xf32, #tpu.memory_space<vmem>>, %arg14: memref<2x10xf32, #tpu.memory_space<vmem>>) attributes {dimension_semantics = [], scalar_prefetch = 0 : i64, scratch_operands = 0 : i64, tpu.core_type = #tpu.core_type<tc>} {
    %c0 = arith.constant 0 : index
    %c0_0 = arith.constant 0 : index
    %0 = vector.load %arg0[%c0, %c0_0] : memref<2x784xf32, #tpu.memory_space<vmem>>, vector<2x784xf32>
    %c0_1 = arith.constant 0 : index
    %c0_2 = arith.constant 0 : index
    %1 = vector.load %arg1[%c0_1, %c0_2] : memref<784x1176xf32, #tpu.memory_space<vmem>>, vector<784x1176xf32>
    %cst = arith.constant dense<0.000000e+00> : vector<2x1176xf32>
    %2 = tpu.matmul %0, %1, %cst {dimension_numbers = #tpu.dot_dimension_numbers<[1], [0], [0], [1], [0, 0, 1, 1], [], []>} : vector<2x784xf32>, vector<784x1176xf32>, vector<2x1176xf32> -> vector<2x1176xf32>
    %c0_3 = arith.constant 0 : index
    %c0_4 = arith.constant 0 : index
    %3 = vector.load %arg2[%c0_3, %c0_4] : memref<6x1176xf32, #tpu.memory_space<vmem>>, vector<6x1176xf32>
    %c0_5 = arith.constant 0 : index
    %c0_6 = arith.constant 0 : index
    %4 = vector.load %arg3[%c0_5, %c0_6] : memref<1176x6xf32, #tpu.memory_space<vmem>>, vector<1176x6xf32>
    %c0_7 = arith.constant 0 : index
    %c0_8 = arith.constant 0 : index
    %5 = vector.load %arg4[%c0_7, %c0_8] : memref<1x6xf32, #tpu.memory_space<vmem>>, vector<1x6xf32>
    %c0_9 = arith.constant 0 : index
    %c0_10 = arith.constant 0 : index
    %6 = vector.load %arg5[%c0_9, %c0_10] : memref<1x6xf32, #tpu.memory_space<vmem>>, vector<1x6xf32>
    %cst_11 = arith.constant dense<0.000000e+00> : vector<1176xf32>
    %7 = vector.multi_reduction <add>, %2, %cst_11 [0] : vector<2x1176xf32> to vector<1176xf32>
    %8 = vector.shape_cast %7 : vector<1176xf32> to vector<1x1176xf32>
    %9 = arith.mulf %2, %2 : vector<2x1176xf32>
    %cst_12 = arith.constant dense<0.000000e+00> : vector<1176xf32>
    %10 = vector.multi_reduction <add>, %9, %cst_12 [0] : vector<2x1176xf32> to vector<1176xf32>
    %11 = vector.shape_cast %10 : vector<1176xf32> to vector<1x1176xf32>
    %cst_13 = arith.constant dense<0.000000e+00> : vector<1x6xf32>
    %12 = tpu.matmul %8, %4, %cst_13 {dimension_numbers = #tpu.dot_dimension_numbers<[1], [0], [0], [1], [0, 0, 1, 1], [], []>} : vector<1x1176xf32>, vector<1176x6xf32>, vector<1x6xf32> -> vector<1x6xf32>
    %cst_14 = arith.constant dense<0.000000e+00> : vector<1x6xf32>
    %13 = tpu.matmul %11, %4, %cst_14 {dimension_numbers = #tpu.dot_dimension_numbers<[1], [0], [0], [1], [0, 0, 1, 1], [], []>} : vector<1x1176xf32>, vector<1176x6xf32>, vector<1x6xf32> -> vector<1x6xf32>
    %cst_15 = arith.constant 0.00255102036 : f32
    %14 = vector.broadcast %cst_15 : f32 to vector<1x6xf32>
    %15 = arith.mulf %12, %14 : vector<1x6xf32>
    %cst_16 = arith.constant 0.00255102036 : f32
    %16 = vector.broadcast %cst_16 : f32 to vector<1x6xf32>
    %17 = arith.mulf %13, %16 : vector<1x6xf32>
    %18 = arith.mulf %15, %15 : vector<1x6xf32>
    %19 = arith.subf %17, %18 : vector<1x6xf32>
    %cst_17 = arith.constant 9.99999974E-6 : f32
    %20 = vector.broadcast %cst_17 : f32 to vector<1x6xf32>
    %21 = arith.addf %19, %20 : vector<1x6xf32>
    %22 = math.rsqrt %21 : vector<1x6xf32>
    %23 = arith.mulf %5, %22 : vector<1x6xf32>
    %24 = arith.mulf %15, %23 : vector<1x6xf32>
    %25 = arith.subf %6, %24 : vector<1x6xf32>
    %cst_18 = arith.constant dense<0.000000e+00> : vector<1x1176xf32>
    %26 = tpu.matmul %23, %3, %cst_18 {dimension_numbers = #tpu.dot_dimension_numbers<[1], [0], [0], [1], [0, 0, 1, 1], [], []>} : vector<1x6xf32>, vector<6x1176xf32>, vector<1x1176xf32> -> vector<1x1176xf32>
    %cst_19 = arith.constant dense<0.000000e+00> : vector<1x1176xf32>
    %27 = tpu.matmul %25, %3, %cst_19 {dimension_numbers = #tpu.dot_dimension_numbers<[1], [0], [0], [1], [0, 0, 1, 1], [], []>} : vector<1x6xf32>, vector<6x1176xf32>, vector<1x1176xf32> -> vector<1x1176xf32>
    %28 = vector.broadcast %26 : vector<1x1176xf32> to vector<2x1176xf32>
    %29 = arith.mulf %2, %28 : vector<2x1176xf32>
    %30 = vector.broadcast %27 : vector<1x1176xf32> to vector<2x1176xf32>
    %31 = arith.addf %29, %30 : vector<2x1176xf32>
    %cst_20 = arith.constant 0.000000e+00 : f32
    %32 = vector.broadcast %cst_20 : f32 to vector<2x1176xf32>
    %33 = arith.maximumf %31, %32 : vector<2x1176xf32>
    %c0_21 = arith.constant 0 : index
    %c0_22 = arith.constant 0 : index
    %34 = vector.load %arg6[%c0_21, %c0_22] : memref<1176x784xf32, #tpu.memory_space<vmem>>, vector<1176x784xf32>
    %cst_23 = arith.constant dense<0.000000e+00> : vector<2x784xf32>
    %35 = tpu.matmul %33, %34, %cst_23 {dimension_numbers = #tpu.dot_dimension_numbers<[1], [0], [0], [1], [0, 0, 1, 1], [], []>} : vector<2x1176xf32>, vector<1176x784xf32>, vector<2x784xf32> -> vector<2x784xf32>
    %c0_24 = arith.constant 0 : index
    %c0_25 = arith.constant 0 : index
    %36 = vector.load %arg7[%c0_24, %c0_25] : memref<16x784xf32, #tpu.memory_space<vmem>>, vector<16x784xf32>
    %c0_26 = arith.constant 0 : index
    %c0_27 = arith.constant 0 : index
    %37 = vector.load %arg8[%c0_26, %c0_27] : memref<784x16xf32, #tpu.memory_space<vmem>>, vector<784x16xf32>
    %c0_28 = arith.constant 0 : index
    %c0_29 = arith.constant 0 : index
    %38 = vector.load %arg9[%c0_28, %c0_29] : memref<1x16xf32, #tpu.memory_space<vmem>>, vector<1x16xf32>
    %c0_30 = arith.constant 0 : index
    %c0_31 = arith.constant 0 : index
    %39 = vector.load %arg10[%c0_30, %c0_31] : memref<1x16xf32, #tpu.memory_space<vmem>>, vector<1x16xf32>
    %cst_32 = arith.constant dense<0.000000e+00> : vector<784xf32>
    %40 = vector.multi_reduction <add>, %35, %cst_32 [0] : vector<2x784xf32> to vector<784xf32>
    %41 = vector.shape_cast %40 : vector<784xf32> to vector<1x784xf32>
    %42 = arith.mulf %35, %35 : vector<2x784xf32>
    %cst_33 = arith.constant dense<0.000000e+00> : vector<784xf32>
    %43 = vector.multi_reduction <add>, %42, %cst_33 [0] : vector<2x784xf32> to vector<784xf32>
    %44 = vector.shape_cast %43 : vector<784xf32> to vector<1x784xf32>
    %cst_34 = arith.constant dense<0.000000e+00> : vector<1x16xf32>
    %45 = tpu.matmul %41, %37, %cst_34 {dimension_numbers = #tpu.dot_dimension_numbers<[1], [0], [0], [1], [0, 0, 1, 1], [], []>} : vector<1x784xf32>, vector<784x16xf32>, vector<1x16xf32> -> vector<1x16xf32>
    %cst_35 = arith.constant dense<0.000000e+00> : vector<1x16xf32>
    %46 = tpu.matmul %44, %37, %cst_35 {dimension_numbers = #tpu.dot_dimension_numbers<[1], [0], [0], [1], [0, 0, 1, 1], [], []>} : vector<1x784xf32>, vector<784x16xf32>, vector<1x16xf32> -> vector<1x16xf32>
    %cst_36 = arith.constant 0.0102040814 : f32
    %47 = vector.broadcast %cst_36 : f32 to vector<1x16xf32>
    %48 = arith.mulf %45, %47 : vector<1x16xf32>
    %cst_37 = arith.constant 0.0102040814 : f32
    %49 = vector.broadcast %cst_37 : f32 to vector<1x16xf32>
    %50 = arith.mulf %46, %49 : vector<1x16xf32>
    %51 = arith.mulf %48, %48 : vector<1x16xf32>
    %52 = arith.subf %50, %51 : vector<1x16xf32>
    %cst_38 = arith.constant 9.99999974E-6 : f32
    %53 = vector.broadcast %cst_38 : f32 to vector<1x16xf32>
    %54 = arith.addf %52, %53 : vector<1x16xf32>
    %55 = math.rsqrt %54 : vector<1x16xf32>
    %56 = arith.mulf %38, %55 : vector<1x16xf32>
    %57 = arith.mulf %48, %56 : vector<1x16xf32>
    %58 = arith.subf %39, %57 : vector<1x16xf32>
    %cst_39 = arith.constant dense<0.000000e+00> : vector<1x784xf32>
    %59 = tpu.matmul %56, %36, %cst_39 {dimension_numbers = #tpu.dot_dimension_numbers<[1], [0], [0], [1], [0, 0, 1, 1], [], []>} : vector<1x16xf32>, vector<16x784xf32>, vector<1x784xf32> -> vector<1x784xf32>
    %cst_40 = arith.constant dense<0.000000e+00> : vector<1x784xf32>
    %60 = tpu.matmul %58, %36, %cst_40 {dimension_numbers = #tpu.dot_dimension_numbers<[1], [0], [0], [1], [0, 0, 1, 1], [], []>} : vector<1x16xf32>, vector<16x784xf32>, vector<1x784xf32> -> vector<1x784xf32>
    %61 = vector.broadcast %59 : vector<1x784xf32> to vector<2x784xf32>
    %62 = arith.mulf %35, %61 : vector<2x784xf32>
    %63 = vector.broadcast %60 : vector<1x784xf32> to vector<2x784xf32>
    %64 = arith.addf %62, %63 : vector<2x784xf32>
    %cst_41 = arith.constant 0.000000e+00 : f32
    %65 = vector.broadcast %cst_41 : f32 to vector<2x784xf32>
    %66 = arith.maximumf %64, %65 : vector<2x784xf32>
    %c0_42 = arith.constant 0 : index
    %c0_43 = arith.constant 0 : index
    %67 = vector.load %arg11[%c0_42, %c0_43] : memref<784x10xf32, #tpu.memory_space<vmem>>, vector<784x10xf32>
    %cst_44 = arith.constant dense<0.000000e+00> : vector<2x10xf32>
    %68 = tpu.matmul %66, %67, %cst_44 {dimension_numbers = #tpu.dot_dimension_numbers<[1], [0], [0], [1], [0, 0, 1, 1], [], []>} : vector<2x784xf32>, vector<784x10xf32>, vector<2x10xf32> -> vector<2x10xf32>
    %c0_45 = arith.constant 0 : index
    %c0_46 = arith.constant 0 : index
    %69 = vector.load %arg12[%c0_45, %c0_46] : memref<1x10xf32, #tpu.memory_space<vmem>>, vector<1x10xf32>
    %70 = vector.broadcast %69 : vector<1x10xf32> to vector<2x10xf32>
    %71 = arith.addf %68, %70 : vector<2x10xf32>
    %cst_47 = arith.constant dense<0xFF800000> : vector<2xf32>
    %72 = vector.multi_reduction <maximumf>, %71, %cst_47 [1] : vector<2x10xf32> to vector<2xf32>
    %73 = vector.shape_cast %72 : vector<2xf32> to vector<2x1xf32>
    %74 = vector.broadcast %73 : vector<2x1xf32> to vector<2x10xf32>
    %75 = arith.subf %71, %74 : vector<2x10xf32>
    %76 = math.exp %75 : vector<2x10xf32>
    %cst_48 = arith.constant dense<0.000000e+00> : vector<2xf32>
    %77 = vector.multi_reduction <add>, %76, %cst_48 [1] : vector<2x10xf32> to vector<2xf32>
    %78 = vector.shape_cast %77 : vector<2xf32> to vector<2x1xf32>
    %79 = math.log %78 : vector<2x1xf32>
    %80 = arith.addf %79, %73 : vector<2x1xf32>
    %c0_49 = arith.constant 0 : index
    %c0_50 = arith.constant 0 : index
    %81 = vector.load %arg14[%c0_49, %c0_50] : memref<2x10xf32, #tpu.memory_space<vmem>>, vector<2x10xf32>
    tpu.vector_store %arg14[%c0_49, %c0_50], %71 {strides = array<i32>} : memref<2x10xf32, #tpu.memory_space<vmem>>, vector<2x10xf32>,
    %82 = vector.broadcast %80 : vector<2x1xf32> to vector<2x10xf32>
    %83 = arith.subf %71, %82 : vector<2x10xf32>
    %c0_51 = arith.constant 0 : index
    %c0_52 = arith.constant 0 : index
    %84 = vector.load %arg13[%c0_51, %c0_52] : memref<2x10xf32, #tpu.memory_space<vmem>>, vector<2x10xf32>
    tpu.vector_store %arg13[%c0_51, %c0_52], %83 {strides = array<i32>} : memref<2x10xf32, #tpu.memory_space<vmem>>, vector<2x10xf32>,
    return
  }
}

</mosaic_0001>

<bundles_post_ra>
// kernel: net_forward.1
= control target key start
LH: loop header
LB: loop body
LE: loop exit
PB: predicated region body
PF: predicated region fallthrough
CT: control target
= control target key end

     0   :  { %20 = vsyncpa [#allocation3], 0  ;;  %vm1071_vm0 = vcmask 130048   ;;  %s18403_s0 = inlined_call_operand.vmem [shape: f32[2,784], index: 0, kind: input, shape index: {}]   ;;  %s18404_s1 = inlined_call_operand.vmem [shape: f32[784,1176], index: 1, kind: input, shape index: {}]   ;;  %s18405_s2 = inlined_call_operand.vmem [shape: f32[6,1176], index: 2, kind: input, shape index: {}]   ;;  %s18406_s3 = inlined_call_operand.vmem [shape: f32[1176,6], index: 3, kind: input, shape index: {}]   ;;  %s18407_s4 = inlined_call_operand.vmem [shape: f32[1,6], index: 4, kind: input, shape index: {}]   ;;  %s18408_s5 = inlined_call_operand.vmem [shape: f32[1,6], index: 5, kind: input, shape index: {}]   ;;  %s18409_s6 = inlined_call_operand.vmem [shape: f32[1176,784], index: 6, kind: input, shape index: {}]   ;;  %s18410_s7 = inlined_call_operand.vmem [shape: f32[16,784], index: 7, kind: input, shape index: {}]   ;;  %s18411_s8 = inlined_call_operand.vmem [shape: f32[784,16], index: 8, kind: input, shape index: {}]   ;;  %s18412_s9 = inlined_call_operand.vmem [shape: f32[1,16], index: 9, kind: input, shape index: {}]   ;;  %s18413_s10 = inlined_call_operand.vmem [shape: f32[1,16], index: 10, kind: input, shape index: {}]   ;;  %s18414_s11 = inlined_call_operand.vmem [shape: f32[784,10], index: 11, kind: input, shape index: {}]   ;;  %s18415_s12 = inlined_call_operand.vmem [shape: f32[1,10], index: 12, kind: input, shape index: {}]   ;;  %s18416_s13 = inlined_call_operand.hbm [shape: f32[2,10], index: 13, kind: output, shape index: {0}]   ;;  %s18417_s14 = inlined_call_operand.hbm [shape: f32[2,10], index: 14, kind: output, shape index: {1}]  }
   0x1   :  { %v201_v0 = vld [vmem:[%s18404_s1 + $0x4b8] sm:$0xff]  ;;  %v200_v2 = vld [vmem:[%s18404_s1 + $0x4b0] sm:$0xff]  ;;  %v191_v4 = vld [vmem:[%s18404_s1 + $0x468] sm:$0xff] }
   0x2   :  { %v521_v1 = vld [vmem:[%s18404_s1 + $0xeb8] sm:$0xff]  ;;  %1074 = vmatprep.subr.mxu0 %v201_v0  ;;  %v520_v3 = vld [vmem:[%s18404_s1 + $0xeb0] sm:$0xff]  ;;  %v511_v5 = vld [vmem:[%s18404_s1 + $0xe68] sm:$0xff] }
   0x3   :  { %1145 = vmatprep.subr.mxu1 %v521_v1  ;;  %1075 = vmatpush1.msra.mxu0 %v200_v2  ;;  %v190_v6 = vld [vmem:[%s18404_s1 + $0x460] sm:$0xff]  ;;  %v181_v8 = vld [vmem:[%s18404_s1 + $0x418] sm:$0xff]  ;;  %v180_v10 = vld [vmem:[%s18404_s1 + $0x410] sm:$0xff] }
   0x4   :  { %1146 = vmatpush1.msra.mxu1 %v520_v3  ;;  %v510_v7 = vld [vmem:[%s18404_s1 + $0xe60] sm:$0xff]  ;;  %1076 = vmatprep.subr.mxu0 %v191_v4  ;;  %v501_v9 = vld [vmem:[%s18404_s1 + $0xe18] sm:$0xff]  ;;  %v500_v11 = vld [vmem:[%s18404_s1 + $0xe10] sm:$0xff] }
   0x5   :  { %1147 = vmatprep.subr.mxu1 %v511_v5  ;;  %1077 = vmatpush1.msra.mxu0 %v190_v6  ;;  %v171_v12 = vld [vmem:[%s18404_s1 + $0x3c8] sm:$0xff]  ;;  %v170_v14 = vld [vmem:[%s18404_s1 + $0x3c0] sm:$0xff]  ;;  %v161_v16 = vld [vmem:[%s18404_s1 + $0x378] sm:$0xff] }
   0x6   :  { %1148 = vmatpush1.msra.mxu1 %v510_v7  ;;  %v491_v13 = vld [vmem:[%s18404_s1 + $0xdc8] sm:$0xff]  ;;  %1078 = vmatprep.subr.mxu0 %v181_v8  ;;  %v490_v15 = vld [vmem:[%s18404_s1 + $0xdc0] sm:$0xff]  ;;  %v481_v17 = vld [vmem:[%s18404_s1 + $0xd78] sm:$0xff] }
   0x7   :  { %1149 = vmatprep.subr.mxu1 %v501_v9  ;;  %1079 = vmatpush1.msra.mxu0 %v180_v10  ;;  %v160_v18 = vld [vmem:[%s18404_s1 + $0x370] sm:$0xff]  ;;  %v151_v20 = vld [vmem:[%s18404_s1 + $0x328] sm:$0xff]  ;;  %v150_v22 = vld [vmem:[%s18404_s1 + $0x320] sm:$0xff] }
   0x8   :  { %1150 = vmatpush1.msra.mxu1 %v500_v11  ;;  %1080 = vmatprep.subr.mxu0 %v171_v12  ;;  %v480_v19 = vld [vmem:[%s18404_s1 + $0xd70] sm:$0xff]  ;;  %v471_v21 = vld [vmem:[%s18404_s1 + $0xd28] sm:$0xff]  ;;  %v470_v23 = vld [vmem:[%s18404_s1 + $0xd20] sm:$0xff] }
   0x9   :  { %1151 = vmatprep.subr.mxu1 %v491_v13  ;;  %1081 = vmatpush1.msra.mxu0 %v170_v14  ;;  %v141_v24 = vld [vmem:[%s18404_s1 + $0x2d8] sm:$0xff]  ;;  %v140_v26 = vld [vmem:[%s18404_s1 + $0x2d0] sm:$0xff]  ;;  %v131_v28 = vld [vmem:[%s18404_s1 + $0x288] sm:$0xff] }
   0xa   :  { %1152 = vmatpush1.msra.mxu1 %v490_v15  ;;  %1082 = vmatprep.subr.mxu0 %v161_v16  ;;  %v461_v25 = vld [vmem:[%s18404_s1 + $0xcd8] sm:$0xff]  ;;  %v460_v27 = vld [vmem:[%s18404_s1 + $0xcd0] sm:$0xff]  ;;  %v451_v29 = vld [vmem:[%s18404_s1 + $0xc88] sm:$0xff] }
   0xb   :  { %1153 = vmatprep.subr.mxu1 %v481_v17  ;;  %1083 = vmatpush1.msra.mxu0 %v160_v18  ;;  %v130_v30 = vld [vmem:[%s18404_s1 + $0x280] sm:$0xff]  ;;  %v121_v32 = vld [vmem:[%s18404_s1 + $0x238] sm:$0xff]  ;;  %v120_v34 = vld [vmem:[%s18404_s1 + $0x230] sm:$0xff] }
   0xc   :  { %1154 = vmatpush1.msra.mxu1 %v480_v19  ;;  %1084 = vmatprep.subr.mxu0 %v151_v20  ;;  %v450_v31 = vld [vmem:[%s18404_s1 + $0xc80] sm:$0xff]  ;;  %v441_v33 = vld [vmem:[%s18404_s1 + $0xc38] sm:$0xff]  ;;  %v440_v35 = vld [vmem:[%s18404_s1 + $0xc30] sm:$0xff] }
   0xd   :  { %1155 = vmatprep.subr.mxu1 %v471_v21  ;;  %1085 = vmatpush1.msra.mxu0 %v150_v22  ;;  %v111_v36 = vld [vmem:[%s18404_s1 + $0x1e8] sm:$0xff]  ;;  %v110_v38 = vld [vmem:[%s18404_s1 + $0x1e0] sm:$0xff]  ;;  %v101_v40 = vld [vmem:[%s18404_s1 + $0x198] sm:$0xff] }
   0xe   :  { %1156 = vmatpush1.msra.mxu1 %v470_v23  ;;  %1086 = vmatprep.subr.mxu0 %v141_v24  ;;  %v431_v37 = vld [vmem:[%s18404_s1 + $0xbe8] sm:$0xff]  ;;  %v430_v39 = vld [vmem:[%s18404_s1 + $0xbe0] sm:$0xff]  ;;  %v421_v41 = vld [vmem:[%s18404_s1 + $0xb98] sm:$0xff] }
   0xf   :  { %1157 = vmatprep.subr.mxu1 %v461_v25  ;;  %1087 = vmatpush1.msra.mxu0 %v140_v26  ;;  %v100_v42 = vld [vmem:[%s18404_s1 + $0x190] sm:$0xff]  ;;  %v91_v44 = vld [vmem:[%s18404_s1 + $0x148] sm:$0xff]  ;;  %v90_v46 = vld [vmem:[%s18404_s1 + $0x140] sm:$0xff] }
  0x10   :  { %1158 = vmatpush1.msra.mxu1 %v460_v27  ;;  %1088 = vmatprep.subr.mxu0 %v131_v28  ;;  %v420_v43 = vld [vmem:[%s18404_s1 + $0xb90] sm:$0xff]  ;;  %v411_v45 = vld [vmem:[%s18404_s1 + $0xb48] sm:$0xff]  ;;  %v410_v47 = vld [vmem:[%s18404_s1 + $0xb40] sm:$0xff] }
  0x11   :  { %1159 = vmatprep.subr.mxu1 %v451_v29  ;;  %1089 = vmatpush1.msra.mxu0 %v130_v30  ;;  %v81_v48 = vld [vmem:[%s18404_s1 + $0xf8] sm:$0xff]  ;;  %v80_v50 = vld [vmem:[%s18404_s1 + $0xf0] sm:$0xff]  ;;  %v71_v52 = vld [vmem:[%s18404_s1 + $0xa8] sm:$0xff]  ;;  %v9624_v30 = vmov 1983009808  }
  0x12   :  { %1160 = vmatpush1.msra.mxu1 %v450_v31  ;;  %1090 = vmatprep.subr.mxu0 %v121_v32  ;;  %v401_v49 = vld [vmem:[%s18404_s1 + $0xaf8] sm:$0xff]  ;;  %v400_v51 = vld [vmem:[%s18404_s1 + $0xaf0] sm:$0xff]  ;;  %v391_v53 = vld [vmem:[%s18404_s1 + $0xaa8] sm:$0xff]  ;;  %v1034_v31 = vunpack.c.l.s4 %v9624_v30  ;;  %v1036_v32 = vlaneseq }
  0x13   :  { %1161 = vmatprep.subr.mxu1 %v441_v33  ;;  %1091 = vmatpush1.msra.mxu0 %v120_v34  ;;  %v70_v54 = vld [vmem:[%s18404_s1 + $0xa0] sm:$0xff]  ;;  %v61_v56 = vld [vmem:[%s18404_s1 + $0x58] sm:$0xff]  ;;  %v60_v58 = vld [vmem:[%s18404_s1 + $0x50] sm:$0xff] }
  0x14   :  { %1162 = vmatpush1.msra.mxu1 %v440_v35  ;;  %1092 = vmatprep.subr.mxu0 %v111_v36  ;;  %v390_v55 = vld [vmem:[%s18404_s1 + $0xaa0] sm:$0xff]  ;;  %v381_v57 = vld [vmem:[%s18404_s1 + $0xa58] sm:$0xff]  ;;  %v380_v59 = vld [vmem:[%s18404_s1 + $0xa50] sm:$0xff] }
  0x15   :  { %1163 = vmatprep.subr.mxu1 %v431_v37  ;;  %1093 = vmatpush1.msra.mxu0 %v110_v38  ;;  %v51_v60 = vld [vmem:[%s18404_s1 + $0x8] sm:$0xff]  ;;  %v50_v62 = vld [vmem:[%s18404_s1] sm:$0xff]  ;;  %v361_v0 = vld [vmem:[%s18404_s1 + $0x9b8] sm:$0xff] }
  0x16   :  { %1164 = vmatpush1.msra.mxu1 %v430_v39  ;;  %1094 = vmatprep.subr.mxu0 %v101_v40  ;;  %v371_v61 = vld [vmem:[%s18404_s1 + $0xa08] sm:$0xff]  ;;  %v370_v63 = vld [vmem:[%s18404_s1 + $0xa00] sm:$0xff]  ;;  %v681_v1 = vld [vmem:[%s18404_s1 + $0x13b8] sm:$0xff] }
  0x17   :  { %1165 = vmatprep.subr.mxu1 %v421_v41  ;;  %1095 = vmatpush1.msra.mxu0 %v100_v42  ;;  %v360_v2 = vld [vmem:[%s18404_s1 + $0x9b0] sm:$0xff]  ;;  %v351_v4 = vld [vmem:[%s18404_s1 + $0x968] sm:$0xff]  ;;  %v350_v6 = vld [vmem:[%s18404_s1 + $0x960] sm:$0xff]  ;;  %v1035_v41 = vunpack.c.0.s8 %v1034_v31  ;;  %v10010_v42 = vshrl.u32 %v1036_v32, 7 }
  0x18   :  { %1166 = vmatpush1.msra.mxu1 %v420_v43  ;;  %1096 = vmatprep.subr.mxu0 %v91_v44  ;;  %v680_v3 = vld [vmem:[%s18404_s1 + $0x13b0] sm:$0xff]  ;;  %v671_v5 = vld [vmem:[%s18404_s1 + $0x1368] sm:$0xff]  ;;  %v670_v7 = vld [vmem:[%s18404_s1 + $0x1360] sm:$0xff] }
  0x19   :  { %1167 = vmatprep.subr.mxu1 %v411_v45  ;;  %1097 = vmatpush1.msra.mxu0 %v90_v46  ;;  %v341_v8 = vld [vmem:[%s18404_s1 + $0x918] sm:$0xff]  ;;  %v340_v10 = vld [vmem:[%s18404_s1 + $0x910] sm:$0xff]  ;;  %v331_v12 = vld [vmem:[%s18404_s1 + $0x8c8] sm:$0xff]  ;;  %18559 = vst [vmem:[#allocation8_spill] sm:$0xff] %v10010_v42 }
  0x1a   :  { %1168 = vmatpush1.msra.mxu1 %v410_v47  ;;  %1098 = vmatprep.subr.mxu0 %v81_v48  ;;  %v661_v9 = vld [vmem:[%s18404_s1 + $0x1318] sm:$0xff]  ;;  %v660_v11 = vld [vmem:[%s18404_s1 + $0x1310] sm:$0xff]  ;;  %v651_v13 = vld [vmem:[%s18404_s1 + $0x12c8] sm:$0xff] }
  0x1b   :  { %1169 = vmatprep.subr.mxu1 %v401_v49  ;;  %1099 = vmatpush1.msra.mxu0 %v80_v50  ;;  %v330_v14 = vld [vmem:[%s18404_s1 + $0x8c0] sm:$0xff]  ;;  %v321_v16 = vld [vmem:[%s18404_s1 + $0x878] sm:$0xff]  ;;  %v320_v18 = vld [vmem:[%s18404_s1 + $0x870] sm:$0xff] }
  0x1c   :  { %1170 = vmatpush1.msra.mxu1 %v400_v51  ;;  %1100 = vmatprep.subr.mxu0 %v71_v52  ;;  %v650_v15 = vld [vmem:[%s18404_s1 + $0x12c0] sm:$0xff]  ;;  %v641_v17 = vld [vmem:[%s18404_s1 + $0x1278] sm:$0xff]  ;;  %v640_v19 = vld [vmem:[%s18404_s1 + $0x1270] sm:$0xff]  ;;  %v10040_v52 = vsub.s32 %v1035_v41, %v10010_v42 }
  0x1d   :  { %1171 = vmatprep.subr.mxu1 %v391_v53  ;;  %1101 = vmatpush1.msra.mxu0 %v70_v54  ;;  %v311_v20 = vld [vmem:[%s18404_s1 + $0x828] sm:$0xff]  ;;  %v310_v22 = vld [vmem:[%s18404_s1 + $0x820] sm:$0xff]  ;;  %v301_v24 = vld [vmem:[%s18404_s1 + $0x7d8] sm:$0xff] }
  0x1e   :  { %1172 = vmatpush1.msra.mxu1 %v390_v55  ;;  %1102 = vmatprep.subr.mxu0 %v61_v56  ;;  %v631_v21 = vld [vmem:[%s18404_s1 + $0x1228] sm:$0xff]  ;;  %v630_v23 = vld [vmem:[%s18404_s1 + $0x1220] sm:$0xff]  ;;  %v621_v25 = vld [vmem:[%s18404_s1 + $0x11d8] sm:$0xff] }
  0x1f   :  { %1173 = vmatprep.subr.mxu1 %v381_v57  ;;  %1103 = vmatpush1.msra.mxu0 %v60_v58  ;;  %v300_v26 = vld [vmem:[%s18404_s1 + $0x7d0] sm:$0xff]  ;;  %v291_v28 = vld [vmem:[%s18404_s1 + $0x788] sm:$0xff]  ;;  %v290_v33 = vld [vmem:[%s18404_s1 + $0x780] sm:$0xff] }
  0x20   :  { %1174 = vmatpush1.msra.mxu1 %v380_v59  ;;  %1104 = vmatprep.subr.mxu0 %v51_v60  ;;  %v620_v27 = vld [vmem:[%s18404_s1 + $0x11d0] sm:$0xff]  ;;  %v611_v29 = vld [vmem:[%s18404_s1 + $0x1188] sm:$0xff]  ;;  %v610_v34 = vld [vmem:[%s18404_s1 + $0x1180] sm:$0xff] }
  0x21   :  { %1175 = vmatprep.subr.mxu1 %v371_v61  ;;  %1105 = vmatpush1.msra.mxu0 %v50_v62  ;;  %v281_v35 = vld [vmem:[%s18404_s1 + $0x738] sm:$0xff]  ;;  %v280_v37 = vld [vmem:[%s18404_s1 + $0x730] sm:$0xff]  ;;  %v271_v39 = vld [vmem:[%s18404_s1 + $0x6e8] sm:$0xff] }
  0x22   :  { %1176 = vmatpush1.msra.mxu1 %v370_v63  ;;  %1106 = vmatprep.subr.mxu0 %v361_v0  ;;  %v601_v36 = vld [vmem:[%s18404_s1 + $0x1138] sm:$0xff]  ;;  %v600_v38 = vld [vmem:[%s18404_s1 + $0x1130] sm:$0xff]  ;;  %v591_v40 = vld [vmem:[%s18404_s1 + $0x10e8] sm:$0xff] }
  0x23   :  { %1177 = vmatprep.subr.mxu1 %v681_v1  ;;  %1107 = vmatpush2.msra.mxu0 %v360_v2  ;;  %v270_v43 = vld [vmem:[%s18404_s1 + $0x6e0] sm:$0xff]  ;;  %v261_v45 = vld [vmem:[%s18404_s1 + $0x698] sm:$0xff]  ;;  %v260_v48 = vld [vmem:[%s18404_s1 + $0x690] sm:$0xff] }
  0x24   :  { %1178 = vmatpush2.msra.mxu1 %v680_v3  ;;  %1108 = vmatprep.subr.mxu0 %v351_v4  ;;  %v590_v44 = vld [vmem:[%s18404_s1 + $0x10e0] sm:$0xff]  ;;  %v581_v46 = vld [vmem:[%s18404_s1 + $0x1098] sm:$0xff]  ;;  %v580_v49 = vld [vmem:[%s18404_s1 + $0x1090] sm:$0xff] }
  0x25   :  { %1179 = vmatprep.subr.mxu1 %v671_v5  ;;  %1109 = vmatpush2.msra.mxu0 %v350_v6  ;;  %v48_v47 = vld [vmem:[%s18403_s0] sm:$0xff]  ;;  %v251_v50 = vld [vmem:[%s18404_s1 + $0x648] sm:$0xff]  ;;  %v241_v56 = vld [vmem:[%s18404_s1 + $0x5f8] sm:$0xff] }
  0x26   :  { %1180 = vmatpush2.msra.mxu1 %v670_v7  ;;  %1110 = vmatprep.subr.mxu0 %v341_v8  ;;  %v571_v51 = vld [vmem:[%s18404_s1 + $0x1048] sm:$0xff]  ;;  %v250_v53 = vld [vmem:[%s18404_s1 + $0x640] sm:$0xff]  ;;  %v1032_v55 = vcombine.high %v48_v47, %v48_v47  ;;  %v561_v57 = vld [vmem:[%s18404_s1 + $0xff8] sm:$0xff]  ;;  %v10067_v62 = vrot.slane %v48_v47, %v10040_v52 }
  0x27   :  { %1181 = vmatprep.subr.mxu1 %v661_v9  ;;  %1111 = vmatpush2.msra.mxu0 %v340_v10  ;;  %v570_v54 = vld [vmem:[%s18404_s1 + $0x1040] sm:$0xff]  ;;  %v240_v58 = vld [vmem:[%s18404_s1 + $0x5f0] sm:$0xff]  ;;  %v231_v60 = vld [vmem:[%s18404_s1 + $0x5a8] sm:$0xff] }
  0x28   :  { %1182 = vmatpush2.msra.mxu1 %v660_v11  ;;  %1112 = vmatprep.subr.mxu0 %v331_v12  ;;  %v560_v59 = vld [vmem:[%s18404_s1 + $0xff0] sm:$0xff]  ;;  %v551_v61 = vld [vmem:[%s18404_s1 + $0xfa8] sm:$0xff]  ;;  %v230_v63 = vld [vmem:[%s18404_s1 + $0x5a0] sm:$0xff]  ;;  %v10076_v1 = vrot.slane %v1032_v55, %v10040_v52  ;;  %v10098_v8 = vcombine.high %v10067_v62, %v10067_v62 }
  0x29   :  { %1183 = vmatprep.subr.mxu1 %v651_v13  ;;  %1113 = vmatpush2.msra.mxu0 %v330_v14  ;;  %v550_v0 = vld [vmem:[%s18404_s1 + $0xfa0] sm:$0xff]  ;;  %v221_v2 = vld [vmem:[%s18404_s1 + $0x558] sm:$0xff]  ;;  %v220_v4 = vld [vmem:[%s18404_s1 + $0x550] sm:$0xff] }
  0x2a   :  { %1184 = vmatpush2.msra.mxu1 %v650_v15  ;;  %1114 = vmatprep.subr.mxu0 %v321_v16  ;;  %v541_v3 = vld [vmem:[%s18404_s1 + $0xf58] sm:$0xff]  ;;  %v540_v5 = vld [vmem:[%s18404_s1 + $0xf50] sm:$0xff]  ;;  %v211_v6 = vld [vmem:[%s18404_s1 + $0x508] sm:$0xff]  ;;  %v10105_v10 = vcombine.high %v10076_v1, %v10076_v1 }
  0x2b   :  { %1185 = vmatprep.subr.mxu1 %v641_v17  ;;  %1115 = vmatpush2.msra.mxu0 %v320_v18  ;;  %v531_v7 = vld [vmem:[%s18404_s1 + $0xf08] sm:$0xff]  ;;  %v210_v9 = vld [vmem:[%s18404_s1 + $0x500] sm:$0xff]  ;;  %v841_v12 = vld [vmem:[%s18404_s1 + $0x18b8] sm:$0xff] }
  0x2c   :  { %1186 = vmatpush2.msra.mxu1 %v640_v19  ;;  %1116 = vmatprep.subr.mxu0 %v311_v20  ;;  %v530_v11 = vld [vmem:[%s18404_s1 + $0xf00] sm:$0xff]  ;;  %v203_v13 = vld [vmem:[%s18404_s1 + $0x4c8] sm:$0xff]  ;;  %v840_v14 = vld [vmem:[%s18404_s1 + $0x18b0] sm:$0xff] }
  0x2d   :  { %1187 = vmatprep.subr.mxu1 %v631_v21  ;;  %1117 = vmatpush2.msra.mxu0 %v310_v22  ;;  %v202_v15 = vld [vmem:[%s18404_s1 + $0x4c0] sm:$0xff]  ;;  %v831_v16 = vld [vmem:[%s18404_s1 + $0x1868] sm:$0xff]  ;;  %v193_v17 = vld [vmem:[%s18404_s1 + $0x478] sm:$0xff] }
  0x2e   :  { %1188 = vmatpush2.msra.mxu1 %v630_v23  ;;  %1118 = vmatprep.subr.mxu0 %v301_v24  ;;  %v830_v18 = vld [vmem:[%s18404_s1 + $0x1860] sm:$0xff]  ;;  %v192_v19 = vld [vmem:[%s18404_s1 + $0x470] sm:$0xff]  ;;  %v821_v20 = vld [vmem:[%s18404_s1 + $0x1818] sm:$0xff] }
  0x2f   :  { %1189 = vmatprep.subr.mxu1 %v621_v25  ;;  %1119 = vmatpush2.msra.mxu0 %v300_v26  ;;  %v183_v21 = vld [vmem:[%s18404_s1 + $0x428] sm:$0xff]  ;;  %v820_v22 = vld [vmem:[%s18404_s1 + $0x1810] sm:$0xff]  ;;  %v182_v23 = vld [vmem:[%s18404_s1 + $0x420] sm:$0xff] }
  0x30   :  { %1190 = vmatpush2.msra.mxu1 %v620_v27  ;;  %1120 = vmatprep.subr.mxu0 %v291_v28  ;;  %v811_v24 = vld [vmem:[%s18404_s1 + $0x17c8] sm:$0xff]  ;;  %v173_v25 = vld [vmem:[%s18404_s1 + $0x3d8] sm:$0xff]  ;;  %v810_v26 = vld [vmem:[%s18404_s1 + $0x17c0] sm:$0xff] }
  0x31   :  { %1191 = vmatprep.subr.mxu1 %v611_v29  ;;  %1121 = vmatpush2.msra.mxu0 %v290_v33  ;;  %v172_v27 = vld [vmem:[%s18404_s1 + $0x3d0] sm:$0xff]  ;;  %v801_v28 = vld [vmem:[%s18404_s1 + $0x1778] sm:$0xff]  ;;  %v163_v29 = vld [vmem:[%s18404_s1 + $0x388] sm:$0xff] }
  0x32   :  { %1192 = vmatpush2.msra.mxu1 %v610_v34  ;;  %1122 = vmatprep.subr.mxu0 %v281_v35  ;;  %v800_v30 = vld [vmem:[%s18404_s1 + $0x1770] sm:$0xff]  ;;  %v162_v31 = vld [vmem:[%s18404_s1 + $0x380] sm:$0xff]  ;;  %v791_v32 = vld [vmem:[%s18404_s1 + $0x1728] sm:$0xff] }
  0x33   :  { %1193 = vmatprep.subr.mxu1 %v601_v36  ;;  %1123 = vmatpush2.msra.mxu0 %v280_v37  ;;  %v153_v33 = vld [vmem:[%s18404_s1 + $0x338] sm:$0xff]  ;;  %v790_v34 = vld [vmem:[%s18404_s1 + $0x1720] sm:$0xff]  ;;  %v152_v35 = vld [vmem:[%s18404_s1 + $0x330] sm:$0xff] }
  0x34   :  { %1194 = vmatpush2.msra.mxu1 %v600_v38  ;;  %1124 = vmatprep.subr.mxu0 %v271_v39  ;;  %v781_v36 = vld [vmem:[%s18404_s1 + $0x16d8] sm:$0xff]  ;;  %v143_v37 = vld [vmem:[%s18404_s1 + $0x2e8] sm:$0xff]  ;;  %v780_v38 = vld [vmem:[%s18404_s1 + $0x16d0] sm:$0xff] }
  0x35   :  { %1195 = vmatprep.subr.mxu1 %v591_v40  ;;  %1125 = vmatpush2.msra.mxu0 %v270_v43  ;;  %v142_v39 = vld [vmem:[%s18404_s1 + $0x2e0] sm:$0xff]  ;;  %v771_v40 = vld [vmem:[%s18404_s1 + $0x1688] sm:$0xff]  ;;  %v133_v41 = vld [vmem:[%s18404_s1 + $0x298] sm:$0xff] }
  0x36   :  { %1196 = vmatpush2.msra.mxu1 %v590_v44  ;;  %1126 = vmatprep.subr.mxu0 %v261_v45  ;;  %v770_v43 = vld [vmem:[%s18404_s1 + $0x1680] sm:$0xff]  ;;  %v132_v44 = vld [vmem:[%s18404_s1 + $0x290] sm:$0xff]  ;;  %v761_v45 = vld [vmem:[%s18404_s1 + $0x1638] sm:$0xff] }
  0x37   :  { %1197 = vmatprep.subr.mxu1 %v581_v46  ;;  %1127 = vmatpush2.msra.mxu0 %v260_v48  ;;  %v123_v46 = vld [vmem:[%s18404_s1 + $0x248] sm:$0xff]  ;;  %v760_v47 = vld [vmem:[%s18404_s1 + $0x1630] sm:$0xff]  ;;  %v122_v48 = vld [vmem:[%s18404_s1 + $0x240] sm:$0xff] }
  0x38   :  { %1198 = vmatpush2.msra.mxu1 %v580_v49  ;;  %1128 = vmatprep.subr.mxu0 %v251_v50  ;;  %v751_v49 = vld [vmem:[%s18404_s1 + $0x15e8] sm:$0xff]  ;;  %v113_v50 = vld [vmem:[%s18404_s1 + $0x1f8] sm:$0xff] }
  0x39   :  { %1199 = vmatprep.subr.mxu1 %v571_v51  ;;  %1129 = vmatpush2.msra.mxu0 %v250_v53  ;;  %v750_v51 = vld [vmem:[%s18404_s1 + $0x15e0] sm:$0xff]  ;;  %v112_v53 = vld [vmem:[%s18404_s1 + $0x1f0] sm:$0xff]  ;;  %v103_v55 = vld [vmem:[%s18404_s1 + $0x1a8] sm:$0xff] }
  0x3a   :  { %1200 = vmatpush2.msra.mxu1 %v570_v54  ;;  %1130 = vmatprep.subr.mxu0 %v241_v56  ;;  %v741_v54 = vld [vmem:[%s18404_s1 + $0x1598] sm:$0xff]  ;;  %v740_v56 = vld [vmem:[%s18404_s1 + $0x1590] sm:$0xff] }
  0x3b   :  { %1201 = vmatprep.subr.mxu1 %v561_v57  ;;  %1131 = vmatpush2.msra.mxu0 %v240_v58  ;;  %v102_v57 = vld [vmem:[%s18404_s1 + $0x1a0] sm:$0xff]  ;;  %v731_v58 = vld [vmem:[%s18404_s1 + $0x1548] sm:$0xff] }
  0x3c   :  { %1202 = vmatpush2.msra.mxu1 %v560_v59  ;;  %1132 = vmatprep.subr.mxu0 %v231_v60  ;;  %v93_v59 = vld [vmem:[%s18404_s1 + $0x158] sm:$0xff]  ;;  %v730_v60 = vld [vmem:[%s18404_s1 + $0x1540] sm:$0xff] }
  0x3d   :  { %1203 = vmatprep.subr.mxu1 %v551_v61  ;;  %1133 = vmatpush2.msra.mxu0 %v230_v63  ;;  %v92_v61 = vld [vmem:[%s18404_s1 + $0x150] sm:$0xff]  ;;  %v721_v63 = vld [vmem:[%s18404_s1 + $0x14f8] sm:$0xff] }
  0x3e   :  { %1204 = vmatpush2.msra.mxu1 %v550_v0  ;;  %1134 = vmatprep.subr.mxu0 %v221_v2  ;;  %v83_v0 = vld [vmem:[%s18404_s1 + $0x108] sm:$0xff]  ;;  %v720_v2 = vld [vmem:[%s18404_s1 + $0x14f0] sm:$0xff] }
  0x3f   :  { %1205 = vmatprep.subr.mxu1 %v541_v3  ;;  %1135 = vmatpush2.msra.mxu0 %v220_v4  ;;  %v82_v3 = vld [vmem:[%s18404_s1 + $0x100] sm:$0xff]  ;;  %v711_v4 = vld [vmem:[%s18404_s1 + $0x14a8] sm:$0xff] }
  0x40   :  { %1206 = vmatpush2.msra.mxu1 %v540_v5  ;;  %1136 = vmatprep.subr.mxu0 %v211_v6  ;;  %v73_v5 = vld [vmem:[%s18404_s1 + $0xb8] sm:$0xff]  ;;  %v710_v6 = vld [vmem:[%s18404_s1 + $0x14a0] sm:$0xff] }
  0x41   :  { %1207 = vmatprep.subr.mxu1 %v531_v7  ;;  %1137 = vmatpush2.msra.mxu0 %v210_v9  ;;  %v72_v7 = vld [vmem:[%s18404_s1 + $0xb0] sm:$0xff]  ;;  %v701_v9 = vld [vmem:[%s18404_s1 + $0x1458] sm:$0xff] }
  0x42   :  { %1138 = vmatprep.mubr.f32.mxu0 %v10098_v8  ;;  %1208 = vmatpush2.msra.mxu1 %v530_v11  ;;  %v63_v11 = vld [vmem:[%s18404_s1 + $0x68] sm:$0xff] }
  0x43   :  { %1209 = vmatprep.mubr.f32.mxu1 %v10105_v10  ;;  %1139 = vmatmul.mubr.f32.vlgmr.msra.gmra.mxu0 %v10067_v62 }
  0x44   :  { %1210 = vmatmul.mubr.f32.vlgmr.msra.gmra.mxu1 %v10076_v1  ;;  %1216 = vmatprep.subr.mxu0 %v841_v12  ;;  %v700_v12 = vld [vmem:[%s18404_s1 + $0x1450] sm:$0xff] }
  0x45   :  { %1358 = vmatprep.subr.mxu1 %v203_v13  ;;  %1217 = vmatpush1.msra.mxu0 %v840_v14  ;;  %v62_v13 = vld [vmem:[%s18404_s1 + $0x60] sm:$0xff]  ;;  %v691_v14 = vld [vmem:[%s18404_s1 + $0x1408] sm:$0xff] }
  0x46   :  { %1359 = vmatpush1.msra.mxu1 %v202_v15  ;;  %1218 = vmatprep.subr.mxu0 %v831_v16  ;;  %v53_v15 = vld [vmem:[%s18404_s1 + $0x18] sm:$0xff]  ;;  %v690_v16 = vld [vmem:[%s18404_s1 + $0x1400] sm:$0xff] }
  0x47   :  { %1360 = vmatprep.subr.mxu1 %v193_v17  ;;  %1219 = vmatpush1.msra.mxu0 %v830_v18  ;;  %v52_v17 = vld [vmem:[%s18404_s1 + $0x10] sm:$0xff]  ;;  %v1001_v18 = vld [vmem:[%s18404_s1 + $0x1db8] sm:$0xff] }
  0x48   :  { %1361 = vmatpush1.msra.mxu1 %v192_v19  ;;  %1220 = vmatprep.subr.mxu0 %v821_v20  ;;  %v363_v19 = vld [vmem:[%s18404_s1 + $0x9c8] sm:$0xff]  ;;  %v1000_v20 = vld [vmem:[%s18404_s1 + $0x1db0] sm:$0xff] }
  0x49   :  { %1362 = vmatprep.subr.mxu1 %v183_v21  ;;  %1221 = vmatpush1.msra.mxu0 %v820_v22  ;;  %v362_v21 = vld [vmem:[%s18404_s1 + $0x9c0] sm:$0xff]  ;;  %v991_v22 = vld [vmem:[%s18404_s1 + $0x1d68] sm:$0xff] }
  0x4a   :  { %1363 = vmatpush1.msra.mxu1 %v182_v23  ;;  %1222 = vmatprep.subr.mxu0 %v811_v24  ;;  %v353_v23 = vld [vmem:[%s18404_s1 + $0x978] sm:$0xff]  ;;  %v990_v24 = vld [vmem:[%s18404_s1 + $0x1d60] sm:$0xff] }
  0x4b   :  { %1364 = vmatprep.subr.mxu1 %v173_v25  ;;  %1223 = vmatpush1.msra.mxu0 %v810_v26  ;;  %v352_v25 = vld [vmem:[%s18404_s1 + $0x970] sm:$0xff]  ;;  %v981_v26 = vld [vmem:[%s18404_s1 + $0x1d18] sm:$0xff] }
  0x4c   :  { %1365 = vmatpush1.msra.mxu1 %v172_v27  ;;  %1224 = vmatprep.subr.mxu0 %v801_v28  ;;  %v343_v27 = vld [vmem:[%s18404_s1 + $0x928] sm:$0xff]  ;;  %v980_v28 = vld [vmem:[%s18404_s1 + $0x1d10] sm:$0xff] }
  0x4d   :  { %1366 = vmatprep.subr.mxu1 %v163_v29  ;;  %1225 = vmatpush1.msra.mxu0 %v800_v30  ;;  %v342_v29 = vld [vmem:[%s18404_s1 + $0x920] sm:$0xff]  ;;  %v971_v30 = vld [vmem:[%s18404_s1 + $0x1cc8] sm:$0xff] }
  0x4e   :  { %1367 = vmatpush1.msra.mxu1 %v162_v31  ;;  %1226 = vmatprep.subr.mxu0 %v791_v32  ;;  %v333_v31 = vld [vmem:[%s18404_s1 + $0x8d8] sm:$0xff]  ;;  %v970_v32 = vld [vmem:[%s18404_s1 + $0x1cc0] sm:$0xff] }
  0x4f   :  { %1368 = vmatprep.subr.mxu1 %v153_v33  ;;  %1227 = vmatpush1.msra.mxu0 %v790_v34  ;;  %v332_v33 = vld [vmem:[%s18404_s1 + $0x8d0] sm:$0xff]  ;;  %v961_v34 = vld [vmem:[%s18404_s1 + $0x1c78] sm:$0xff] }
  0x50   :  { %1369 = vmatpush1.msra.mxu1 %v152_v35  ;;  %1228 = vmatprep.subr.mxu0 %v781_v36  ;;  %v323_v35 = vld [vmem:[%s18404_s1 + $0x888] sm:$0xff]  ;;  %v960_v36 = vld [vmem:[%s18404_s1 + $0x1c70] sm:$0xff] }
  0x51   :  { %1370 = vmatprep.subr.mxu1 %v143_v37  ;;  %1229 = vmatpush1.msra.mxu0 %v780_v38  ;;  %v322_v37 = vld [vmem:[%s18404_s1 + $0x880] sm:$0xff]  ;;  %v951_v38 = vld [vmem:[%s18404_s1 + $0x1c28] sm:$0xff] }
  0x52   :  { %1371 = vmatpush1.msra.mxu1 %v142_v39  ;;  %1230 = vmatprep.subr.mxu0 %v771_v40  ;;  %v313_v39 = vld [vmem:[%s18404_s1 + $0x838] sm:$0xff]  ;;  %v950_v40 = vld [vmem:[%s18404_s1 + $0x1c20] sm:$0xff] }
  0x53   :  { %1372 = vmatprep.subr.mxu1 %v133_v41  ;;  %1231 = vmatpush1.msra.mxu0 %v770_v43  ;;  %v312_v41 = vld [vmem:[%s18404_s1 + $0x830] sm:$0xff]  ;;  %v941_v43 = vld [vmem:[%s18404_s1 + $0x1bd8] sm:$0xff] }
  0x54   :  { %1373 = vmatpush1.msra.mxu1 %v132_v44  ;;  %1232 = vmatprep.subr.mxu0 %v761_v45  ;;  %v303_v44 = vld [vmem:[%s18404_s1 + $0x7e8] sm:$0xff]  ;;  %v940_v45 = vld [vmem:[%s18404_s1 + $0x1bd0] sm:$0xff] }
  0x55   :  { %1374 = vmatprep.subr.mxu1 %v123_v46  ;;  %1233 = vmatpush1.msra.mxu0 %v760_v47  ;;  %v302_v46 = vld [vmem:[%s18404_s1 + $0x7e0] sm:$0xff]  ;;  %v931_v47 = vld [vmem:[%s18404_s1 + $0x1b88] sm:$0xff] }
  0x56   :  { %1375 = vmatpush1.msra.mxu1 %v122_v48  ;;  %1234 = vmatprep.subr.mxu0 %v751_v49  ;;  %v293_v48 = vld [vmem:[%s18404_s1 + $0x798] sm:$0xff]  ;;  %v930_v49 = vld [vmem:[%s18404_s1 + $0x1b80] sm:$0xff] }
  0x57   :  { %1376 = vmatprep.subr.mxu1 %v113_v50  ;;  %1235 = vmatpush1.msra.mxu0 %v750_v51  ;;  %v292_v50 = vld [vmem:[%s18404_s1 + $0x790] sm:$0xff]  ;;  %v921_v51 = vld [vmem:[%s18404_s1 + $0x1b38] sm:$0xff] }
  0x58   :  { %1377 = vmatpush1.msra.mxu1 %v112_v53  ;;  %1236 = vmatprep.subr.mxu0 %v741_v54  ;;  %v283_v53 = vld [vmem:[%s18404_s1 + $0x748] sm:$0xff]  ;;  %v920_v54 = vld [vmem:[%s18404_s1 + $0x1b30] sm:$0xff] }
  0x59   :  { %1378 = vmatprep.subr.mxu1 %v103_v55  ;;  %1237 = vmatpush1.msra.mxu0 %v740_v56  ;;  %v282_v55 = vld [vmem:[%s18404_s1 + $0x740] sm:$0xff]  ;;  %v911_v56 = vld [vmem:[%s18404_s1 + $0x1ae8] sm:$0xff] }
  0x5a   :  { %1379 = vmatpush1.msra.mxu1 %v102_v57  ;;  %1238 = vmatprep.subr.mxu0 %v731_v58  ;;  %v273_v57 = vld [vmem:[%s18404_s1 + $0x6f8] sm:$0xff]  ;;  %v910_v58 = vld [vmem:[%s18404_s1 + $0x1ae0] sm:$0xff] }
  0x5b   :  { %1380 = vmatprep.subr.mxu1 %v93_v59  ;;  %1239 = vmatpush1.msra.mxu0 %v730_v60  ;;  %v272_v59 = vld [vmem:[%s18404_s1 + $0x6f0] sm:$0xff]  ;;  %v901_v60 = vld [vmem:[%s18404_s1 + $0x1a98] sm:$0xff] }
  0x5c   :  { %1381 = vmatpush1.msra.mxu1 %v92_v61  ;;  %1240 = vmatprep.subr.mxu0 %v721_v63  ;;  %v263_v61 = vld [vmem:[%s18404_s1 + $0x6a8] sm:$0xff]  ;;  %v900_v63 = vld [vmem:[%s18404_s1 + $0x1a90] sm:$0xff] }
  0x5d   :  { %1382 = vmatprep.subr.mxu1 %v83_v0  ;;  %1241 = vmatpush1.msra.mxu0 %v720_v2  ;;  %v262_v0 = vld [vmem:[%s18404_s1 + $0x6a0] sm:$0xff]  ;;  %v891_v2 = vld [vmem:[%s18404_s1 + $0x1a48] sm:$0xff] }
  0x5e   :  { %1383 = vmatpush1.msra.mxu1 %v82_v3  ;;  %1242 = vmatprep.subr.mxu0 %v711_v4  ;;  %v253_v3 = vld [vmem:[%s18404_s1 + $0x658] sm:$0xff]  ;;  %v890_v4 = vld [vmem:[%s18404_s1 + $0x1a40] sm:$0xff] }
  0x5f   :  { %1384 = vmatprep.subr.mxu1 %v73_v5  ;;  %1243 = vmatpush1.msra.mxu0 %v710_v6  ;;  %v252_v5 = vld [vmem:[%s18404_s1 + $0x650] sm:$0xff]  ;;  %v49_v6 = vld [vmem:[%s18403_s0 + $0x8] sm:$0x3f] }
  0x60   :  { %1385 = vmatpush1.msra.mxu1 %v72_v7  ;;  %1244 = vmatprep.subr.mxu0 %v701_v9  ;;  %v881_v7 = vld [vmem:[%s18404_s1 + $0x19f8] sm:$0xff]  ;;  %v243_v9 = vld [vmem:[%s18404_s1 + $0x608] sm:$0xff] }
  0x61   :  { %1386 = vmatprep.subr.mxu1 %v63_v11  ;;  %1245 = vmatpush1.msra.mxu0 %v700_v12  ;;  %v880_v11 = vld [vmem:[%s18404_s1 + $0x19f0] sm:$0xff]  ;;  %v242_v12 = vld [vmem:[%s18404_s1 + $0x600] sm:$0xff] }
  0x62   :  { %1387 = vmatpush1.msra.mxu1 %v62_v13  ;;  %1246 = vmatprep.subr.mxu0 %v691_v14  ;;  %v871_v13 = vld [vmem:[%s18404_s1 + $0x19a8] sm:$0xff]  ;;  %v233_v14 = vld [vmem:[%s18404_s1 + $0x5b8] sm:$0xff] }
  0x63   :  { %1388 = vmatprep.subr.mxu1 %v53_v15  ;;  %1247 = vmatpush1.msra.mxu0 %v690_v16  ;;  %v10472_v15 = vrot.slane %v49_v6, %v10040_v52  ;;  %v870_v16 = vld [vmem:[%s18404_s1 + $0x19a0] sm:$0xff] }
  0x64   :  { %1389 = vmatpush1.msra.mxu1 %v52_v17  ;;  %1248 = vmatprep.subr.mxu0 %v1001_v18  ;;  %v232_v17 = vld [vmem:[%s18404_s1 + $0x5b0] sm:$0xff]  ;;  %v861_v18 = vld [vmem:[%s18404_s1 + $0x1958] sm:$0xff] }
  0x65   :  { %1390 = vmatprep.subr.mxu1 %v363_v19  ;;  %1249 = vmatpush2.msra.mxu0 %v1000_v20  ;;  %v223_v19 = vld [vmem:[%s18404_s1 + $0x568] sm:$0xff]  ;;  %v860_v20 = vld [vmem:[%s18404_s1 + $0x1950] sm:$0xff] }
  0x66   :  { %1391 = vmatpush2.msra.mxu1 %v362_v21  ;;  %1250 = vmatprep.subr.mxu0 %v991_v22  ;;  %v222_v21 = vld [vmem:[%s18404_s1 + $0x560] sm:$0xff]  ;;  %v851_v22 = vld [vmem:[%s18404_s1 + $0x1908] sm:$0xff] }
  0x67   :  { %1392 = vmatprep.subr.mxu1 %v353_v23  ;;  %1251 = vmatpush2.msra.mxu0 %v990_v24  ;;  %v213_v23 = vld [vmem:[%s18404_s1 + $0x518] sm:$0xff]  ;;  %v10500_v24 = vcombine.high %v10472_v15, %v10472_v15 }
  0x68   :  { %1393 = vmatpush2.msra.mxu1 %v352_v25  ;;  %1252 = vmatprep.subr.mxu0 %v981_v26  ;;  %v850_v25 = vld [vmem:[%s18404_s1 + $0x1900] sm:$0xff]  ;;  %v212_v26 = vld [vmem:[%s18404_s1 + $0x510] sm:$0xff] }
  0x69   :  { %1394 = vmatprep.subr.mxu1 %v343_v27  ;;  %1253 = vmatpush2.msra.mxu0 %v980_v28  ;;  %v1021_v27 = vld [vmem:[%s18404_s1 + $0x1e58] sm:$0xff]  ;;  %v1049_v28 = vcombine.high %v49_v6, %v49_v6 }
  0x6a   :  { %1395 = vmatpush2.msra.mxu1 %v342_v29  ;;  %1254 = vmatprep.subr.mxu0 %v971_v30  ;;  %v843_v29 = vld [vmem:[%s18404_s1 + $0x18c8] sm:$0xff]  ;;  %v1020_v30 = vld [vmem:[%s18404_s1 + $0x1e50] sm:$0xff]  ;;  %v753_v6 = vld [vmem:[%s18404_s1 + $0x15f8] sm:$0xff] }
  0x6b   :  { %1396 = vmatprep.subr.mxu1 %v333_v31  ;;  %1255 = vmatpush2.msra.mxu0 %v970_v32  ;;  %v1011_v31 = vld [vmem:[%s18404_s1 + $0x1e08] sm:$0xff]  ;;  %v842_v32 = vld [vmem:[%s18404_s1 + $0x18c0] sm:$0xff] }
  0x6c   :  { %1397 = vmatpush2.msra.mxu1 %v332_v33  ;;  %1256 = vmatprep.subr.mxu0 %v961_v34  ;;  %v1010_v33 = vld [vmem:[%s18404_s1 + $0x1e00] sm:$0xff]  ;;  %v833_v34 = vld [vmem:[%s18404_s1 + $0x1878] sm:$0xff] }
  0x6d   :  { %1398 = vmatprep.subr.mxu1 %v323_v35  ;;  %1257 = vmatpush2.msra.mxu0 %v960_v36  ;;  %v10533_v35 = vrot.slane %v1049_v28, %v10040_v52  ;;  %v832_v36 = vld [vmem:[%s18404_s1 + $0x1870] sm:$0xff]  ;;  %v18418_v52 = vmov 0.0  }
  0x6e   :  { %1399 = vmatpush2.msra.mxu1 %v322_v37  ;;  %1258 = vmatprep.subr.mxu0 %v951_v38  ;;  %v523_v37 = vld [vmem:[%s18404_s1 + $0xec8] sm:$0xff]  ;;  %v712_v28 = vld [vmem:[%s18404_s1 + $0x14b0] sm:$0xff] }
  0x6f   :  { %1400 = vmatprep.subr.mxu1 %v313_v39  ;;  %1259 = vmatpush2.msra.mxu0 %v950_v40  ;;  %v823_v38 = vld [vmem:[%s18404_s1 + $0x1828] sm:$0xff]  ;;  %v522_v39 = vld [vmem:[%s18404_s1 + $0xec0] sm:$0xff] }
  0x70   :  { %1401 = vmatpush2.msra.mxu1 %v312_v41  ;;  %1260 = vmatprep.subr.mxu0 %v941_v43  ;;  %v822_v40 = vld [vmem:[%s18404_s1 + $0x1820] sm:$0xff]  ;;  %v513_v41 = vld [vmem:[%s18404_s1 + $0xe78] sm:$0xff] }
  0x71   :  { %1402 = vmatprep.subr.mxu1 %v303_v44  ;;  %1261 = vmatpush2.msra.mxu0 %v940_v45  ;;  %v813_v43 = vld [vmem:[%s18404_s1 + $0x17d8] sm:$0xff]  ;;  %v512_v44 = vld [vmem:[%s18404_s1 + $0xe70] sm:$0xff] }
  0x72   :  { %1403 = vmatpush2.msra.mxu1 %v302_v46  ;;  %1262 = vmatprep.subr.mxu0 %v931_v47  ;;  %v812_v45 = vld [vmem:[%s18404_s1 + $0x17d0] sm:$0xff]  ;;  %v503_v46 = vld [vmem:[%s18404_s1 + $0xe28] sm:$0xff] }
  0x73   :  { %1404 = vmatprep.subr.mxu1 %v293_v48  ;;  %1263 = vmatpush2.msra.mxu0 %v930_v49  ;;  %v803_v47 = vld [vmem:[%s18404_s1 + $0x1788] sm:$0xff]  ;;  %v502_v48 = vld [vmem:[%s18404_s1 + $0xe20] sm:$0xff] }
  0x74   :  { %1405 = vmatpush2.msra.mxu1 %v292_v50  ;;  %1264 = vmatprep.subr.mxu0 %v921_v51  ;;  %v802_v49 = vld [vmem:[%s18404_s1 + $0x1780] sm:$0xff]  ;;  %v493_v50 = vld [vmem:[%s18404_s1 + $0xdd8] sm:$0xff] }
  0x75   :  { %1406 = vmatprep.subr.mxu1 %v283_v53  ;;  %1265 = vmatpush2.msra.mxu0 %v920_v54  ;;  %v793_v51 = vld [vmem:[%s18404_s1 + $0x1738] sm:$0xff]  ;;  %v492_v53 = vld [vmem:[%s18404_s1 + $0xdd0] sm:$0xff] }
  0x76   :  { %1407 = vmatpush2.msra.mxu1 %v282_v55  ;;  %1266 = vmatprep.subr.mxu0 %v911_v56  ;;  %v792_v54 = vld [vmem:[%s18404_s1 + $0x1730] sm:$0xff]  ;;  %v483_v55 = vld [vmem:[%s18404_s1 + $0xd88] sm:$0xff] }
  0x77   :  { %1408 = vmatprep.subr.mxu1 %v273_v57  ;;  %1267 = vmatpush2.msra.mxu0 %v910_v58  ;;  %v783_v56 = vld [vmem:[%s18404_s1 + $0x16e8] sm:$0xff]  ;;  %v482_v57 = vld [vmem:[%s18404_s1 + $0xd80] sm:$0xff] }
  0x78   :  { %1409 = vmatpush2.msra.mxu1 %v272_v59  ;;  %1268 = vmatprep.subr.mxu0 %v901_v60  ;;  %v782_v58 = vld [vmem:[%s18404_s1 + $0x16e0] sm:$0xff]  ;;  %v473_v59 = vld [vmem:[%s18404_s1 + $0xd38] sm:$0xff] }
  0x79   :  { %1410 = vmatprep.subr.mxu1 %v263_v61  ;;  %1269 = vmatpush2.msra.mxu0 %v900_v63  ;;  %v773_v60 = vld [vmem:[%s18404_s1 + $0x1698] sm:$0xff]  ;;  %v472_v61 = vld [vmem:[%s18404_s1 + $0xd30] sm:$0xff] }
  0x7a   :  { %1411 = vmatpush2.msra.mxu1 %v262_v0  ;;  %1270 = vmatprep.subr.mxu0 %v891_v2  ;;  %v772_v63 = vld [vmem:[%s18404_s1 + $0x1690] sm:$0xff]  ;;  %v463_v0 = vld [vmem:[%s18404_s1 + $0xce8] sm:$0xff] }
  0x7b   :  { %1412 = vmatprep.subr.mxu1 %v253_v3  ;;  %1271 = vmatpush2.msra.mxu0 %v890_v4  ;;  %v763_v2 = vld [vmem:[%s18404_s1 + $0x1648] sm:$0xff]  ;;  %v462_v3 = vld [vmem:[%s18404_s1 + $0xce0] sm:$0xff] }
  0x7c   :  { %1413 = vmatpush2.msra.mxu1 %v252_v5  ;;  %1272 = vmatprep.subr.mxu0 %v881_v7  ;;  %v762_v4 = vld [vmem:[%s18404_s1 + $0x1640] sm:$0xff]  ;;  %v453_v5 = vld [vmem:[%s18404_s1 + $0xc98] sm:$0xff]  ;;  %v452_v7 = vld [vmem:[%s18404_s1 + $0xc90] sm:$0xff] }
  0x7d   :  { %1414 = vmatprep.subr.mxu1 %v243_v9  ;;  %1273 = vmatpush2.msra.mxu0 %v880_v11  ;;  %v752_v9 = vld [vmem:[%s18404_s1 + $0x15f0] sm:$0xff]  ;;  %v443_v11 = vld [vmem:[%s18404_s1 + $0xc48] sm:$0xff] }
  0x7e   :  { %1415 = vmatpush2.msra.mxu1 %v242_v12  ;;  %1274 = vmatprep.subr.mxu0 %v871_v13  ;;  %v743_v12 = vld [vmem:[%s18404_s1 + $0x15a8] sm:$0xff]  ;;  %v442_v13 = vld [vmem:[%s18404_s1 + $0xc40] sm:$0xff] }
  0x7f   :  { %1416 = vmatprep.subr.mxu1 %v233_v14  ;;  %1275 = vmatpush2.msra.mxu0 %v870_v16  ;;  %v742_v14 = vld [vmem:[%s18404_s1 + $0x15a0] sm:$0xff]  ;;  %v433_v16 = vld [vmem:[%s18404_s1 + $0xbf8] sm:$0xff] }
  0x80   :  { %1417 = vmatpush2.msra.mxu1 %v232_v17  ;;  %1276 = vmatprep.subr.mxu0 %v861_v18  ;;  %v733_v17 = vld [vmem:[%s18404_s1 + $0x1558] sm:$0xff]  ;;  %v432_v18 = vld [vmem:[%s18404_s1 + $0xbf0] sm:$0xff] }
  0x81   :  { %1418 = vmatprep.subr.mxu1 %v223_v19  ;;  %1277 = vmatpush2.msra.mxu0 %v860_v20  ;;  %v732_v19 = vld [vmem:[%s18404_s1 + $0x1550] sm:$0xff]  ;;  %v423_v20 = vld [vmem:[%s18404_s1 + $0xba8] sm:$0xff] }
  0x82   :  { %1419 = vmatpush2.msra.mxu1 %v222_v21  ;;  %1278 = vmatprep.subr.mxu0 %v851_v22  ;;  %v723_v21 = vld [vmem:[%s18404_s1 + $0x1508] sm:$0xff]  ;;  %v422_v22 = vld [vmem:[%s18404_s1 + $0xba0] sm:$0xff] }
  0x83   :  { %1420 = vmatprep.subr.mxu1 %v213_v23  ;;  %1279 = vmatpush2.msra.mxu0 %v850_v25  ;;  %v722_v23 = vld [vmem:[%s18404_s1 + $0x1500] sm:$0xff]  ;;  %v413_v25 = vld [vmem:[%s18404_s1 + $0xb58] sm:$0xff] }
  0x84   :  { %1280 = vmatprep.mubr.f32.mxu0 %v10500_v24  ;;  %1421 = vmatpush2.msra.mxu1 %v212_v26  ;;  %v713_v26 = vld [vmem:[%s18404_s1 + $0x14b8] sm:$0xff] }
  0x85   :  { %1281 = vmatmul.mubr.f32.vlgmr.msra.gmra.mxu0 %v10472_v15  ;;  %1315 = vmatprep.subr.mxu0 %v1021_v27  ;;  %v412_v27 = vld [vmem:[%s18404_s1 + $0xb50] sm:$0xff] }
  0x86   :  { %1422 = vmatprep.mubr.f32.mxu1 %v10098_v8  ;;  %1500 = vmatprep.subr.mxu1 %v843_v29  ;;  %v403_v29 = vld [vmem:[%s18404_s1 + $0xb08] sm:$0xff] }
  0x87   :  { %1316 = vmatpush1.msra.mxu0 %v1020_v30  ;;  %1423 = vmatmul.mubr.f32.vlgmr.msra.gmra.mxu1 %v10067_v62  ;;  %v703_v30 = vld [vmem:[%s18404_s1 + $0x1468] sm:$0xff] }
  0x88   :  { %1317 = vmatprep.subr.mxu0 %v1011_v31  ;;  %1501 = vmatpush1.msra.mxu1 %v842_v32  ;;  %v402_v31 = vld [vmem:[%s18404_s1 + $0xb00] sm:$0xff] }
  0x89   :  { %1318 = vmatpush1.msra.mxu0 %v1010_v33  ;;  %1502 = vmatprep.subr.mxu1 %v833_v34  ;;  %v702_v32 = vld [vmem:[%s18404_s1 + $0x1460] sm:$0xff]  ;;  %v393_v33 = vld [vmem:[%s18404_s1 + $0xab8] sm:$0xff] }
  0x8a   :  { %1351 = vmatprep.mubr.f32.mxu0 %v18418_v52  ;;  %1503 = vmatpush1.msra.mxu1 %v832_v36  ;;  %v693_v34 = vld [vmem:[%s18404_s1 + $0x1418] sm:$0xff]  ;;  %v392_v36 = vld [vmem:[%s18404_s1 + $0xab0] sm:$0xff] }
  0x8b   :  { %8702 = vmatmul.mubr.msk.f32.vlgmr.msra.gmra.mxu0 %vm1071_vm0, %v10533_v35  ;;  %1429 = vmatprep.subr.mxu0 %v523_v37  ;;  %v692_v37 = vld [vmem:[%s18404_s1 + $0x1410] sm:$0xff] }
  0x8c   :  { %1504 = vmatprep.subr.mxu1 %v823_v38  ;;  %1430 = vmatpush1.msra.mxu0 %v522_v39  ;;  %v383_v38 = vld [vmem:[%s18404_s1 + $0xa68] sm:$0xff] }
  0x8d   :  { %1505 = vmatpush1.msra.mxu1 %v822_v40  ;;  %1431 = vmatprep.subr.mxu0 %v513_v41  ;;  %v1003_v39 = vld [vmem:[%s18404_s1 + $0x1dc8] sm:$0xff]  ;;  %v382_v40 = vld [vmem:[%s18404_s1 + $0xa60] sm:$0xff] }
  0x8e   :  { %1506 = vmatprep.subr.mxu1 %v813_v43  ;;  %1432 = vmatpush1.msra.mxu0 %v512_v44  ;;  %v1002_v41 = vld [vmem:[%s18404_s1 + $0x1dc0] sm:$0xff]  ;;  %v373_v43 = vld [vmem:[%s18404_s1 + $0xa18] sm:$0xff] }
  0x8f   :  { %1507 = vmatpush1.msra.mxu1 %v812_v45  ;;  %1433 = vmatprep.subr.mxu0 %v503_v46  ;;  %v993_v44 = vld [vmem:[%s18404_s1 + $0x1d78] sm:$0xff]  ;;  %v372_v45 = vld [vmem:[%s18404_s1 + $0xa10] sm:$0xff] }
  0x90   :  { %1508 = vmatprep.subr.mxu1 %v803_v47  ;;  %1434 = vmatpush1.msra.mxu0 %v502_v48  ;;  %v992_v46 = vld [vmem:[%s18404_s1 + $0x1d70] sm:$0xff]  ;;  %v683_v47 = vld [vmem:[%s18404_s1 + $0x13c8] sm:$0xff] }
  0x91   :  { %1509 = vmatpush1.msra.mxu1 %v802_v49  ;;  %1435 = vmatprep.subr.mxu0 %v493_v50  ;;  %v983_v48 = vld [vmem:[%s18404_s1 + $0x1d28] sm:$0xff]  ;;  %v682_v49 = vld [vmem:[%s18404_s1 + $0x13c0] sm:$0xff] }
  0x92   :  { %1510 = vmatprep.subr.mxu1 %v793_v51  ;;  %1436 = vmatpush1.msra.mxu0 %v492_v53  ;;  %v982_v50 = vld [vmem:[%s18404_s1 + $0x1d20] sm:$0xff]  ;;  %v673_v51 = vld [vmem:[%s18404_s1 + $0x1378] sm:$0xff] }
  0x93   :  { %1511 = vmatpush1.msra.mxu1 %v792_v54  ;;  %1437 = vmatprep.subr.mxu0 %v483_v55  ;;  %v973_v53 = vld [vmem:[%s18404_s1 + $0x1cd8] sm:$0xff]  ;;  %v672_v54 = vld [vmem:[%s18404_s1 + $0x1370] sm:$0xff] }
  0x94   :  { %1512 = vmatprep.subr.mxu1 %v783_v56  ;;  %1438 = vmatpush1.msra.mxu0 %v482_v57  ;;  %v972_v55 = vld [vmem:[%s18404_s1 + $0x1cd0] sm:$0xff]  ;;  %v663_v56 = vld [vmem:[%s18404_s1 + $0x1328] sm:$0xff] }
  0x95   :  { %1513 = vmatpush1.msra.mxu1 %v782_v58  ;;  %1439 = vmatprep.subr.mxu0 %v473_v59  ;;  %v963_v57 = vld [vmem:[%s18404_s1 + $0x1c88] sm:$0xff]  ;;  %v662_v58 = vld [vmem:[%s18404_s1 + $0x1320] sm:$0xff] }
  0x96   :  { %1514 = vmatprep.subr.mxu1 %v773_v60  ;;  %1440 = vmatpush1.msra.mxu0 %v472_v61  ;;  %v962_v59 = vld [vmem:[%s18404_s1 + $0x1c80] sm:$0xff]  ;;  %v653_v60 = vld [vmem:[%s18404_s1 + $0x12d8] sm:$0xff] }
  0x97   :  { %1515 = vmatpush1.msra.mxu1 %v772_v63  ;;  %1441 = vmatprep.subr.mxu0 %v463_v0  ;;  %v953_v61 = vld [vmem:[%s18404_s1 + $0x1c38] sm:$0xff]  ;;  %v652_v63 = vld [vmem:[%s18404_s1 + $0x12d0] sm:$0xff] }
  0x98   :  { %1516 = vmatprep.subr.mxu1 %v763_v2  ;;  %1442 = vmatpush1.msra.mxu0 %v462_v3  ;;  %v952_v0 = vld [vmem:[%s18404_s1 + $0x1c30] sm:$0xff]  ;;  %v643_v2 = vld [vmem:[%s18404_s1 + $0x1288] sm:$0xff] }
  0x99   :  { %1517 = vmatpush1.msra.mxu1 %v762_v4  ;;  %1443 = vmatprep.subr.mxu0 %v453_v5  ;;  %v943_v3 = vld [vmem:[%s18404_s1 + $0x1be8] sm:$0xff]  ;;  %v642_v4 = vld [vmem:[%s18404_s1 + $0x1280] sm:$0xff] }
  0x9a   :  { %1518 = vmatprep.subr.mxu1 %v753_v6  ;;  %1444 = vmatpush1.msra.mxu0 %v452_v7  ;;  %v942_v5 = vld [vmem:[%s18404_s1 + $0x1be0] sm:$0xff]  ;;  %v633_v6 = vld [vmem:[%s18404_s1 + $0x1238] sm:$0xff] }
  0x9b   :  { %1519 = vmatpush1.msra.mxu1 %v752_v9  ;;  %1445 = vmatprep.subr.mxu0 %v443_v11  ;;  %v933_v7 = vld [vmem:[%s18404_s1 + $0x1b98] sm:$0xff]  ;;  %v632_v9 = vld [vmem:[%s18404_s1 + $0x1230] sm:$0xff] }
  0x9c   :  { %1520 = vmatprep.subr.mxu1 %v743_v12  ;;  %1446 = vmatpush1.msra.mxu0 %v442_v13  ;;  %v932_v11 = vld [vmem:[%s18404_s1 + $0x1b90] sm:$0xff]  ;;  %v623_v12 = vld [vmem:[%s18404_s1 + $0x11e8] sm:$0xff] }
  0x9d   :  { %1521 = vmatpush1.msra.mxu1 %v742_v14  ;;  %1447 = vmatprep.subr.mxu0 %v433_v16  ;;  %v923_v13 = vld [vmem:[%s18404_s1 + $0x1b48] sm:$0xff]  ;;  %v622_v14 = vld [vmem:[%s18404_s1 + $0x11e0] sm:$0xff] }
  0x9e   :  { %1522 = vmatprep.subr.mxu1 %v733_v17  ;;  %1448 = vmatpush1.msra.mxu0 %v432_v18  ;;  %v922_v16 = vld [vmem:[%s18404_s1 + $0x1b40] sm:$0xff]  ;;  %v613_v17 = vld [vmem:[%s18404_s1 + $0x1198] sm:$0xff] }
  0x9f   :  { %1523 = vmatpush1.msra.mxu1 %v732_v19  ;;  %1449 = vmatprep.subr.mxu0 %v423_v20  ;;  %v913_v18 = vld [vmem:[%s18404_s1 + $0x1af8] sm:$0xff]  ;;  %v612_v19 = vld [vmem:[%s18404_s1 + $0x1190] sm:$0xff] }
  0xa0   :  { %1524 = vmatprep.subr.mxu1 %v723_v21  ;;  %1450 = vmatpush1.msra.mxu0 %v422_v22  ;;  %v912_v20 = vld [vmem:[%s18404_s1 + $0x1af0] sm:$0xff]  ;;  %v603_v21 = vld [vmem:[%s18404_s1 + $0x1148] sm:$0xff] }
  0xa1   :  { %1525 = vmatpush1.msra.mxu1 %v722_v23  ;;  %1451 = vmatprep.subr.mxu0 %v413_v25  ;;  %v903_v22 = vld [vmem:[%s18404_s1 + $0x1aa8] sm:$0xff]  ;;  %v602_v23 = vld [vmem:[%s18404_s1 + $0x1140] sm:$0xff] }
  0xa2   :  { %1526 = vmatprep.subr.mxu1 %v713_v26  ;;  %1452 = vmatpush1.msra.mxu0 %v412_v27  ;;  %v902_v25 = vld [vmem:[%s18404_s1 + $0x1aa0] sm:$0xff]  ;;  %v593_v26 = vld [vmem:[%s18404_s1 + $0x10f8] sm:$0xff] }
  0xa3   :  { %1527 = vmatpush1.msra.mxu1 %v712_v28  ;;  %1453 = vmatprep.subr.mxu0 %v403_v29  ;;  %v893_v27 = vld [vmem:[%s18404_s1 + $0x1a58] sm:$0xff]  ;;  %v592_v28 = vld [vmem:[%s18404_s1 + $0x10f0] sm:$0xff] }
  0xa4   :  { %1528 = vmatprep.subr.mxu1 %v703_v30  ;;  %1454 = vmatpush1.msra.mxu0 %v402_v31  ;;  %v892_v29 = vld [vmem:[%s18404_s1 + $0x1a50] sm:$0xff]  ;;  %v583_v30 = vld [vmem:[%s18404_s1 + $0x10a8] sm:$0xff] }
  0xa5   :  { %1529 = vmatpush1.msra.mxu1 %v702_v32  ;;  %1455 = vmatprep.subr.mxu0 %v393_v33  ;;  %v883_v31 = vld [vmem:[%s18404_s1 + $0x1a08] sm:$0xff]  ;;  %v582_v32 = vld [vmem:[%s18404_s1 + $0x10a0] sm:$0xff] }
  0xa6   :  { %1530 = vmatprep.subr.mxu1 %v693_v34  ;;  %1456 = vmatpush1.msra.mxu0 %v392_v36  ;;  %v882_v33 = vld [vmem:[%s18404_s1 + $0x1a00] sm:$0xff]  ;;  %v573_v34 = vld [vmem:[%s18404_s1 + $0x1058] sm:$0xff] }
  0xa7   :  { %1531 = vmatpush1.msra.mxu1 %v692_v37  ;;  %1457 = vmatprep.subr.mxu0 %v383_v38  ;;  %v873_v36 = vld [vmem:[%s18404_s1 + $0x19b8] sm:$0xff]  ;;  %v572_v37 = vld [vmem:[%s18404_s1 + $0x1050] sm:$0xff] }
  0xa8   :  { %1532 = vmatprep.subr.mxu1 %v1003_v39  ;;  %1458 = vmatpush1.msra.mxu0 %v382_v40  ;;  %v872_v38 = vld [vmem:[%s18404_s1 + $0x19b0] sm:$0xff]  ;;  %v563_v39 = vld [vmem:[%s18404_s1 + $0x1008] sm:$0xff] }
  0xa9   :  { %1533 = vmatpush2.msra.mxu1 %v1002_v41  ;;  %1459 = vmatprep.subr.mxu0 %v373_v43  ;;  %v863_v40 = vld [vmem:[%s18404_s1 + $0x1968] sm:$0xff]  ;;  %v562_v41 = vld [vmem:[%s18404_s1 + $0x1000] sm:$0xff] }
  0xaa   :  { %1534 = vmatprep.subr.mxu1 %v993_v44  ;;  %1460 = vmatpush1.msra.mxu0 %v372_v45  ;;  %v862_v43 = vld [vmem:[%s18404_s1 + $0x1960] sm:$0xff]  ;;  %v553_v44 = vld [vmem:[%s18404_s1 + $0xfb8] sm:$0xff] }
  0xab   :  { %1535 = vmatpush2.msra.mxu1 %v992_v46  ;;  %1461 = vmatprep.subr.mxu0 %v683_v47  ;;  %v853_v45 = vld [vmem:[%s18404_s1 + $0x1918] sm:$0xff]  ;;  %v552_v46 = vld [vmem:[%s18404_s1 + $0xfb0] sm:$0xff] }
  0xac   :  { %1536 = vmatprep.subr.mxu1 %v983_v48  ;;  %1462 = vmatpush2.msra.mxu0 %v682_v49  ;;  %v852_v47 = vld [vmem:[%s18404_s1 + $0x1910] sm:$0xff]  ;;  %v543_v48 = vld [vmem:[%s18404_s1 + $0xf68] sm:$0xff]  ;;  %v525_v49 = vld [vmem:[%s18404_s1 + $0xed8] sm:$0xff] }
  0xad   :  { %1537 = vmatpush2.msra.mxu1 %v982_v50  ;;  %1463 = vmatprep.subr.mxu0 %v673_v51  ;;  %v542_v50 = vld [vmem:[%s18404_s1 + $0xf60] sm:$0xff]  ;;  %v533_v51 = vld [vmem:[%s18404_s1 + $0xf18] sm:$0xff] }
  0xae   :  { %1538 = vmatprep.subr.mxu1 %v973_v53  ;;  %1464 = vmatpush2.msra.mxu0 %v672_v54  ;;  %v524_v53 = vld [vmem:[%s18404_s1 + $0xed0] sm:$0xff] }
  0xaf   :  { %1539 = vmatpush2.msra.mxu1 %v972_v55  ;;  %1465 = vmatprep.subr.mxu0 %v663_v56  ;;  %v532_v54 = vld [vmem:[%s18404_s1 + $0xf10] sm:$0xff]  ;;  %v515_v55 = vld [vmem:[%s18404_s1 + $0xe88] sm:$0xff]  ;;  %v514_v56 = vld [vmem:[%s18404_s1 + $0xe80] sm:$0xff] }
  0xb0   :  { %1540 = vmatprep.subr.mxu1 %v963_v57  ;;  %1466 = vmatpush2.msra.mxu0 %v662_v58  ;;  %v1023_v57 = vld [vmem:[%s18404_s1 + $0x1e68] sm:$0xff]  ;;  %v505_v58 = vld [vmem:[%s18404_s1 + $0xe38] sm:$0xff] }
  0xb1   :  { %1541 = vmatpush2.msra.mxu1 %v962_v59  ;;  %1467 = vmatprep.subr.mxu0 %v653_v60  ;;  %v1022_v59 = vld [vmem:[%s18404_s1 + $0x1e60] sm:$0xff]  ;;  %v504_v60 = vld [vmem:[%s18404_s1 + $0xe30] sm:$0xff] }
  0xb2   :  { %1542 = vmatprep.subr.mxu1 %v953_v61  ;;  %1468 = vmatpush2.msra.mxu0 %v652_v63  ;;  %v1013_v61 = vld [vmem:[%s18404_s1 + $0x1e18] sm:$0xff]  ;;  %v495_v63 = vld [vmem:[%s18404_s1 + $0xde8] sm:$0xff] }
  0xb3   :  { %1543 = vmatpush2.msra.mxu1 %v952_v0  ;;  %1469 = vmatprep.subr.mxu0 %v643_v2  ;;  %v1012_v0 = vld [vmem:[%s18404_s1 + $0x1e10] sm:$0xff]  ;;  %v494_v2 = vld [vmem:[%s18404_s1 + $0xde0] sm:$0xff] }
  0xb4   :  { %1544 = vmatprep.subr.mxu1 %v943_v3  ;;  %1470 = vmatpush2.msra.mxu0 %v642_v4  ;;  %v205_v3 = vld [vmem:[%s18404_s1 + $0x4d8] sm:$0xff] }
  0xb5   :  { %1545 = vmatpush2.msra.mxu1 %v942_v5  ;;  %1471 = vmatprep.subr.mxu0 %v633_v6  ;;  %v485_v4 = vld [vmem:[%s18404_s1 + $0xd98] sm:$0xff]  ;;  %v204_v5 = vld [vmem:[%s18404_s1 + $0x4d0] sm:$0xff] }
  0xb6   :  { %1546 = vmatprep.subr.mxu1 %v933_v7  ;;  %1472 = vmatpush2.msra.mxu0 %v632_v9  ;;  %v484_v6 = vld [vmem:[%s18404_s1 + $0xd90] sm:$0xff]  ;;  %v195_v7 = vld [vmem:[%s18404_s1 + $0x488] sm:$0xff] }
  0xb7   :  { %1547 = vmatpush2.msra.mxu1 %v932_v11  ;;  %1473 = vmatprep.subr.mxu0 %v623_v12  ;;  %v475_v9 = vld [vmem:[%s18404_s1 + $0xd48] sm:$0xff]  ;;  %v194_v11 = vld [vmem:[%s18404_s1 + $0x480] sm:$0xff] }
  0xb8   :  { %1548 = vmatprep.subr.mxu1 %v923_v13  ;;  %1474 = vmatpush2.msra.mxu0 %v622_v14  ;;  %v474_v12 = vld [vmem:[%s18404_s1 + $0xd40] sm:$0xff]  ;;  %v185_v13 = vld [vmem:[%s18404_s1 + $0x438] sm:$0xff] }
  0xb9   :  { %1549 = vmatpush2.msra.mxu1 %v922_v16  ;;  %1475 = vmatprep.subr.mxu0 %v613_v17  ;;  %v465_v14 = vld [vmem:[%s18404_s1 + $0xcf8] sm:$0xff]  ;;  %v184_v16 = vld [vmem:[%s18404_s1 + $0x430] sm:$0xff] }
  0xba   :  { %1550 = vmatprep.subr.mxu1 %v913_v18  ;;  %1476 = vmatpush2.msra.mxu0 %v612_v19  ;;  %v464_v17 = vld [vmem:[%s18404_s1 + $0xcf0] sm:$0xff]  ;;  %v175_v18 = vld [vmem:[%s18404_s1 + $0x3e8] sm:$0xff] }
  0xbb   :  { %1551 = vmatpush2.msra.mxu1 %v912_v20  ;;  %1477 = vmatprep.subr.mxu0 %v603_v21  ;;  %v455_v19 = vld [vmem:[%s18404_s1 + $0xca8] sm:$0xff]  ;;  %v174_v20 = vld [vmem:[%s18404_s1 + $0x3e0] sm:$0xff] }
  0xbc   :  { %1552 = vmatprep.subr.mxu1 %v903_v22  ;;  %1478 = vmatpush2.msra.mxu0 %v602_v23  ;;  %v454_v21 = vld [vmem:[%s18404_s1 + $0xca0] sm:$0xff]  ;;  %v165_v22 = vld [vmem:[%s18404_s1 + $0x398] sm:$0xff] }
  0xbd   :  { %1553 = vmatpush2.msra.mxu1 %v902_v25  ;;  %1479 = vmatprep.subr.mxu0 %v593_v26  ;;  %v445_v23 = vld [vmem:[%s18404_s1 + $0xc58] sm:$0xff]  ;;  %v164_v25 = vld [vmem:[%s18404_s1 + $0x390] sm:$0xff] }
  0xbe   :  { %1554 = vmatprep.subr.mxu1 %v893_v27  ;;  %1480 = vmatpush2.msra.mxu0 %v592_v28  ;;  %v444_v26 = vld [vmem:[%s18404_s1 + $0xc50] sm:$0xff]  ;;  %v155_v27 = vld [vmem:[%s18404_s1 + $0x348] sm:$0xff] }
  0xbf   :  { %1555 = vmatpush2.msra.mxu1 %v892_v29  ;;  %1481 = vmatprep.subr.mxu0 %v583_v30  ;;  %v435_v28 = vld [vmem:[%s18404_s1 + $0xc08] sm:$0xff]  ;;  %v154_v29 = vld [vmem:[%s18404_s1 + $0x340] sm:$0xff] }
  0xc0   :  { %1556 = vmatprep.subr.mxu1 %v883_v31  ;;  %1482 = vmatpush2.msra.mxu0 %v582_v32  ;;  %v434_v30 = vld [vmem:[%s18404_s1 + $0xc00] sm:$0xff]  ;;  %v145_v31 = vld [vmem:[%s18404_s1 + $0x2f8] sm:$0xff] }
  0xc1   :  { %1557 = vmatpush2.msra.mxu1 %v882_v33  ;;  %1483 = vmatprep.subr.mxu0 %v573_v34  ;;  %v425_v32 = vld [vmem:[%s18404_s1 + $0xbb8] sm:$0xff]  ;;  %v144_v33 = vld [vmem:[%s18404_s1 + $0x2f0] sm:$0xff] }
  0xc2   :  { %1558 = vmatprep.subr.mxu1 %v873_v36  ;;  %1484 = vmatpush2.msra.mxu0 %v572_v37  ;;  %v424_v34 = vld [vmem:[%s18404_s1 + $0xbb0] sm:$0xff]  ;;  %v135_v36 = vld [vmem:[%s18404_s1 + $0x2a8] sm:$0xff] }
  0xc3   :  { %1559 = vmatpush2.msra.mxu1 %v872_v38  ;;  %1485 = vmatprep.subr.mxu0 %v563_v39  ;;  %v415_v37 = vld [vmem:[%s18404_s1 + $0xb68] sm:$0xff]  ;;  %v134_v38 = vld [vmem:[%s18404_s1 + $0x2a0] sm:$0xff] }
  0xc4   :  { %1560 = vmatprep.subr.mxu1 %v863_v40  ;;  %1486 = vmatpush2.msra.mxu0 %v562_v41  ;;  %v414_v39 = vld [vmem:[%s18404_s1 + $0xb60] sm:$0xff]  ;;  %v125_v40 = vld [vmem:[%s18404_s1 + $0x258] sm:$0xff] }
  0xc5   :  { %1561 = vmatpush2.msra.mxu1 %v862_v43  ;;  %1487 = vmatprep.subr.mxu0 %v553_v44  ;;  %v405_v41 = vld [vmem:[%s18404_s1 + $0xb18] sm:$0xff]  ;;  %v124_v43 = vld [vmem:[%s18404_s1 + $0x250] sm:$0xff] }
  0xc6   :  { %1562 = vmatprep.subr.mxu1 %v853_v45  ;;  %1488 = vmatpush2.msra.mxu0 %v552_v46  ;;  %v404_v44 = vld [vmem:[%s18404_s1 + $0xb10] sm:$0xff]  ;;  %v115_v45 = vld [vmem:[%s18404_s1 + $0x208] sm:$0xff] }
  0xc7   :  { %1563 = vmatpush2.msra.mxu1 %v852_v47  ;;  %1489 = vmatprep.subr.mxu0 %v543_v48  ;;  %v395_v46 = vld [vmem:[%s18404_s1 + $0xac8] sm:$0xff]  ;;  %v114_v47 = vld [vmem:[%s18404_s1 + $0x200] sm:$0xff] }
  0xc8   :  { %1564 = vmatprep.mubr.f32.mxu1 %v10500_v24  ;;  %1713 = vmatprep.subr.mxu1 %v525_v49  ;;  %v394_v48 = vld [vmem:[%s18404_s1 + $0xac0] sm:$0xff]  ;;  %v105_v49 = vld [vmem:[%s18404_s1 + $0x1b8] sm:$0xff] }
  0xc9   :  { %1490 = vmatpush2.msra.mxu0 %v542_v50  ;;  %1565 = vmatmul.mubr.f32.vlgmr.msra.gmra.mxu1 %v10472_v15  ;;  %v385_v50 = vld [vmem:[%s18404_s1 + $0xa78] sm:$0xff] }
  0xca   :  { %1491 = vmatprep.subr.mxu0 %v533_v51  ;;  %1714 = vmatpush1.msra.mxu1 %v524_v53  ;;  %v104_v51 = vld [vmem:[%s18404_s1 + $0x1b0] sm:$0xff] }
  0xcb   :  { %1492 = vmatpush2.msra.mxu0 %v532_v54  ;;  %1715 = vmatprep.subr.mxu1 %v515_v55  ;;  %v384_v53 = vld [vmem:[%s18404_s1 + $0xa70] sm:$0xff]  ;;  %v95_v54 = vld [vmem:[%s18404_s1 + $0x168] sm:$0xff] }
  0xcc   :  { %1493 = vmatprep.mubr.f32.mxu0 %v10105_v10  ;;  %1716 = vmatpush1.msra.mxu1 %v514_v56  ;;  %v375_v55 = vld [vmem:[%s18404_s1 + $0xa28] sm:$0xff]  ;;  %v94_v56 = vld [vmem:[%s18404_s1 + $0x160] sm:$0xff] }
  0xcd   :  { %1494 = vmatmul.mubr.f32.vlgmr.msra.gmra.mxu0 %v10076_v1  ;;  %1599 = vmatprep.subr.mxu0 %v1023_v57  ;;  %v374_v57 = vld [vmem:[%s18404_s1 + $0xa20] sm:$0xff] }
  0xce   :  { %1717 = vmatprep.subr.mxu1 %v505_v58  ;;  %1600 = vmatpush1.msra.mxu0 %v1022_v59  ;;  %v85_v58 = vld [vmem:[%s18404_s1 + $0x118] sm:$0xff] }
  0xcf   :  { %1718 = vmatpush1.msra.mxu1 %v504_v60  ;;  %1601 = vmatprep.subr.mxu0 %v1013_v61  ;;  %v685_v59 = vld [vmem:[%s18404_s1 + $0x13d8] sm:$0xff]  ;;  %v84_v60 = vld [vmem:[%s18404_s1 + $0x110] sm:$0xff] }
  0xd0   :  { %1719 = vmatprep.subr.mxu1 %v495_v63  ;;  %1602 = vmatpush1.msra.mxu0 %v1012_v0  ;;  %v684_v61 = vld [vmem:[%s18404_s1 + $0x13d0] sm:$0xff]  ;;  %v75_v63 = vld [vmem:[%s18404_s1 + $0xc8] sm:$0xff] }
  0xd1   :  { %1635 = vmatprep.mubr.f32.mxu0 %v18418_v52  ;;  %1720 = vmatpush1.msra.mxu1 %v494_v2  ;;  %v675_v0 = vld [vmem:[%s18404_s1 + $0x1388] sm:$0xff] }
  0xd2   :  { %8703 = vmatmul.mubr.msk.f32.vlgmr.msra.gmra.mxu0 %vm1071_vm0, %v10533_v35  ;;  %1642 = vmatprep.subr.mxu0 %v205_v3 }
  0xd3   :  { %1721 = vmatprep.subr.mxu1 %v485_v4  ;;  %1643 = vmatpush1.msra.mxu0 %v204_v5 }
  0xd4   :  { %1722 = vmatpush1.msra.mxu1 %v484_v6  ;;  %1644 = vmatprep.subr.mxu0 %v195_v7 }
  0xd5   :  { %1723 = vmatprep.subr.mxu1 %v475_v9  ;;  %1645 = vmatpush1.msra.mxu0 %v194_v11 }
  0xd6   :  { %1724 = vmatpush1.msra.mxu1 %v474_v12  ;;  %1646 = vmatprep.subr.mxu0 %v185_v13 }
  0xd7   :  { %1725 = vmatprep.subr.mxu1 %v465_v14  ;;  %1647 = vmatpush1.msra.mxu0 %v184_v16 }
  0xd8   :  { %1726 = vmatpush1.msra.mxu1 %v464_v17  ;;  %1648 = vmatprep.subr.mxu0 %v175_v18 }
  0xd9   :  { %1727 = vmatprep.subr.mxu1 %v455_v19  ;;  %1649 = vmatpush1.msra.mxu0 %v174_v20 }
  0xda   :  { %1728 = vmatpush1.msra.mxu1 %v454_v21  ;;  %1650 = vmatprep.subr.mxu0 %v165_v22 }
  0xdb   :  { %1729 = vmatprep.subr.mxu1 %v445_v23  ;;  %1651 = vmatpush1.msra.mxu0 %v164_v25 }
  0xdc   :  { %1730 = vmatpush1.msra.mxu1 %v444_v26  ;;  %1652 = vmatprep.subr.mxu0 %v155_v27 }
  0xdd   :  { %1731 = vmatprep.subr.mxu1 %v435_v28  ;;  %1653 = vmatpush1.msra.mxu0 %v154_v29 }
  0xde   :  { %1732 = vmatpush1.msra.mxu1 %v434_v30  ;;  %1654 = vmatprep.subr.mxu0 %v145_v31 }
  0xdf   :  { %1733 = vmatprep.subr.mxu1 %v425_v32  ;;  %1655 = vmatpush1.msra.mxu0 %v144_v33 }
  0xe0   :  { %1734 = vmatpush1.msra.mxu1 %v424_v34  ;;  %1656 = vmatprep.subr.mxu0 %v135_v36 }
  0xe1   :  { %1735 = vmatprep.subr.mxu1 %v415_v37  ;;  %1657 = vmatpush1.msra.mxu0 %v134_v38 }
  0xe2   :  { %1736 = vmatpush1.msra.mxu1 %v414_v39  ;;  %1658 = vmatprep.subr.mxu0 %v125_v40 }
  0xe3   :  { %1737 = vmatprep.subr.mxu1 %v405_v41  ;;  %1659 = vmatpush1.msra.mxu0 %v124_v43 }
  0xe4   :  { %1738 = vmatpush1.msra.mxu1 %v404_v44  ;;  %1660 = vmatprep.subr.mxu0 %v115_v45 }
  0xe5   :  { %1739 = vmatprep.subr.mxu1 %v395_v46  ;;  %1661 = vmatpush1.msra.mxu0 %v114_v47 }
  0xe6   :  { %1740 = vmatpush1.msra.mxu1 %v394_v48  ;;  %1662 = vmatprep.subr.mxu0 %v105_v49 }
  0xe7   :  { %1741 = vmatprep.subr.mxu1 %v385_v50  ;;  %1663 = vmatpush1.msra.mxu0 %v104_v51 }
  0xe8   :  { %1742 = vmatpush1.msra.mxu1 %v384_v53  ;;  %1664 = vmatprep.subr.mxu0 %v95_v54 }
  0xe9   :  { %1743 = vmatprep.subr.mxu1 %v375_v55  ;;  %1665 = vmatpush1.msra.mxu0 %v94_v56 }
  0xea   :  { %1744 = vmatpush1.msra.mxu1 %v374_v57 }
  0xeb   :  { %21 = vsyncpa [#allocation5], 0  ;;  %1666 = vmatprep.subr.mxu0 %v85_v58  ;;  %1745 = vmatprep.subr.mxu1 %v685_v59  ;;  %v74_v2 = vld [vmem:[%s18404_s1 + $0xc0] sm:$0xff]  ;;  %v65_v4 = vld [vmem:[%s18404_s1 + $0x78] sm:$0xff]  ;;  %vm2653_vm1 = vcmask 1041408   ;;  %vm2717_vm2 = vcmask 189440  }
  0xec   :  { %v674_v3 = vld [vmem:[%s18404_s1 + $0x1380] sm:$0xff]  ;;  %1667 = vmatpush1.msra.mxu0 %v84_v60  ;;  %1746 = vmatpush2.msra.mxu1 %v684_v61  ;;  %v665_v5 = vld [vmem:[%s18404_s1 + $0x1338] sm:$0xff]  ;;  %v64_v6 = vld [vmem:[%s18404_s1 + $0x70] sm:$0xff]  ;;  %vm2805_vm3 = vcmask 195584   ;;  %vm3525_vm4 = vcmask 1045504   ;;  %vm3521_vm5 = vcmask 48128  }
  0xed   :  { %1668 = vmatprep.subr.mxu0 %v75_v63  ;;  %1747 = vmatprep.subr.mxu1 %v675_v0  ;;  %v664_v7 = vld [vmem:[%s18404_s1 + $0x1330] sm:$0xff]  ;;  %v55_v9 = vld [vmem:[%s18404_s1 + $0x28] sm:$0xff]  ;;  %v54_v12 = vld [vmem:[%s18404_s1 + $0x20] sm:$0xff]  ;;  %vm9626_vm6 = vmmov 0   ;;  %vm6982_vm7 = vcmask 123904   ;;  %vm8658_vm8 = vcmask 74752  }
  0xee   :  { %1669 = vmatpush1.msra.mxu0 %v74_v2  ;;  %1748 = vmatpush2.msra.mxu1 %v674_v3  ;;  %v655_v11 = vld [vmem:[%s18404_s1 + $0x12e8] sm:$0xff]  ;;  %v654_v13 = vld [vmem:[%s18404_s1 + $0x12e0] sm:$0xff]  ;;  %v365_v14 = vld [vmem:[%s18404_s1 + $0x9d8] sm:$0xff] }
  0xef   :  { %1670 = vmatprep.subr.mxu0 %v65_v4  ;;  %1749 = vmatprep.subr.mxu1 %v665_v5  ;;  %v645_v16 = vld [vmem:[%s18404_s1 + $0x1298] sm:$0xff]  ;;  %v364_v17 = vld [vmem:[%s18404_s1 + $0x9d0] sm:$0xff]  ;;  %v355_v19 = vld [vmem:[%s18404_s1 + $0x988] sm:$0xff] }
  0xf0   :  { %1671 = vmatpush1.msra.mxu0 %v64_v6  ;;  %1750 = vmatpush2.msra.mxu1 %v664_v7  ;;  %v644_v18 = vld [vmem:[%s18404_s1 + $0x1290] sm:$0xff]  ;;  %v635_v20 = vld [vmem:[%s18404_s1 + $0x1248] sm:$0xff]  ;;  %v354_v21 = vld [vmem:[%s18404_s1 + $0x980] sm:$0xff] }
  0xf1   :  { %1672 = vmatprep.subr.mxu0 %v55_v9  ;;  %1751 = vmatprep.subr.mxu1 %v655_v11  ;;  %v634_v22 = vld [vmem:[%s18404_s1 + $0x1240] sm:$0xff]  ;;  %v345_v23 = vld [vmem:[%s18404_s1 + $0x938] sm:$0xff]  ;;  %v344_v26 = vld [vmem:[%s18404_s1 + $0x930] sm:$0xff] }
  0xf2   :  { %1673 = vmatpush1.msra.mxu0 %v54_v12  ;;  %1752 = vmatpush2.msra.mxu1 %v654_v13  ;;  %v625_v25 = vld [vmem:[%s18404_s1 + $0x11f8] sm:$0xff]  ;;  %v624_v27 = vld [vmem:[%s18404_s1 + $0x11f0] sm:$0xff]  ;;  %v335_v28 = vld [vmem:[%s18404_s1 + $0x8e8] sm:$0xff] }
  0xf3   :  { %1674 = vmatprep.subr.mxu0 %v365_v14  ;;  %1753 = vmatprep.subr.mxu1 %v645_v16  ;;  %v615_v29 = vld [vmem:[%s18404_s1 + $0x11a8] sm:$0xff]  ;;  %v334_v30 = vld [vmem:[%s18404_s1 + $0x8e0] sm:$0xff]  ;;  %v325_v32 = vld [vmem:[%s18404_s1 + $0x898] sm:$0xff] }
  0xf4   :  { %1675 = vmatpush2.msra.mxu0 %v364_v17  ;;  %1754 = vmatpush2.msra.mxu1 %v644_v18  ;;  %v614_v31 = vld [vmem:[%s18404_s1 + $0x11a0] sm:$0xff]  ;;  %v605_v33 = vld [vmem:[%s18404_s1 + $0x1158] sm:$0xff]  ;;  %v324_v34 = vld [vmem:[%s18404_s1 + $0x890] sm:$0xff] }
  0xf5   :  { %1676 = vmatprep.subr.mxu0 %v355_v19  ;;  %1755 = vmatprep.subr.mxu1 %v635_v20  ;;  %v604_v36 = vld [vmem:[%s18404_s1 + $0x1150] sm:$0xff]  ;;  %v315_v37 = vld [vmem:[%s18404_s1 + $0x848] sm:$0xff]  ;;  %v314_v39 = vld [vmem:[%s18404_s1 + $0x840] sm:$0xff] }
  0xf6   :  { %1677 = vmatpush2.msra.mxu0 %v354_v21  ;;  %1756 = vmatpush2.msra.mxu1 %v634_v22  ;;  %v595_v38 = vld [vmem:[%s18404_s1 + $0x1108] sm:$0xff]  ;;  %v594_v40 = vld [vmem:[%s18404_s1 + $0x1100] sm:$0xff]  ;;  %v305_v41 = vld [vmem:[%s18404_s1 + $0x7f8] sm:$0xff] }
  0xf7   :  { %1678 = vmatprep.subr.mxu0 %v345_v23  ;;  %1757 = vmatprep.subr.mxu1 %v625_v25  ;;  %v585_v43 = vld [vmem:[%s18404_s1 + $0x10b8] sm:$0xff]  ;;  %v304_v44 = vld [vmem:[%s18404_s1 + $0x7f0] sm:$0xff]  ;;  %v295_v46 = vld [vmem:[%s18404_s1 + $0x7a8] sm:$0xff] }
  0xf8   :  { %1679 = vmatpush2.msra.mxu0 %v344_v26  ;;  %1758 = vmatpush2.msra.mxu1 %v624_v27  ;;  %v584_v45 = vld [vmem:[%s18404_s1 + $0x10b0] sm:$0xff]  ;;  %v575_v47 = vld [vmem:[%s18404_s1 + $0x1068] sm:$0xff]  ;;  %v294_v48 = vld [vmem:[%s18404_s1 + $0x7a0] sm:$0xff] }
  0xf9   :  { %1680 = vmatprep.subr.mxu0 %v335_v28  ;;  %1759 = vmatprep.subr.mxu1 %v615_v29  ;;  %v574_v49 = vld [vmem:[%s18404_s1 + $0x1060] sm:$0xff]  ;;  %v285_v50 = vld [vmem:[%s18404_s1 + $0x758] sm:$0xff]  ;;  %v284_v53 = vld [vmem:[%s18404_s1 + $0x750] sm:$0xff] }
  0xfa   :  { %1681 = vmatpush2.msra.mxu0 %v334_v30  ;;  %1760 = vmatpush2.msra.mxu1 %v614_v31  ;;  %v565_v51 = vld [vmem:[%s18404_s1 + $0x1018] sm:$0xff]  ;;  %v564_v54 = vld [vmem:[%s18404_s1 + $0x1010] sm:$0xff]  ;;  %v275_v55 = vld [vmem:[%s18404_s1 + $0x708] sm:$0xff] }
  0xfb   :  { %1682 = vmatprep.subr.mxu0 %v325_v32  ;;  %1761 = vmatprep.subr.mxu1 %v605_v33  ;;  %v555_v56 = vld [vmem:[%s18404_s1 + $0xfc8] sm:$0xff]  ;;  %v274_v57 = vld [vmem:[%s18404_s1 + $0x700] sm:$0xff]  ;;  %v265_v59 = vld [vmem:[%s18404_s1 + $0x6b8] sm:$0xff] }
  0xfc   :  { %1683 = vmatpush2.msra.mxu0 %v324_v34  ;;  %1762 = vmatpush2.msra.mxu1 %v604_v36  ;;  %v554_v58 = vld [vmem:[%s18404_s1 + $0xfc0] sm:$0xff]  ;;  %v545_v60 = vld [vmem:[%s18404_s1 + $0xf78] sm:$0xff]  ;;  %v264_v61 = vld [vmem:[%s18404_s1 + $0x6b0] sm:$0xff] }
  0xfd   :  { %1684 = vmatprep.subr.mxu0 %v315_v37  ;;  %1763 = vmatprep.subr.mxu1 %v595_v38  ;;  %v544_v63 = vld [vmem:[%s18404_s1 + $0xf70] sm:$0xff]  ;;  %v255_v0 = vld [vmem:[%s18404_s1 + $0x668] sm:$0xff]  ;;  %v254_v3 = vld [vmem:[%s18404_s1 + $0x660] sm:$0xff] }
  0xfe   :  { %1685 = vmatpush2.msra.mxu0 %v314_v39  ;;  %1764 = vmatpush2.msra.mxu1 %v594_v40  ;;  %v535_v2 = vld [vmem:[%s18404_s1 + $0xf28] sm:$0xff]  ;;  %v534_v4 = vld [vmem:[%s18404_s1 + $0xf20] sm:$0xff]  ;;  %v245_v5 = vld [vmem:[%s18404_s1 + $0x618] sm:$0xff] }
  0xff   :  { %1686 = vmatprep.subr.mxu0 %v305_v41  ;;  %1765 = vmatprep.subr.mxu1 %v585_v43  ;;  %v207_v6 = vld [vmem:[%s18404_s1 + $0x4e8] sm:$0xff]  ;;  %v244_v7 = vld [vmem:[%s18404_s1 + $0x610] sm:$0xff]  ;;  %v206_v11 = vld [vmem:[%s18404_s1 + $0x4e0] sm:$0xff] }
 0x100   :  { %1687 = vmatpush2.msra.mxu0 %v304_v44  ;;  %1766 = vmatpush2.msra.mxu1 %v584_v45  ;;  %v235_v9 = vld [vmem:[%s18404_s1 + $0x5c8] sm:$0xff]  ;;  %v234_v12 = vld [vmem:[%s18404_s1 + $0x5c0] sm:$0xff]  ;;  %v197_v13 = vld [vmem:[%s18404_s1 + $0x498] sm:$0xff] }
 0x101   :  { %1688 = vmatprep.subr.mxu0 %v295_v46  ;;  %1767 = vmatprep.subr.mxu1 %v575_v47  ;;  %v225_v14 = vld [vmem:[%s18404_s1 + $0x578] sm:$0xff]  ;;  %v196_v16 = vld [vmem:[%s18404_s1 + $0x490] sm:$0xff]  ;;  %v187_v18 = vld [vmem:[%s18404_s1 + $0x448] sm:$0xff] }
 0x102   :  { %1689 = vmatpush2.msra.mxu0 %v294_v48  ;;  %1768 = vmatpush2.msra.mxu1 %v574_v49  ;;  %v224_v17 = vld [vmem:[%s18404_s1 + $0x570] sm:$0xff]  ;;  %v215_v19 = vld [vmem:[%s18404_s1 + $0x528] sm:$0xff]  ;;  %v186_v20 = vld [vmem:[%s18404_s1 + $0x440] sm:$0xff] }
 0x103   :  { %1690 = vmatprep.subr.mxu0 %v285_v50  ;;  %1769 = vmatprep.subr.mxu1 %v565_v51  ;;  %v214_v21 = vld [vmem:[%s18404_s1 + $0x520] sm:$0xff]  ;;  %v177_v22 = vld [vmem:[%s18404_s1 + $0x3f8] sm:$0xff]  ;;  %v176_v23 = vld [vmem:[%s18404_s1 + $0x3f0] sm:$0xff] }
 0x104   :  { %1691 = vmatpush2.msra.mxu0 %v284_v53  ;;  %1770 = vmatpush2.msra.mxu1 %v564_v54  ;;  %v845_v25 = vld [vmem:[%s18404_s1 + $0x18d8] sm:$0xff]  ;;  %v167_v26 = vld [vmem:[%s18404_s1 + $0x3a8] sm:$0xff]  ;;  %v844_v27 = vld [vmem:[%s18404_s1 + $0x18d0] sm:$0xff] }
 0x105   :  { %1692 = vmatprep.subr.mxu0 %v275_v55  ;;  %1771 = vmatprep.subr.mxu1 %v555_v56  ;;  %v166_v28 = vld [vmem:[%s18404_s1 + $0x3a0] sm:$0xff]  ;;  %v835_v29 = vld [vmem:[%s18404_s1 + $0x1888] sm:$0xff]  ;;  %v157_v30 = vld [vmem:[%s18404_s1 + $0x358] sm:$0xff] }
 0x106   :  { %1693 = vmatpush2.msra.mxu0 %v274_v57  ;;  %1772 = vmatpush2.msra.mxu1 %v554_v58  ;;  %v834_v31 = vld [vmem:[%s18404_s1 + $0x1880] sm:$0xff]  ;;  %v156_v32 = vld [vmem:[%s18404_s1 + $0x350] sm:$0xff]  ;;  %v825_v33 = vld [vmem:[%s18404_s1 + $0x1838] sm:$0xff] }
 0x107   :  { %1694 = vmatprep.subr.mxu0 %v265_v59  ;;  %1773 = vmatprep.subr.mxu1 %v545_v60  ;;  %v147_v34 = vld [vmem:[%s18404_s1 + $0x308] sm:$0xff]  ;;  %v824_v36 = vld [vmem:[%s18404_s1 + $0x1830] sm:$0xff]  ;;  %v146_v37 = vld [vmem:[%s18404_s1 + $0x300] sm:$0xff] }
 0x108   :  { %1695 = vmatpush2.msra.mxu0 %v264_v61  ;;  %1774 = vmatpush2.msra.mxu1 %v544_v63  ;;  %v815_v38 = vld [vmem:[%s18404_s1 + $0x17e8] sm:$0xff]  ;;  %v137_v39 = vld [vmem:[%s18404_s1 + $0x2b8] sm:$0xff]  ;;  %v814_v40 = vld [vmem:[%s18404_s1 + $0x17e0] sm:$0xff] }
 0x109   :  { %1696 = vmatprep.subr.mxu0 %v255_v0  ;;  %1775 = vmatprep.subr.mxu1 %v535_v2  ;;  %v136_v41 = vld [vmem:[%s18404_s1 + $0x2b0] sm:$0xff]  ;;  %v805_v43 = vld [vmem:[%s18404_s1 + $0x1798] sm:$0xff]  ;;  %v127_v44 = vld [vmem:[%s18404_s1 + $0x268] sm:$0xff] }
 0x10a   :  { %1697 = vmatpush2.msra.mxu0 %v254_v3  ;;  %1776 = vmatpush2.msra.mxu1 %v534_v4  ;;  %v804_v45 = vld [vmem:[%s18404_s1 + $0x1790] sm:$0xff]  ;;  %v126_v46 = vld [vmem:[%s18404_s1 + $0x260] sm:$0xff]  ;;  %v795_v47 = vld [vmem:[%s18404_s1 + $0x1748] sm:$0xff] }
 0x10b   :  { %1698 = vmatprep.subr.mxu0 %v245_v5  ;;  %1777 = vmatprep.mubr.f32.mxu1 %v10105_v10  ;;  %v117_v48 = vld [vmem:[%s18404_s1 + $0x218] sm:$0xff]  ;;  %v794_v49 = vld [vmem:[%s18404_s1 + $0x1740] sm:$0xff]  ;;  %v116_v50 = vld [vmem:[%s18404_s1 + $0x210] sm:$0xff] }
 0x10c   :  { %1926 = vmatprep.subr.mxu1 %v207_v6  ;;  %1699 = vmatpush2.msra.mxu0 %v244_v7  ;;  %v785_v51 = vld [vmem:[%s18404_s1 + $0x16f8] sm:$0xff]  ;;  %v107_v53 = vld [vmem:[%s18404_s1 + $0x1c8] sm:$0xff]  ;;  %v784_v54 = vld [vmem:[%s18404_s1 + $0x16f0] sm:$0xff] }
 0x10d   :  { %1778 = vmatmul.mubr.f32.vlgmr.msra.gmra.mxu1 %v10076_v1  ;;  %1700 = vmatprep.subr.mxu0 %v235_v9  ;;  %v106_v55 = vld [vmem:[%s18404_s1 + $0x1c0] sm:$0xff]  ;;  %v775_v56 = vld [vmem:[%s18404_s1 + $0x16a8] sm:$0xff]  ;;  %v97_v57 = vld [vmem:[%s18404_s1 + $0x178] sm:$0xff] }
 0x10e   :  { %1927 = vmatpush1.msra.mxu1 %v206_v11  ;;  %1701 = vmatpush2.msra.mxu0 %v234_v12  ;;  %v774_v58 = vld [vmem:[%s18404_s1 + $0x16a0] sm:$0xff]  ;;  %v96_v59 = vld [vmem:[%s18404_s1 + $0x170] sm:$0xff]  ;;  %v765_v60 = vld [vmem:[%s18404_s1 + $0x1658] sm:$0xff] }
 0x10f   :  { %1928 = vmatprep.subr.mxu1 %v197_v13  ;;  %1702 = vmatprep.subr.mxu0 %v225_v14  ;;  %v87_v61 = vld [vmem:[%s18404_s1 + $0x128] sm:$0xff]  ;;  %v764_v63 = vld [vmem:[%s18404_s1 + $0x1650] sm:$0xff]  ;;  %v86_v0 = vld [vmem:[%s18404_s1 + $0x120] sm:$0xff] }
 0x110   :  { %1929 = vmatpush1.msra.mxu1 %v196_v16  ;;  %1703 = vmatpush2.msra.mxu0 %v224_v17  ;;  %v755_v2 = vld [vmem:[%s18404_s1 + $0x1608] sm:$0xff]  ;;  %v77_v3 = vld [vmem:[%s18404_s1 + $0xd8] sm:$0xff]  ;;  %v754_v4 = vld [vmem:[%s18404_s1 + $0x1600] sm:$0xff] }
 0x111   :  { %1930 = vmatprep.subr.mxu1 %v187_v18  ;;  %1704 = vmatprep.subr.mxu0 %v215_v19  ;;  %v76_v5 = vld [vmem:[%s18404_s1 + $0xd0] sm:$0xff]  ;;  %v745_v6 = vld [vmem:[%s18404_s1 + $0x15b8] sm:$0xff]  ;;  %v67_v7 = vld [vmem:[%s18404_s1 + $0x88] sm:$0xff] }
 0x112   :  { %1931 = vmatpush1.msra.mxu1 %v186_v20  ;;  %1705 = vmatpush2.msra.mxu0 %v214_v21  ;;  %v744_v9 = vld [vmem:[%s18404_s1 + $0x15b0] sm:$0xff]  ;;  %v66_v11 = vld [vmem:[%s18404_s1 + $0x80] sm:$0xff]  ;;  %v735_v12 = vld [vmem:[%s18404_s1 + $0x1568] sm:$0xff] }
 0x113   :  { %1932 = vmatprep.subr.mxu1 %v177_v22  ;;  %1706 = vmatprep.mubr.f32.mxu0 %v10098_v8  ;;  %v57_v13 = vld [vmem:[%s18404_s1 + $0x38] sm:$0xff]  ;;  %v734_v14 = vld [vmem:[%s18404_s1 + $0x1560] sm:$0xff]  ;;  %v56_v16 = vld [vmem:[%s18404_s1 + $0x30] sm:$0xff] }
 0x114   :  { %1933 = vmatpush1.msra.mxu1 %v176_v23  ;;  %1707 = vmatmul.mubr.f32.vlgmr.msra.gmra.mxu0 %v10067_v62  ;;  %v725_v17 = vld [vmem:[%s18404_s1 + $0x1518] sm:$0xff]  ;;  %v367_v18 = vld [vmem:[%s18404_s1 + $0x9e8] sm:$0xff]  ;;  %v724_v19 = vld [vmem:[%s18404_s1 + $0x1510] sm:$0xff] }
 0x115   :  { %1784 = vmatprep.subr.mxu0 %v845_v25  ;;  %1934 = vmatprep.subr.mxu1 %v167_v26  ;;  %v366_v20 = vld [vmem:[%s18404_s1 + $0x9e0] sm:$0xff]  ;;  %v715_v21 = vld [vmem:[%s18404_s1 + $0x14c8] sm:$0xff]  ;;  %v357_v22 = vld [vmem:[%s18404_s1 + $0x998] sm:$0xff] }
 0x116   :  { %1785 = vmatpush1.msra.mxu0 %v844_v27  ;;  %1935 = vmatpush1.msra.mxu1 %v166_v28  ;;  %v714_v23 = vld [vmem:[%s18404_s1 + $0x14c0] sm:$0xff]  ;;  %v356_v25 = vld [vmem:[%s18404_s1 + $0x990] sm:$0xff]  ;;  %v705_v26 = vld [vmem:[%s18404_s1 + $0x1478] sm:$0xff] }
 0x117   :  { %1786 = vmatprep.subr.mxu0 %v835_v29  ;;  %1936 = vmatprep.subr.mxu1 %v157_v30  ;;  %v347_v27 = vld [vmem:[%s18404_s1 + $0x948] sm:$0xff]  ;;  %v704_v28 = vld [vmem:[%s18404_s1 + $0x1470] sm:$0xff]  ;;  %v346_v29 = vld [vmem:[%s18404_s1 + $0x940] sm:$0xff] }
 0x118   :  { %1787 = vmatpush1.msra.mxu0 %v834_v31  ;;  %1937 = vmatpush1.msra.mxu1 %v156_v32  ;;  %v695_v30 = vld [vmem:[%s18404_s1 + $0x1428] sm:$0xff]  ;;  %v337_v31 = vld [vmem:[%s18404_s1 + $0x8f8] sm:$0xff]  ;;  %v694_v32 = vld [vmem:[%s18404_s1 + $0x1420] sm:$0xff] }
 0x119   :  { %1788 = vmatprep.subr.mxu0 %v825_v33  ;;  %1938 = vmatprep.subr.mxu1 %v147_v34  ;;  %v336_v33 = vld [vmem:[%s18404_s1 + $0x8f0] sm:$0xff]  ;;  %v1005_v34 = vld [vmem:[%s18404_s1 + $0x1dd8] sm:$0xff]  ;;  %v879_v42 = vld [vmem:[%s18404_s1 + $0x19e8] sm:$0xff] }
 0x11a   :  { %1789 = vmatpush1.msra.mxu0 %v824_v36  ;;  %1939 = vmatpush1.msra.mxu1 %v146_v37  ;;  %v327_v36 = vld [vmem:[%s18404_s1 + $0x8a8] sm:$0xff]  ;;  %v1004_v37 = vld [vmem:[%s18404_s1 + $0x1dd0] sm:$0xff] }
 0x11b   :  { %1790 = vmatprep.subr.mxu0 %v815_v38  ;;  %1940 = vmatprep.subr.mxu1 %v137_v39  ;;  %v326_v38 = vld [vmem:[%s18404_s1 + $0x8a0] sm:$0xff]  ;;  %v995_v39 = vld [vmem:[%s18404_s1 + $0x1d88] sm:$0xff] }
 0x11c   :  { %1791 = vmatpush1.msra.mxu0 %v814_v40  ;;  %1941 = vmatpush1.msra.mxu1 %v136_v41  ;;  %v317_v40 = vld [vmem:[%s18404_s1 + $0x858] sm:$0xff]  ;;  %v994_v41 = vld [vmem:[%s18404_s1 + $0x1d80] sm:$0xff] }
 0x11d   :  { %1792 = vmatprep.subr.mxu0 %v805_v43  ;;  %1942 = vmatprep.subr.mxu1 %v127_v44  ;;  %v316_v43 = vld [vmem:[%s18404_s1 + $0x850] sm:$0xff]  ;;  %v985_v44 = vld [vmem:[%s18404_s1 + $0x1d38] sm:$0xff] }
 0x11e   :  { %1793 = vmatpush1.msra.mxu0 %v804_v45  ;;  %1943 = vmatpush1.msra.mxu1 %v126_v46  ;;  %v307_v45 = vld [vmem:[%s18404_s1 + $0x808] sm:$0xff]  ;;  %v984_v46 = vld [vmem:[%s18404_s1 + $0x1d30] sm:$0xff] }
 0x11f   :  { %1794 = vmatprep.subr.mxu0 %v795_v47  ;;  %1944 = vmatprep.subr.mxu1 %v117_v48  ;;  %v306_v47 = vld [vmem:[%s18404_s1 + $0x800] sm:$0xff]  ;;  %v975_v48 = vld [vmem:[%s18404_s1 + $0x1ce8] sm:$0xff] }
 0x120   :  { %1795 = vmatpush1.msra.mxu0 %v794_v49  ;;  %1945 = vmatpush1.msra.mxu1 %v116_v50  ;;  %v297_v49 = vld [vmem:[%s18404_s1 + $0x7b8] sm:$0xff]  ;;  %v974_v50 = vld [vmem:[%s18404_s1 + $0x1ce0] sm:$0xff] }
 0x121   :  { %1796 = vmatprep.subr.mxu0 %v785_v51  ;;  %1946 = vmatprep.subr.mxu1 %v107_v53  ;;  %v296_v51 = vld [vmem:[%s18404_s1 + $0x7b0] sm:$0xff]  ;;  %v965_v53 = vld [vmem:[%s18404_s1 + $0x1c98] sm:$0xff] }
 0x122   :  { %1797 = vmatpush1.msra.mxu0 %v784_v54  ;;  %1947 = vmatpush1.msra.mxu1 %v106_v55  ;;  %v287_v54 = vld [vmem:[%s18404_s1 + $0x768] sm:$0xff]  ;;  %v964_v55 = vld [vmem:[%s18404_s1 + $0x1c90] sm:$0xff] }
 0x123   :  { %1798 = vmatprep.subr.mxu0 %v775_v56  ;;  %1948 = vmatprep.subr.mxu1 %v97_v57  ;;  %v286_v56 = vld [vmem:[%s18404_s1 + $0x760] sm:$0xff]  ;;  %v955_v57 = vld [vmem:[%s18404_s1 + $0x1c48] sm:$0xff] }
 0x124   :  { %1799 = vmatpush1.msra.mxu0 %v774_v58  ;;  %1949 = vmatpush1.msra.mxu1 %v96_v59  ;;  %v277_v58 = vld [vmem:[%s18404_s1 + $0x718] sm:$0xff]  ;;  %v954_v59 = vld [vmem:[%s18404_s1 + $0x1c40] sm:$0xff] }
 0x125   :  { %1800 = vmatprep.subr.mxu0 %v765_v60  ;;  %1950 = vmatprep.subr.mxu1 %v87_v61  ;;  %v276_v60 = vld [vmem:[%s18404_s1 + $0x710] sm:$0xff]  ;;  %v945_v61 = vld [vmem:[%s18404_s1 + $0x1bf8] sm:$0xff] }
 0x126   :  { %1801 = vmatpush1.msra.mxu0 %v764_v63  ;;  %1951 = vmatpush1.msra.mxu1 %v86_v0  ;;  %v267_v63 = vld [vmem:[%s18404_s1 + $0x6c8] sm:$0xff]  ;;  %v944_v0 = vld [vmem:[%s18404_s1 + $0x1bf0] sm:$0xff] }
 0x127   :  { %1802 = vmatprep.subr.mxu0 %v755_v2  ;;  %1952 = vmatprep.subr.mxu1 %v77_v3  ;;  %v266_v2 = vld [vmem:[%s18404_s1 + $0x6c0] sm:$0xff]  ;;  %v935_v3 = vld [vmem:[%s18404_s1 + $0x1ba8] sm:$0xff] }
 0x128   :  { %1803 = vmatpush1.msra.mxu0 %v754_v4  ;;  %1953 = vmatpush1.msra.mxu1 %v76_v5  ;;  %v257_v4 = vld [vmem:[%s18404_s1 + $0x678] sm:$0xff]  ;;  %v934_v5 = vld [vmem:[%s18404_s1 + $0x1ba0] sm:$0xff] }
 0x129   :  { %1804 = vmatprep.subr.mxu0 %v745_v6  ;;  %1954 = vmatprep.subr.mxu1 %v67_v7  ;;  %v256_v6 = vld [vmem:[%s18404_s1 + $0x670] sm:$0xff]  ;;  %v925_v7 = vld [vmem:[%s18404_s1 + $0x1b58] sm:$0xff] }
 0x12a   :  { %1805 = vmatpush1.msra.mxu0 %v744_v9  ;;  %1955 = vmatpush1.msra.mxu1 %v66_v11  ;;  %v247_v9 = vld [vmem:[%s18404_s1 + $0x628] sm:$0xff]  ;;  %v924_v11 = vld [vmem:[%s18404_s1 + $0x1b50] sm:$0xff] }
 0x12b   :  { %1806 = vmatprep.subr.mxu0 %v735_v12  ;;  %1956 = vmatprep.subr.mxu1 %v57_v13  ;;  %v246_v12 = vld [vmem:[%s18404_s1 + $0x620] sm:$0xff]  ;;  %v915_v13 = vld [vmem:[%s18404_s1 + $0x1b08] sm:$0xff] }
 0x12c   :  { %1807 = vmatpush1.msra.mxu0 %v734_v14  ;;  %1957 = vmatpush1.msra.mxu1 %v56_v16  ;;  %v237_v14 = vld [vmem:[%s18404_s1 + $0x5d8] sm:$0xff]  ;;  %v914_v16 = vld [vmem:[%s18404_s1 + $0x1b00] sm:$0xff] }
 0x12d   :  { %1808 = vmatprep.subr.mxu0 %v725_v17  ;;  %1958 = vmatprep.subr.mxu1 %v367_v18  ;;  %v236_v17 = vld [vmem:[%s18404_s1 + $0x5d0] sm:$0xff]  ;;  %v905_v18 = vld [vmem:[%s18404_s1 + $0x1ab8] sm:$0xff] }
 0x12e   :  { %1809 = vmatpush1.msra.mxu0 %v724_v19  ;;  %1959 = vmatpush2.msra.mxu1 %v366_v20  ;;  %v227_v19 = vld [vmem:[%s18404_s1 + $0x588] sm:$0xff]  ;;  %v904_v20 = vld [vmem:[%s18404_s1 + $0x1ab0] sm:$0xff] }
 0x12f   :  { %1810 = vmatprep.subr.mxu0 %v715_v21  ;;  %1960 = vmatprep.subr.mxu1 %v357_v22  ;;  %v226_v21 = vld [vmem:[%s18404_s1 + $0x580] sm:$0xff]  ;;  %v895_v22 = vld [vmem:[%s18404_s1 + $0x1a68] sm:$0xff] }
 0x130   :  { %1811 = vmatpush1.msra.mxu0 %v714_v23  ;;  %1961 = vmatpush2.msra.mxu1 %v356_v25  ;;  %v217_v23 = vld [vmem:[%s18404_s1 + $0x538] sm:$0xff]  ;;  %v894_v25 = vld [vmem:[%s18404_s1 + $0x1a60] sm:$0xff] }
 0x131   :  { %1812 = vmatprep.subr.mxu0 %v705_v26  ;;  %1962 = vmatprep.subr.mxu1 %v347_v27  ;;  %v216_v26 = vld [vmem:[%s18404_s1 + $0x530] sm:$0xff]  ;;  %v885_v27 = vld [vmem:[%s18404_s1 + $0x1a18] sm:$0xff] }
 0x132   :  { %1813 = vmatpush1.msra.mxu0 %v704_v28  ;;  %1963 = vmatpush2.msra.mxu1 %v346_v29  ;;  %v847_v28 = vld [vmem:[%s18404_s1 + $0x18e8] sm:$0xff]  ;;  %v884_v29 = vld [vmem:[%s18404_s1 + $0x1a10] sm:$0xff] }
 0x133   :  { %1814 = vmatprep.subr.mxu0 %v695_v30  ;;  %1964 = vmatprep.subr.mxu1 %v337_v31  ;;  %v875_v30 = vld [vmem:[%s18404_s1 + $0x19c8] sm:$0xff]  ;;  %v846_v31 = vld [vmem:[%s18404_s1 + $0x18e0] sm:$0xff] }
 0x134   :  { %1815 = vmatpush1.msra.mxu0 %v694_v32  ;;  %1965 = vmatpush2.msra.mxu1 %v336_v33  ;;  %v874_v32 = vld [vmem:[%s18404_s1 + $0x19c0] sm:$0xff]  ;;  %v837_v33 = vld [vmem:[%s18404_s1 + $0x1898] sm:$0xff] }
 0x135   :  { %1816 = vmatprep.subr.mxu0 %v1005_v34  ;;  %1966 = vmatprep.subr.mxu1 %v327_v36  ;;  %v865_v34 = vld [vmem:[%s18404_s1 + $0x1978] sm:$0xff]  ;;  %v836_v36 = vld [vmem:[%s18404_s1 + $0x1890] sm:$0xff] }
 0x136   :  { %1817 = vmatpush2.msra.mxu0 %v1004_v37  ;;  %1967 = vmatpush2.msra.mxu1 %v326_v38  ;;  %v864_v37 = vld [vmem:[%s18404_s1 + $0x1970] sm:$0xff]  ;;  %v827_v38 = vld [vmem:[%s18404_s1 + $0x1848] sm:$0xff] }
 0x137   :  { %1818 = vmatprep.subr.mxu0 %v995_v39  ;;  %1968 = vmatprep.subr.mxu1 %v317_v40  ;;  %v855_v39 = vld [vmem:[%s18404_s1 + $0x1928] sm:$0xff]  ;;  %v826_v40 = vld [vmem:[%s18404_s1 + $0x1840] sm:$0xff] }
 0x138   :  { %1819 = vmatpush2.msra.mxu0 %v994_v41  ;;  %1969 = vmatpush2.msra.mxu1 %v316_v43  ;;  %v854_v41 = vld [vmem:[%s18404_s1 + $0x1920] sm:$0xff]  ;;  %v817_v43 = vld [vmem:[%s18404_s1 + $0x17f8] sm:$0xff] }
 0x139   :  { %1820 = vmatprep.subr.mxu0 %v985_v44  ;;  %1970 = vmatprep.subr.mxu1 %v307_v45  ;;  %v816_v44 = vld [vmem:[%s18404_s1 + $0x17f0] sm:$0xff]  ;;  %v1025_v45 = vld [vmem:[%s18404_s1 + $0x1e78] sm:$0xff] }
 0x13a   :  { %1821 = vmatpush2.msra.mxu0 %v984_v46  ;;  %1971 = vmatpush2.msra.mxu1 %v306_v47  ;;  %v807_v46 = vld [vmem:[%s18404_s1 + $0x17a8] sm:$0xff]  ;;  %v1024_v47 = vld [vmem:[%s18404_s1 + $0x1e70] sm:$0xff] }
 0x13b   :  { %1822 = vmatprep.subr.mxu0 %v975_v48  ;;  %1972 = vmatprep.subr.mxu1 %v297_v49  ;;  %v806_v48 = vld [vmem:[%s18404_s1 + $0x17a0] sm:$0xff]  ;;  %v1015_v49 = vld [vmem:[%s18404_s1 + $0x1e28] sm:$0xff] }
 0x13c   :  { %1823 = vmatpush2.msra.mxu0 %v974_v50  ;;  %1973 = vmatpush2.msra.mxu1 %v296_v51  ;;  %v797_v50 = vld [vmem:[%s18404_s1 + $0x1758] sm:$0xff]  ;;  %v1014_v51 = vld [vmem:[%s18404_s1 + $0x1e20] sm:$0xff] }
 0x13d   :  { %1824 = vmatprep.subr.mxu0 %v965_v53  ;;  %1974 = vmatprep.subr.mxu1 %v287_v54  ;;  %v796_v53 = vld [vmem:[%s18404_s1 + $0x1750] sm:$0xff]  ;;  %v527_v54 = vld [vmem:[%s18404_s1 + $0xee8] sm:$0xff] }
 0x13e   :  { %1825 = vmatpush2.msra.mxu0 %v964_v55  ;;  %1975 = vmatpush2.msra.mxu1 %v286_v56  ;;  %v787_v55 = vld [vmem:[%s18404_s1 + $0x1708] sm:$0xff]  ;;  %v526_v56 = vld [vmem:[%s18404_s1 + $0xee0] sm:$0xff] }
 0x13f   :  { %1826 = vmatprep.subr.mxu0 %v955_v57  ;;  %1976 = vmatprep.subr.mxu1 %v277_v58  ;;  %v786_v57 = vld [vmem:[%s18404_s1 + $0x1700] sm:$0xff]  ;;  %v517_v58 = vld [vmem:[%s18404_s1 + $0xe98] sm:$0xff] }
 0x140   :  { %1827 = vmatpush2.msra.mxu0 %v954_v59  ;;  %1977 = vmatpush2.msra.mxu1 %v276_v60  ;;  %v777_v59 = vld [vmem:[%s18404_s1 + $0x16b8] sm:$0xff]  ;;  %v516_v60 = vld [vmem:[%s18404_s1 + $0xe90] sm:$0xff] }
 0x141   :  { %1828 = vmatprep.subr.mxu0 %v945_v61  ;;  %1978 = vmatprep.subr.mxu1 %v267_v63  ;;  %v776_v61 = vld [vmem:[%s18404_s1 + $0x16b0] sm:$0xff]  ;;  %v507_v63 = vld [vmem:[%s18404_s1 + $0xe48] sm:$0xff] }
 0x142   :  { %1829 = vmatpush2.msra.mxu0 %v944_v0  ;;  %1979 = vmatpush2.msra.mxu1 %v266_v2  ;;  %v767_v0 = vld [vmem:[%s18404_s1 + $0x1668] sm:$0xff]  ;;  %v506_v2 = vld [vmem:[%s18404_s1 + $0xe40] sm:$0xff] }
 0x143   :  { %1830 = vmatprep.subr.mxu0 %v935_v3  ;;  %1980 = vmatprep.subr.mxu1 %v257_v4  ;;  %v766_v3 = vld [vmem:[%s18404_s1 + $0x1660] sm:$0xff]  ;;  %v497_v4 = vld [vmem:[%s18404_s1 + $0xdf8] sm:$0xff] }
 0x144   :  { %1831 = vmatpush2.msra.mxu0 %v934_v5  ;;  %1981 = vmatpush2.msra.mxu1 %v256_v6  ;;  %v757_v5 = vld [vmem:[%s18404_s1 + $0x1618] sm:$0xff]  ;;  %v496_v6 = vld [vmem:[%s18404_s1 + $0xdf0] sm:$0xff] }
 0x145   :  { %1832 = vmatprep.subr.mxu0 %v925_v7  ;;  %1982 = vmatprep.subr.mxu1 %v247_v9  ;;  %v756_v7 = vld [vmem:[%s18404_s1 + $0x1610] sm:$0xff]  ;;  %v487_v9 = vld [vmem:[%s18404_s1 + $0xda8] sm:$0xff] }
 0x146   :  { %1833 = vmatpush2.msra.mxu0 %v924_v11  ;;  %1983 = vmatpush2.msra.mxu1 %v246_v12  ;;  %v747_v11 = vld [vmem:[%s18404_s1 + $0x15c8] sm:$0xff]  ;;  %v486_v12 = vld [vmem:[%s18404_s1 + $0xda0] sm:$0xff] }
 0x147   :  { %1834 = vmatprep.subr.mxu0 %v915_v13  ;;  %1984 = vmatprep.subr.mxu1 %v237_v14  ;;  %v746_v13 = vld [vmem:[%s18404_s1 + $0x15c0] sm:$0xff]  ;;  %v477_v14 = vld [vmem:[%s18404_s1 + $0xd58] sm:$0xff] }
 0x148   :  { %1835 = vmatpush2.msra.mxu0 %v914_v16  ;;  %1985 = vmatpush2.msra.mxu1 %v236_v17  ;;  %v737_v16 = vld [vmem:[%s18404_s1 + $0x1578] sm:$0xff]  ;;  %v476_v17 = vld [vmem:[%s18404_s1 + $0xd50] sm:$0xff] }
 0x149   :  { %1836 = vmatprep.subr.mxu0 %v905_v18  ;;  %1986 = vmatprep.subr.mxu1 %v227_v19  ;;  %v736_v18 = vld [vmem:[%s18404_s1 + $0x1570] sm:$0xff]  ;;  %v467_v19 = vld [vmem:[%s18404_s1 + $0xd08] sm:$0xff] }
 0x14a   :  { %1837 = vmatpush2.msra.mxu0 %v904_v20  ;;  %1987 = vmatpush2.msra.mxu1 %v226_v21  ;;  %v727_v20 = vld [vmem:[%s18404_s1 + $0x1528] sm:$0xff]  ;;  %v466_v21 = vld [vmem:[%s18404_s1 + $0xd00] sm:$0xff] }
 0x14b   :  { %1838 = vmatprep.subr.mxu0 %v895_v22  ;;  %1988 = vmatprep.subr.mxu1 %v217_v23  ;;  %v726_v22 = vld [vmem:[%s18404_s1 + $0x1520] sm:$0xff]  ;;  %v457_v23 = vld [vmem:[%s18404_s1 + $0xcb8] sm:$0xff] }
 0x14c   :  { %1839 = vmatpush2.msra.mxu0 %v894_v25  ;;  %1989 = vmatpush2.msra.mxu1 %v216_v26  ;;  %v717_v25 = vld [vmem:[%s18404_s1 + $0x14d8] sm:$0xff]  ;;  %v456_v26 = vld [vmem:[%s18404_s1 + $0xcb0] sm:$0xff] }
 0x14d   :  { %1840 = vmatprep.subr.mxu0 %v885_v27  ;;  %1990 = vmatprep.mubr.f32.mxu1 %v10098_v8  ;;  %v716_v27 = vld [vmem:[%s18404_s1 + $0x14d0] sm:$0xff] }
 0x14e   :  { %2068 = vmatprep.subr.mxu1 %v847_v28  ;;  %1841 = vmatpush2.msra.mxu0 %v884_v29  ;;  %v447_v28 = vld [vmem:[%s18404_s1 + $0xc68] sm:$0xff] }
 0x14f   :  { %1991 = vmatmul.mubr.f32.vlgmr.msra.gmra.mxu1 %v10067_v62  ;;  %1842 = vmatprep.subr.mxu0 %v875_v30  ;;  %v707_v29 = vld [vmem:[%s18404_s1 + $0x1488] sm:$0xff]  ;;  %v446_v30 = vld [vmem:[%s18404_s1 + $0xc60] sm:$0xff] }
 0x150   :  { %2069 = vmatpush1.msra.mxu1 %v846_v31  ;;  %1843 = vmatpush2.msra.mxu0 %v874_v32  ;;  %v706_v31 = vld [vmem:[%s18404_s1 + $0x1480] sm:$0xff]  ;;  %v437_v32 = vld [vmem:[%s18404_s1 + $0xc18] sm:$0xff] }
 0x151   :  { %2070 = vmatprep.subr.mxu1 %v837_v33  ;;  %1844 = vmatprep.subr.mxu0 %v865_v34  ;;  %v697_v33 = vld [vmem:[%s18404_s1 + $0x1438] sm:$0xff]  ;;  %v436_v34 = vld [vmem:[%s18404_s1 + $0xc10] sm:$0xff] }
 0x152   :  { %2071 = vmatpush1.msra.mxu1 %v836_v36  ;;  %1845 = vmatpush2.msra.mxu0 %v864_v37  ;;  %v696_v36 = vld [vmem:[%s18404_s1 + $0x1430] sm:$0xff]  ;;  %v427_v37 = vld [vmem:[%s18404_s1 + $0xbc8] sm:$0xff] }
 0x153   :  { %2072 = vmatprep.subr.mxu1 %v827_v38  ;;  %1846 = vmatprep.subr.mxu0 %v855_v39  ;;  %v1007_v38 = vld [vmem:[%s18404_s1 + $0x1de8] sm:$0xff]  ;;  %v426_v39 = vld [vmem:[%s18404_s1 + $0xbc0] sm:$0xff] }
 0x154   :  { %2073 = vmatpush1.msra.mxu1 %v826_v40  ;;  %1847 = vmatpush2.msra.mxu0 %v854_v41  ;;  %v1006_v40 = vld [vmem:[%s18404_s1 + $0x1de0] sm:$0xff]  ;;  %v417_v41 = vld [vmem:[%s18404_s1 + $0xb78] sm:$0xff] }
 0x155   :  { %2074 = vmatprep.subr.mxu1 %v817_v43  ;;  %1848 = vmatprep.mubr.f32.mxu0 %v10500_v24  ;;  %v997_v43 = vld [vmem:[%s18404_s1 + $0x1d98] sm:$0xff] }
 0x156   :  { %2075 = vmatpush1.msra.mxu1 %v816_v44  ;;  %1849 = vmatmul.mubr.f32.vlgmr.msra.gmra.mxu0 %v10472_v15  ;;  %v416_v44 = vld [vmem:[%s18404_s1 + $0xb70] sm:$0xff] }
 0x157   :  { %1883 = vmatprep.subr.mxu0 %v1025_v45  ;;  %2076 = vmatprep.subr.mxu1 %v807_v46  ;;  %v996_v45 = vld [vmem:[%s18404_s1 + $0x1d90] sm:$0xff]  ;;  %v407_v46 = vld [vmem:[%s18404_s1 + $0xb28] sm:$0xff] }
 0x158   :  { %1884 = vmatpush1.msra.mxu0 %v1024_v47  ;;  %2077 = vmatpush1.msra.mxu1 %v806_v48  ;;  %v987_v47 = vld [vmem:[%s18404_s1 + $0x1d48] sm:$0xff]  ;;  %v406_v48 = vld [vmem:[%s18404_s1 + $0xb20] sm:$0xff] }
 0x159   :  { %1885 = vmatprep.subr.mxu0 %v1015_v49  ;;  %2078 = vmatprep.subr.mxu1 %v797_v50  ;;  %v986_v49 = vld [vmem:[%s18404_s1 + $0x1d40] sm:$0xff]  ;;  %v397_v50 = vld [vmem:[%s18404_s1 + $0xad8] sm:$0xff] }
 0x15a   :  { %1886 = vmatpush1.msra.mxu0 %v1014_v51  ;;  %1919 = vmatprep.mubr.f32.mxu0 %v18418_v52  ;;  %v977_v51 = vld [vmem:[%s18404_s1 + $0x1cf8] sm:$0xff] }
 0x15b   :  { %2079 = vmatpush1.msra.mxu1 %v796_v53  ;;  %8704 = vmatmul.mubr.msk.f32.vlgmr.msra.gmra.mxu0 %vm1071_vm0, %v10533_v35  ;;  %v396_v53 = vld [vmem:[%s18404_s1 + $0xad0] sm:$0xff] }
 0x15c   :  { %1997 = vmatprep.subr.mxu0 %v527_v54  ;;  %2080 = vmatprep.subr.mxu1 %v787_v55  ;;  %v976_v54 = vld [vmem:[%s18404_s1 + $0x1cf0] sm:$0xff]  ;;  %v387_v55 = vld [vmem:[%s18404_s1 + $0xa88] sm:$0xff] }
 0x15d   :  { %1998 = vmatpush1.msra.mxu0 %v526_v56  ;;  %2081 = vmatpush1.msra.mxu1 %v786_v57  ;;  %v967_v56 = vld [vmem:[%s18404_s1 + $0x1ca8] sm:$0xff]  ;;  %v386_v57 = vld [vmem:[%s18404_s1 + $0xa80] sm:$0xff] }
 0x15e   :  { %1999 = vmatprep.subr.mxu0 %v517_v58  ;;  %2082 = vmatprep.subr.mxu1 %v777_v59  ;;  %v966_v58 = vld [vmem:[%s18404_s1 + $0x1ca0] sm:$0xff]  ;;  %v377_v59 = vld [vmem:[%s18404_s1 + $0xa38] sm:$0xff] }
 0x15f   :  { %2000 = vmatpush1.msra.mxu0 %v516_v60  ;;  %2083 = vmatpush1.msra.mxu1 %v776_v61  ;;  %v957_v60 = vld [vmem:[%s18404_s1 + $0x1c58] sm:$0xff]  ;;  %v376_v61 = vld [vmem:[%s18404_s1 + $0xa30] sm:$0xff] }
 0x160   :  { %2001 = vmatprep.subr.mxu0 %v507_v63  ;;  %2084 = vmatprep.subr.mxu1 %v767_v0  ;;  %v956_v63 = vld [vmem:[%s18404_s1 + $0x1c50] sm:$0xff]  ;;  %v687_v0 = vld [vmem:[%s18404_s1 + $0x13e8] sm:$0xff] }
 0x161   :  { %2002 = vmatpush1.msra.mxu0 %v506_v2  ;;  %2085 = vmatpush1.msra.mxu1 %v766_v3  ;;  %v947_v2 = vld [vmem:[%s18404_s1 + $0x1c08] sm:$0xff]  ;;  %v686_v3 = vld [vmem:[%s18404_s1 + $0x13e0] sm:$0xff] }
 0x162   :  { %2003 = vmatprep.subr.mxu0 %v497_v4  ;;  %2086 = vmatprep.subr.mxu1 %v757_v5  ;;  %v946_v4 = vld [vmem:[%s18404_s1 + $0x1c00] sm:$0xff]  ;;  %v677_v5 = vld [vmem:[%s18404_s1 + $0x1398] sm:$0xff] }
 0x163   :  { %2004 = vmatpush1.msra.mxu0 %v496_v6  ;;  %2087 = vmatpush1.msra.mxu1 %v756_v7  ;;  %v937_v6 = vld [vmem:[%s18404_s1 + $0x1bb8] sm:$0xff]  ;;  %v676_v7 = vld [vmem:[%s18404_s1 + $0x1390] sm:$0xff] }
 0x164   :  { %2005 = vmatprep.subr.mxu0 %v487_v9  ;;  %2088 = vmatprep.subr.mxu1 %v747_v11  ;;  %v936_v9 = vld [vmem:[%s18404_s1 + $0x1bb0] sm:$0xff]  ;;  %v667_v11 = vld [vmem:[%s18404_s1 + $0x1348] sm:$0xff] }
 0x165   :  { %2006 = vmatpush1.msra.mxu0 %v486_v12  ;;  %2089 = vmatpush1.msra.mxu1 %v746_v13  ;;  %v927_v12 = vld [vmem:[%s18404_s1 + $0x1b68] sm:$0xff]  ;;  %v666_v13 = vld [vmem:[%s18404_s1 + $0x1340] sm:$0xff] }
 0x166   :  { %2007 = vmatprep.subr.mxu0 %v477_v14  ;;  %2090 = vmatprep.subr.mxu1 %v737_v16  ;;  %v926_v14 = vld [vmem:[%s18404_s1 + $0x1b60] sm:$0xff]  ;;  %v657_v16 = vld [vmem:[%s18404_s1 + $0x12f8] sm:$0xff] }
 0x167   :  { %2008 = vmatpush1.msra.mxu0 %v476_v17  ;;  %2091 = vmatpush1.msra.mxu1 %v736_v18  ;;  %v917_v17 = vld [vmem:[%s18404_s1 + $0x1b18] sm:$0xff]  ;;  %v656_v18 = vld [vmem:[%s18404_s1 + $0x12f0] sm:$0xff] }
 0x168   :  { %2009 = vmatprep.subr.mxu0 %v467_v19  ;;  %2092 = vmatprep.subr.mxu1 %v727_v20  ;;  %v916_v19 = vld [vmem:[%s18404_s1 + $0x1b10] sm:$0xff]  ;;  %v647_v20 = vld [vmem:[%s18404_s1 + $0x12a8] sm:$0xff] }
 0x169   :  { %2010 = vmatpush1.msra.mxu0 %v466_v21  ;;  %2093 = vmatpush1.msra.mxu1 %v726_v22  ;;  %v907_v21 = vld [vmem:[%s18404_s1 + $0x1ac8] sm:$0xff]  ;;  %v646_v22 = vld [vmem:[%s18404_s1 + $0x12a0] sm:$0xff] }
 0x16a   :  { %2011 = vmatprep.subr.mxu0 %v457_v23  ;;  %2094 = vmatprep.subr.mxu1 %v717_v25  ;;  %v906_v23 = vld [vmem:[%s18404_s1 + $0x1ac0] sm:$0xff]  ;;  %v637_v25 = vld [vmem:[%s18404_s1 + $0x1258] sm:$0xff] }
 0x16b   :  { %2012 = vmatpush1.msra.mxu0 %v456_v26  ;;  %2095 = vmatpush1.msra.mxu1 %v716_v27  ;;  %v897_v26 = vld [vmem:[%s18404_s1 + $0x1a78] sm:$0xff]  ;;  %v636_v27 = vld [vmem:[%s18404_s1 + $0x1250] sm:$0xff] }
 0x16c   :  { %2013 = vmatprep.subr.mxu0 %v447_v28  ;;  %2096 = vmatprep.subr.mxu1 %v707_v29  ;;  %v896_v28 = vld [vmem:[%s18404_s1 + $0x1a70] sm:$0xff]  ;;  %v627_v29 = vld [vmem:[%s18404_s1 + $0x1208] sm:$0xff] }
 0x16d   :  { %2014 = vmatpush1.msra.mxu0 %v446_v30  ;;  %2097 = vmatpush1.msra.mxu1 %v706_v31  ;;  %v887_v30 = vld [vmem:[%s18404_s1 + $0x1a28] sm:$0xff]  ;;  %v626_v31 = vld [vmem:[%s18404_s1 + $0x1200] sm:$0xff] }
 0x16e   :  { %2015 = vmatprep.subr.mxu0 %v437_v32  ;;  %2098 = vmatprep.subr.mxu1 %v697_v33  ;;  %v886_v32 = vld [vmem:[%s18404_s1 + $0x1a20] sm:$0xff]  ;;  %v617_v33 = vld [vmem:[%s18404_s1 + $0x11b8] sm:$0xff] }
 0x16f   :  { %2016 = vmatpush1.msra.mxu0 %v436_v34  ;;  %2099 = vmatpush1.msra.mxu1 %v696_v36  ;;  %v877_v34 = vld [vmem:[%s18404_s1 + $0x19d8] sm:$0xff]  ;;  %v616_v36 = vld [vmem:[%s18404_s1 + $0x11b0] sm:$0xff] }
 0x170   :  { %2017 = vmatprep.subr.mxu0 %v427_v37  ;;  %2100 = vmatprep.subr.mxu1 %v1007_v38  ;;  %v876_v37 = vld [vmem:[%s18404_s1 + $0x19d0] sm:$0xff]  ;;  %v607_v38 = vld [vmem:[%s18404_s1 + $0x1168] sm:$0xff] }
 0x171   :  { %2018 = vmatpush1.msra.mxu0 %v426_v39  ;;  %2101 = vmatpush2.msra.mxu1 %v1006_v40  ;;  %v867_v39 = vld [vmem:[%s18404_s1 + $0x1988] sm:$0xff]  ;;  %v606_v40 = vld [vmem:[%s18404_s1 + $0x1160] sm:$0xff] }
 0x172   :  { %2019 = vmatprep.subr.mxu0 %v417_v41  ;;  %2102 = vmatprep.subr.mxu1 %v997_v43  ;;  %v866_v41 = vld [vmem:[%s18404_s1 + $0x1980] sm:$0xff]  ;;  %v597_v43 = vld [vmem:[%s18404_s1 + $0x1118] sm:$0xff] }
 0x173   :  { %2020 = vmatpush1.msra.mxu0 %v416_v44  ;;  %2103 = vmatpush2.msra.mxu1 %v996_v45  ;;  %v857_v44 = vld [vmem:[%s18404_s1 + $0x1938] sm:$0xff]  ;;  %v596_v45 = vld [vmem:[%s18404_s1 + $0x1110] sm:$0xff] }
 0x174   :  { %2021 = vmatprep.subr.mxu0 %v407_v46  ;;  %2104 = vmatprep.subr.mxu1 %v987_v47  ;;  %v856_v46 = vld [vmem:[%s18404_s1 + $0x1930] sm:$0xff]  ;;  %v587_v47 = vld [vmem:[%s18404_s1 + $0x10c8] sm:$0xff] }
 0x175   :  { %2022 = vmatpush1.msra.mxu0 %v406_v48  ;;  %2105 = vmatpush2.msra.mxu1 %v986_v49  ;;  %v529_v48 = vld [vmem:[%s18404_s1 + $0xef8] sm:$0xff]  ;;  %v586_v49 = vld [vmem:[%s18404_s1 + $0x10c0] sm:$0xff] }
 0x176   :  { %2023 = vmatprep.subr.mxu0 %v397_v50  ;;  %2106 = vmatprep.subr.mxu1 %v977_v51  ;;  %v577_v50 = vld [vmem:[%s18404_s1 + $0x1078] sm:$0xff]  ;;  %v528_v51 = vld [vmem:[%s18404_s1 + $0xef0] sm:$0xff] }
 0x177   :  { %2024 = vmatpush1.msra.mxu0 %v396_v53  ;;  %2107 = vmatpush2.msra.mxu1 %v976_v54  ;;  %v576_v53 = vld [vmem:[%s18404_s1 + $0x1070] sm:$0xff]  ;;  %v519_v54 = vld [vmem:[%s18404_s1 + $0xea8] sm:$0xff] }
 0x178   :  { %2025 = vmatprep.subr.mxu0 %v387_v55  ;;  %2108 = vmatprep.subr.mxu1 %v967_v56  ;;  %v567_v55 = vld [vmem:[%s18404_s1 + $0x1028] sm:$0xff]  ;;  %v518_v56 = vld [vmem:[%s18404_s1 + $0xea0] sm:$0xff] }
 0x179   :  { %2026 = vmatpush1.msra.mxu0 %v386_v57  ;;  %2109 = vmatpush2.msra.mxu1 %v966_v58  ;;  %v566_v57 = vld [vmem:[%s18404_s1 + $0x1020] sm:$0xff]  ;;  %v509_v58 = vld [vmem:[%s18404_s1 + $0xe58] sm:$0xff] }
 0x17a   :  { %2027 = vmatprep.subr.mxu0 %v377_v59  ;;  %2110 = vmatprep.subr.mxu1 %v957_v60  ;;  %v557_v59 = vld [vmem:[%s18404_s1 + $0xfd8] sm:$0xff]  ;;  %v508_v60 = vld [vmem:[%s18404_s1 + $0xe50] sm:$0xff] }
 0x17b   :  { %2028 = vmatpush1.msra.mxu0 %v376_v61  ;;  %2111 = vmatpush2.msra.mxu1 %v956_v63  ;;  %v556_v61 = vld [vmem:[%s18404_s1 + $0xfd0] sm:$0xff]  ;;  %v499_v63 = vld [vmem:[%s18404_s1 + $0xe08] sm:$0xff] }
 0x17c   :  { %2029 = vmatprep.subr.mxu0 %v687_v0  ;;  %2112 = vmatprep.subr.mxu1 %v947_v2  ;;  %v547_v0 = vld [vmem:[%s18404_s1 + $0xf88] sm:$0xff]  ;;  %v498_v2 = vld [vmem:[%s18404_s1 + $0xe00] sm:$0xff] }
 0x17d   :  { %2030 = vmatpush2.msra.mxu0 %v686_v3  ;;  %2113 = vmatpush2.msra.mxu1 %v946_v4  ;;  %v546_v3 = vld [vmem:[%s18404_s1 + $0xf80] sm:$0xff]  ;;  %v489_v4 = vld [vmem:[%s18404_s1 + $0xdb8] sm:$0xff] }
 0x17e   :  { %2031 = vmatprep.subr.mxu0 %v677_v5  ;;  %2114 = vmatprep.subr.mxu1 %v937_v6  ;;  %v537_v5 = vld [vmem:[%s18404_s1 + $0xf38] sm:$0xff]  ;;  %v488_v6 = vld [vmem:[%s18404_s1 + $0xdb0] sm:$0xff] }
 0x17f   :  { %2032 = vmatpush2.msra.mxu0 %v676_v7  ;;  %2115 = vmatpush2.msra.mxu1 %v936_v9  ;;  %v536_v7 = vld [vmem:[%s18404_s1 + $0xf30] sm:$0xff]  ;;  %v479_v9 = vld [vmem:[%s18404_s1 + $0xd68] sm:$0xff] }
 0x180   :  { %2033 = vmatprep.subr.mxu0 %v667_v11  ;;  %2116 = vmatprep.subr.mxu1 %v927_v12  ;;  %v478_v11 = vld [vmem:[%s18404_s1 + $0xd60] sm:$0xff]  ;;  %v1027_v12 = vld [vmem:[%s18404_s1 + $0x1e88] sm:$0xff] }
 0x181   :  { %2034 = vmatpush2.msra.mxu0 %v666_v13  ;;  %2117 = vmatpush2.msra.mxu1 %v926_v14  ;;  %v469_v13 = vld [vmem:[%s18404_s1 + $0xd18] sm:$0xff]  ;;  %v1026_v14 = vld [vmem:[%s18404_s1 + $0x1e80] sm:$0xff] }
 0x182   :  { %2035 = vmatprep.subr.mxu0 %v657_v16  ;;  %2118 = vmatprep.subr.mxu1 %v917_v17  ;;  %v468_v16 = vld [vmem:[%s18404_s1 + $0xd10] sm:$0xff]  ;;  %v1017_v17 = vld [vmem:[%s18404_s1 + $0x1e38] sm:$0xff] }
 0x183   :  { %2036 = vmatpush2.msra.mxu0 %v656_v18  ;;  %2119 = vmatpush2.msra.mxu1 %v916_v19  ;;  %v459_v18 = vld [vmem:[%s18404_s1 + $0xcc8] sm:$0xff]  ;;  %v1016_v19 = vld [vmem:[%s18404_s1 + $0x1e30] sm:$0xff] }
 0x184   :  { %2037 = vmatprep.subr.mxu0 %v647_v20  ;;  %2120 = vmatprep.subr.mxu1 %v907_v21  ;;  %v458_v20 = vld [vmem:[%s18404_s1 + $0xcc0] sm:$0xff]  ;;  %v209_v21 = vld [vmem:[%s18404_s1 + $0x4f8] sm:$0xff] }
 0x185   :  { %2038 = vmatpush2.msra.mxu0 %v646_v22  ;;  %2121 = vmatpush2.msra.mxu1 %v906_v23  ;;  %v449_v22 = vld [vmem:[%s18404_s1 + $0xc78] sm:$0xff]  ;;  %v208_v23 = vld [vmem:[%s18404_s1 + $0x4f0] sm:$0xff] }
 0x186   :  { %2039 = vmatprep.subr.mxu0 %v637_v25  ;;  %2122 = vmatprep.subr.mxu1 %v897_v26  ;;  %v448_v25 = vld [vmem:[%s18404_s1 + $0xc70] sm:$0xff]  ;;  %v199_v26 = vld [vmem:[%s18404_s1 + $0x4a8] sm:$0xff] }
 0x187   :  { %2040 = vmatpush2.msra.mxu0 %v636_v27  ;;  %2123 = vmatpush2.msra.mxu1 %v896_v28  ;;  %v439_v27 = vld [vmem:[%s18404_s1 + $0xc28] sm:$0xff]  ;;  %v198_v28 = vld [vmem:[%s18404_s1 + $0x4a0] sm:$0xff] }
 0x188   :  { %2041 = vmatprep.subr.mxu0 %v627_v29  ;;  %2124 = vmatprep.subr.mxu1 %v887_v30  ;;  %v438_v29 = vld [vmem:[%s18404_s1 + $0xc20] sm:$0xff]  ;;  %v12199_v30 = vpop.f32.mrf.mxu0 }
 0x189   :  { %2042 = vmatpush2.msra.mxu0 %v626_v31  ;;  %2125 = vmatpush2.msra.mxu1 %v886_v32  ;;  %v189_v31 = vld [vmem:[%s18404_s1 + $0x458] sm:$0xff] }
 0x18a   :  { %2043 = vmatprep.subr.mxu0 %v617_v33  ;;  %2126 = vmatprep.subr.mxu1 %v877_v34  ;;  %v429_v32 = vld [vmem:[%s18404_s1 + $0xbd8] sm:$0xff]  ;;  %v188_v33 = vld [vmem:[%s18404_s1 + $0x450] sm:$0xff] }
 0x18b   :  { %2044 = vmatpush2.msra.mxu0 %v616_v36  ;;  %2127 = vmatpush2.msra.mxu1 %v876_v37  ;;  %v428_v34 = vld [vmem:[%s18404_s1 + $0xbd0] sm:$0xff]  ;;  %v179_v36 = vld [vmem:[%s18404_s1 + $0x408] sm:$0xff] }
 0x18c   :  { %2045 = vmatprep.subr.mxu0 %v607_v38  ;;  %2128 = vmatprep.subr.mxu1 %v867_v39  ;;  %v419_v37 = vld [vmem:[%s18404_s1 + $0xb88] sm:$0xff]  ;;  %v178_v38 = vld [vmem:[%s18404_s1 + $0x400] sm:$0xff] }
 0x18d   :  { %2046 = vmatpush2.msra.mxu0 %v606_v40  ;;  %2129 = vmatpush2.msra.mxu1 %v866_v41  ;;  %v418_v39 = vld [vmem:[%s18404_s1 + $0xb80] sm:$0xff]  ;;  %v1142_v40 = vpop.f32.mrf.mxu0  ;;  %v169_v41 = vld [vmem:[%s18404_s1 + $0x3b8] sm:$0xff] }
 0x18e   :  { %2047 = vmatprep.subr.mxu0 %v597_v43  ;;  %2130 = vmatprep.subr.mxu1 %v857_v44  ;;  %v409_v43 = vld [vmem:[%s18404_s1 + $0xb38] sm:$0xff]  ;;  %v168_v44 = vld [vmem:[%s18404_s1 + $0x3b0] sm:$0xff] }
 0x18f   :  { %2048 = vmatpush2.msra.mxu0 %v596_v45  ;;  %2131 = vmatpush2.msra.mxu1 %v856_v46  ;;  %v408_v45 = vld [vmem:[%s18404_s1 + $0xb30] sm:$0xff]  ;;  %v12237_v46 = vpop.f32.mrf.mxu0 }
 0x190   :  { %2049 = vmatprep.subr.mxu0 %v587_v47  ;;  %2132 = vmatprep.mubr.f32.mxu1 %v10500_v24  ;;  %v159_v47 = vld [vmem:[%s18404_s1 + $0x368] sm:$0xff] }
 0x191   :  { %2281 = vmatprep.subr.mxu1 %v529_v48  ;;  %2050 = vmatpush2.msra.mxu0 %v586_v49  ;;  %v399_v48 = vld [vmem:[%s18404_s1 + $0xae8] sm:$0xff]  ;;  %v158_v49 = vld [vmem:[%s18404_s1 + $0x360] sm:$0xff] }
 0x192   :  { %2133 = vmatmul.mubr.f32.vlgmr.msra.gmra.mxu1 %v10472_v15  ;;  %2051 = vmatprep.subr.mxu0 %v577_v50  ;;  %v398_v50 = vld [vmem:[%s18404_s1 + $0xae0] sm:$0xff] }
 0x193   :  { %2282 = vmatpush1.msra.mxu1 %v528_v51  ;;  %2052 = vmatpush2.msra.mxu0 %v576_v53  ;;  %v149_v51 = vld [vmem:[%s18404_s1 + $0x318] sm:$0xff] }
 0x194   :  { %2283 = vmatprep.subr.mxu1 %v519_v54  ;;  %2053 = vmatprep.subr.mxu0 %v567_v55  ;;  %v389_v53 = vld [vmem:[%s18404_s1 + $0xa98] sm:$0xff]  ;;  %v148_v54 = vld [vmem:[%s18404_s1 + $0x310] sm:$0xff] }
 0x195   :  { %2284 = vmatpush1.msra.mxu1 %v518_v56  ;;  %2054 = vmatpush2.msra.mxu0 %v566_v57  ;;  %v388_v55 = vld [vmem:[%s18404_s1 + $0xa90] sm:$0xff]  ;;  %v12263_v56 = vpop.f32.mrf.mxu1  ;;  %v1284_v57 = vpop.f32.mrf.mxu0 }
 0x196   :  { %2285 = vmatprep.subr.mxu1 %v509_v58  ;;  %2055 = vmatprep.subr.mxu0 %v557_v59  ;;  %v139_v58 = vld [vmem:[%s18404_s1 + $0x2c8] sm:$0xff] }
 0x197   :  { %2286 = vmatpush1.msra.mxu1 %v508_v60  ;;  %2056 = vmatpush2.msra.mxu0 %v556_v61  ;;  %v379_v59 = vld [vmem:[%s18404_s1 + $0xa48] sm:$0xff]  ;;  %v138_v60 = vld [vmem:[%s18404_s1 + $0x2c0] sm:$0xff] }
 0x198   :  { %2287 = vmatprep.subr.mxu1 %v499_v63  ;;  %2057 = vmatprep.subr.mxu0 %v547_v0  ;;  %v378_v61 = vld [vmem:[%s18404_s1 + $0xa40] sm:$0xff]  ;;  %v129_v63 = vld [vmem:[%s18404_s1 + $0x278] sm:$0xff] }
 0x199   :  { %2288 = vmatpush1.msra.mxu1 %v498_v2  ;;  %2058 = vmatpush2.msra.mxu0 %v546_v3  ;;  %v689_v0 = vld [vmem:[%s18404_s1 + $0x13f8] sm:$0xff]  ;;  %v128_v2 = vld [vmem:[%s18404_s1 + $0x270] sm:$0xff] }
 0x19a   :  { %2289 = vmatprep.subr.mxu1 %v489_v4  ;;  %2059 = vmatprep.subr.mxu0 %v537_v5  ;;  %v688_v3 = vld [vmem:[%s18404_s1 + $0x13f0] sm:$0xff]  ;;  %v1213_v4 = vpop.f32.mrf.mxu1  ;;  %v12289_v5 = vpop.f32.mrf.mxu0 }
 0x19b   :  { %2290 = vmatpush1.msra.mxu1 %v488_v6  ;;  %2060 = vmatpush2.msra.mxu0 %v536_v7  ;;  %v119_v6 = vld [vmem:[%s18404_s1 + $0x228] sm:$0xff] }
 0x19c   :  { %2291 = vmatprep.subr.mxu1 %v479_v9  ;;  %2061 = vmatprep.mubr.f32.mxu0 %v10105_v10  ;;  %v679_v7 = vld [vmem:[%s18404_s1 + $0x13a8] sm:$0xff]  ;;  %v118_v9 = vld [vmem:[%s18404_s1 + $0x220] sm:$0xff] }
 0x19d   :  { %2292 = vmatpush1.msra.mxu1 %v478_v11  ;;  %2062 = vmatmul.mubr.f32.vlgmr.msra.gmra.mxu0 %v10076_v1  ;;  %v678_v11 = vld [vmem:[%s18404_s1 + $0x13a0] sm:$0xff] }
 0x19e   :  { %2167 = vmatprep.subr.mxu0 %v1027_v12  ;;  %2293 = vmatprep.subr.mxu1 %v469_v13  ;;  %v109_v12 = vld [vmem:[%s18404_s1 + $0x1d8] sm:$0xff] }
 0x19f   :  { %2168 = vmatpush1.msra.mxu0 %v1026_v14  ;;  %2294 = vmatpush1.msra.mxu1 %v468_v16  ;;  %v669_v13 = vld [vmem:[%s18404_s1 + $0x1358] sm:$0xff]  ;;  %v1214_v14 = vadd.f32 %v1213_v4, %v1142_v40  ;;  %v108_v16 = vld [vmem:[%s18404_s1 + $0x1d0] sm:$0xff]  ;;  %v578_v4 = vld [vmem:[%s18404_s1 + $0x1080] sm:$0xff] }
 0x1a0   :  { %2169 = vmatprep.subr.mxu0 %v1017_v17  ;;  %2295 = vmatprep.subr.mxu1 %v459_v18  ;;  %v668_v17 = vld [vmem:[%s18404_s1 + $0x1350] sm:$0xff]  ;;  %v1355_v18 = vpop.f32.mrf.mxu0 }
 0x1a1   :  { %2170 = vmatpush1.msra.mxu0 %v1016_v19  ;;  %2203 = vmatprep.mubr.f32.mxu0 %v18418_v52  ;;  %v99_v19 = vld [vmem:[%s18404_s1 + $0x188] sm:$0xff]  ;;  %v628_v40 = vld [vmem:[%s18404_s1 + $0x1210] sm:$0xff] }
 0x1a2   :  { %2296 = vmatpush1.msra.mxu1 %v458_v20  ;;  %8705 = vmatmul.mubr.msk.f32.vlgmr.msra.gmra.mxu0 %vm1071_vm0, %v10533_v35  ;;  %v659_v20 = vld [vmem:[%s18404_s1 + $0x1308] sm:$0xff] }
 0x1a3   :  { %2210 = vmatprep.subr.mxu0 %v209_v21  ;;  %2297 = vmatprep.subr.mxu1 %v449_v22  ;;  %v1285_v21 = vadd.f32 %v1284_v57, %v1214_v14  ;;  %v98_v22 = vld [vmem:[%s18404_s1 + $0x180] sm:$0xff]  ;;  %v319_v14 = vld [vmem:[%s18404_s1 + $0x868] sm:$0xff] }
 0x1a4   :  { %2211 = vmatpush1.msra.mxu0 %v208_v23  ;;  %2298 = vmatpush1.msra.mxu1 %v448_v25  ;;  %v658_v23 = vld [vmem:[%s18404_s1 + $0x1300] sm:$0xff]  ;;  %v89_v25 = vld [vmem:[%s18404_s1 + $0x138] sm:$0xff] }
 0x1a5   :  { %2212 = vmatprep.subr.mxu0 %v199_v26  ;;  %2299 = vmatprep.subr.mxu1 %v439_v27  ;;  %v649_v26 = vld [vmem:[%s18404_s1 + $0x12b8] sm:$0xff]  ;;  %v12333_v27 = vadd.f32 %v1355_v18, %v1285_v21  ;;  %v598_v57 = vld [vmem:[%s18404_s1 + $0x1120] sm:$0xff] }
 0x1a6   :  { %2213 = vmatpush1.msra.mxu0 %v198_v28  ;;  %2300 = vmatpush1.msra.mxu1 %v438_v29  ;;  %v88_v28 = vld [vmem:[%s18404_s1 + $0x130] sm:$0xff]  ;;  %v558_v18 = vld [vmem:[%s18404_s1 + $0xfe0] sm:$0xff]  ;;  %v309_v21 = vld [vmem:[%s18404_s1 + $0x818] sm:$0xff] }
 0x1a7   :  { %2214 = vmatprep.subr.mxu0 %v189_v31  ;;  %2301 = vmatprep.subr.mxu1 %v429_v32  ;;  %18560 = vst [vmem:[#allocation9_spill] sm:$0xff] %v12333_v27  ;;  %v648_v29 = vld [vmem:[%s18404_s1 + $0x12b0] sm:$0xff]  ;;  %v79_v31 = vld [vmem:[%s18404_s1 + $0xe8] sm:$0xff] }
 0x1a8   :  { %2215 = vmatpush1.msra.mxu0 %v188_v33  ;;  %2302 = vmatpush1.msra.mxu1 %v428_v34  ;;  %v639_v32 = vld [vmem:[%s18404_s1 + $0x1268] sm:$0xff]  ;;  %v78_v33 = vld [vmem:[%s18404_s1 + $0xe0] sm:$0xff] }
 0x1a9   :  { %2216 = vmatprep.subr.mxu0 %v179_v36  ;;  %2303 = vmatprep.subr.mxu1 %v419_v37  ;;  %v638_v34 = vld [vmem:[%s18404_s1 + $0x1260] sm:$0xff]  ;;  %v69_v36 = vld [vmem:[%s18404_s1 + $0x98] sm:$0xff] }
 0x1aa   :  { %2217 = vmatpush1.msra.mxu0 %v178_v38  ;;  %2304 = vmatpush1.msra.mxu1 %v418_v39  ;;  %v629_v37 = vld [vmem:[%s18404_s1 + $0x1218] sm:$0xff]  ;;  %v2661_v38 = vsel %vm2653_vm1, %v12333_v27, 0.0  ;;  %v68_v39 = vld [vmem:[%s18404_s1 + $0x90] sm:$0xff] }
 0x1ab   :  { %2218 = vmatprep.subr.mxu0 %v169_v41  ;;  %2305 = vmatprep.subr.mxu1 %v409_v43  ;;  %v59_v41 = vld [vmem:[%s18404_s1 + $0x48] sm:$0xff] }
 0x1ac   :  { %2219 = vmatpush1.msra.mxu0 %v168_v44  ;;  %2306 = vmatpush1.msra.mxu1 %v408_v45  ;;  %v619_v43 = vld [vmem:[%s18404_s1 + $0x11c8] sm:$0xff]  ;;  %v58_v44 = vld [vmem:[%s18404_s1 + $0x40] sm:$0xff] }
 0x1ad   :  { %2220 = vmatprep.subr.mxu0 %v159_v47  ;;  %2307 = vmatprep.subr.mxu1 %v399_v48  ;;  %v618_v45 = vld [vmem:[%s18404_s1 + $0x11c0] sm:$0xff]  ;;  %v2662_v47 = vrot.slane %v2661_v38, 4  ;;  %v369_v48 = vld [vmem:[%s18404_s1 + $0x9f8] sm:$0xff] }
 0x1ae   :  { %2221 = vmatpush1.msra.mxu0 %v158_v49  ;;  %2308 = vmatpush1.msra.mxu1 %v398_v50  ;;  %v609_v49 = vld [vmem:[%s18404_s1 + $0x1178] sm:$0xff]  ;;  %v368_v50 = vld [vmem:[%s18404_s1 + $0x9f0] sm:$0xff] }
 0x1af   :  { %2222 = vmatprep.subr.mxu0 %v149_v51  ;;  %2309 = vmatprep.subr.mxu1 %v389_v53  ;;  %v608_v51 = vld [vmem:[%s18404_s1 + $0x1170] sm:$0xff]  ;;  %v359_v53 = vld [vmem:[%s18404_s1 + $0x9a8] sm:$0xff] }
 0x1b0   :  { %2223 = vmatpush1.msra.mxu0 %v148_v54  ;;  %2310 = vmatpush1.msra.mxu1 %v388_v55  ;;  %v599_v54 = vld [vmem:[%s18404_s1 + $0x1128] sm:$0xff]  ;;  %v358_v55 = vld [vmem:[%s18404_s1 + $0x9a0] sm:$0xff] }
 0x1b1   :  { %2224 = vmatprep.subr.mxu0 %v139_v58  ;;  %2311 = vmatprep.subr.mxu1 %v379_v59  ;;  %v2663_v58 = vadd.f32 %v2662_v47, %v2661_v38  ;;  %v349_v59 = vld [vmem:[%s18404_s1 + $0x958] sm:$0xff] }
 0x1b2   :  { %2225 = vmatpush1.msra.mxu0 %v138_v60  ;;  %2312 = vmatpush1.msra.mxu1 %v378_v61  ;;  %v589_v60 = vld [vmem:[%s18404_s1 + $0x10d8] sm:$0xff]  ;;  %v348_v61 = vld [vmem:[%s18404_s1 + $0x950] sm:$0xff] }
 0x1b3   :  { %2226 = vmatprep.subr.mxu0 %v129_v63  ;;  %2313 = vmatprep.subr.mxu1 %v689_v0  ;;  %v588_v63 = vld [vmem:[%s18404_s1 + $0x10d0] sm:$0xff]  ;;  %v339_v0 = vld [vmem:[%s18404_s1 + $0x908] sm:$0xff]  ;;  %v12487_v38 = vld [vmem:[%s18406_s3 + $0xf8] sm:$0xff] }
 0x1b4   :  { %2227 = vmatpush1.msra.mxu0 %v128_v2  ;;  %2314 = vmatpush2.msra.mxu1 %v688_v3  ;;  %v579_v2 = vld [vmem:[%s18404_s1 + $0x1088] sm:$0xff]  ;;  %v338_v3 = vld [vmem:[%s18404_s1 + $0x900] sm:$0xff] }
 0x1b5   :  { %2228 = vmatprep.subr.mxu0 %v119_v6  ;;  %2315 = vmatprep.subr.mxu1 %v679_v7  ;;  %v12427_v6 = vpop.f32.mrf.mxu1  ;;  %v329_v7 = vld [vmem:[%s18404_s1 + $0x8b8] sm:$0xff] }
 0x1b6   :  { %2229 = vmatpush1.msra.mxu0 %v118_v9  ;;  %2316 = vmatpush2.msra.mxu1 %v678_v11  ;;  %v569_v9 = vld [vmem:[%s18404_s1 + $0x1038] sm:$0xff]  ;;  %v2664_v11 = vrot.slane %v2663_v58, 2 }
 0x1b7   :  { %2230 = vmatprep.subr.mxu0 %v109_v12  ;;  %2317 = vmatprep.subr.mxu1 %v669_v13  ;;  %v328_v12 = vld [vmem:[%s18404_s1 + $0x8b0] sm:$0xff] }
 0x1b8   :  { %2231 = vmatpush1.msra.mxu0 %v108_v16  ;;  %2318 = vmatpush2.msra.mxu1 %v668_v17  ;;  %v568_v13 = vld [vmem:[%s18404_s1 + $0x1030] sm:$0xff]  ;;  %v559_v16 = vld [vmem:[%s18404_s1 + $0xfe8] sm:$0xff]  ;;  %v318_v17 = vld [vmem:[%s18404_s1 + $0x860] sm:$0xff] }
 0x1b9   :  { %2232 = vmatprep.subr.mxu0 %v99_v19  ;;  %2319 = vmatprep.subr.mxu1 %v659_v20  ;;  %v1426_v19 = vpop.f32.mrf.mxu1  ;;  %v12453_v20 = vpop.f32.mrf.mxu0 }
 0x1ba   :  { %2233 = vmatpush1.msra.mxu0 %v98_v22  ;;  %2320 = vmatpush2.msra.mxu1 %v658_v23  ;;  %v549_v22 = vld [vmem:[%s18404_s1 + $0xf98] sm:$0xff]  ;;  %v2665_v23 = vadd.f32 %v2664_v11, %v2663_v58  ;;  %v2532_v58 = vld [vmem:[%s18406_s3 + $0xe0] sm:$0xff]  ;;  %v2514_v11 = vld [vmem:[%s18406_s3 + $0x50] sm:$0xff] }
 0x1bb   :  { %2234 = vmatprep.subr.mxu0 %v89_v25  ;;  %2321 = vmatprep.subr.mxu1 %v649_v26  ;;  %v308_v25 = vld [vmem:[%s18404_s1 + $0x810] sm:$0xff] }
 0x1bc   :  { %2235 = vmatpush1.msra.mxu0 %v88_v28  ;;  %2322 = vmatpush2.msra.mxu1 %v648_v29  ;;  %v548_v26 = vld [vmem:[%s18404_s1 + $0xf90] sm:$0xff]  ;;  %v299_v28 = vld [vmem:[%s18404_s1 + $0x7c8] sm:$0xff] }
 0x1bd   :  { %2236 = vmatprep.subr.mxu0 %v79_v31  ;;  %2323 = vmatprep.subr.mxu1 %v639_v32  ;;  %v539_v29 = vld [vmem:[%s18404_s1 + $0xf48] sm:$0xff]  ;;  %v298_v31 = vld [vmem:[%s18404_s1 + $0x7c0] sm:$0xff] }
 0x1be   :  { %2237 = vmatpush1.msra.mxu0 %v78_v33  ;;  %2324 = vmatpush2.msra.mxu1 %v638_v34  ;;  %v538_v32 = vld [vmem:[%s18404_s1 + $0xf40] sm:$0xff]  ;;  %v1497_v33 = vpop.f32.mrf.mxu0  ;;  %v12479_v34 = vpop.f32.mrf.mxu1 }
 0x1bf   :  { %2238 = vmatprep.subr.mxu0 %v69_v36  ;;  %2325 = vmatprep.subr.mxu1 %v629_v37  ;;  %v289_v36 = vld [vmem:[%s18404_s1 + $0x778] sm:$0xff]  ;;  %v2666_v37 = vrot.slane %v2665_v23, 1 }
 0x1c0   :  { %2239 = vmatpush1.msra.mxu0 %v68_v39  ;;  %2326 = vmatpush2.msra.mxu1 %v628_v40  ;;  %v288_v39 = vld [vmem:[%s18404_s1 + $0x770] sm:$0xff]  ;;  %v2519_v40 = vld [vmem:[%s18406_s3 + $0x78] sm:$0xff] }
 0x1c1   :  { %2240 = vmatprep.subr.mxu0 %v59_v41  ;;  %2327 = vmatprep.subr.mxu1 %v619_v43  ;;  %v1498_v41 = vadd.f32 %v1497_v33, %v1426_v19  ;;  %v279_v43 = vld [vmem:[%s18404_s1 + $0x728] sm:$0xff]  ;;  %v2667_v47 = vadd.f32 %v2666_v37, %v2665_v23  ;;  %v2512_v23 = vld [vmem:[%s18406_s3 + $0x40] sm:$0xff] }
 0x1c2   :  { %2241 = vmatpush1.msra.mxu0 %v58_v44  ;;  %2328 = vmatpush2.msra.mxu1 %v618_v45  ;;  %v1568_v44 = vpop.f32.mrf.mxu1  ;;  %v12499_v45 = vpop.f32.mrf.mxu0  ;;  %v839_v33 = vld [vmem:[%s18404_s1 + $0x18a8] sm:$0xff] }
 0x1c3   :  { %2242 = vmatprep.subr.mxu0 %v369_v48  ;;  %2329 = vmatprep.subr.mxu1 %v609_v49  ;;  %v2534_v48 = vld [vmem:[%s18406_s3 + $0xf0] sm:$0xff]  ;;  %v1212_v49 = vadd.f32 %v12263_v56, %v12199_v30 }
 0x1c4   :  { %2243 = vmatpush2.msra.mxu0 %v368_v50  ;;  %2330 = vmatpush2.msra.mxu1 %v608_v51  ;;  %v269_v50 = vld [vmem:[%s18404_s1 + $0x6d8] sm:$0xff]  ;;  %v2533_v51 = vld [vmem:[%s18406_s3 + $0xe8] sm:$0xff]  ;;  %v268_v30 = vld [vmem:[%s18404_s1 + $0x6d0] sm:$0xff] }
 0x1c5   :  { %2244 = vmatprep.subr.mxu0 %v359_v53  ;;  %2331 = vmatprep.subr.mxu1 %v599_v54  ;;  %v1283_v56 = vadd.f32 %v12237_v46, %v1212_v49  ;;  %v1569_v53 = vadd.f32 %v1568_v44, %v1498_v41  ;;  %v2517_v54 = vld [vmem:[%s18406_s3 + $0x68] sm:$0xff]  ;;  %v258_v46 = vld [vmem:[%s18404_s1 + $0x680] sm:$0xff]  ;;  %v828_v41 = vld [vmem:[%s18404_s1 + $0x1850] sm:$0xff] }
 0x1c6   :  { %2245 = vmatpush2.msra.mxu0 %v358_v55  ;;  %2332 = vmatpush2.msra.mxu1 %v598_v57  ;;  %v259_v55 = vld [vmem:[%s18404_s1 + $0x688] sm:$0xff]  ;;  %v1639_v57 = vpop.f32.mrf.mxu0  ;;  %v2508_v49 = vld [vmem:[%s18406_s3 + $0x20] sm:$0xff] }
 0x1c7   :  { %2246 = vmatprep.subr.mxu0 %v349_v59  ;;  %2333 = vmatprep.subr.mxu1 %v589_v60  ;;  %v12537_v59 = vadd.f32 %v12289_v5, %v1283_v56  ;;  %v2516_v60 = vld [vmem:[%s18406_s3 + $0x60] sm:$0xff]  ;;  %v248_v5 = vld [vmem:[%s18404_s1 + $0x630] sm:$0xff]  ;;  %v2509_v44 = vld [vmem:[%s18406_s3 + $0x28] sm:$0xff] }
 0x1c8   :  { %2247 = vmatpush2.msra.mxu0 %v348_v61  ;;  %2334 = vmatpush2.msra.mxu1 %v588_v63  ;;  %v249_v61 = vld [vmem:[%s18404_s1 + $0x638] sm:$0xff] }
 0x1c9   :  { %2248 = vmatprep.subr.mxu0 %v339_v0  ;;  %2335 = vmatprep.subr.mxu1 %v579_v2  ;;  %18561 = vst [vmem:[#allocation10_spill] sm:$0xff] %v12537_v59  ;;  %v2531_v63 = vld [vmem:[%s18406_s3 + $0xd8] sm:$0xff]  ;;  %v12551_v0 = vadd.f32 %v1639_v57, %v1569_v53  ;;  %v798_v57 = vld [vmem:[%s18404_s1 + $0x1760] sm:$0xff] }
 0x1ca   :  { %2249 = vmatpush2.msra.mxu0 %v338_v3  ;;  %2336 = vmatpush2.msra.mxu1 %v578_v4  ;;  %v2515_v2 = vld [vmem:[%s18406_s3 + $0x58] sm:$0xff]  ;;  %v239_v3 = vld [vmem:[%s18404_s1 + $0x5e8] sm:$0xff]  ;;  %v2530_v4 = vld [vmem:[%s18406_s3 + $0xd0] sm:$0xff] }
 0x1cb   :  { %2250 = vmatprep.subr.mxu0 %v329_v7  ;;  %2337 = vmatprep.subr.mxu1 %v569_v9  ;;  %18562 = vst [vmem:[#allocation11_spill] sm:$0xff] %v12551_v0  ;;  %v238_v7 = vld [vmem:[%s18404_s1 + $0x5e0] sm:$0xff]  ;;  %v2654_v9 = vsel %vm2653_vm1, %v12537_v59, 0.0  ;;  %v2507_v53 = vld [vmem:[%s18406_s3 + $0x18] sm:$0xff] }
 0x1cc   :  { %2251 = vmatpush2.msra.mxu0 %v328_v12  ;;  %2338 = vmatpush2.msra.mxu1 %v568_v13  ;;  %v229_v12 = vld [vmem:[%s18404_s1 + $0x598] sm:$0xff]  ;;  %v2529_v13 = vld [vmem:[%s18406_s3 + $0xc8] sm:$0xff]  ;;  %v2655_v19 = vrot.slane %v2654_v9, 4 }
 0x1cd   :  { %2252 = vmatprep.subr.mxu0 %v319_v14  ;;  %2339 = vmatprep.subr.mxu1 %v559_v16  ;;  %v228_v14 = vld [vmem:[%s18404_s1 + $0x590] sm:$0xff]  ;;  %v2675_v16 = vsel %vm2653_vm1, %v12551_v0, 0.0 }
 0x1ce   :  { %2253 = vmatpush2.msra.mxu0 %v318_v17  ;;  %2340 = vmatpush2.msra.mxu1 %v558_v18  ;;  %v2513_v17 = vld [vmem:[%s18406_s3 + $0x48] sm:$0xff] }
 0x1cf   :  { %2254 = vmatprep.subr.mxu0 %v309_v21  ;;  %2341 = vmatprep.subr.mxu1 %v549_v22  ;;  %v219_v18 = vld [vmem:[%s18404_s1 + $0x548] sm:$0xff]  ;;  %v2528_v21 = vld [vmem:[%s18406_s3 + $0xc0] sm:$0xff] }
 0x1d0   :  { %2255 = vmatpush2.msra.mxu0 %v308_v25  ;;  %2342 = vmatpush2.msra.mxu1 %v548_v26  ;;  %v218_v22 = vld [vmem:[%s18404_s1 + $0x540] sm:$0xff]  ;;  %v2676_v25 = vrot.slane %v2675_v16, 4  ;;  %v849_v26 = vld [vmem:[%s18404_s1 + $0x18f8] sm:$0xff] }
 0x1d1   :  { %2256 = vmatprep.subr.mxu0 %v299_v28  ;;  %2343 = vmatprep.subr.mxu1 %v539_v29  ;;  %v2527_v28 = vld [vmem:[%s18406_s3 + $0xb8] sm:$0xff]  ;;  %v848_v29 = vld [vmem:[%s18404_s1 + $0x18f0] sm:$0xff] }
 0x1d2   :  { %2257 = vmatpush2.msra.mxu0 %v298_v31  ;;  %2344 = vmatpush2.msra.mxu1 %v538_v32  ;;  %v2656_v31 = vadd.f32 %v2655_v19, %v2654_v9  ;;  %v2511_v32 = vld [vmem:[%s18406_s3 + $0x38] sm:$0xff]  ;;  %v2677_v37 = vadd.f32 %v2676_v25, %v2675_v16  ;;  %v1496_v9 = vadd.f32 %v12453_v20, %v12427_v6  ;;  %v12755_v25 = vld [vmem:[%s18406_s3 + $0x1e8] sm:$0xff] }
 0x1d3   :  { %2345 = vmatprep.mubr.f32.mxu1 %v10105_v10  ;;  %2258 = vmatprep.subr.mxu0 %v289_v36  ;;  %v278_v10 = vld [vmem:[%s18404_s1 + $0x720] sm:$0xff]  ;;  %v2526_v36 = vld [vmem:[%s18406_s3 + $0xb0] sm:$0xff]  ;;  %v12718_v6 = vld [vmem:[%s18406_s3 + $0x1f8] sm:$0xff] }
 0x1d4   :  { %2346 = vmatmul.mubr.f32.vlgmr.msra.gmra.mxu1 %v10076_v1  ;;  %8755 = vmatprep.subr.mxu1 %v12487_v38  ;;  %v2518_v1 = vld [vmem:[%s18406_s3 + $0x70] sm:$0xff]  ;;  %v12727_v16 = vld [vmem:[%s18406_s3 + $0x178] sm:$0xff] }
 0x1d5   :  { %2259 = vmatpush2.msra.mxu0 %v288_v39  ;;  %8756 = vmatpush3.msra.mxu1 %v2519_v40  ;;  %v2510_v39 = vld [vmem:[%s18406_s3 + $0x30] sm:$0xff]  ;;  %v2525_v40 = vld [vmem:[%s18406_s3 + $0xa8] sm:$0xff] }
 0x1d6   :  { %2873 = vmatprep.mubr.f32.mxu1 %v2667_v47  ;;  %2260 = vmatprep.subr.mxu0 %v279_v43  ;;  %v2657_v43 = vrot.slane %v2656_v31, 2  ;;  %v819_v47 = vld [vmem:[%s18404_s1 + $0x1808] sm:$0xff] }
 0x1d7   :  { %8757 = vmatprep.subr.mxu1 %v2534_v48  ;;  %2261 = vmatpush2.msra.mxu0 %v278_v10  ;;  %v2524_v48 = vld [vmem:[%s18406_s3 + $0xa0] sm:$0xff] }
 0x1d8   :  { %8758 = vmatpush3.msra.mxu1 %v2518_v1  ;;  %2262 = vmatprep.subr.mxu0 %v269_v50  ;;  %v818_v10 = vld [vmem:[%s18404_s1 + $0x1800] sm:$0xff]  ;;  %v809_v1 = vld [vmem:[%s18404_s1 + $0x17b8] sm:$0xff]  ;;  %v2678_v50 = vrot.slane %v2677_v37, 2  ;;  %v2658_v56 = vadd.f32 %v2657_v43, %v2656_v31 }
 0x1d9   :  { %8759 = vmatprep.subr.mxu1 %v2533_v51  ;;  %2263 = vmatpush2.msra.mxu0 %v268_v30  ;;  %v2523_v51 = vld [vmem:[%s18406_s3 + $0x98] sm:$0xff]  ;;  %v808_v30 = vld [vmem:[%s18404_s1 + $0x17b0] sm:$0xff]  ;;  %v718_v43 = vld [vmem:[%s18404_s1 + $0x14e0] sm:$0xff] }
 0x1da   :  { %8760 = vmatpush3.msra.mxu1 %v2517_v54  ;;  %2264 = vmatprep.subr.mxu0 %v259_v55  ;;  %v799_v54 = vld [vmem:[%s18404_s1 + $0x1768] sm:$0xff]  ;;  %v12664_v55 = vld [vmem:[%s18406_s3 + $0x90] sm:$0xff] }
 0x1db   :  { %8761 = vmatprep.subr.mxu1 %v2532_v58  ;;  %2265 = vmatpush2.msra.mxu0 %v258_v46  ;;  %v12672_v58 = vld [vmem:[%s18406_s3 + $0x10] sm:$0xff]  ;;  %v789_v46 = vld [vmem:[%s18404_s1 + $0x1718] sm:$0xff] }
 0x1dc   :  { %8762 = vmatpush3.msra.mxu1 %v2516_v60  ;;  %2266 = vmatprep.subr.mxu0 %v249_v61  ;;  %v2679_v60 = vadd.f32 %v2678_v50, %v2677_v37  ;;  %v12680_v61 = vld [vmem:[%s18406_s3 + $0x88] sm:$0xff]  ;;  %v728_v37 = vld [vmem:[%s18404_s1 + $0x1530] sm:$0xff] }
 0x1dd   :  { %8763 = vmatprep.subr.mxu1 %v2531_v63  ;;  %2267 = vmatpush2.msra.mxu0 %v248_v5  ;;  %v788_v63 = vld [vmem:[%s18404_s1 + $0x1710] sm:$0xff]  ;;  %v12689_v5 = vld [vmem:[%s18406_s3 + $0x8] sm:$0xff] }
 0x1de   :  { %8764 = vmatpush3.msra.mxu1 %v2515_v2  ;;  %2268 = vmatprep.subr.mxu0 %v239_v3  ;;  %v779_v2 = vld [vmem:[%s18404_s1 + $0x16c8] sm:$0xff]  ;;  %v2659_v3 = vrot.slane %v2658_v56, 1 }
 0x1df   :  { %8765 = vmatprep.subr.mxu1 %v2530_v4  ;;  %2269 = vmatpush2.msra.mxu0 %v238_v7  ;;  %v12698_v4 = vld [vmem:[%s18406_s3 + $0x80] sm:$0xff]  ;;  %v699_v50 = vld [vmem:[%s18404_s1 + $0x1448] sm:$0xff] }
 0x1e0   :  { %8766 = vmatpush3.msra.mxu1 %v2514_v11  ;;  %2270 = vmatprep.subr.mxu0 %v229_v12  ;;  %v778_v7 = vld [vmem:[%s18404_s1 + $0x16c0] sm:$0xff]  ;;  %v769_v12 = vld [vmem:[%s18404_s1 + $0x1678] sm:$0xff]  ;;  %v2660_v20 = vadd.f32 %v2659_v3, %v2658_v56 }
 0x1e1   :  { %8767 = vmatprep.subr.mxu1 %v2529_v13  ;;  %2271 = vmatpush2.msra.mxu0 %v228_v14  ;;  %v12709_v11 = vld [vmem:[%s18406_s3] sm:$0xff]  ;;  %v2680_v13 = vrot.slane %v2679_v60, 1  ;;  %v768_v14 = vld [vmem:[%s18404_s1 + $0x1670] sm:$0xff] }
 0x1e2   :  { %8768 = vmatpush3.msra.mxu1 %v2513_v17  ;;  %2272 = vmatprep.subr.mxu0 %v219_v18  ;;  %v759_v17 = vld [vmem:[%s18404_s1 + $0x1628] sm:$0xff]  ;;  %v1567_v18 = vadd.f32 %v12479_v34, %v1496_v9  ;;  %v12747_v34 = vld [vmem:[%s18406_s3 + $0x170] sm:$0xff]  ;;  %v12859_v56 = vld [vmem:[%s18406_s3 + $0x140] sm:$0xff] }
 0x1e3   :  { %8769 = vmatprep.subr.mxu1 %v2528_v21  ;;  %2273 = vmatpush2.msra.mxu0 %v218_v22  ;;  %v2681_v19 = vadd.f32 %v2680_v13, %v2679_v60  ;;  %v12738_v21 = vld [vmem:[%s18406_s3 + $0x1f0] sm:$0xff]  ;;  %v758_v22 = vld [vmem:[%s18404_s1 + $0x1620] sm:$0xff]  ;;  %v12877_v60 = vld [vmem:[%s18406_s3 + $0x138] sm:$0xff] }
 0x1e4   :  { %2274 = vmatprep.mubr.f32.mxu0 %v10098_v8  ;;  %8770 = vmatpush3.msra.mxu1 %v2512_v23  ;;  %v838_v8 = vld [vmem:[%s18404_s1 + $0x18a0] sm:$0xff]  ;;  %v749_v23 = vld [vmem:[%s18404_s1 + $0x15d8] sm:$0xff]  ;;  %v12770_v31 = vadd.f32 %v12499_v45, %v1567_v18  ;;  %v988_v13 = vld [vmem:[%s18404_s1 + $0x1d50] sm:$0xff] }
 0x1e5   :  { %2275 = vmatmul.mubr.f32.vlgmr.msra.gmra.mxu0 %v10067_v62  ;;  %2352 = vmatprep.subr.mxu0 %v849_v26  ;;  %v829_v62 = vld [vmem:[%s18404_s1 + $0x1858] sm:$0xff]  ;;  %v748_v26 = vld [vmem:[%s18404_s1 + $0x15d0] sm:$0xff]  ;;  %v12785_v45 = vld [vmem:[%s18406_s3 + $0x160] sm:$0xff] }
 0x1e6   :  { %8771 = vmatprep.subr.mxu1 %v2527_v28  ;;  %2353 = vmatpush1.msra.mxu0 %v848_v29  ;;  %v12764_v28 = vld [vmem:[%s18406_s3 + $0x168] sm:$0xff]  ;;  %v998_v3 = vld [vmem:[%s18404_s1 + $0x1da0] sm:$0xff]  ;;  %v989_v9 = vld [vmem:[%s18404_s1 + $0x1d58] sm:$0xff] }
 0x1e7   :  { %8772 = vmatpush3.msra.mxu1 %v2511_v32  ;;  %2354 = vmatprep.subr.mxu0 %v839_v33  ;;  %v739_v29 = vld [vmem:[%s18404_s1 + $0x1588] sm:$0xff]  ;;  %v12776_v32 = vld [vmem:[%s18406_s3 + $0x1e0] sm:$0xff] }
 0x1e8   :  { %8773 = vmatprep.subr.mxu1 %v2526_v36  ;;  %2355 = vmatpush1.msra.mxu0 %v838_v8  ;;  %v738_v33 = vld [vmem:[%s18404_s1 + $0x1580] sm:$0xff]  ;;  %v729_v36 = vld [vmem:[%s18404_s1 + $0x1538] sm:$0xff] }
 0x1e9   :  { %8774 = vmatpush3.msra.mxu1 %v2510_v39  ;;  %2356 = vmatprep.subr.mxu0 %v829_v62  ;;  %v12794_v8 = vld [vmem:[%s18406_s3 + $0x1d8] sm:$0xff]  ;;  %v719_v62 = vld [vmem:[%s18404_s1 + $0x14e8] sm:$0xff]  ;;  %v12922_v18 = vld [vmem:[%s18406_s3 + $0x1a0] sm:$0xff] }
 0x1ea   :  { %8775 = vmatprep.subr.mxu1 %v2525_v40  ;;  %2357 = vmatpush1.msra.mxu0 %v828_v41  ;;  %v12803_v39 = vld [vmem:[%s18406_s3 + $0x158] sm:$0xff]  ;;  %v2668_v40 = vsel %vm2653_vm1, %v12770_v31, 0.0  ;;  %v12814_v41 = vld [vmem:[%s18406_s3 + $0x1d0] sm:$0xff] }
 0x1eb   :  { %8776 = vmatpush3.msra.mxu1 %v2509_v44  ;;  %2358 = vmatprep.subr.mxu0 %v819_v47  ;;  %v12823_v44 = vld [vmem:[%s18406_s3 + $0x150] sm:$0xff]  ;;  %v709_v47 = vld [vmem:[%s18404_s1 + $0x1498] sm:$0xff] }
 0x1ec   :  { %8777 = vmatprep.subr.mxu1 %v2524_v48  ;;  %2359 = vmatpush1.msra.mxu0 %v818_v10  ;;  %v12832_v48 = vld [vmem:[%s18406_s3 + $0x1c8] sm:$0xff]  ;;  %v708_v10 = vld [vmem:[%s18404_s1 + $0x1490] sm:$0xff] }
 0x1ed   :  { %8778 = vmatpush3.msra.mxu1 %v2508_v49  ;;  %2360 = vmatprep.subr.mxu0 %v809_v1  ;;  %v2669_v49 = vrot.slane %v2668_v40, 4  ;;  %v12841_v1 = vld [vmem:[%s18406_s3 + $0x148] sm:$0xff] }
 0x1ee   :  { %8779 = vmatprep.subr.mxu1 %v2523_v51  ;;  %2361 = vmatpush1.msra.mxu0 %v808_v30  ;;  %v12850_v51 = vld [vmem:[%s18406_s3 + $0x1c0] sm:$0xff] }
 0x1ef   :  { %8780 = vmatpush3.msra.mxu1 %v2507_v53  ;;  %2362 = vmatprep.subr.mxu0 %v799_v54  ;;  %v698_v30 = vld [vmem:[%s18404_s1 + $0x1440] sm:$0xff]  ;;  %v1009_v53 = vld [vmem:[%s18404_s1 + $0x1df8] sm:$0xff] }
 0x1f0   :  { %8781 = vmatprep.subr.mxu1 %v12664_v55  ;;  %2363 = vmatpush1.msra.mxu0 %v798_v57  ;;  %v12868_v54 = vld [vmem:[%s18406_s3 + $0x1b8] sm:$0xff]  ;;  %v1008_v57 = vld [vmem:[%s18404_s1 + $0x1df0] sm:$0xff] }
 0x1f1   :  { %8782 = vmatpush3.msra.mxu1 %v12672_v58  ;;  %2364 = vmatprep.subr.mxu0 %v789_v46  ;;  %v2670_v46 = vadd.f32 %v2669_v49, %v2668_v40  ;;  %v958_v40 = vld [vmem:[%s18404_s1 + $0x1c60] sm:$0xff]  ;;  %v12978_v49 = vld [vmem:[%s18406_s3 + $0x188] sm:$0xff] }
 0x1f2   :  { %8783 = vmatprep.subr.mxu1 %v12680_v61  ;;  %2365 = vmatpush1.msra.mxu0 %v788_v63  ;;  %v999_v63 = vld [vmem:[%s18404_s1 + $0x1da8] sm:$0xff] }
 0x1f3   :  { %8784 = vmatpush3.msra.mxu1 %v12689_v5  ;;  %2366 = vmatprep.subr.mxu0 %v779_v2  ;;  %v12886_v2 = vld [vmem:[%s18406_s3 + $0x1b0] sm:$0xff] }
 0x1f4   :  { %8785 = vmatprep.subr.mxu1 %v12698_v4  ;;  %2367 = vmatpush1.msra.mxu0 %v778_v7  ;;  %v12895_v7 = vld [vmem:[%s18406_s3 + $0x130] sm:$0xff] }
 0x1f5   :  { %8786 = vmatpush3.msra.mxu1 %v12709_v11  ;;  %2368 = vmatprep.subr.mxu0 %v769_v12  ;;  %v12904_v12 = vld [vmem:[%s18406_s3 + $0x1a8] sm:$0xff] }
 0x1f6   :  { %2874 = vmatmul.mubr.f32.vlgmr.msra.gmra.mxu1 %v2660_v20  ;;  %8790 = vmatprep.subr.mxu1 %v12718_v6  ;;  %v2671_v20 = vrot.slane %v2670_v46, 2 }
 0x1f7   :  { %2369 = vmatpush1.msra.mxu0 %v768_v14  ;;  %8791 = vmatpush3.msra.mxu1 %v12727_v16  ;;  %v12913_v14 = vld [vmem:[%s18406_s3 + $0x128] sm:$0xff] }
 0x1f8   :  { %2943 = vmatprep.mubr.f32.mxu1 %v2681_v19  ;;  %2370 = vmatprep.subr.mxu0 %v759_v17  ;;  %v979_v17 = vld [vmem:[%s18404_s1 + $0x1d08] sm:$0xff]  ;;  %v978_v19 = vld [vmem:[%s18404_s1 + $0x1d00] sm:$0xff] }
 0x1f9   :  { %8792 = vmatprep.subr.mxu1 %v12738_v21  ;;  %2371 = vmatpush1.msra.mxu0 %v758_v22  ;;  %v12931_v22 = vld [vmem:[%s18406_s3 + $0x120] sm:$0xff] }
 0x1fa   :  { %8793 = vmatpush3.msra.mxu1 %v12747_v34  ;;  %2372 = vmatprep.subr.mxu0 %v749_v23  ;;  %v969_v23 = vld [vmem:[%s18404_s1 + $0x1cb8] sm:$0xff] }
 0x1fb   :  { %8794 = vmatprep.subr.mxu1 %v12755_v25  ;;  %2373 = vmatpush1.msra.mxu0 %v748_v26  ;;  %v12940_v26 = vld [vmem:[%s18406_s3 + $0x198] sm:$0xff] }
 0x1fc   :  { %8795 = vmatpush3.msra.mxu1 %v12764_v28  ;;  %2374 = vmatprep.subr.mxu0 %v739_v29  ;;  %v968_v29 = vld [vmem:[%s18404_s1 + $0x1cb0] sm:$0xff] }
 0x1fd   :  { %8796 = vmatprep.subr.mxu1 %v12776_v32  ;;  %2375 = vmatpush1.msra.mxu0 %v738_v33  ;;  %v2672_v33 = vadd.f32 %v2671_v20, %v2670_v46  ;;  %v12996_v46 = vld [vmem:[%s18406_s3 + $0x180] sm:$0xff] }
 0x1fe   :  { %8797 = vmatpush3.msra.mxu1 %v12785_v45  ;;  %2376 = vmatprep.subr.mxu0 %v729_v36  ;;  %v12949_v36 = vld [vmem:[%s18406_s3 + $0x118] sm:$0xff] }
 0x1ff   :  { %8798 = vmatprep.subr.mxu1 %v12794_v8  ;;  %2377 = vmatpush1.msra.mxu0 %v728_v37  ;;  %v959_v37 = vld [vmem:[%s18404_s1 + $0x1c68] sm:$0xff] }
 0x200   :  { %8799 = vmatpush3.msra.mxu1 %v12803_v39  ;;  %2378 = vmatprep.subr.mxu0 %v719_v62  ;;  %v12958_v62 = vld [vmem:[%s18406_s3 + $0x190] sm:$0xff] }
 0x201   :  { %8800 = vmatprep.subr.mxu1 %v12814_v41  ;;  %2379 = vmatpush1.msra.mxu0 %v718_v43  ;;  %v12967_v43 = vld [vmem:[%s18406_s3 + $0x110] sm:$0xff] }
 0x202   :  { %8801 = vmatpush3.msra.mxu1 %v12823_v44  ;;  %2380 = vmatprep.subr.mxu0 %v709_v47  ;;  %v949_v47 = vld [vmem:[%s18404_s1 + $0x1c18] sm:$0xff] }
 0x203   :  { %8802 = vmatprep.subr.mxu1 %v12832_v48  ;;  %2381 = vmatpush1.msra.mxu0 %v708_v10  ;;  %v12972_v10 = vpop.f32.mrf.mxu0 }
 0x204   :  { %8803 = vmatpush3.msra.mxu1 %v12841_v1  ;;  %2382 = vmatprep.subr.mxu0 %v699_v50  ;;  %v948_v50 = vld [vmem:[%s18404_s1 + $0x1c10] sm:$0xff] }
 0x205   :  { %8804 = vmatprep.subr.mxu1 %v12850_v51  ;;  %2383 = vmatpush1.msra.mxu0 %v698_v30  ;;  %v12987_v30 = vld [vmem:[%s18406_s3 + $0x108] sm:$0xff]  ;;  %v1710_v20 = vpop.f32.mrf.mxu0 }
 0x206   :  { %8805 = vmatpush3.msra.mxu1 %v12859_v56  ;;  %2384 = vmatprep.subr.mxu0 %v1009_v53  ;;  %v939_v53 = vld [vmem:[%s18404_s1 + $0x1bc8] sm:$0xff] }
 0x207   :  { %8806 = vmatprep.subr.mxu1 %v12868_v54  ;;  %2385 = vmatpush2.msra.mxu0 %v1008_v57  ;;  %v2673_v57 = vrot.slane %v2672_v33, 1 }
 0x208   :  { %8807 = vmatpush3.msra.mxu1 %v12877_v60  ;;  %2386 = vmatprep.subr.mxu0 %v999_v63  ;;  %v938_v63 = vld [vmem:[%s18404_s1 + $0x1bc0] sm:$0xff] }
 0x209   :  { %8808 = vmatprep.subr.mxu1 %v12886_v2  ;;  %2387 = vmatpush2.msra.mxu0 %v998_v3  ;;  %v13001_v3 = vpop.f32.mrf.mxu1 }
 0x20a   :  { %8809 = vmatpush3.msra.mxu1 %v12895_v7  ;;  %2388 = vmatprep.subr.mxu0 %v989_v9  ;;  %v13007_v9 = vld [vmem:[%s18406_s3 + $0x100] sm:$0xff] }
 0x20b   :  { %8810 = vmatprep.subr.mxu1 %v12904_v12  ;;  %2389 = vmatpush2.msra.mxu0 %v988_v13  ;;  %v929_v13 = vld [vmem:[%s18404_s1 + $0x1b78] sm:$0xff] }
 0x20c   :  { %8811 = vmatpush3.msra.mxu1 %v12913_v14  ;;  %2390 = vmatprep.subr.mxu0 %v979_v17  ;;  %v928_v17 = vld [vmem:[%s18404_s1 + $0x1b70] sm:$0xff] }
 0x20d   :  { %8812 = vmatprep.subr.mxu1 %v12922_v18  ;;  %2391 = vmatpush2.msra.mxu0 %v978_v19  ;;  %v2674_v19 = vadd.f32 %v2673_v57, %v2672_v33  ;;  %v909_v33 = vld [vmem:[%s18404_s1 + $0x1ad8] sm:$0xff] }
 0x20e   :  { %8813 = vmatpush3.msra.mxu1 %v12931_v22  ;;  %2392 = vmatprep.subr.mxu0 %v969_v23  ;;  %v919_v23 = vld [vmem:[%s18404_s1 + $0x1b28] sm:$0xff] }
 0x20f   :  { %8814 = vmatprep.subr.mxu1 %v12940_v26  ;;  %2393 = vmatpush2.msra.mxu0 %v968_v29  ;;  %v918_v29 = vld [vmem:[%s18404_s1 + $0x1b20] sm:$0xff] }
 0x210   :  { %8815 = vmatpush3.msra.mxu1 %v12949_v36  ;;  %2394 = vmatprep.subr.mxu0 %v959_v37 }
 0x211   :  { %8816 = vmatprep.subr.mxu1 %v12958_v62  ;;  %2395 = vmatpush2.msra.mxu0 %v958_v40  ;;  %v13029_v40 = vld [vmem:[%s18406_s3 + $0x3f8] sm:$0xff] }
 0x212   :  { %8817 = vmatpush3.msra.mxu1 %v12967_v43  ;;  %2396 = vmatprep.subr.mxu0 %v949_v47  ;;  %v1781_v47 = vpop.f32.mrf.mxu1 }
 0x213   :  { %8818 = vmatprep.subr.mxu1 %v12978_v49  ;;  %2397 = vmatpush2.msra.mxu0 %v948_v50  ;;  %v13037_v50 = vld [vmem:[%s18406_s3 + $0x378] sm:$0xff] }
 0x214   :  { %8819 = vmatpush3.msra.mxu1 %v12987_v30  ;;  %2398 = vmatprep.subr.mxu0 %v939_v53  ;;  %v908_v53 = vld [vmem:[%s18404_s1 + $0x1ad0] sm:$0xff] }
 0x215   :  { %8820 = vmatprep.subr.mxu1 %v12996_v46  ;;  %2399 = vmatpush2.msra.mxu0 %v938_v63  ;;  %v13046_v63 = vld [vmem:[%s18406_s3 + $0x3f0] sm:$0xff] }
 0x216   :  { %8821 = vmatpush3.msra.mxu1 %v13007_v9  ;;  %2400 = vmatprep.subr.mxu0 %v929_v13  ;;  %v13024_v37 = vpop.f32.mrf.mxu0  ;;  %18563 = vst [vmem:[#allocation12_spill] sm:$0xff] %v13046_v63  ;;  %v899_v13 = vld [vmem:[%s18404_s1 + $0x1a88] sm:$0xff] }
 0x217   :  { %2944 = vmatmul.mubr.f32.vlgmr.msra.gmra.mxu1 %v2674_v19  ;;  %2401 = vmatpush2.msra.mxu0 %v928_v17  ;;  %v13055_v17 = vld [vmem:[%s18406_s3 + $0x370] sm:$0xff]  ;;  %v1782_v19 = vadd.f32 %v1781_v47, %v1710_v20  ;;  %v13075_v20 = vld [vmem:[%s18406_s3 + $0x368] sm:$0xff] }
 0x218   :  { %2402 = vmatprep.subr.mxu0 %v919_v23  ;;  %v1852_v57 = vpop.f32.mrf.mxu0  ;;  %2416 = vmatprep.mubr.f32.mxu0 %v10500_v24  ;;  %v898_v24 = vld [vmem:[%s18404_s1 + $0x1a80] sm:$0xff]  ;;  %v13064_v23 = vld [vmem:[%s18406_s3 + $0x3e8] sm:$0xff]  ;;  %18565 = vst [vmem:[#allocation14_spill] sm:$0xff] %v13075_v20  ;;  %v888_v47 = vld [vmem:[%s18404_s1 + $0x1a30] sm:$0xff] }
 0x219   :  { %2403 = vmatpush2.msra.mxu0 %v918_v29  ;;  %8860 = vmatprep.subr.mxu1 %v13029_v40  ;;  %18564 = vst [vmem:[#allocation13_spill] sm:$0xff] %v13064_v23  ;;  %v889_v29 = vld [vmem:[%s18404_s1 + $0x1a38] sm:$0xff] }
 0x21a   :  { %2404 = vmatprep.subr.mxu0 %v909_v33  ;;  %8861 = vmatpush3.msra.mxu1 %v13037_v50  ;;  %v1853_v33 = vadd.f32 %v1852_v57, %v1782_v19  ;;  %v878_v57 = vld [vmem:[%s18404_s1 + $0x19e0] sm:$0xff] }
 0x21b   :  { %2405 = vmatpush2.msra.mxu0 %v908_v53  ;;  %v13069_v52 = vpop.f32.mrf.mxu0  ;;  %8862 = vmatprep.subr.mxu1 %v13046_v63  ;;  %v13084_v53 = vld [vmem:[%s18406_s3 + $0x3e0] sm:$0xff] }
 0x21c   :  { %2406 = vmatprep.subr.mxu0 %v899_v13  ;;  %8863 = vmatpush3.msra.mxu1 %v13055_v17  ;;  %18566 = vst [vmem:[#allocation15_spill] sm:$0xff] %v13084_v53  ;;  %v13093_v13 = vld [vmem:[%s18406_s3 + $0x360] sm:$0xff] }
 0x21d   :  { %2407 = vmatpush2.msra.mxu0 %v898_v24  ;;  %v1923_v63 = vpop.f32.mrf.mxu0  ;;  %8864 = vmatprep.subr.mxu1 %v13064_v23  ;;  %18567 = vst [vmem:[#allocation16_spill] sm:$0xff] %v13093_v13  ;;  %v13104_v24 = vld [vmem:[%s18406_s3 + $0x3d8] sm:$0xff] }
 0x21e   :  { %2408 = vmatprep.subr.mxu0 %v889_v29  ;;  %v13098_v19 = vadd.f32 %v1923_v63, %v1853_v33  ;;  %8865 = vmatpush3.msra.mxu1 %v13075_v20  ;;  %18569 = vst [vmem:[#allocation18_spill] sm:$0xff] %v13104_v24  ;;  %v869_v23 = vld [vmem:[%s18404_s1 + $0x1998] sm:$0xff]  ;;  %v868_v63 = vld [vmem:[%s18404_s1 + $0x1990] sm:$0xff] }
 0x21f   :  { %2409 = vmatpush2.msra.mxu0 %v888_v47  ;;  %8866 = vmatprep.subr.mxu1 %v13084_v53  ;;  %v13113_v29 = vld [vmem:[%s18406_s3 + $0x358] sm:$0xff]  ;;  %v13124_v47 = vld [vmem:[%s18406_s3 + $0x3d0] sm:$0xff] }
 0x220   :  { %18568 = vst [vmem:[#allocation17_spill] sm:$0xff] %v13098_v19  ;;  %18570 = vst [vmem:[#allocation19_spill] sm:$0xff] %v13113_v29  ;;  %2410 = vmatprep.subr.mxu0 %v879_v42  ;;  %v2689_v33 = vsel %vm2653_vm1, %v13098_v19, 0.0  ;;  %8867 = vmatpush3.msra.mxu1 %v13093_v13  ;;  %v859_v42 = vld [vmem:[%s18404_s1 + $0x1948] sm:$0xff]  ;;  %v13133_v20 = vld [vmem:[%s18406_s3 + $0x350] sm:$0xff] }
 0x221   :  { %2411 = vmatpush2.msra.mxu0 %v878_v57  ;;  %v2690_v53 = vrot.slane %v2689_v33, 4  ;;  %8868 = vmatprep.subr.mxu1 %v13104_v24  ;;  %18571 = vst [vmem:[#allocation20_spill] sm:$0xff] %v13133_v20  ;;  %v858_v19 = vld [vmem:[%s18404_s1 + $0x1940] sm:$0xff]  ;;  %v13142_v57 = vld [vmem:[%s18406_s3 + $0x3c8] sm:$0xff]  ;;  %v1029_v24 = vld [vmem:[%s18404_s1 + $0x1e98] sm:$0xff] }
 0x222   :  { %2412 = vmatprep.subr.mxu0 %v869_v23  ;;  %8869 = vmatpush3.msra.mxu1 %v13113_v29  ;;  %18572 = vst [vmem:[#allocation21_spill] sm:$0xff] %v13142_v57  ;;  %v1028_v23 = vld [vmem:[%s18404_s1 + $0x1e90] sm:$0xff]  ;;  %v1019_v29 = vld [vmem:[%s18404_s1 + $0x1e48] sm:$0xff] }
 0x223   :  { %2413 = vmatpush2.msra.mxu0 %v868_v63  ;;  %v2691_v13 = vadd.f32 %v2690_v53, %v2689_v33  ;;  %8870 = vmatprep.subr.mxu1 %v13124_v47  ;;  %v13159_v53 = vld [vmem:[%s18406_s3 + $0x348] sm:$0xff]  ;;  %v1018_v33 = vld [vmem:[%s18404_s1 + $0x1e40] sm:$0xff] }
 0x224   :  { %2414 = vmatprep.subr.mxu0 %v859_v42  ;;  %8871 = vmatpush3.msra.mxu1 %v13133_v20  ;;  %v18574_v42 = vmov 0.0  }
 0x225   :  { %2415 = vmatpush2.msra.mxu0 %v858_v19  ;;  %v2692_v63 = vrot.slane %v2691_v13, 2  ;;  %8872 = vmatprep.subr.mxu1 %v13142_v57  ;;  %v13168_v19 = vld [vmem:[%s18406_s3 + $0x3c0] sm:$0xff]  ;;  %v13174_v57 = vld [vmem:[%s18406_s3 + $0x2f8] sm:$0xff] }
 0x226   :  { %2417 = vmatmul.mubr.f32.vlgmr.msra.gmra.mxu0 %v10472_v15  ;;  %2451 = vmatprep.subr.mxu0 %v1029_v24  ;;  %18573 = vst [vmem:[#allocation22_spill] sm:$0xff] %v13168_v19  ;;  %v13179_v15 = vld [vmem:[%s18406_s3 + $0x278] sm:$0xff]  ;;  %v13185_v24 = vld [vmem:[%s18406_s3 + $0x340] sm:$0xff] }
 0x227   :  { %2452 = vmatpush1.msra.mxu0 %v1028_v23  ;;  %2487 = vmatprep.mubr.f32.mxu0 %v18574_v42  ;;  %v2693_v20 = vadd.f32 %v2692_v63, %v2691_v13  ;;  %18575 = vst [vmem:[#allocation23_spill] sm:$0xff] %v13179_v15  ;;  %v1780_v23 = vadd.f32 %v13001_v3, %v12972_v10  ;;  %v13192_v13 = vld [vmem:[%s18406_s3 + $0x2f0] sm:$0xff]  ;;  %v13198_v63 = vld [vmem:[%s18406_s3 + $0x3b8] sm:$0xff] }
 0x228   :  { %2453 = vmatprep.subr.mxu0 %v1019_v29  ;;  %8873 = vmatpush3.msra.mxu1 %v13159_v53  ;;  %18576 = vst [vmem:[#allocation24_spill] sm:$0xff] %v13192_v13  ;;  %18577 = vst [vmem:[#allocation25_spill] sm:$0xff] %v13198_v63  ;;  %v13206_v10 = vld [vmem:[%s18406_s3 + $0x270] sm:$0xff] }
 0x229   :  { %2454 = vmatpush1.msra.mxu0 %v1018_v33  ;;  %v2694_v29 = vrot.slane %v2693_v20, 1  ;;  %8874 = vmatprep.subr.mxu1 %v13168_v19  ;;  %18578 = vst [vmem:[#allocation26_spill] sm:$0xff] %v13206_v10  ;;  %v1851_v3 = vadd.f32 %v13024_v37, %v1780_v23  ;;  %v13213_v33 = vld [vmem:[%s18406_s3 + $0x2e8] sm:$0xff] }
 0x22a   :  { %8706 = vmatmul.mubr.msk.f32.vlgmr.msra.gmra.mxu0 %vm1071_vm0, %v10533_v35  ;;  %8825 = vmatprep.subr.mxu0 %v13174_v57  ;;  %18579 = vst [vmem:[#allocation27_spill] sm:$0xff] %v13213_v33  ;;  %v13219_v35 = vld [vmem:[%s18406_s3 + $0x338] sm:$0xff]  ;;  %v13225_v37 = vld [vmem:[%s18406_s3 + $0x268] sm:$0xff] }
 0x22b   :  { %8826 = vmatpush3.msra.mxu0 %v13179_v15  ;;  %v2695_v19 = vadd.f32 %v2694_v29, %v2693_v20  ;;  %8875 = vmatpush3.msra.mxu1 %v13185_v24  ;;  %18580 = vst [vmem:[#allocation28_spill] sm:$0xff] %v13219_v35  ;;  %18581 = vst [vmem:[#allocation29_spill] sm:$0xff] %v13225_v37  ;;  %v13231_v20 = vld [vmem:[%s18406_s3 + $0x3b0] sm:$0xff]  ;;  %v13234_v23 = vadd.f32 %v13069_v52, %v1851_v3  ;;  %v13240_v29 = vld [vmem:[%s18406_s3 + $0x2e0] sm:$0xff] }
 0x22c   :  { %8827 = vmatprep.subr.mxu0 %v13192_v13  ;;  %8876 = vmatprep.subr.mxu1 %v13198_v63  ;;  %18582 = vst [vmem:[#allocation30_spill] sm:$0xff] %v13231_v20  ;;  %18584 = vst [vmem:[#allocation32_spill] sm:$0xff] %v13240_v29  ;;  %v13245_v13 = vld [vmem:[%s18406_s3 + $0x330] sm:$0xff]  ;;  %v13251_v52 = vld [vmem:[%s18406_s3 + $0x260] sm:$0xff] }
 0x22d   :  { %18583 = vst [vmem:[#allocation31_spill] sm:$0xff] %v13234_v23  ;;  %8828 = vmatpush3.msra.mxu0 %v13206_v10  ;;  %3013 = vmatprep.mubr.f32.mxu0 %v2695_v19  ;;  %18585 = vst [vmem:[#allocation33_spill] sm:$0xff] %v13245_v13  ;;  %v13257_v3 = vld [vmem:[%s18406_s3 + $0x3a8] sm:$0xff]  ;;  %v13263_v19 = vld [vmem:[%s18406_s3 + $0x2d8] sm:$0xff]  ;;  %v2682_v15 = vsel %vm2653_vm1, %v13234_v23, 0.0 }
 0x22e   :  { %8829 = vmatprep.subr.mxu0 %v13213_v33  ;;  %18586 = vst [vmem:[#allocation34_spill] sm:$0xff] %v13251_v52  ;;  %8877 = vmatpush3.msra.mxu1 %v13219_v35  ;;  %18587 = vst [vmem:[#allocation35_spill] sm:$0xff] %v13257_v3  ;;  %v13269_v33 = vld [vmem:[%s18406_s3 + $0x328] sm:$0xff]  ;;  %v13275_v10 = vld [vmem:[%s18406_s3 + $0x258] sm:$0xff] }
 0x22f   :  { %8830 = vmatpush3.msra.mxu0 %v13225_v37  ;;  %18588 = vst [vmem:[#allocation36_spill] sm:$0xff] %v13263_v19  ;;  %8878 = vmatprep.subr.mxu1 %v13231_v20  ;;  %18589 = vst [vmem:[#allocation37_spill] sm:$0xff] %v13269_v33  ;;  %v13281_v37 = vld [vmem:[%s18406_s3 + $0x3a0] sm:$0xff]  ;;  %v13301_v23 = vld [vmem:[%s18406_s3 + $0x250] sm:$0xff] }
 0x230   :  { %8831 = vmatprep.subr.mxu0 %v13240_v29  ;;  %18590 = vst [vmem:[#allocation38_spill] sm:$0xff] %v13275_v10  ;;  %8879 = vmatpush3.msra.mxu1 %v13245_v13  ;;  %18591 = vst [vmem:[#allocation39_spill] sm:$0xff] %v13281_v37  ;;  %v13289_v29 = vld [vmem:[%s18406_s3 + $0x2d0] sm:$0xff]  ;;  %v13295_v13 = vld [vmem:[%s18406_s3 + $0x320] sm:$0xff] }
 0x231   :  { %8832 = vmatpush3.msra.mxu0 %v13251_v52  ;;  %18592 = vst [vmem:[#allocation40_spill] sm:$0xff] %v13289_v29  ;;  %8880 = vmatprep.subr.mxu1 %v13257_v3  ;;  %18593 = vst [vmem:[#allocation41_spill] sm:$0xff] %v13295_v13  ;;  %v13307_v52 = vld [vmem:[%s18406_s3 + $0x398] sm:$0xff]  ;;  %v13313_v3 = vld [vmem:[%s18406_s3 + $0x2c8] sm:$0xff] }
 0x232   :  { %8833 = vmatprep.subr.mxu0 %v13263_v19  ;;  %18594 = vst [vmem:[#allocation42_spill] sm:$0xff] %v13301_v23  ;;  %8881 = vmatpush3.msra.mxu1 %v13269_v33  ;;  %18595 = vst [vmem:[#allocation43_spill] sm:$0xff] %v13307_v52  ;;  %v13319_v19 = vld [vmem:[%s18406_s3 + $0x318] sm:$0xff]  ;;  %v2683_v33 = vrot.slane %v2682_v15, 4  ;;  %v13325_v20 = vld [vmem:[%s18406_s3 + $0x248] sm:$0xff] }
 0x233   :  { %8834 = vmatpush3.msra.mxu0 %v13275_v10  ;;  %18596 = vst [vmem:[#allocation44_spill] sm:$0xff] %v13313_v3  ;;  %8882 = vmatprep.subr.mxu1 %v13281_v37  ;;  %18597 = vst [vmem:[#allocation45_spill] sm:$0xff] %v13319_v19  ;;  %v13331_v10 = vld [vmem:[%s18406_s3 + $0x390] sm:$0xff]  ;;  %v13337_v37 = vld [vmem:[%s18406_s3 + $0x2c0] sm:$0xff] }
 0x234   :  { %8835 = vmatprep.subr.mxu0 %v13289_v29  ;;  %18598 = vst [vmem:[#allocation46_spill] sm:$0xff] %v13325_v20  ;;  %8883 = vmatpush3.msra.mxu1 %v13295_v13  ;;  %18599 = vst [vmem:[#allocation47_spill] sm:$0xff] %v13331_v10  ;;  %v13343_v29 = vld [vmem:[%s18406_s3 + $0x310] sm:$0xff]  ;;  %v13349_v13 = vld [vmem:[%s18406_s3 + $0x240] sm:$0xff] }
 0x235   :  { %8836 = vmatpush3.msra.mxu0 %v13301_v23  ;;  %18600 = vst [vmem:[#allocation48_spill] sm:$0xff] %v13337_v37  ;;  %8884 = vmatprep.subr.mxu1 %v13307_v52  ;;  %18601 = vst [vmem:[#allocation49_spill] sm:$0xff] %v13343_v29  ;;  %v13355_v23 = vld [vmem:[%s18406_s3 + $0x388] sm:$0xff]  ;;  %v13361_v52 = vld [vmem:[%s18406_s3 + $0x2b8] sm:$0xff] }
 0x236   :  { %8837 = vmatprep.subr.mxu0 %v13313_v3  ;;  %18602 = vst [vmem:[#allocation50_spill] sm:$0xff] %v13349_v13  ;;  %8885 = vmatpush3.msra.mxu1 %v13319_v19  ;;  %18603 = vst [vmem:[#allocation51_spill] sm:$0xff] %v13355_v23  ;;  %v13367_v3 = vld [vmem:[%s18406_s3 + $0x308] sm:$0xff]  ;;  %v2684_v19 = vadd.f32 %v2683_v33, %v2682_v15  ;;  %v13373_v35 = vld [vmem:[%s18406_s3 + $0x238] sm:$0xff] }
 0x237   :  { %8838 = vmatpush3.msra.mxu0 %v13325_v20  ;;  %18604 = vst [vmem:[#allocation52_spill] sm:$0xff] %v13361_v52  ;;  %8886 = vmatprep.subr.mxu1 %v13331_v10  ;;  %18605 = vst [vmem:[#allocation53_spill] sm:$0xff] %v13367_v3  ;;  %v13379_v20 = vld [vmem:[%s18406_s3 + $0x380] sm:$0xff]  ;;  %v13385_v15 = vld [vmem:[%s18406_s3 + $0x2b0] sm:$0xff] }
 0x238   :  { %8839 = vmatprep.subr.mxu0 %v13337_v37  ;;  %18606 = vst [vmem:[#allocation54_spill] sm:$0xff] %v13373_v35  ;;  %8887 = vmatpush3.msra.mxu1 %v13343_v29  ;;  %18607 = vst [vmem:[#allocation55_spill] sm:$0xff] %v13379_v20  ;;  %v13391_v33 = vld [vmem:[%s18406_s3 + $0x300] sm:$0xff]  ;;  %v13397_v37 = vld [vmem:[%s18406_s3 + $0x230] sm:$0xff] }
 0x239   :  { %8840 = vmatpush3.msra.mxu0 %v13349_v13  ;;  %18608 = vst [vmem:[#allocation56_spill] sm:$0xff] %v13385_v15  ;;  %8888 = vmatprep.subr.mxu1 %v13355_v23  ;;  %18609 = vst [vmem:[#allocation57_spill] sm:$0xff] %v13391_v33  ;;  %v13404_v13 = vld [vmem:[%s18406_s3 + $0x2a8] sm:$0xff]  ;;  %v2685_v23 = vrot.slane %v2684_v19, 2 }
 0x23a   :  { %8841 = vmatprep.subr.mxu0 %v13361_v52  ;;  %18610 = vst [vmem:[#allocation58_spill] sm:$0xff] %v13397_v37  ;;  %8889 = vmatpush3.msra.mxu1 %v13367_v3  ;;  %18611 = vst [vmem:[#allocation59_spill] sm:$0xff] %v13404_v13  ;;  %v13411_v52 = vld [vmem:[%s18406_s3 + $0x228] sm:$0xff]  ;;  %v13518_v3 = vld [vmem:[%s18406_s3 + $0x450] sm:$0xff] }
 0x23b   :  { %8842 = vmatpush3.msra.mxu0 %v13373_v35  ;;  %8890 = vmatprep.subr.mxu1 %v13379_v20  ;;  %18612 = vst [vmem:[#allocation60_spill] sm:$0xff] %v13411_v52  ;;  %v13418_v35 = vld [vmem:[%s18406_s3 + $0x2a0] sm:$0xff]  ;;  %18627 = vst [vmem:[#allocation75_spill] sm:$0xff] %v13518_v3 }
 0x23c   :  { %8843 = vmatprep.subr.mxu0 %v13385_v15  ;;  %8891 = vmatpush3.msra.mxu1 %v13391_v33  ;;  %18613 = vst [vmem:[#allocation61_spill] sm:$0xff] %v13418_v35  ;;  %v13425_v15 = vld [vmem:[%s18406_s3 + $0x220] sm:$0xff]  ;;  %v2686_v33 = vadd.f32 %v2685_v23, %v2684_v19  ;;  %v13449_v23 = vld [vmem:[%s18406_s3 + $0x210] sm:$0xff]  ;;  %v13455_v19 = vld [vmem:[%s18406_s3 + $0x288] sm:$0xff] }
 0x23d   :  { %8844 = vmatpush3.msra.mxu0 %v13397_v37  ;;  %8895 = vmatprep.subr.mxu1 %v12487_v38  ;;  %18614 = vst [vmem:[#allocation62_spill] sm:$0xff] %v13425_v15  ;;  %v13431_v37 = vld [vmem:[%s18406_s3 + $0x298] sm:$0xff]  ;;  %18618 = vst [vmem:[#allocation66_spill] sm:$0xff] %v13449_v23 }
 0x23e   :  { %8845 = vmatprep.subr.mxu0 %v13404_v13  ;;  %18615 = vst [vmem:[#allocation63_spill] sm:$0xff] %v13431_v37  ;;  %v13437_v38 = vld [vmem:[%s18406_s3 + $0x218] sm:$0xff]  ;;  %v13443_v13 = vld [vmem:[%s18406_s3 + $0x290] sm:$0xff]  ;;  %18619 = vst [vmem:[#allocation67_spill] sm:$0xff] %v13455_v19 }
 0x23f   :  { %8846 = vmatpush3.msra.mxu0 %v13411_v52  ;;  %18616 = vst [vmem:[#allocation64_spill] sm:$0xff] %v13437_v38  ;;  %18617 = vst [vmem:[#allocation65_spill] sm:$0xff] %v13443_v13 }
 0x240   :  { %8847 = vmatprep.subr.mxu0 %v13418_v35  ;;  %v13467_v35 = vld [vmem:[%s18406_s3 + $0x280] sm:$0xff] }
 0x241   :  { %8848 = vmatpush3.msra.mxu0 %v13425_v15  ;;  %v13461_v15 = vld [vmem:[%s18406_s3 + $0x208] sm:$0xff]  ;;  %18621 = vst [vmem:[#allocation69_spill] sm:$0xff] %v13467_v35 }
 0x242   :  { %8849 = vmatprep.subr.mxu0 %v13431_v37  ;;  %18620 = vst [vmem:[#allocation68_spill] sm:$0xff] %v13461_v15  ;;  %v2687_v37 = vrot.slane %v2686_v33, 1 }
 0x243   :  { %8850 = vmatpush3.msra.mxu0 %v13437_v38  ;;  %v13473_v38 = vld [vmem:[%s18406_s3 + $0x200] sm:$0xff] }
 0x244   :  { %8851 = vmatprep.subr.mxu0 %v13443_v13  ;;  %18622 = vst [vmem:[#allocation70_spill] sm:$0xff] %v13473_v38  ;;  %v2688_v13 = vadd.f32 %v2687_v37, %v2686_v33  ;;  %v13498_v33 = vld [vmem:[%s18406_s3 + $0x468] sm:$0xff] }
 0x245   :  { %8852 = vmatpush3.msra.mxu0 %v13449_v23  ;;  %v1992_v23 = vpop.f32.mrf.mxu1  ;;  %18625 = vst [vmem:[#allocation73_spill] sm:$0xff] %v13498_v33 }
 0x246   :  { %8853 = vmatprep.subr.mxu0 %v13455_v19  ;;  %v13482_v19 = vld [vmem:[%s18406_s3 + $0x478] sm:$0xff] }
 0x247   :  { %8854 = vmatpush3.msra.mxu0 %v13461_v15  ;;  %v1994_v52 = vpop.f32.mrf.mxu1  ;;  %18623 = vst [vmem:[#allocation71_spill] sm:$0xff] %v13482_v19  ;;  %v2726_v15 = vmul.f32 %v12333_v27, %v12333_v27  ;;  %v13504_v27 = vld [vmem:[%s18406_s3 + $0x460] sm:$0xff] }
 0x248   :  { %8855 = vmatprep.subr.mxu0 %v13467_v35  ;;  %18626 = vst [vmem:[#allocation74_spill] sm:$0xff] %v13504_v27 }
 0x249   :  { %8856 = vmatpush3.msra.mxu0 %v13473_v38 }
 0x24a   :  { %3014 = vmatmul.mubr.f32.vlgmr.msra.gmra.mxu0 %v2688_v13  ;;  %3089 = vmatprep.subr.mxu0 %v18574_v42  ;;  %v13491_v13 = vld [vmem:[%s18406_s3 + $0x470] sm:$0xff] }
 0x24b   :  { %3090 = vmatpush1.msra.mxu0 %v13482_v19  ;;  %18624 = vst [vmem:[#allocation72_spill] sm:$0xff] %v13491_v13  ;;  %v2742_v19 = vsel %vm2653_vm1, %v2726_v15, 0.0 }
 0x24c   :  { %3091 = vmatprep.subr.mxu0 %v18574_v42  ;;  %v2743_v15 = vrot.slane %v2742_v19, 4 }
 0x24d   :  { %3092 = vmatpush1.msra.mxu0 %v13491_v13  ;;  %v13511_v13 = vld [vmem:[%s18406_s3 + $0x458] sm:$0xff] }
 0x24e   :  { %3093 = vmatprep.subr.mxu0 %v18574_v42 }
 0x24f   :  { %3094 = vmatpush1.msra.mxu0 %v13498_v33 }
 0x250   :  { %3095 = vmatprep.subr.mxu0 %v18574_v42 }
 0x251   :  { %3096 = vmatpush1.msra.mxu0 %v13504_v27 }
 0x252   :  { %v2134_v37 = vpop.f32.mrf.mxu1  ;;  %3097 = vmatprep.subr.mxu0 %v18574_v42 }
 0x253   :  { %3098 = vmatpush1.msra.mxu0 %v13511_v13 }
 0x254   :  { %v2136_v33 = vpop.f32.mrf.mxu1  ;;  %3099 = vmatprep.subr.mxu0 %v18574_v42 }
 0x255   :  { %3100 = vmatpush1.msra.mxu0 %v13518_v3 }
 0x256   :  { %3101 = vmatprep.subr.mxu0 %v18574_v42 }
 0x25d   :  { %v2063_v38 = vpop.f32.mrf.mxu0 }
 0x25e   :  { %v2064_v35 = vadd.f32 %v2063_v38, %v1992_v23  ;;  %v13525_v38 = vld [vmem:[%s18406_s3 + $0x448] sm:$0xff] }
 0x25f   :  { %v2065_v20 = vpop.f32.mrf.mxu0  ;;  %18628 = vst [vmem:[#allocation76_spill] sm:$0xff] %v13525_v38  ;;  %3102 = vmatpush1.msra.mxu0 %v13525_v38 }
 0x260   :  { %v2066_v29 = vadd.f32 %v2065_v20, %v1994_v52  ;;  %v2135_v10 = vadd.f32 %v2134_v37, %v2064_v35  ;;  %v13534_v35 = vld [vmem:[%s18406_s3 + $0x440] sm:$0xff]  ;;  %v2744_v52 = vadd.f32 %v2743_v15, %v2742_v19  ;;  %3103 = vmatprep.subr.mxu0 %v18574_v42  ;;  %v13549_v19 = vld [vmem:[%s18406_s3 + $0x438] sm:$0xff] }
 0x261   :  { %18629 = vst [vmem:[#allocation77_spill] sm:$0xff] %v13534_v35  ;;  %3104 = vmatpush1.msra.mxu0 %v13534_v35  ;;  %18630 = vst [vmem:[#allocation78_spill] sm:$0xff] %v13549_v19 }
 0x262   :  { %v2137_v23 = vadd.f32 %v2136_v33, %v2066_v29  ;;  %v2205_v27 = vpop.f32.mrf.mxu0  ;;  %3105 = vmatprep.subr.mxu0 %v18574_v42  ;;  %v2745_v38 = vrot.slane %v2744_v52, 2 }
 0x263   :  { %v13528_v63 = vadd.f32 %v2205_v27, %v2135_v10  ;;  %3106 = vmatpush1.msra.mxu0 %v13549_v19 }
 0x264   :  { %v2207_v20 = vpop.f32.mrf.mxu0  ;;  %3107 = vmatprep.subr.mxu0 %v18574_v42  ;;  %v2746_v3 = vadd.f32 %v2745_v38, %v2744_v52 }
 0x265   :  { %v2696_v37 = vsel %vm2653_vm1, %v13528_v63, 0.0  ;;  %v13539_v29 = vadd.f32 %v2207_v20, %v2137_v23  ;;  %v13556_v23 = vld [vmem:[%s18406_s3 + $0x430] sm:$0xff] }
 0x266   :  { %v2697_v27 = vrot.slane %v2696_v37, 4  ;;  %18631 = vst [vmem:[#allocation79_spill] sm:$0xff] %v13556_v23  ;;  %3108 = vmatpush1.msra.mxu0 %v13556_v23  ;;  %v2747_v52 = vrot.slane %v2746_v3, 1 }
 0x267   :  { %v2703_v10 = vsel %vm2653_vm1, %v13539_v29, 0.0  ;;  %3109 = vmatprep.subr.mxu0 %v18574_v42 }
 0x268   :  { %v2698_v33 = vadd.f32 %v2697_v27, %v2696_v37  ;;  %v2704_v15 = vrot.slane %v2703_v10, 4  ;;  %v13563_v37 = vld [vmem:[%s18406_s3 + $0x428] sm:$0xff] }
 0x269   :  { %3110 = vmatpush1.msra.mxu0 %v13563_v37 }
 0x26a   :  { %v2699_v20 = vrot.slane %v2698_v33, 2  ;;  %v2705_v35 = vadd.f32 %v2704_v15, %v2703_v10  ;;  %3111 = vmatprep.subr.mxu0 %v18574_v42  ;;  %v13570_v10 = vld [vmem:[%s18406_s3 + $0x420] sm:$0xff] }
 0x26b   :  { %18632 = vst [vmem:[#allocation80_spill] sm:$0xff] %v13570_v10  ;;  %3112 = vmatpush1.msra.mxu0 %v13570_v10  ;;  %v13591_v10 = vld [vmem:[%s18406_s3 + $0x408] sm:$0xff] }
 0x26c   :  { %v2700_v27 = vadd.f32 %v2699_v20, %v2698_v33  ;;  %v2706_v19 = vrot.slane %v2705_v35, 2  ;;  %3113 = vmatprep.subr.mxu0 %v18574_v42  ;;  %v13577_v33 = vld [vmem:[%s18406_s3 + $0x418] sm:$0xff] }
 0x26d   :  { %18633 = vst [vmem:[#allocation81_spill] sm:$0xff] %v13577_v33  ;;  %3114 = vmatpush1.msra.mxu0 %v13577_v33  ;;  %v2748_v33 = vadd.f32 %v2747_v52, %v2746_v3  ;;  %v13606_v3 = vld [vmem:[%s18406_s3 + $0x490] sm:$0xff] }
 0x26e   :  { %v2707_v15 = vadd.f32 %v2706_v19, %v2705_v35  ;;  %v2701_v23 = vrot.slane %v2700_v27, 1  ;;  %3115 = vmatprep.subr.mxu0 %v18574_v42  ;;  %v13584_v35 = vld [vmem:[%s18406_s3 + $0x410] sm:$0xff] }
 0x26f   :  { %3116 = vmatpush1.msra.mxu0 %v13584_v35  ;;  %v9557_v52 = vld [vmem:[%s18406_s3 + $0x70] sm:$0xff] }
 0x270   :  { %v2708_v38 = vrot.slane %v2707_v15, 1  ;;  %v2702_v20 = vadd.f32 %v2701_v23, %v2700_v27  ;;  %3117 = vmatprep.subr.mxu0 %v18574_v42  ;;  %v9555_v23 = vld [vmem:[%s18406_s3 + $0x78] sm:$0xff]  ;;  %v9556_v27 = vld [vmem:[%s18406_s3 + $0xf0] sm:$0xff] }
 0x271   :  { %3118 = vmatpush1.msra.mxu0 %v13591_v10 }
 0x272   :  { %v2709_v19 = vadd.f32 %v2708_v38, %v2707_v15  ;;  %3119 = vmatprep.subr.mxu0 %v18574_v42  ;;  %v13598_v15 = vld [vmem:[%s18406_s3 + $0x400] sm:$0xff]  ;;  %v2725_v38 = vmul.f32 %v12537_v59, %v12537_v59 }
 0x273   :  { %3120 = vmatpush1.msra.mxu0 %v13598_v15 }
 0x274   :  { %3083 = vmatprep.mubr.f32.mxu1 %v2709_v19  ;;  %3147 = vmatprep.subr.mxu0 %v18574_v42  ;;  %v2728_v19 = vmul.f32 %v12551_v0, %v12551_v0  ;;  %v9562_v0 = vld [vmem:[%s18406_s3 + $0xd8] sm:$0xff] }
 0x275   :  { %3084 = vmatmul.mubr.f32.vlgmr.msra.gmra.mxu1 %v2702_v20  ;;  %v9558_v20 = vld [vmem:[%s18406_s3 + $0xe8] sm:$0xff]  ;;  %3148 = vmatpush2.msra.mxu0 %v13606_v3 }
 0x276   :  { %8896 = vmatpush3.msra.mxu1 %v9555_v23  ;;  %3226 = vmatprep.mubr.f32.mxu1 %v2748_v33  ;;  %v13621_v33 = vld [vmem:[%s18406_s3 + $0x488] sm:$0xff]  ;;  %v2756_v59 = vsel %vm2653_vm1, %v2728_v19, 0.0 }
 0x277   :  { %8897 = vmatprep.subr.mxu1 %v9556_v27  ;;  %18634 = vst [vmem:[#allocation82_spill] sm:$0xff] %v13621_v33  ;;  %v9559_v23 = vld [vmem:[%s18406_s3 + $0x68] sm:$0xff]  ;;  %3149 = vmatprep.subr.mxu0 %v18574_v42  ;;  %v13636_v27 = vld [vmem:[%s18406_s3 + $0x480] sm:$0xff]  ;;  %v2757_v19 = vrot.slane %v2756_v59, 4 }
 0x278   :  { %8898 = vmatpush3.msra.mxu1 %v9557_v52  ;;  %18635 = vst [vmem:[#allocation83_spill] sm:$0xff] %v13636_v27  ;;  %v9560_v52 = vld [vmem:[%s18406_s3 + $0xe0] sm:$0xff]  ;;  %3150 = vmatpush2.msra.mxu0 %v13621_v33 }
 0x279   :  { %8899 = vmatprep.subr.mxu1 %v9558_v20  ;;  %v2735_v20 = vsel %vm2653_vm1, %v2725_v38, 0.0  ;;  %3151 = vmatprep.subr.mxu0 %v18574_v42  ;;  %v9563_v38 = vld [vmem:[%s18406_s3 + $0x58] sm:$0xff]  ;;  %v2758_v33 = vadd.f32 %v2757_v19, %v2756_v59  ;;  %v9573_v59 = vld [vmem:[%s18406_s3 + $0x30] sm:$0xff] }
 0x27a   :  { %8900 = vmatpush3.msra.mxu1 %v9559_v23  ;;  %v9561_v23 = vld [vmem:[%s18406_s3 + $0x60] sm:$0xff]  ;;  %3152 = vmatpush2.msra.mxu0 %v13636_v27  ;;  %v9566_v27 = vld [vmem:[%s18406_s3 + $0xc8] sm:$0xff] }
 0x27b   :  { %8901 = vmatprep.subr.mxu1 %v9560_v52  ;;  %8965 = vmatprep.subr.mxu0 %v13174_v57  ;;  %v2736_v52 = vrot.slane %v2735_v20, 4  ;;  %v9567_v57 = vld [vmem:[%s18406_s3 + $0x48] sm:$0xff]  ;;  %v2759_v19 = vrot.slane %v2758_v33, 2 }
 0x27c   :  { %8902 = vmatpush3.msra.mxu1 %v9561_v23  ;;  %v9564_v23 = vld [vmem:[%s18406_s3 + $0xd0] sm:$0xff] }
 0x27d   :  { %8903 = vmatprep.subr.mxu1 %v9562_v0  ;;  %v9565_v0 = vld [vmem:[%s18406_s3 + $0x50] sm:$0xff] }
 0x27e   :  { %8904 = vmatpush3.msra.mxu1 %v9563_v38  ;;  %v2737_v38 = vadd.f32 %v2736_v52, %v2735_v20  ;;  %v9571_v20 = vld [vmem:[%s18406_s3 + $0x38] sm:$0xff] }
 0x27f   :  { %8905 = vmatprep.subr.mxu1 %v9564_v23  ;;  %v9568_v23 = vld [vmem:[%s18406_s3 + $0xc0] sm:$0xff] }
 0x280   :  { %8906 = vmatpush3.msra.mxu1 %v9565_v0  ;;  %v9569_v0 = vld [vmem:[%s18406_s3 + $0x40] sm:$0xff]  ;;  %v2738_v52 = vrot.slane %v2737_v38, 2 }
 0x281   :  { %8907 = vmatprep.subr.mxu1 %v9566_v27  ;;  %v9570_v27 = vld [vmem:[%s18406_s3 + $0xb8] sm:$0xff] }
 0x282   :  { %8908 = vmatpush3.msra.mxu1 %v9567_v57  ;;  %v9572_v57 = vld [vmem:[%s18406_s3 + $0xb0] sm:$0xff] }
 0x283   :  { %8909 = vmatprep.subr.mxu1 %v9568_v23  ;;  %v9574_v23 = vld [vmem:[%s18406_s3 + $0xa8] sm:$0xff] }
 0x284   :  { %8910 = vmatpush3.msra.mxu1 %v9569_v0  ;;  %v9575_v0 = vld [vmem:[%s18406_s3 + $0x28] sm:$0xff] }
 0x285   :  { %8911 = vmatprep.subr.mxu1 %v9570_v27  ;;  %v9576_v27 = vld [vmem:[%s18406_s3 + $0xa0] sm:$0xff] }
 0x286   :  { %8912 = vmatpush3.msra.mxu1 %v9571_v20  ;;  %v2739_v20 = vadd.f32 %v2738_v52, %v2737_v38 }
 0x287   :  { %8913 = vmatprep.subr.mxu1 %v9572_v57  ;;  %v9577_v57 = vld [vmem:[%s18406_s3 + $0x20] sm:$0xff] }
 0x288   :  { %8914 = vmatpush3.msra.mxu1 %v9573_v59  ;;  %v2760_v59 = vadd.f32 %v2759_v19, %v2758_v33  ;;  %v18657_v19 = vld [vmem:[#allocation49_spill] sm:$0xff] }
 0x289   :  { %8915 = vmatprep.subr.mxu1 %v9574_v23  ;;  %v9578_v23 = vld [vmem:[%s18406_s3 + $0x98] sm:$0xff] }
 0x28a   :  { %8916 = vmatpush3.msra.mxu1 %v9575_v0  ;;  %v9579_v0 = vld [vmem:[%s18406_s3 + $0x18] sm:$0xff]  ;;  %v2761_v38 = vrot.slane %v2760_v59, 1 }
 0x28b   :  { %8917 = vmatprep.subr.mxu1 %v9576_v27  ;;  %v2740_v27 = vrot.slane %v2739_v20, 1 }
 0x28c   :  { %8918 = vmatpush3.msra.mxu1 %v9577_v57  ;;  %v2762_v52 = vadd.f32 %v2761_v38, %v2760_v59  ;;  %v18659_v57 = vld [vmem:[#allocation53_spill] sm:$0xff]  ;;  %v18660_v59 = vld [vmem:[#allocation55_spill] sm:$0xff] }
 0x28d   :  { %8919 = vmatprep.subr.mxu1 %v9578_v23  ;;  %v2741_v33 = vadd.f32 %v2740_v27, %v2739_v20  ;;  %v18658_v20 = vld [vmem:[#allocation51_spill] sm:$0xff]  ;;  %v18662_v38 = vld [vmem:[#allocation17_spill] sm:$0xff] }
 0x28e   :  { %8920 = vmatpush3.msra.mxu1 %v9579_v0  ;;  %v18661_v0 = vld [vmem:[#allocation57_spill] sm:$0xff] }
 0x28f   :  { %8921 = vmatprep.subr.mxu1 %v12664_v55  ;;  %v2727_v55 = vmul.f32 %v12770_v31, %v12770_v31 }
 0x290   :  { %8922 = vmatpush3.msra.mxu1 %v12672_v58  ;;  %v2732_v58 = vmul.f32 %v13539_v29, %v13539_v29 }
 0x291   :  { %8923 = vmatprep.subr.mxu1 %v12680_v61  ;;  %v2749_v61 = vsel %vm2653_vm1, %v2727_v55, 0.0 }
 0x292   :  { %8924 = vmatpush3.msra.mxu1 %v12689_v5  ;;  %v2784_v5 = vsel %vm2653_vm1, %v2732_v58, 0.0 }
 0x293   :  { %8925 = vmatprep.subr.mxu1 %v12698_v4  ;;  %v2750_v4 = vrot.slane %v2749_v61, 4 }
 0x294   :  { %8926 = vmatpush3.msra.mxu1 %v12709_v11  ;;  %v2785_v11 = vrot.slane %v2784_v5, 4 }
 0x295   :  { %3227 = vmatmul.mubr.f32.vlgmr.msra.gmra.mxu1 %v2741_v33  ;;  %8930 = vmatprep.subr.mxu1 %v12718_v6  ;;  %v2751_v6 = vadd.f32 %v2750_v4, %v2749_v61  ;;  %v2730_v33 = vmul.f32 %v18662_v38, %v18662_v38 }
 0x296   :  { %8931 = vmatpush3.msra.mxu1 %v12727_v16  ;;  %3296 = vmatprep.mubr.f32.mxu1 %v2762_v52  ;;  %v2786_v16 = vadd.f32 %v2785_v11, %v2784_v5  ;;  %v2347_v52 = vpop.f32.mrf.mxu1 }
 0x297   :  { %8932 = vmatprep.subr.mxu1 %v12738_v21  ;;  %v2752_v21 = vrot.slane %v2751_v6, 2  ;;  %v2770_v58 = vsel %vm2653_vm1, %v2730_v33, 0.0  ;;  %v18675_v33 = vld [vmem:[#allocation44_spill] sm:$0xff] }
 0x298   :  { %8933 = vmatpush3.msra.mxu1 %v12747_v34  ;;  %v2787_v34 = vrot.slane %v2786_v16, 2  ;;  %v2349_v61 = vpop.f32.mrf.mxu1  ;;  %v2771_v11 = vrot.slane %v2770_v58, 4 }
 0x299   :  { %8934 = vmatprep.subr.mxu1 %v12755_v25  ;;  %v2753_v25 = vadd.f32 %v2752_v21, %v2751_v6 }
 0x29a   :  { %8935 = vmatpush3.msra.mxu1 %v12764_v28  ;;  %v2788_v28 = vadd.f32 %v2787_v34, %v2786_v16 }
 0x29b   :  { %8936 = vmatprep.subr.mxu1 %v12776_v32  ;;  %v2754_v32 = vrot.slane %v2753_v25, 1 }
 0x29c   :  { %8937 = vmatpush3.msra.mxu1 %v12785_v45  ;;  %v2789_v45 = vrot.slane %v2788_v28, 1 }
 0x29d   :  { %8938 = vmatprep.subr.mxu1 %v12794_v8  ;;  %v2755_v8 = vadd.f32 %v2754_v32, %v2753_v25 }
 0x29e   :  { %8939 = vmatpush3.msra.mxu1 %v12803_v39  ;;  %v2790_v39 = vadd.f32 %v2789_v45, %v2788_v28  ;;  %v2772_v45 = vadd.f32 %v2771_v11, %v2770_v58 }
 0x29f   :  { %8940 = vmatprep.subr.mxu1 %v12814_v41  ;;  %v18636_v41 = vld [vmem:[#allocation12_spill] sm:$0xff] }
 0x2a0   :  { %8941 = vmatpush3.msra.mxu1 %v12823_v44  ;;  %v2731_v44 = vmul.f32 %v13528_v63, %v13528_v63 }
 0x2a1   :  { %8942 = vmatprep.subr.mxu1 %v12832_v48  ;;  %v18637_v48 = vld [vmem:[#allocation13_spill] sm:$0xff] }
 0x2a2   :  { %8943 = vmatpush3.msra.mxu1 %v12841_v1  ;;  %v18638_v1 = vld [vmem:[#allocation14_spill] sm:$0xff] }
 0x2a3   :  { %8944 = vmatprep.subr.mxu1 %v12850_v51  ;;  %v18639_v51 = vld [vmem:[#allocation15_spill] sm:$0xff] }
 0x2a4   :  { %8945 = vmatpush3.msra.mxu1 %v12859_v56  ;;  %v2777_v56 = vsel %vm2653_vm1, %v2731_v44, 0.0 }
 0x2a5   :  { %8946 = vmatprep.subr.mxu1 %v12868_v54  ;;  %v18640_v54 = vld [vmem:[#allocation16_spill] sm:$0xff]  ;;  %v2276_v27 = vpop.f32.mrf.mxu0 }
 0x2a6   :  { %8947 = vmatpush3.msra.mxu1 %v12877_v60  ;;  %v18641_v60 = vld [vmem:[#allocation18_spill] sm:$0xff]  ;;  %v2348_v4 = vadd.f32 %v2347_v52, %v2276_v27 }
 0x2a7   :  { %8948 = vmatprep.subr.mxu1 %v12886_v2  ;;  %v18642_v2 = vld [vmem:[#allocation19_spill] sm:$0xff]  ;;  %v2278_v55 = vpop.f32.mrf.mxu0  ;;  %v18674_v27 = vld [vmem:[#allocation42_spill] sm:$0xff] }
 0x2a8   :  { %8949 = vmatpush3.msra.mxu1 %v12895_v7  ;;  %v2778_v7 = vrot.slane %v2777_v56, 4  ;;  %v2350_v16 = vadd.f32 %v2349_v61, %v2278_v55  ;;  %v18676_v52 = vld [vmem:[#allocation46_spill] sm:$0xff]  ;;  %v18677_v61 = vld [vmem:[#allocation48_spill] sm:$0xff] }
 0x2a9   :  { %8950 = vmatprep.subr.mxu1 %v12904_v12  ;;  %v18643_v12 = vld [vmem:[#allocation20_spill] sm:$0xff] }
 0x2aa   :  { %8951 = vmatpush3.msra.mxu1 %v12913_v14  ;;  %v18644_v14 = vld [vmem:[#allocation21_spill] sm:$0xff] }
 0x2ab   :  { %8952 = vmatprep.subr.mxu1 %v12922_v18  ;;  %v2779_v18 = vadd.f32 %v2778_v7, %v2777_v56 }
 0x2ac   :  { %8953 = vmatpush3.msra.mxu1 %v12931_v22  ;;  %v18645_v22 = vld [vmem:[#allocation22_spill] sm:$0xff] }
 0x2ad   :  { %8954 = vmatprep.subr.mxu1 %v12940_v26  ;;  %v18646_v26 = vld [vmem:[#allocation25_spill] sm:$0xff] }
 0x2ae   :  { %8955 = vmatpush3.msra.mxu1 %v12949_v36  ;;  %v18647_v36 = vld [vmem:[#allocation28_spill] sm:$0xff] }
 0x2af   :  { %8956 = vmatprep.subr.mxu1 %v12958_v62  ;;  %v2780_v62 = vrot.slane %v2779_v18, 2 }
 0x2b0   :  { %8957 = vmatpush3.msra.mxu1 %v12967_v43  ;;  %v18648_v43 = vld [vmem:[#allocation30_spill] sm:$0xff] }
 0x2b1   :  { %8958 = vmatprep.subr.mxu1 %v12978_v49  ;;  %v18649_v49 = vld [vmem:[#allocation33_spill] sm:$0xff] }
 0x2b2   :  { %8959 = vmatpush3.msra.mxu1 %v12987_v30  ;;  %v18650_v30 = vld [vmem:[#allocation35_spill] sm:$0xff] }
 0x2b3   :  { %8960 = vmatprep.subr.mxu1 %v12996_v46  ;;  %v18651_v46 = vld [vmem:[#allocation37_spill] sm:$0xff] }
 0x2b4   :  { %8961 = vmatpush3.msra.mxu1 %v13007_v9  ;;  %v18652_v9 = vld [vmem:[#allocation39_spill] sm:$0xff] }
 0x2b5   :  { %3297 = vmatmul.mubr.f32.vlgmr.msra.gmra.mxu1 %v2755_v8  ;;  %9000 = vmatprep.subr.mxu1 %v13029_v40  ;;  %v2781_v40 = vadd.f32 %v2780_v62, %v2779_v18 }
 0x2b6   :  { %9001 = vmatpush3.msra.mxu1 %v13037_v50  ;;  %3436 = vmatprep.mubr.f32.mxu1 %v2790_v39  ;;  %v18653_v50 = vld [vmem:[#allocation41_spill] sm:$0xff] }
 0x2b7   :  { %9002 = vmatprep.subr.mxu1 %v18636_v41 }
 0x2b8   :  { %9003 = vmatpush3.msra.mxu1 %v13055_v17  ;;  %v18654_v17 = vld [vmem:[#allocation43_spill] sm:$0xff] }
 0x2b9   :  { %9004 = vmatprep.subr.mxu1 %v18637_v48 }
 0x2ba   :  { %9005 = vmatpush3.msra.mxu1 %v18638_v1 }
 0x2bb   :  { %9006 = vmatprep.subr.mxu1 %v18639_v51  ;;  %v2773_v51 = vrot.slane %v2772_v45, 2 }
 0x2bc   :  { %9007 = vmatpush3.msra.mxu1 %v18640_v54 }
 0x2bd   :  { %9008 = vmatprep.subr.mxu1 %v18641_v60  ;;  %v2774_v7 = vadd.f32 %v2773_v51, %v2772_v45  ;;  %v18682_v45 = vld [vmem:[#allocation58_spill] sm:$0xff] }
 0x2be   :  { %9009 = vmatpush3.msra.mxu1 %v18642_v2 }
 0x2bf   :  { %9010 = vmatprep.subr.mxu1 %v13124_v47  ;;  %v18655_v47 = vld [vmem:[#allocation45_spill] sm:$0xff] }
 0x2c0   :  { %9011 = vmatpush3.msra.mxu1 %v18643_v12 }
 0x2c1   :  { %9012 = vmatprep.subr.mxu1 %v18644_v14 }
 0x2c2   :  { %9013 = vmatpush3.msra.mxu1 %v13159_v53  ;;  %v18656_v53 = vld [vmem:[#allocation47_spill] sm:$0xff] }
 0x2c3   :  { %9014 = vmatprep.subr.mxu1 %v18645_v22  ;;  %v2775_v22 = vrot.slane %v2774_v7, 1 }
 0x2c4   :  { %9015 = vmatpush3.msra.mxu1 %v13185_v24  ;;  %v2782_v24 = vrot.slane %v2781_v40, 1 }
 0x2c5   :  { %9016 = vmatprep.subr.mxu1 %v18646_v26  ;;  %v2776_v62 = vadd.f32 %v2775_v22, %v2774_v7  ;;  %v18690_v7 = vld [vmem:[#allocation66_spill] sm:$0xff]  ;;  %v18693_v22 = vld [vmem:[#allocation69_spill] sm:$0xff] }
 0x2c6   :  { %9017 = vmatpush3.msra.mxu1 %v18647_v36  ;;  %v2783_v23 = vadd.f32 %v2782_v24, %v2781_v40  ;;  %v18670_v24 = vld [vmem:[#allocation34_spill] sm:$0xff] }
 0x2c7   :  { %9018 = vmatprep.subr.mxu1 %v18648_v43  ;;  %v18663_v43 = vld [vmem:[#allocation23_spill] sm:$0xff] }
 0x2c8   :  { %9019 = vmatpush3.msra.mxu1 %v18649_v49  ;;  %v18664_v49 = vld [vmem:[#allocation24_spill] sm:$0xff] }
 0x2c9   :  { %9020 = vmatprep.subr.mxu1 %v18650_v30  ;;  %v18665_v30 = vld [vmem:[#allocation31_spill] sm:$0xff] }
 0x2ca   :  { %9021 = vmatpush3.msra.mxu1 %v18651_v46  ;;  %v2729_v46 = vmul.f32 %v18665_v30, %v18665_v30 }
 0x2cb   :  { %9022 = vmatprep.subr.mxu1 %v18652_v9  ;;  %v18666_v9 = vld [vmem:[#allocation26_spill] sm:$0xff] }
 0x2cc   :  { %9023 = vmatpush3.msra.mxu1 %v18653_v50  ;;  %v18667_v50 = vld [vmem:[#allocation27_spill] sm:$0xff] }
 0x2cd   :  { %9024 = vmatprep.subr.mxu1 %v18654_v17  ;;  %v18668_v17 = vld [vmem:[#allocation29_spill] sm:$0xff] }
 0x2ce   :  { %9025 = vmatpush3.msra.mxu1 %v18655_v47  ;;  %v18669_v47 = vld [vmem:[#allocation32_spill] sm:$0xff] }
 0x2cf   :  { %9026 = vmatprep.subr.mxu1 %v18656_v53  ;;  %v2763_v53 = vsel %vm2653_vm1, %v2729_v46, 0.0  ;;  %v18697_v46 = vld [vmem:[#allocation73_spill] sm:$0xff] }
 0x2d0   :  { %9027 = vmatpush3.msra.mxu1 %v18657_v19 }
 0x2d1   :  { %9028 = vmatprep.subr.mxu1 %v18658_v20  ;;  %v18671_v20 = vld [vmem:[#allocation36_spill] sm:$0xff] }
 0x2d2   :  { %9029 = vmatpush3.msra.mxu1 %v18659_v57  ;;  %v18672_v57 = vld [vmem:[#allocation38_spill] sm:$0xff] }
 0x2d3   :  { %9030 = vmatprep.subr.mxu1 %v18660_v59  ;;  %v2764_v59 = vrot.slane %v2763_v53, 4 }
 0x2d4   :  { %9031 = vmatpush3.msra.mxu1 %v18661_v0 }
 0x2d5   :  { %3437 = vmatmul.mubr.f32.vlgmr.msra.gmra.mxu1 %v2783_v23  ;;  %v18673_v23 = vld [vmem:[#allocation40_spill] sm:$0xff]  ;;  %v2765_v58 = vadd.f32 %v2764_v59, %v2763_v53  ;;  %v18701_v53 = vld [vmem:[#allocation77_spill] sm:$0xff] }
 0x2d6   :  { %3620 = vmatprep.mubr.f32.mxu1 %v18574_v42 }
 0x2e6   :  { %v2418_v5 = vpop.f32.mrf.mxu0 }
 0x2e7   :  { %v2419_v21 = vadd.f32 %v2418_v5, %v2348_v4  ;;  %v18678_v4 = vld [vmem:[#allocation50_spill] sm:$0xff] }
 0x2e8   :  { %v2420_v6 = vpop.f32.mrf.mxu0 }
 0x2e9   :  { %v2421_v25 = vadd.f32 %v2420_v6, %v2350_v16  ;;  %v18679_v16 = vld [vmem:[#allocation52_spill] sm:$0xff] }
 0x2ea   :  { %v2489_v34 = vpop.f32.mrf.mxu0 }
 0x2eb   :  { %v13787_v28 = vadd.f32 %v2489_v34, %v2419_v21  ;;  %v18680_v21 = vld [vmem:[#allocation54_spill] sm:$0xff]  ;;  %v2766_v34 = vrot.slane %v2765_v58, 2 }
 0x2ec   :  { %v2491_v32 = vpop.f32.mrf.mxu0 }
 0x2ed   :  { %v2710_v8 = vsel %vm2653_vm1, %v13787_v28, 0.0  ;;  %v13791_v39 = vadd.f32 %v2491_v32, %v2421_v25  ;;  %v18681_v25 = vld [vmem:[#allocation56_spill] sm:$0xff] }
 0x2ee   :  { %v2711_v41 = vrot.slane %v2710_v8, 4 }
 0x2ef   :  { %v2718_v44 = vsel %vm2717_vm2, %v13791_v39, 0.0  ;;  %v2734_v40 = vmul.f32 %v13791_v39, %v13791_v39 }
 0x2f0   :  { %v2712_v48 = vadd.f32 %v2711_v41, %v2710_v8  ;;  %v2719_v1 = vrot.slane %v2718_v44, 4  ;;  %v18683_v8 = vld [vmem:[#allocation59_spill] sm:$0xff]  ;;  %v18684_v41 = vld [vmem:[#allocation60_spill] sm:$0xff] }
 0x2f1   :  { %v2798_v19 = vsel %vm2717_vm2, %v2734_v40, 0.0  ;;  %v2733_v40 = vmul.f32 %v13787_v28, %v13787_v28 }
 0x2f2   :  { %v2713_v56 = vrot.slane %v2712_v48, 2  ;;  %v2720_v54 = vadd.f32 %v2719_v1, %v2718_v44  ;;  %v2799_v0 = vrot.slane %v2798_v19, 4  ;;  %v18685_v44 = vld [vmem:[#allocation61_spill] sm:$0xff]  ;;  %v18686_v1 = vld [vmem:[#allocation62_spill] sm:$0xff] }
 0x2f4   :  { %v2714_v60 = vadd.f32 %v2713_v56, %v2712_v48  ;;  %v2721_v2 = vrot.slane %v2720_v54, 2  ;;  %v2800_v5 = vadd.f32 %v2799_v0, %v2798_v19  ;;  %v2767_v48 = vadd.f32 %v2766_v34, %v2765_v58  ;;  %v18687_v56 = vld [vmem:[#allocation63_spill] sm:$0xff]  ;;  %v18702_v19 = vld [vmem:[#allocation78_spill] sm:$0xff]  ;;  %v13913_v58 = vld [vmem:[%s18405_s2 + $0x48] sm:$0x3f] }
 0x2f6   :  { %v2722_v12 = vadd.f32 %v2721_v2, %v2720_v54  ;;  %v2715_v14 = vrot.slane %v2714_v60, 1  ;;  %v2801_v32 = vrot.slane %v2800_v5, 2  ;;  %v18688_v54 = vld [vmem:[#allocation64_spill] sm:$0xff]  ;;  %v2768_v2 = vrot.slane %v2767_v48, 1 }
 0x2f8   :  { %v2723_v18 = vrot.slane %v2722_v12, 1  ;;  %v2716_v36 = vadd.f32 %v2715_v14, %v2714_v60  ;;  %v2802_v51 = vadd.f32 %v2801_v32, %v2800_v5  ;;  %v18689_v60 = vld [vmem:[#allocation65_spill] sm:$0xff]  ;;  %v18691_v14 = vld [vmem:[#allocation67_spill] sm:$0xff] }
 0x2fa   :  { %v2724_v26 = vadd.f32 %v2723_v18, %v2722_v12  ;;  %v2803_v12 = vrot.slane %v2802_v51, 1  ;;  %v18692_v18 = vld [vmem:[#allocation68_spill] sm:$0xff] }
 0x2fc   :  { %8707 = vmatprep.mubr.msk.f32.mxu0 %vm2805_vm3, %v2724_v26  ;;  %v2769_v26 = vadd.f32 %v2768_v2, %v2767_v48 }
 0x2fd   :  { %3154 = vmatmul.mubr.f32.vlgmr.msra.gmra.mxu0 %v2716_v36  ;;  %v18694_v36 = vld [vmem:[#allocation70_spill] sm:$0xff] }
 0x2fe   :  { %8966 = vmatpush3.msra.mxu0 %v18663_v43  ;;  %3366 = vmatprep.mubr.f32.mxu0 %v2776_v62  ;;  %v2804_v62 = vadd.f32 %v2803_v12, %v2802_v51  ;;  %v18695_v43 = vld [vmem:[#allocation71_spill] sm:$0xff] }
 0x2ff   :  { %8967 = vmatprep.subr.mxu0 %v18664_v49  ;;  %v18696_v49 = vld [vmem:[#allocation72_spill] sm:$0xff] }
 0x300   :  { %8968 = vmatpush3.msra.mxu0 %v18666_v9  ;;  %v18698_v9 = vld [vmem:[#allocation74_spill] sm:$0xff] }
 0x301   :  { %8969 = vmatprep.subr.mxu0 %v18667_v50  ;;  %v18699_v50 = vld [vmem:[#allocation75_spill] sm:$0xff] }
 0x302   :  { %8970 = vmatpush3.msra.mxu0 %v18668_v17  ;;  %v2791_v17 = vsel %vm2653_vm1, %v2733_v40, 0.0 }
 0x303   :  { %8971 = vmatprep.subr.mxu0 %v18669_v47  ;;  %v18700_v47 = vld [vmem:[#allocation76_spill] sm:$0xff] }
 0x304   :  { %8972 = vmatpush3.msra.mxu0 %v18670_v24  ;;  %v2792_v24 = vrot.slane %v2791_v17, 4 }
 0x305   :  { %8973 = vmatprep.subr.mxu0 %v18671_v20 }
 0x306   :  { %8974 = vmatpush3.msra.mxu0 %v18672_v57  ;;  %v2793_v20 = vadd.f32 %v2792_v24, %v2791_v17  ;;  %v18704_v57 = vld [vmem:[#allocation80_spill] sm:$0xff]  ;;  %v2651_v24 = vld [vmem:[%s18407_s4] sm:$0x1] }
 0x307   :  { %8975 = vmatprep.subr.mxu0 %v18673_v23  ;;  %v18705_v23 = vld [vmem:[#allocation81_spill] sm:$0xff] }
 0x308   :  { %8976 = vmatpush3.msra.mxu0 %v18674_v27  ;;  %v2794_v59 = vrot.slane %v2793_v20, 2  ;;  %v18706_v27 = vld [vmem:[#allocation82_spill] sm:$0xff] }
 0x309   :  { %8977 = vmatprep.subr.mxu0 %v18675_v33  ;;  %v18707_v33 = vld [vmem:[#allocation83_spill] sm:$0xff] }
 0x30a   :  { %8978 = vmatpush3.msra.mxu0 %v18676_v52  ;;  %v8857_v55 = vpop.f32.mrf.mxu0  ;;  %v2795_v0 = vadd.f32 %v2794_v59, %v2793_v20  ;;  %v13898_v52 = vld [vmem:[%s18405_s2 + $0x20] sm:$0x3f]  ;;  %v2496_v20 = vld [vmem:[%s18405_s2 + $0x10] sm:$0x3f]  ;;  %v2501_v59 = vld [vmem:[%s18405_s2 + $0x38] sm:$0x3f] }
 0x30b   :  { %8979 = vmatprep.subr.mxu0 %v18677_v61  ;;  %v8787_v61 = vpop.f32.mrf.mxu1 }
 0x30c   :  { %8980 = vmatpush3.msra.mxu0 %v18678_v4  ;;  %v8858_v11 = vpop.f32.mrf.mxu0 }
 0x30d   :  { %v13817_v6 = vadd.f32 %v8858_v11, %v8857_v55  ;;  %8981 = vmatprep.subr.mxu0 %v18679_v16  ;;  %v2497_v55 = vld [vmem:[%s18405_s2 + $0x18] sm:$0x3f]  ;;  %v8788_v5 = vpop.f32.mrf.mxu1 }
 0x30e   :  { %8982 = vmatpush3.msra.mxu0 %v18680_v21 }
 0x30f   :  { %8983 = vmatprep.subr.mxu0 %v18681_v25  ;;  %v8822_v4 = vpop.f32.mrf.mxu1  ;;  %v8789_v25 = vadd.f32 %v8788_v5, %v8787_v61  ;;  %v4708_v61 = vld [vmem:[%s18409_s6 + $0xa48] sm:$0xff]  ;;  %v4463_v5 = vld [vmem:[%s18409_s6 + $0x2a0] sm:$0xff] }
 0x310   :  { %8984 = vmatpush3.msra.mxu0 %v18682_v45 }
 0x311   :  { %8985 = vmatprep.subr.mxu0 %v18683_v8  ;;  %v8823_v11 = vpop.f32.mrf.mxu1 }
 0x312   :  { %8986 = vmatpush3.msra.mxu0 %v18684_v41  ;;  %v8824_v21 = vadd.f32 %v8823_v11, %v8822_v4  ;;  %v4702_v4 = vld [vmem:[%s18409_s6 + $0xa18] sm:$0xff]  ;;  %v4457_v11 = vld [vmem:[%s18409_s6 + $0x270] sm:$0xff] }
 0x313   :  { %8987 = vmatprep.subr.mxu0 %v18685_v44 }
 0x314   :  { %8988 = vmatpush3.msra.mxu0 %v18686_v1  ;;  %v2946_v32 = vadd.f32 %v8824_v21, %v8789_v25  ;;  %v4456_v21 = vld [vmem:[%s18409_s6 + $0x268] sm:$0xff]  ;;  %v4450_v25 = vld [vmem:[%s18409_s6 + $0x238] sm:$0xff] }
 0x315   :  { %8989 = vmatprep.subr.mxu0 %v18687_v56 }
 0x316   :  { %8990 = vmatpush3.msra.mxu0 %v18688_v54  ;;  %v3016_v8 = vadd.f32 %v13817_v6, %v2946_v32  ;;  %v4694_v32 = vld [vmem:[%s18409_s6 + $0x9d8] sm:$0xff] }
 0x317   :  { %8991 = vmatprep.subr.mxu0 %v18689_v60 }
 0x318   :  { %8992 = vmatpush3.msra.mxu0 %v18690_v7 }
 0x319   :  { %8993 = vmatprep.subr.mxu0 %v18691_v14 }
 0x31a   :  { %8994 = vmatpush3.msra.mxu0 %v18692_v18 }
 0x31b   :  { %8995 = vmatprep.subr.mxu0 %v18693_v22 }
 0x31c   :  { %8996 = vmatpush3.msra.mxu0 %v18694_v36 }
 0x31d   :  { %3367 = vmatmul.mubr.f32.vlgmr.msra.gmra.mxu0 %v2769_v26  ;;  %3442 = vmatprep.subr.mxu0 %v18574_v42 }
 0x31e   :  { %3443 = vmatpush1.msra.mxu0 %v18695_v43  ;;  %8708 = vmatprep.mubr.msk.f32.mxu0 %vm2805_vm3, %v2804_v62 }
 0x31f   :  { %3444 = vmatprep.subr.mxu0 %v18574_v42 }
 0x320   :  { %3445 = vmatpush1.msra.mxu0 %v18696_v49 }
 0x321   :  { %3446 = vmatprep.subr.mxu0 %v18574_v42 }
 0x322   :  { %3447 = vmatpush1.msra.mxu0 %v18697_v46 }
 0x323   :  { %3448 = vmatprep.subr.mxu0 %v18574_v42 }
 0x324   :  { %3449 = vmatpush1.msra.mxu0 %v18698_v9 }
 0x325   :  { %3450 = vmatprep.subr.mxu0 %v18574_v42 }
 0x326   :  { %3451 = vmatpush1.msra.mxu0 %v13511_v13  ;;  %v18703_v13 = vld [vmem:[#allocation79_spill] sm:$0xff] }
 0x327   :  { %3452 = vmatprep.subr.mxu0 %v18574_v42 }
 0x328   :  { %3453 = vmatpush1.msra.mxu0 %v18699_v50 }
 0x329   :  { %3454 = vmatprep.subr.mxu0 %v18574_v42 }
 0x32a   :  { %3455 = vmatpush1.msra.mxu0 %v18700_v47 }
 0x32b   :  { %3456 = vmatprep.subr.mxu0 %v18574_v42 }
 0x32c   :  { %3457 = vmatpush1.msra.mxu0 %v18701_v53 }
 0x32d   :  { %3458 = vmatprep.subr.mxu0 %v18574_v42 }
 0x32e   :  { %3459 = vmatpush1.msra.mxu0 %v18702_v19 }
 0x32f   :  { %3460 = vmatprep.subr.mxu0 %v18574_v42 }
 0x330   :  { %3461 = vmatpush1.msra.mxu0 %v18703_v13 }
 0x331   :  { %3462 = vmatprep.subr.mxu0 %v18574_v42 }
 0x332   :  { %3463 = vmatpush1.msra.mxu0 %v13563_v37  ;;  %v2796_v37 = vrot.slane %v2795_v0, 1 }
 0x333   :  { %3464 = vmatprep.subr.mxu0 %v18574_v42 }
 0x334   :  { %3465 = vmatpush1.msra.mxu0 %v18704_v57  ;;  %v2502_v57 = vld [vmem:[%s18405_s2 + $0x40] sm:$0x3f] }
 0x335   :  { %3466 = vmatprep.subr.mxu0 %v18574_v42  ;;  %v8892_v16 = vpop.f32.mrf.mxu1 }
 0x336   :  { %3467 = vmatpush1.msra.mxu0 %v18705_v23  ;;  %v2500_v23 = vld [vmem:[%s18405_s2 + $0x30] sm:$0x3f] }
 0x337   :  { %3468 = vmatprep.subr.mxu0 %v18574_v42  ;;  %v8893_v34 = vpop.f32.mrf.mxu1 }
 0x338   :  { %3469 = vmatpush1.msra.mxu0 %v13584_v35  ;;  %v2797_v35 = vadd.f32 %v2796_v37, %v2795_v0  ;;  %v8894_v45 = vadd.f32 %v8893_v34, %v8892_v16  ;;  %v2652_v37 = vld [vmem:[%s18408_s5] sm:$0x1]  ;;  %v4701_v16 = vld [vmem:[%s18409_s6 + $0xa10] sm:$0xff] }
 0x339   :  { %3470 = vmatprep.subr.mxu0 %v18574_v42  ;;  %v4695_v34 = vld [vmem:[%s18409_s6 + $0x9e0] sm:$0xff] }
 0x33a   :  { %3471 = vmatpush1.msra.mxu0 %v13591_v10  ;;  %v13881_v10 = vld [vmem:[%s18405_s2 + $0x8] sm:$0x3f]  ;;  %v3086_v41 = vadd.f32 %v8894_v45, %v3016_v8  ;;  %v4449_v45 = vld [vmem:[%s18409_s6 + $0x230] sm:$0xff] }
 0x33b   :  { %3472 = vmatprep.subr.mxu0 %v18574_v42  ;;  %8709 = vmatprep.subr.msk.mxu1 %vm3525_vm4, %v13881_v10  ;;  %v4688_v8 = vld [vmem:[%s18409_s6 + $0x9a8] sm:$0xff] }
 0x33c   :  { %3473 = vmatpush1.msra.mxu0 %v13598_v15  ;;  %v13886_v15 = vld [vmem:[%s18405_s2] sm:$0x3f] }
 0x33d   :  { %3500 = vmatprep.subr.mxu0 %v18574_v42  ;;  %8710 = vmatpush1.msk.msra.mxu1 %vm3525_vm4, %v13886_v15 }
 0x33e   :  { %3501 = vmatpush2.msra.mxu0 %v13606_v3  ;;  %v13893_v3 = vld [vmem:[%s18405_s2 + $0x28] sm:$0x3f]  ;;  %8712 = vmatprep.subr.msk.mxu1 %vm3525_vm4, %v2497_v55 }
 0x33f   :  { %3502 = vmatprep.subr.mxu0 %v18574_v42 }
 0x340   :  { %3503 = vmatpush2.msra.mxu0 %v18706_v27 }
 0x341   :  { %3504 = vmatprep.subr.mxu0 %v18574_v42 }
 0x342   :  { %3505 = vmatpush2.msra.mxu0 %v18707_v33  ;;  %v4484_v33 = vld [vmem:[%s18409_s6 + $0x348] sm:$0xff] }
 0x343   :  { %3507 = vmatmul.mubr.f32.vlgmr.msra.gmra.mxu0 %v2797_v35  ;;  %8715 = vmatprep.subr.msk.mxu0 %vm3525_vm4, %v13893_v3  ;;  %v4485_v35 = vld [vmem:[%s18409_s6 + $0x350] sm:$0xff] }
 0x344   :  { %3762 = vmatprep.mubr.f32.mxu0 %v18574_v42  ;;  %8716 = vmatpush1.msk.msra.mxu0 %vm3525_vm4, %v13898_v52 }
 0x345   :  { %8721 = vmatprep.subr.msk.mxu0 %vm3525_vm4, %v13913_v58 }
 0x355   :  { %v8927_v51 = vpop.f32.mrf.mxu1 }
 0x357   :  { %v8928_v56 = vpop.f32.mrf.mxu1 }
 0x358   :  { %v8929_v18 = vadd.f32 %v8928_v56, %v8927_v51  ;;  %v4436_v51 = vld [vmem:[%s18409_s6 + $0x1c8] sm:$0xff] }
 0x359   :  { %v4680_v56 = vld [vmem:[%s18409_s6 + $0x968] sm:$0xff] }
 0x375   :  { %v8962_v54 = vpop.f32.mrf.mxu1 }
 0x377   :  { %v8963_v2 = vpop.f32.mrf.mxu1 }
 0x378   :  { %v8964_v12 = vadd.f32 %v8963_v2, %v8962_v54  ;;  %v4435_v54 = vld [vmem:[%s18409_s6 + $0x1c0] sm:$0xff]  ;;  %v4429_v2 = vld [vmem:[%s18409_s6 + $0x190] sm:$0xff] }
 0x37a   :  { %v3299_v26 = vadd.f32 %v8964_v12, %v8929_v18  ;;  %v4428_v12 = vld [vmem:[%s18409_s6 + $0x188] sm:$0xff]  ;;  %v4422_v18 = vld [vmem:[%s18409_s6 + $0x158] sm:$0xff] }
 0x395   :  { %v9032_v14 = vpop.f32.mrf.mxu1 }
 0x397   :  { %v9033_v36 = vpop.f32.mrf.mxu1 }
 0x398   :  { %v9034_v43 = vadd.f32 %v9033_v36, %v9032_v14  ;;  %v4667_v14 = vld [vmem:[%s18409_s6 + $0x900] sm:$0xff]  ;;  %v4660_v36 = vld [vmem:[%s18409_s6 + $0x8c8] sm:$0xff] }
 0x3bd   :  { %v3155_v44 = vpop.f32.mrf.mxu0 }
 0x3be   :  { %v3156_v48 = vadd.f32 %v3155_v44, %v3086_v41  ;;  %v4443_v41 = vld [vmem:[%s18409_s6 + $0x200] sm:$0xff] }
 0x3bf   :  { %v3157_v1 = vpop.f32.mrf.mxu0  ;;  %v4687_v44 = vld [vmem:[%s18409_s6 + $0x9a0] sm:$0xff] }
 0x3c0   :  { %v3512_v49 = vmul.f32 0.0025510204, %v3156_v48  ;;  %v4442_v48 = vld [vmem:[%s18409_s6 + $0x1f8] sm:$0xff]  ;;  %v4681_v1 = vld [vmem:[%s18409_s6 + $0x970] sm:$0xff] }
 0x3c2   :  { %v3514_v50 = vmul.f32 %v3512_v49, %v3512_v49 }
 0x3dd   :  { %v8997_v60 = vpop.f32.mrf.mxu0 }
 0x3df   :  { %v8998_v7 = vpop.f32.mrf.mxu0 }
 0x3e0   :  { %v8999_v22 = vadd.f32 %v8998_v7, %v8997_v60  ;;  %v4674_v60 = vld [vmem:[%s18409_s6 + $0x938] sm:$0xff]  ;;  %v4673_v7 = vld [vmem:[%s18409_s6 + $0x930] sm:$0xff] }
 0x3e2   :  { %v3369_v62 = vadd.f32 %v8999_v22, %v3299_v26  ;;  %v4666_v22 = vld [vmem:[%s18409_s6 + $0x8f8] sm:$0xff]  ;;  %v4421_v26 = vld [vmem:[%s18409_s6 + $0x150] sm:$0xff] }
 0x3e4   :  { %v3439_v6 = vadd.f32 %v9034_v43, %v3369_v62  ;;  %v4415_v62 = vld [vmem:[%s18409_s6 + $0x120] sm:$0xff] }
 0x3e5   :  { %v4659_v43 = vld [vmem:[%s18409_s6 + $0x8c0] sm:$0xff] }
 0x403   :  { %v3508_v46 = vpop.f32.mrf.mxu0 }
 0x404   :  { %v3509_v9 = vadd.f32 %v3508_v46, %v3439_v6  ;;  %v4653_v6 = vld [vmem:[%s18409_s6 + $0x890] sm:$0xff]  ;;  %v4408_v46 = vld [vmem:[%s18409_s6 + $0xe8] sm:$0xff] }
 0x405   :  { %v3510_v40 = vpop.f32.mrf.mxu0 }
 0x406   :  { %v3513_v17 = vmul.f32 0.0025510204, %v3509_v9  ;;  %v4652_v9 = vld [vmem:[%s18409_s6 + $0x888] sm:$0xff]  ;;  %v4407_v40 = vld [vmem:[%s18409_s6 + $0xe0] sm:$0xff] }
 0x408   :  { %v3515_v47 = vsub.f32 %v3513_v17, %v3514_v50  ;;  %v4646_v50 = vld [vmem:[%s18409_s6 + $0x858] sm:$0xff]  ;;  %v4401_v17 = vld [vmem:[%s18409_s6 + $0xb0] sm:$0xff] }
 0x40a   :  { %v3516_v53 = vadd.f32 1e-05, %v3515_v47  ;;  %v4645_v47 = vld [vmem:[%s18409_s6 + $0x850] sm:$0xff] }
 0x40c   :  { %9547 = vrsqrt.f32 %v3516_v53  ;;  %v4400_v53 = vld [vmem:[%s18409_s6 + $0xa8] sm:$0xff] }
 0x419   :  { %v9548_v19 = vpop.eup %9547 }
 0x41a   :  { %v3518_v13 = vmul.f32 %v9548_v19, %v2651_v24  ;;  %v4639_v24 = vld [vmem:[%s18409_s6 + $0x820] sm:$0xff]  ;;  %v4394_v19 = vld [vmem:[%s18409_s6 + $0x78] sm:$0xff] }
 0x41c   :  { %8711 = vmatmul.mubr.msk.f32.vlgmr.msra.gmra.mxu1 %vm3521_vm5, %v3518_v13  ;;  %8717 = vmatmul.mubr.msk.f32.vlgmr.msra.gmra.mxu0 %vm3521_vm5, %v3518_v13  ;;  %v3519_v0 = vmul.f32 %v3518_v13, %v3512_v49  ;;  %v4414_v49 = vld [vmem:[%s18409_s6 + $0x118] sm:$0xff] }
 0x41d   :  { %8713 = vmatpush1.msk.msra.mxu1 %vm3525_vm4, %v2496_v20  ;;  %3691 = vmatprep.mubr.f32.mxu1 %v18574_v42 }
 0x41e   :  { %8722 = vmatpush1.msk.msra.mxu0 %vm3525_vm4, %v2502_v57  ;;  %3904 = vmatprep.mubr.f32.mxu0 %v18574_v42  ;;  %v3520_v27 = vsub.f32 %v2652_v37, %v3519_v0  ;;  %v4386_v0 = vld [vmem:[%s18409_s6 + $0x38] sm:$0xff]  ;;  %v4625_v37 = vld [vmem:[%s18409_s6 + $0x7b0] sm:$0xff] }
 0x41f   :  { %8718 = vmatprep.subr.msk.mxu1 %vm3525_vm4, %v2501_v59  ;;  %8727 = vmatprep.subr.msk.mxu0 %vm3525_vm4, %v2497_v55  ;;  %v4471_v55 = vld [vmem:[%s18409_s6 + $0x2e0] sm:$0xff] }
 0x420   :  { %8714 = vmatmul.mubr.msk.f32.vlgmr.msra.gmra.mxu1 %vm3521_vm5, %v3518_v13  ;;  %8723 = vmatmul.mubr.msk.f32.vlgmr.msra.gmra.mxu0 %vm3521_vm5, %v3518_v13 }
 0x421   :  { %8719 = vmatpush1.msk.msra.mxu1 %vm3525_vm4, %v2500_v23  ;;  %3833 = vmatprep.mubr.f32.mxu1 %v18574_v42 }
 0x422   :  { %8728 = vmatpush1.msk.msra.mxu0 %vm3525_vm4, %v2496_v20  ;;  %4049 = vmatprep.mubr.f32.mxu0 %v18574_v42  ;;  %v4393_v20 = vld [vmem:[%s18409_s6 + $0x70] sm:$0xff] }
 0x423   :  { %8724 = vmatprep.subr.msk.mxu1 %vm3525_vm4, %v13881_v10  ;;  %8733 = vmatprep.subr.msk.mxu0 %vm3525_vm4, %v2501_v59  ;;  %v4478_v10 = vld [vmem:[%s18409_s6 + $0x318] sm:$0xff]  ;;  %v4387_v59 = vld [vmem:[%s18409_s6 + $0x40] sm:$0xff] }
 0x424   :  { %8720 = vmatmul.mubr.msk.f32.vlgmr.msra.gmra.mxu1 %vm3521_vm5, %v3518_v13  ;;  %8729 = vmatmul.mubr.msk.f32.vlgmr.msra.gmra.mxu0 %vm3521_vm5, %v3520_v27  ;;  %v4638_v13 = vld [vmem:[%s18409_s6 + $0x818] sm:$0xff] }
 0x425   :  { %8725 = vmatpush1.msk.msra.mxu1 %vm3525_vm4, %v13886_v15  ;;  %3978 = vmatprep.mubr.f32.mxu1 %v18574_v42  ;;  %v4477_v15 = vld [vmem:[%s18409_s6 + $0x310] sm:$0xff] }
 0x426   :  { %8734 = vmatpush1.msk.msra.mxu0 %vm3525_vm4, %v2500_v23  ;;  %4191 = vmatprep.mubr.f32.mxu0 %v18574_v42  ;;  %v4631_v23 = vld [vmem:[%s18409_s6 + $0x7e0] sm:$0xff] }
 0x427   :  { %8730 = vmatprep.subr.msk.mxu1 %vm3525_vm4, %v13893_v3  ;;  %5411 = vmatprep.subr.mxu0 %v4485_v35  ;;  %v4709_v3 = vld [vmem:[%s18409_s6 + $0xa50] sm:$0xff]  ;;  %v4624_v35 = vld [vmem:[%s18409_s6 + $0x7a8] sm:$0xff] }
 0x428   :  { %8726 = vmatmul.mubr.msk.f32.vlgmr.msra.gmra.mxu1 %vm3521_vm5, %v3520_v27  ;;  %8735 = vmatmul.mubr.msk.f32.vlgmr.msra.gmra.mxu0 %vm3521_vm5, %v3520_v27 }
 0x429   :  { %8731 = vmatpush1.msk.msra.mxu1 %vm3525_vm4, %v13898_v52  ;;  %4120 = vmatprep.mubr.f32.mxu1 %v18574_v42  ;;  %v4470_v52 = vld [vmem:[%s18409_s6 + $0x2d8] sm:$0xff] }
 0x42a   :  { %8736 = vmatprep.subr.msk.mxu1 %vm3525_vm4, %v13913_v58  ;;  %5412 = vmatpush1.msra.mxu0 %v4484_v33  ;;  %v4464_v58 = vld [vmem:[%s18409_s6 + $0x2a8] sm:$0xff]  ;;  %v4379_v33 = vld [vmem:[%s18409_s6] sm:$0xff] }
 0x42b   :  { %5413 = vmatprep.subr.mxu0 %v4478_v10  ;;  %v4618_v10 = vld [vmem:[%s18409_s6 + $0x778] sm:$0xff] }
 0x42c   :  { %8732 = vmatmul.mubr.msk.f32.vlgmr.msra.gmra.mxu1 %vm3521_vm5, %v3520_v27  ;;  %5414 = vmatpush1.msra.mxu0 %v4477_v15  ;;  %v4597_v15 = vld [vmem:[%s18409_s6 + $0x6d0] sm:$0xff] }
 0x42d   :  { %8737 = vmatpush1.msk.msra.mxu1 %vm3525_vm4, %v2502_v57  ;;  %4262 = vmatprep.mubr.f32.mxu1 %v18574_v42  ;;  %v4632_v57 = vld [vmem:[%s18409_s6 + $0x7e8] sm:$0xff] }
 0x42e   :  { %5482 = vmatprep.subr.mxu1 %v4709_v3  ;;  %5415 = vmatprep.subr.mxu0 %v4471_v55  ;;  %v4617_v3 = vld [vmem:[%s18409_s6 + $0x770] sm:$0xff]  ;;  %v4596_v55 = vld [vmem:[%s18409_s6 + $0x6c8] sm:$0xff] }
 0x42f   :  { %5416 = vmatpush1.msra.mxu0 %v4470_v52  ;;  %v4611_v52 = vld [vmem:[%s18409_s6 + $0x740] sm:$0xff] }
 0x430   :  { %8738 = vmatmul.mubr.msk.f32.vlgmr.msra.gmra.mxu1 %vm3521_vm5, %v3520_v27  ;;  %5417 = vmatprep.subr.mxu0 %v4464_v58  ;;  %v4380_v27 = vld [vmem:[%s18409_s6 + $0x8] sm:$0xff]  ;;  %v4590_v58 = vld [vmem:[%s18409_s6 + $0x698] sm:$0xff] }
 0x431   :  { %5483 = vmatpush1.msra.mxu1 %v4708_v61  ;;  %5418 = vmatpush1.msra.mxu0 %v4463_v5  ;;  %v4610_v61 = vld [vmem:[%s18409_s6 + $0x738] sm:$0xff]  ;;  %v4589_v5 = vld [vmem:[%s18409_s6 + $0x690] sm:$0xff] }
 0x432   :  { %5484 = vmatprep.subr.mxu1 %v4702_v4  ;;  %5419 = vmatprep.subr.mxu0 %v4457_v11  ;;  %v4604_v4 = vld [vmem:[%s18409_s6 + $0x708] sm:$0xff]  ;;  %v4583_v11 = vld [vmem:[%s18409_s6 + $0x660] sm:$0xff] }
 0x433   :  { %5485 = vmatpush1.msra.mxu1 %v4701_v16  ;;  %5420 = vmatpush1.msra.mxu0 %v4456_v21  ;;  %v4603_v16 = vld [vmem:[%s18409_s6 + $0x700] sm:$0xff]  ;;  %v4582_v21 = vld [vmem:[%s18409_s6 + $0x658] sm:$0xff] }
 0x434   :  { %5486 = vmatprep.subr.mxu1 %v4695_v34  ;;  %5421 = vmatprep.subr.mxu0 %v4450_v25  ;;  %v4821_v34 = vld [vmem:[%s18409_s6 + $0xdd0] sm:$0xff]  ;;  %v4576_v25 = vld [vmem:[%s18409_s6 + $0x628] sm:$0xff] }
 0x435   :  { %5487 = vmatpush1.msra.mxu1 %v4694_v32  ;;  %5422 = vmatpush1.msra.mxu0 %v4449_v45  ;;  %v4820_v32 = vld [vmem:[%s18409_s6 + $0xdc8] sm:$0xff]  ;;  %v4575_v45 = vld [vmem:[%s18409_s6 + $0x620] sm:$0xff] }
 0x436   :  { %5488 = vmatprep.subr.mxu1 %v4688_v8  ;;  %5423 = vmatprep.subr.mxu0 %v4443_v41  ;;  %v4814_v8 = vld [vmem:[%s18409_s6 + $0xd98] sm:$0xff]  ;;  %v4569_v41 = vld [vmem:[%s18409_s6 + $0x5f0] sm:$0xff] }
 0x437   :  { %5489 = vmatpush1.msra.mxu1 %v4687_v44  ;;  %5424 = vmatpush1.msra.mxu0 %v4442_v48  ;;  %v4813_v44 = vld [vmem:[%s18409_s6 + $0xd90] sm:$0xff]  ;;  %v4568_v48 = vld [vmem:[%s18409_s6 + $0x5e8] sm:$0xff] }
 0x438   :  { %5490 = vmatprep.subr.mxu1 %v4681_v1  ;;  %5425 = vmatprep.subr.mxu0 %v4436_v51  ;;  %v4807_v1 = vld [vmem:[%s18409_s6 + $0xd60] sm:$0xff]  ;;  %v4562_v51 = vld [vmem:[%s18409_s6 + $0x5b8] sm:$0xff] }
 0x439   :  { %5491 = vmatpush1.msra.mxu1 %v4680_v56  ;;  %5426 = vmatpush1.msra.mxu0 %v4435_v54  ;;  %v4806_v56 = vld [vmem:[%s18409_s6 + $0xd58] sm:$0xff]  ;;  %v4800_v54 = vld [vmem:[%s18409_s6 + $0xd28] sm:$0xff] }
 0x43a   :  { %5492 = vmatprep.subr.mxu1 %v4674_v60  ;;  %5427 = vmatprep.subr.mxu0 %v4429_v2  ;;  %v4799_v60 = vld [vmem:[%s18409_s6 + $0xd20] sm:$0xff]  ;;  %v4793_v2 = vld [vmem:[%s18409_s6 + $0xcf0] sm:$0xff] }
 0x43b   :  { %5493 = vmatpush1.msra.mxu1 %v4673_v7  ;;  %5428 = vmatpush1.msra.mxu0 %v4428_v12  ;;  %v4792_v7 = vld [vmem:[%s18409_s6 + $0xce8] sm:$0xff]  ;;  %v4786_v12 = vld [vmem:[%s18409_s6 + $0xcb8] sm:$0xff] }
 0x43c   :  { %5494 = vmatprep.subr.mxu1 %v4667_v14  ;;  %5429 = vmatprep.subr.mxu0 %v4422_v18  ;;  %v4785_v14 = vld [vmem:[%s18409_s6 + $0xcb0] sm:$0xff]  ;;  %v4779_v18 = vld [vmem:[%s18409_s6 + $0xc80] sm:$0xff] }
 0x43d   :  { %5495 = vmatpush1.msra.mxu1 %v4666_v22  ;;  %5430 = vmatpush1.msra.mxu0 %v4421_v26  ;;  %v4778_v22 = vld [vmem:[%s18409_s6 + $0xc78] sm:$0xff]  ;;  %v4772_v26 = vld [vmem:[%s18409_s6 + $0xc48] sm:$0xff] }
 0x43e   :  { %5496 = vmatprep.subr.mxu1 %v4660_v36  ;;  %5431 = vmatprep.subr.mxu0 %v4415_v62  ;;  %v4561_v36 = vld [vmem:[%s18409_s6 + $0x5b0] sm:$0xff]  ;;  %v4771_v62 = vld [vmem:[%s18409_s6 + $0xc40] sm:$0xff] }
 0x43f   :  { %5497 = vmatpush1.msra.mxu1 %v4659_v43  ;;  %5432 = vmatpush1.msra.mxu0 %v4414_v49  ;;  %v4555_v43 = vld [vmem:[%s18409_s6 + $0x580] sm:$0xff]  ;;  %v4765_v49 = vld [vmem:[%s18409_s6 + $0xc10] sm:$0xff] }
 0x440   :  { %5498 = vmatprep.subr.mxu1 %v4653_v6  ;;  %5433 = vmatprep.subr.mxu0 %v4408_v46  ;;  %v4554_v6 = vld [vmem:[%s18409_s6 + $0x578] sm:$0xff]  ;;  %v4764_v46 = vld [vmem:[%s18409_s6 + $0xc08] sm:$0xff] }
 0x441   :  { %5499 = vmatpush1.msra.mxu1 %v4652_v9  ;;  %5434 = vmatpush1.msra.mxu0 %v4407_v40  ;;  %v4548_v9 = vld [vmem:[%s18409_s6 + $0x548] sm:$0xff]  ;;  %v4758_v40 = vld [vmem:[%s18409_s6 + $0xbd8] sm:$0xff] }
 0x442   :  { %5500 = vmatprep.subr.mxu1 %v4646_v50  ;;  %5435 = vmatprep.subr.mxu0 %v4401_v17  ;;  %v4547_v50 = vld [vmem:[%s18409_s6 + $0x540] sm:$0xff]  ;;  %v4757_v17 = vld [vmem:[%s18409_s6 + $0xbd0] sm:$0xff] }
 0x443   :  { %5501 = vmatpush1.msra.mxu1 %v4645_v47  ;;  %5436 = vmatpush1.msra.mxu0 %v4400_v53  ;;  %v4541_v47 = vld [vmem:[%s18409_s6 + $0x510] sm:$0xff]  ;;  %v4751_v53 = vld [vmem:[%s18409_s6 + $0xba0] sm:$0xff] }
 0x444   :  { %5502 = vmatprep.subr.mxu1 %v4639_v24  ;;  %5437 = vmatprep.subr.mxu0 %v4394_v19  ;;  %v4540_v24 = vld [vmem:[%s18409_s6 + $0x508] sm:$0xff]  ;;  %v4750_v19 = vld [vmem:[%s18409_s6 + $0xb98] sm:$0xff] }
 0x445   :  { %5503 = vmatpush1.msra.mxu1 %v4638_v13  ;;  %5438 = vmatpush1.msra.mxu0 %v4393_v20  ;;  %v4534_v13 = vld [vmem:[%s18409_s6 + $0x4d8] sm:$0xff]  ;;  %v4744_v20 = vld [vmem:[%s18409_s6 + $0xb68] sm:$0xff] }
 0x446   :  { %5504 = vmatprep.subr.mxu1 %v4632_v57  ;;  %5439 = vmatprep.subr.mxu0 %v4387_v59  ;;  %v4533_v57 = vld [vmem:[%s18409_s6 + $0x4d0] sm:$0xff]  ;;  %v4743_v59 = vld [vmem:[%s18409_s6 + $0xb60] sm:$0xff] }
 0x447   :  { %5505 = vmatpush1.msra.mxu1 %v4631_v23  ;;  %5440 = vmatpush1.msra.mxu0 %v4386_v0  ;;  %v4527_v23 = vld [vmem:[%s18409_s6 + $0x4a0] sm:$0xff]  ;;  %v4737_v0 = vld [vmem:[%s18409_s6 + $0xb30] sm:$0xff] }
 0x448   :  { %5506 = vmatprep.subr.mxu1 %v4625_v37  ;;  %5441 = vmatprep.subr.mxu0 %v4380_v27  ;;  %v4526_v37 = vld [vmem:[%s18409_s6 + $0x498] sm:$0xff]  ;;  %v4736_v27 = vld [vmem:[%s18409_s6 + $0xb28] sm:$0xff] }
 0x449   :  { %5507 = vmatpush1.msra.mxu1 %v4624_v35  ;;  %5442 = vmatpush1.msra.mxu0 %v4379_v33  ;;  %v4520_v35 = vld [vmem:[%s18409_s6 + $0x468] sm:$0xff]  ;;  %v4730_v33 = vld [vmem:[%s18409_s6 + $0xaf8] sm:$0xff] }
 0x44a   :  { %5508 = vmatprep.subr.mxu1 %v4618_v10  ;;  %5443 = vmatprep.subr.mxu0 %v4597_v15  ;;  %v4519_v10 = vld [vmem:[%s18409_s6 + $0x460] sm:$0xff]  ;;  %v4729_v15 = vld [vmem:[%s18409_s6 + $0xaf0] sm:$0xff] }
 0x44b   :  { %5509 = vmatpush1.msra.mxu1 %v4617_v3  ;;  %5444 = vmatpush2.msra.mxu0 %v4596_v55  ;;  %v4513_v3 = vld [vmem:[%s18409_s6 + $0x430] sm:$0xff]  ;;  %v4723_v55 = vld [vmem:[%s18409_s6 + $0xac0] sm:$0xff] }
 0x44c   :  { %5510 = vmatprep.subr.mxu1 %v4611_v52  ;;  %5445 = vmatprep.subr.mxu0 %v4590_v58  ;;  %v4512_v52 = vld [vmem:[%s18409_s6 + $0x428] sm:$0xff]  ;;  %v4722_v58 = vld [vmem:[%s18409_s6 + $0xab8] sm:$0xff] }
 0x44d   :  { %5511 = vmatpush1.msra.mxu1 %v4610_v61  ;;  %5446 = vmatpush2.msra.mxu0 %v4589_v5  ;;  %v4506_v61 = vld [vmem:[%s18409_s6 + $0x3f8] sm:$0xff]  ;;  %v4716_v5 = vld [vmem:[%s18409_s6 + $0xa88] sm:$0xff] }
 0x44e   :  { %5512 = vmatprep.subr.mxu1 %v4604_v4  ;;  %5447 = vmatprep.subr.mxu0 %v4583_v11  ;;  %v4505_v4 = vld [vmem:[%s18409_s6 + $0x3f0] sm:$0xff]  ;;  %v4715_v11 = vld [vmem:[%s18409_s6 + $0xa80] sm:$0xff] }
 0x44f   :  { %5513 = vmatpush1.msra.mxu1 %v4603_v16  ;;  %5448 = vmatpush2.msra.mxu0 %v4582_v21  ;;  %v4499_v16 = vld [vmem:[%s18409_s6 + $0x3c0] sm:$0xff]  ;;  %v5157_v21 = vld [vmem:[%s18409_s6 + $0x1850] sm:$0xff] }
 0x450   :  { %5514 = vmatprep.subr.mxu1 %v4821_v34  ;;  %5449 = vmatprep.subr.mxu0 %v4576_v25  ;;  %v4498_v34 = vld [vmem:[%s18409_s6 + $0x3b8] sm:$0xff]  ;;  %v4492_v25 = vld [vmem:[%s18409_s6 + $0x388] sm:$0xff] }
 0x451   :  { %5515 = vmatpush2.msra.mxu1 %v4820_v32  ;;  %5450 = vmatpush2.msra.mxu0 %v4575_v45  ;;  %v4491_v32 = vld [vmem:[%s18409_s6 + $0x380] sm:$0xff]  ;;  %v4933_v45 = vld [vmem:[%s18409_s6 + $0x1150] sm:$0xff] }
 0x452   :  { %5516 = vmatprep.subr.mxu1 %v4814_v8  ;;  %5451 = vmatprep.subr.mxu0 %v4569_v41 }
 0x453   :  { %5517 = vmatpush2.msra.mxu1 %v4813_v44  ;;  %5452 = vmatpush2.msra.mxu0 %v4568_v48 }
 0x454   :  { %5518 = vmatprep.subr.mxu1 %v4807_v1  ;;  %5453 = vmatprep.subr.mxu0 %v4562_v51  ;;  %v18708_v1 = vld [vmem:[#allocation8_spill] sm:$0xff] }
 0x455   :  { %5519 = vmatpush2.msra.mxu1 %v4806_v56  ;;  %5454 = vmatpush2.msra.mxu0 %v4561_v36  ;;  %v14364_v51 = vsub.s32 0, %v18708_v1  ;;  %v5135_v1 = vld [vmem:[%s18409_s6 + $0x17a0] sm:$0xff] }
 0x456   :  { %5520 = vmatprep.subr.mxu1 %v4800_v54  ;;  %5455 = vmatprep.subr.mxu0 %v4555_v43 }
 0x457   :  { %5521 = vmatpush2.msra.mxu1 %v4799_v60  ;;  %5456 = vmatpush2.msra.mxu0 %v4554_v6  ;;  %18709 = vst [vmem:[#allocation12_spill] sm:$0xff] %v14364_v51  ;;  %v18710_v6 = vld [vmem:[#allocation11_spill] sm:$0xff] }
 0x458   :  { %5522 = vmatprep.subr.mxu1 %v4793_v2  ;;  %5457 = vmatprep.subr.mxu0 %v4548_v9 }
 0x459   :  { %5523 = vmatpush2.msra.mxu1 %v4792_v7  ;;  %5458 = vmatpush2.msra.mxu0 %v4547_v50 }
 0x45a   :  { %5524 = vmatprep.subr.mxu1 %v4786_v12  ;;  %5459 = vmatprep.subr.mxu0 %v4541_v47 }
 0x45b   :  { %5525 = vmatpush2.msra.mxu1 %v4785_v14  ;;  %5460 = vmatpush2.msra.mxu0 %v4540_v24 }
 0x45c   :  { %5526 = vmatprep.subr.mxu1 %v4779_v18  ;;  %5461 = vmatprep.subr.mxu0 %v4534_v13  ;;  %v18711_v13 = vld [vmem:[#allocation10_spill] sm:$0xff] }
 0x45d   :  { %5527 = vmatpush2.msra.mxu1 %v4778_v22  ;;  %5462 = vmatpush2.msra.mxu0 %v4533_v57 }
 0x45e   :  { %5528 = vmatprep.subr.mxu1 %v4772_v26  ;;  %5463 = vmatprep.subr.mxu0 %v4527_v23 }
 0x45f   :  { %5529 = vmatpush2.msra.mxu1 %v4771_v62  ;;  %5464 = vmatpush2.msra.mxu0 %v4526_v37 }
 0x460   :  { %5530 = vmatprep.subr.mxu1 %v4765_v49  ;;  %5465 = vmatprep.subr.mxu0 %v4520_v35 }
 0x461   :  { %5531 = vmatpush2.msra.mxu1 %v4764_v46  ;;  %5466 = vmatpush2.msra.mxu0 %v4519_v10 }
 0x462   :  { %5532 = vmatprep.subr.mxu1 %v4758_v40  ;;  %5467 = vmatprep.subr.mxu0 %v4513_v3 }
 0x463   :  { %5533 = vmatpush2.msra.mxu1 %v4757_v17  ;;  %5468 = vmatpush2.msra.mxu0 %v4512_v52 }
 0x464   :  { %5534 = vmatprep.subr.mxu1 %v4751_v53  ;;  %5469 = vmatprep.subr.mxu0 %v4506_v61 }
 0x465   :  { %5535 = vmatpush2.msra.mxu1 %v4750_v19  ;;  %5470 = vmatpush2.msra.mxu0 %v4505_v4 }
 0x466   :  { %5536 = vmatprep.subr.mxu1 %v4744_v20  ;;  %5471 = vmatprep.subr.mxu0 %v4499_v16 }
 0x467   :  { %5537 = vmatpush2.msra.mxu1 %v4743_v59  ;;  %5472 = vmatpush2.msra.mxu0 %v4498_v34 }
 0x468   :  { %5538 = vmatprep.subr.mxu1 %v4737_v0  ;;  %5473 = vmatprep.subr.mxu0 %v4492_v25 }
 0x469   :  { %5539 = vmatpush2.msra.mxu1 %v4736_v27  ;;  %5474 = vmatpush2.msra.mxu0 %v4491_v32  ;;  %v5142_v32 = vld [vmem:[%s18409_s6 + $0x17d8] sm:$0xff] }
 0x46a   :  { %5540 = vmatprep.subr.mxu1 %v4730_v33  ;;  %5553 = vmatprep.subr.mxu0 %v4933_v45 }
 0x46b   :  { %5541 = vmatpush2.msra.mxu1 %v4729_v15 }
 0x46c   :  { %5542 = vmatprep.subr.mxu1 %v4723_v55  ;;  %v5156_v55 = vld [vmem:[%s18409_s6 + $0x1848] sm:$0xff] }
 0x46d   :  { %5543 = vmatpush2.msra.mxu1 %v4722_v58 }
 0x46e   :  { %5544 = vmatprep.subr.mxu1 %v4716_v5  ;;  %v5150_v5 = vld [vmem:[%s18409_s6 + $0x1818] sm:$0xff] }
 0x46f   :  { %5545 = vmatpush2.msra.mxu1 %v4715_v11  ;;  %v5149_v11 = vld [vmem:[%s18409_s6 + $0x1810] sm:$0xff] }
 0x470   :  { %5624 = vmatprep.subr.mxu1 %v5157_v21 }
 0x4dc   :  { %v3622_v8 = vpop.f32.mrf.mxu1  ;;  %v3764_v41 = vpop.f32.mrf.mxu0 }
 0x4dd   :  { %v4272_v26 = vrot.slane %v3622_v8, %v14364_v51  ;;  %v4288_v50 = vrot.slane %v3764_v41, %v14364_v51  ;;  %v4932_v41 = vld [vmem:[%s18409_s6 + $0x1148] sm:$0xff] }
 0x4de   :  { %v3624_v44 = vpop.f32.mrf.mxu1  ;;  %v3766_v48 = vpop.f32.mrf.mxu0 }
 0x4df   :  { %v4276_v36 = vrot.slane %v3624_v44, %v14364_v51  ;;  %v4309_v20 = vmul.f32 %v4272_v26, %v18711_v13  ;;  %v4292_v59 = vrot.slane %v3766_v48, %v14364_v51  ;;  %v4313_v10 = vmul.f32 %v4288_v50, %v18665_v30  ;;  %v5136_v44 = vld [vmem:[%s18409_s6 + $0x17a8] sm:$0xff]  ;;  %v4926_v48 = vld [vmem:[%s18409_s6 + $0x1118] sm:$0xff] }
 0x4e0   :  { %v3693_v56 = vpop.f32.mrf.mxu1  ;;  %v14366_v54 = vpop.f32.mrf.mxu0  ;;  %v4912_v26 = vld [vmem:[%s18409_s6 + $0x10a8] sm:$0xff]  ;;  %v4890_v13 = vld [vmem:[%s18409_s6 + $0xff8] sm:$0xff] }
 0x4e1   :  { %v4280_v60 = vrot.slane %v3693_v56, %v14364_v51  ;;  %v4314_v30 = vmul.f32 %v4292_v59, %v18662_v38  ;;  %v5143_v38 = vld [vmem:[%s18409_s6 + $0x17e0] sm:$0xff]  ;;  %v5108_v50 = vld [vmem:[%s18409_s6 + $0x16c8] sm:$0xff] }
 0x4e2   :  { %v3695_v2 = vpop.f32.mrf.mxu1  ;;  %v14369_v7 = vpop.f32.mrf.mxu0  ;;  %v4883_v59 = vld [vmem:[%s18409_s6 + $0xfc0] sm:$0xff] }
 0x4e3   :  { %v4284_v12 = vrot.slane %v3695_v2, %v14364_v51  ;;  %v4311_v62 = vmul.f32 %v4280_v60, %v12770_v31  ;;  %v18712_v31 = vld [vmem:[#allocation9_spill] sm:$0xff]  ;;  %v4919_v2 = vld [vmem:[%s18409_s6 + $0x10e0] sm:$0xff] }
 0x4e4   :  { %v14372_v14 = vpop.f32.mrf.mxu1  ;;  %v4051_v18 = vpop.f32.mrf.mxu0  ;;  %v4310_v57 = vmul.f32 %v4276_v36, %v18712_v31  ;;  %v4925_v60 = vld [vmem:[%s18409_s6 + $0x1110] sm:$0xff]  ;;  %v5122_v36 = vld [vmem:[%s18409_s6 + $0x1738] sm:$0xff]  ;;  %v4884_v31 = vld [vmem:[%s18409_s6 + $0xfc8] sm:$0xff] }
 0x4e5   :  { %v4330_v22 = vrot.slane %v4051_v18, %v14364_v51  ;;  %v4312_v46 = vmul.f32 %v4284_v12, %v18710_v6  ;;  %v5129_v12 = vld [vmem:[%s18409_s6 + $0x1770] sm:$0xff]  ;;  %v4918_v18 = vld [vmem:[%s18409_s6 + $0x10d8] sm:$0xff]  ;;  %v5115_v6 = vld [vmem:[%s18409_s6 + $0x1700] sm:$0xff] }
 0x4e6   :  { %v3837_v43 = vpop.f32.mrf.mxu1  ;;  %v4053_v49 = vpop.f32.mrf.mxu0 }
 0x4e7   :  { %v4300_v9 = vrot.slane %v3837_v43, %v14364_v51  ;;  %v4334_v40 = vrot.slane %v4053_v49, %v14364_v51  ;;  %v4361_v17 = vadd.f32 %v4330_v22, %v4311_v62  ;;  %v5128_v22 = vld [vmem:[%s18409_s6 + $0x1768] sm:$0xff]  ;;  %v4911_v62 = vld [vmem:[%s18409_s6 + $0x10a0] sm:$0xff]  ;;  %v5121_v43 = vld [vmem:[%s18409_s6 + $0x1730] sm:$0xff] }
 0x4e8   :  { %v3980_v47 = vpop.f32.mrf.mxu1  ;;  %v14382_v53 = vpop.f32.mrf.mxu0  ;;  %v4905_v49 = vld [vmem:[%s18409_s6 + $0x1070] sm:$0xff] }
 0x4e9   :  { %v4362_v24 = vadd.f32 %v4334_v40, %v4312_v46  ;;  %v4322_v19 = vrot.slane %v3980_v47, %v14364_v51  ;;  %v4316_v37 = vmul.f32 %v4300_v9, %v13539_v29  ;;  %v14394_v15 = vmax.f32 %v4361_v17, 0.0  ;;  %v4904_v46 = vld [vmem:[%s18409_s6 + $0x1068] sm:$0xff]  ;;  %v5114_v9 = vld [vmem:[%s18409_s6 + $0x16f8] sm:$0xff]  ;;  %v4897_v17 = vld [vmem:[%s18409_s6 + $0x1030] sm:$0xff] }
 0x4ea   :  { %v3982_v23 = vpop.f32.mrf.mxu1  ;;  %v4195_v0 = vpop.f32.mrf.mxu0  ;;  %v4898_v40 = vld [vmem:[%s18409_s6 + $0x1038] sm:$0xff]  ;;  %v5107_v47 = vld [vmem:[%s18409_s6 + $0x16c0] sm:$0xff] }
 0x4eb   :  { %v14389_v27 = vmax.f32 %v4362_v24, 0.0  ;;  %v4326_v35 = vrot.slane %v3982_v23, %v14364_v51  ;;  %v4350_v33 = vrot.slane %v4195_v0, %v14364_v51  ;;  %v4359_v52 = vadd.f32 %v4322_v19, %v4309_v20  ;;  %v4891_v24 = vld [vmem:[%s18409_s6 + $0x1000] sm:$0xff]  ;;  %v5101_v19 = vld [vmem:[%s18409_s6 + $0x1690] sm:$0xff]  ;;  %v5100_v20 = vld [vmem:[%s18409_s6 + $0x1688] sm:$0xff] }
 0x4ec   :  { %v4122_v3 = vpop.f32.mrf.mxu1  ;;  %v5093_v23 = vld [vmem:[%s18409_s6 + $0x1650] sm:$0xff] }
 0x4ed   :  { %v4360_v58 = vadd.f32 %v4326_v35, %v4310_v57  ;;  %v4366_v61 = vadd.f32 %v4350_v33, %v4316_v37  ;;  %v4338_v29 = vrot.slane %v4122_v3, %v14364_v51  ;;  %5546 = vmatprep.mubr.f32.mxu1 %v14389_v27  ;;  %v14422_v45 = vmax.f32 %v4359_v52, 0.0  ;;  %v5094_v57 = vld [vmem:[%s18409_s6 + $0x1658] sm:$0xff]  ;;  %v4877_v0 = vld [vmem:[%s18409_s6 + $0xf90] sm:$0xff]  ;;  %v5087_v37 = vld [vmem:[%s18409_s6 + $0x1620] sm:$0xff] }
 0x4ee   :  { %v4124_v4 = vpop.f32.mrf.mxu1  ;;  %5547 = vmatmul.mubr.f32.vlgmr.msra.gmra.mxu1 %v14394_v15  ;;  %v4876_v35 = vld [vmem:[%s18409_s6 + $0xf88] sm:$0xff]  ;;  %v5086_v33 = vld [vmem:[%s18409_s6 + $0x1618] sm:$0xff]  ;;  %v5079_v52 = vld [vmem:[%s18409_s6 + $0x15e0] sm:$0xff] }
 0x4ef   :  { %v14409_v16 = vmax.f32 %v4360_v58, 0.0  ;;  %v14411_v21 = vmax.f32 %v4366_v61, 0.0  ;;  %v14413_v34 = vadd.f32 %v4338_v29, %v4313_v10  ;;  %v4342_v25 = vrot.slane %v4124_v4, %v14364_v51  ;;  %5625 = vmatpush1.msra.mxu1 %v5156_v55  ;;  %v4870_v10 = vld [vmem:[%s18409_s6 + $0xf58] sm:$0xff]  ;;  %v5080_v3 = vld [vmem:[%s18409_s6 + $0x15e8] sm:$0xff]  ;;  %v4869_v55 = vld [vmem:[%s18409_s6 + $0xf50] sm:$0xff] }
 0x4f0   :  { %5626 = vmatprep.subr.mxu1 %v5150_v5  ;;  %v4863_v58 = vld [vmem:[%s18409_s6 + $0xf20] sm:$0xff]  ;;  %v5073_v61 = vld [vmem:[%s18409_s6 + $0x15b0] sm:$0xff]  ;;  %v4862_v29 = vld [vmem:[%s18409_s6 + $0xf18] sm:$0xff] }
 0x4f1   :  { %v4364_v8 = vadd.f32 %v4342_v25, %v4314_v30  ;;  %5627 = vmatpush1.msra.mxu1 %v5149_v11  ;;  %5475 = vmatprep.mubr.f32.mxu0 %v14409_v16  ;;  %v5072_v5 = vld [vmem:[%s18409_s6 + $0x15a8] sm:$0xff]  ;;  %v5066_v4 = vld [vmem:[%s18409_s6 + $0x1578] sm:$0xff]  ;;  %v4855_v11 = vld [vmem:[%s18409_s6 + $0xee0] sm:$0xff] }
 0x4f2   :  { %5628 = vmatprep.subr.mxu1 %v5143_v38  ;;  %5688 = vmatprep.mubr.f32.mxu1 %v14411_v21  ;;  %v4856_v30 = vld [vmem:[%s18409_s6 + $0xee8] sm:$0xff]  ;;  %v5065_v25 = vld [vmem:[%s18409_s6 + $0x1570] sm:$0xff] }
 0x4f3   :  { %v14438_v56 = vmax.f32 %v4364_v8, 0.0  ;;  %5476 = vmatmul.mubr.f32.vlgmr.msra.gmra.mxu0 %v14422_v45  ;;  %5629 = vmatpush1.msra.mxu1 %v5142_v32  ;;  %v4849_v38 = vld [vmem:[%s18409_s6 + $0xeb0] sm:$0xff]  ;;  %v5059_v32 = vld [vmem:[%s18409_s6 + $0x1540] sm:$0xff]  ;;  %v4848_v8 = vld [vmem:[%s18409_s6 + $0xea8] sm:$0xff] }
 0x4f4   :  { %5554 = vmatpush1.msra.mxu0 %v4932_v41  ;;  %5630 = vmatprep.subr.mxu1 %v5136_v44  ;;  %v5058_v41 = vld [vmem:[%s18409_s6 + $0x1538] sm:$0xff] }
 0x4f5   :  { %5555 = vmatprep.subr.mxu0 %v4926_v48  ;;  %5631 = vmatpush1.msra.mxu1 %v5135_v1  ;;  %v4842_v44 = vld [vmem:[%s18409_s6 + $0xe78] sm:$0xff]  ;;  %v5052_v48 = vld [vmem:[%s18409_s6 + $0x1508] sm:$0xff]  ;;  %v4841_v1 = vld [vmem:[%s18409_s6 + $0xe70] sm:$0xff] }
 0x4f6   :  { %5556 = vmatpush1.msra.mxu0 %v4925_v60  ;;  %5617 = vmatprep.mubr.f32.mxu0 %v14438_v56  ;;  %v5051_v60 = vld [vmem:[%s18409_s6 + $0x1500] sm:$0xff] }
 0x4f7   :  { %5557 = vmatprep.subr.mxu0 %v4919_v2  ;;  %5632 = vmatprep.subr.mxu1 %v5129_v12  ;;  %v4835_v2 = vld [vmem:[%s18409_s6 + $0xe40] sm:$0xff]  ;;  %v5269_v12 = vld [vmem:[%s18409_s6 + $0x1bd0] sm:$0xff] }
 0x4f8   :  { %5558 = vmatpush1.msra.mxu0 %v4918_v18  ;;  %5633 = vmatpush1.msra.mxu1 %v5128_v22  ;;  %v4834_v18 = vld [vmem:[%s18409_s6 + $0xe38] sm:$0xff]  ;;  %v5268_v22 = vld [vmem:[%s18409_s6 + $0x1bc8] sm:$0xff] }
 0x4f9   :  { %5559 = vmatprep.subr.mxu0 %v4912_v26  ;;  %5634 = vmatprep.subr.mxu1 %v5122_v36  ;;  %v4828_v26 = vld [vmem:[%s18409_s6 + $0xe08] sm:$0xff]  ;;  %v5262_v36 = vld [vmem:[%s18409_s6 + $0x1b98] sm:$0xff] }
 0x4fa   :  { %5560 = vmatpush1.msra.mxu0 %v4911_v62  ;;  %5635 = vmatpush1.msra.mxu1 %v5121_v43  ;;  %v4827_v62 = vld [vmem:[%s18409_s6 + $0xe00] sm:$0xff]  ;;  %v5261_v43 = vld [vmem:[%s18409_s6 + $0x1b90] sm:$0xff] }
 0x4fb   :  { %5561 = vmatprep.subr.mxu0 %v4905_v49  ;;  %5636 = vmatprep.subr.mxu1 %v5115_v6  ;;  %v5045_v49 = vld [vmem:[%s18409_s6 + $0x14d0] sm:$0xff]  ;;  %v5255_v6 = vld [vmem:[%s18409_s6 + $0x1b60] sm:$0xff] }
 0x4fc   :  { %5562 = vmatpush1.msra.mxu0 %v4904_v46  ;;  %5637 = vmatpush1.msra.mxu1 %v5114_v9  ;;  %v5044_v46 = vld [vmem:[%s18409_s6 + $0x14c8] sm:$0xff]  ;;  %v5254_v9 = vld [vmem:[%s18409_s6 + $0x1b58] sm:$0xff] }
 0x4fd   :  { %5563 = vmatprep.subr.mxu0 %v4898_v40  ;;  %5638 = vmatprep.subr.mxu1 %v5108_v50  ;;  %v5038_v40 = vld [vmem:[%s18409_s6 + $0x1498] sm:$0xff]  ;;  %v5248_v50 = vld [vmem:[%s18409_s6 + $0x1b28] sm:$0xff] }
 0x4fe   :  { %5564 = vmatpush1.msra.mxu0 %v4897_v17  ;;  %5639 = vmatpush1.msra.mxu1 %v5107_v47  ;;  %v5037_v17 = vld [vmem:[%s18409_s6 + $0x1490] sm:$0xff]  ;;  %v5247_v47 = vld [vmem:[%s18409_s6 + $0x1b20] sm:$0xff] }
 0x4ff   :  { %5565 = vmatprep.subr.mxu0 %v4891_v24  ;;  %5640 = vmatprep.subr.mxu1 %v5101_v19  ;;  %v5031_v24 = vld [vmem:[%s18409_s6 + $0x1460] sm:$0xff]  ;;  %v5241_v19 = vld [vmem:[%s18409_s6 + $0x1af0] sm:$0xff] }
 0x500   :  { %5566 = vmatpush1.msra.mxu0 %v4890_v13  ;;  %5641 = vmatpush1.msra.mxu1 %v5100_v20  ;;  %v5030_v13 = vld [vmem:[%s18409_s6 + $0x1458] sm:$0xff]  ;;  %v5240_v20 = vld [vmem:[%s18409_s6 + $0x1ae8] sm:$0xff] }
 0x501   :  { %5567 = vmatprep.subr.mxu0 %v4884_v31  ;;  %5642 = vmatprep.subr.mxu1 %v5094_v57  ;;  %v5024_v31 = vld [vmem:[%s18409_s6 + $0x1428] sm:$0xff]  ;;  %v5234_v57 = vld [vmem:[%s18409_s6 + $0x1ab8] sm:$0xff] }
 0x502   :  { %5568 = vmatpush1.msra.mxu0 %v4883_v59  ;;  %5643 = vmatpush1.msra.mxu1 %v5093_v23  ;;  %v5023_v59 = vld [vmem:[%s18409_s6 + $0x1420] sm:$0xff]  ;;  %v5233_v23 = vld [vmem:[%s18409_s6 + $0x1ab0] sm:$0xff] }
 0x503   :  { %5569 = vmatprep.subr.mxu0 %v4877_v0  ;;  %5644 = vmatprep.subr.mxu1 %v5087_v37  ;;  %v5017_v0 = vld [vmem:[%s18409_s6 + $0x13f0] sm:$0xff]  ;;  %v5227_v37 = vld [vmem:[%s18409_s6 + $0x1a80] sm:$0xff] }
 0x504   :  { %5570 = vmatpush1.msra.mxu0 %v4876_v35  ;;  %5645 = vmatpush1.msra.mxu1 %v5086_v33  ;;  %v5016_v35 = vld [vmem:[%s18409_s6 + $0x13e8] sm:$0xff]  ;;  %v5226_v33 = vld [vmem:[%s18409_s6 + $0x1a78] sm:$0xff] }
 0x505   :  { %5571 = vmatprep.subr.mxu0 %v4870_v10  ;;  %5646 = vmatprep.subr.mxu1 %v5080_v3  ;;  %v5010_v10 = vld [vmem:[%s18409_s6 + $0x13b8] sm:$0xff]  ;;  %v5220_v3 = vld [vmem:[%s18409_s6 + $0x1a48] sm:$0xff] }
 0x506   :  { %5572 = vmatpush1.msra.mxu0 %v4869_v55  ;;  %5647 = vmatpush1.msra.mxu1 %v5079_v52  ;;  %v5009_v55 = vld [vmem:[%s18409_s6 + $0x13b0] sm:$0xff]  ;;  %v5219_v52 = vld [vmem:[%s18409_s6 + $0x1a40] sm:$0xff] }
 0x507   :  { %5573 = vmatprep.subr.mxu0 %v4863_v58  ;;  %5648 = vmatprep.subr.mxu1 %v5073_v61  ;;  %v5003_v58 = vld [vmem:[%s18409_s6 + $0x1380] sm:$0xff]  ;;  %v5213_v61 = vld [vmem:[%s18409_s6 + $0x1a10] sm:$0xff] }
 0x508   :  { %5574 = vmatpush1.msra.mxu0 %v4862_v29  ;;  %5649 = vmatpush1.msra.mxu1 %v5072_v5  ;;  %v5002_v29 = vld [vmem:[%s18409_s6 + $0x1378] sm:$0xff]  ;;  %v5212_v5 = vld [vmem:[%s18409_s6 + $0x1a08] sm:$0xff] }
 0x509   :  { %5575 = vmatprep.subr.mxu0 %v4856_v30  ;;  %5650 = vmatprep.subr.mxu1 %v5066_v4  ;;  %v4996_v30 = vld [vmem:[%s18409_s6 + $0x1348] sm:$0xff]  ;;  %v5206_v4 = vld [vmem:[%s18409_s6 + $0x19d8] sm:$0xff] }
 0x50a   :  { %5576 = vmatpush1.msra.mxu0 %v4855_v11  ;;  %5651 = vmatpush1.msra.mxu1 %v5065_v25  ;;  %v4995_v11 = vld [vmem:[%s18409_s6 + $0x1340] sm:$0xff]  ;;  %v5205_v25 = vld [vmem:[%s18409_s6 + $0x19d0] sm:$0xff] }
 0x50b   :  { %5577 = vmatprep.subr.mxu0 %v4849_v38  ;;  %5652 = vmatprep.subr.mxu1 %v5059_v32  ;;  %v4989_v38 = vld [vmem:[%s18409_s6 + $0x1310] sm:$0xff]  ;;  %v5199_v32 = vld [vmem:[%s18409_s6 + $0x19a0] sm:$0xff] }
 0x50c   :  { %5578 = vmatpush1.msra.mxu0 %v4848_v8  ;;  %5653 = vmatpush1.msra.mxu1 %v5058_v41  ;;  %v4988_v8 = vld [vmem:[%s18409_s6 + $0x1308] sm:$0xff]  ;;  %v5198_v41 = vld [vmem:[%s18409_s6 + $0x1998] sm:$0xff] }
 0x50d   :  { %5579 = vmatprep.subr.mxu0 %v4842_v44  ;;  %5654 = vmatprep.subr.mxu1 %v5052_v48  ;;  %v4982_v44 = vld [vmem:[%s18409_s6 + $0x12d8] sm:$0xff]  ;;  %v5192_v48 = vld [vmem:[%s18409_s6 + $0x1968] sm:$0xff] }
 0x50e   :  { %5580 = vmatpush1.msra.mxu0 %v4841_v1  ;;  %5655 = vmatpush1.msra.mxu1 %v5051_v60  ;;  %v4296_v1 = vrot.slane %v14372_v14, %v14364_v51  ;;  %v4981_v60 = vld [vmem:[%s18409_s6 + $0x12d0] sm:$0xff] }
 0x50f   :  { %5581 = vmatprep.subr.mxu0 %v4835_v2  ;;  %5656 = vmatprep.subr.mxu1 %v5269_v12  ;;  %v5191_v2 = vld [vmem:[%s18409_s6 + $0x1960] sm:$0xff]  ;;  %v5185_v14 = vld [vmem:[%s18409_s6 + $0x1930] sm:$0xff] }
 0x510   :  { %5582 = vmatpush1.msra.mxu0 %v4834_v18  ;;  %5657 = vmatpush2.msra.mxu1 %v5268_v22  ;;  %v4975_v12 = vld [vmem:[%s18409_s6 + $0x12a0] sm:$0xff]  ;;  %v4346_v18 = vrot.slane %v14382_v53, %v14364_v51  ;;  %v14743_v22 = vpop.f32.mrf.mxu1  ;;  %v5178_v53 = vld [vmem:[%s18409_s6 + $0x18f8] sm:$0xff] }
 0x511   :  { %5583 = vmatprep.subr.mxu0 %v4828_v26  ;;  %5658 = vmatprep.subr.mxu1 %v5262_v36  ;;  %v4974_v26 = vld [vmem:[%s18409_s6 + $0x1298] sm:$0xff]  ;;  %v5184_v36 = vld [vmem:[%s18409_s6 + $0x1928] sm:$0xff] }
 0x512   :  { %5584 = vmatpush1.msra.mxu0 %v4827_v62  ;;  %5659 = vmatpush2.msra.mxu1 %v5261_v43  ;;  %v4968_v62 = vld [vmem:[%s18409_s6 + $0x1268] sm:$0xff]  ;;  %v4315_v43 = vmul.f32 %v4296_v1, %v13528_v63  ;;  %v5171_v63 = vld [vmem:[%s18409_s6 + $0x18c0] sm:$0xff] }
 0x513   :  { %5585 = vmatprep.subr.mxu0 %v5045_v49  ;;  %5660 = vmatprep.subr.mxu1 %v5255_v6  ;;  %v4967_v49 = vld [vmem:[%s18409_s6 + $0x1260] sm:$0xff]  ;;  %v5177_v6 = vld [vmem:[%s18409_s6 + $0x18f0] sm:$0xff] }
 0x514   :  { %5586 = vmatpush2.msra.mxu0 %v5044_v46  ;;  %5661 = vmatpush2.msra.mxu1 %v5254_v9  ;;  %v4961_v46 = vld [vmem:[%s18409_s6 + $0x1230] sm:$0xff]  ;;  %v4365_v9 = vadd.f32 %v4346_v18, %v4315_v43  ;;  %v4451_v1 = vld [vmem:[%s18409_s6 + $0x240] sm:$0xff]  ;;  %v5346_v18 = vld [vmem:[%s18409_s6 + $0x1e38] sm:$0xff] }
 0x515   :  { %5587 = vmatprep.subr.mxu0 %v5038_v40  ;;  %5662 = vmatprep.subr.mxu1 %v5248_v50  ;;  %v4266_v40 = vpop.f32.mrf.mxu1  ;;  %v4960_v50 = vld [vmem:[%s18409_s6 + $0x1228] sm:$0xff]  ;;  %v4431_v43 = vld [vmem:[%s18409_s6 + $0x1a0] sm:$0xff] }
 0x516   :  { %5588 = vmatpush2.msra.mxu0 %v5037_v17  ;;  %5663 = vmatpush2.msra.mxu1 %v5247_v47  ;;  %v5170_v17 = vld [vmem:[%s18409_s6 + $0x18b8] sm:$0xff]  ;;  %v4308_v47 = vrot.slane %v14369_v7, %v14364_v51  ;;  %v5163_v7 = vld [vmem:[%s18409_s6 + $0x1880] sm:$0xff] }
 0x517   :  { %5589 = vmatprep.subr.mxu0 %v5031_v24  ;;  %5664 = vmatprep.subr.mxu1 %v5241_v19  ;;  %v4954_v24 = vld [vmem:[%s18409_s6 + $0x11f8] sm:$0xff]  ;;  %v5164_v19 = vld [vmem:[%s18409_s6 + $0x1888] sm:$0xff] }
 0x518   :  { %5590 = vmatpush2.msra.mxu0 %v5030_v13  ;;  %5665 = vmatpush2.msra.mxu1 %v5240_v20  ;;  %v4953_v13 = vld [vmem:[%s18409_s6 + $0x11f0] sm:$0xff]  ;;  %v4358_v20 = vrot.slane %v4266_v40, %v14364_v51  ;;  %v4423_v40 = vld [vmem:[%s18409_s6 + $0x160] sm:$0xff] }
 0x519   :  { %5591 = vmatprep.subr.mxu0 %v5024_v31  ;;  %5666 = vmatprep.subr.mxu1 %v5234_v57  ;;  %v4947_v31 = vld [vmem:[%s18409_s6 + $0x11c0] sm:$0xff]  ;;  %v14794_v57 = vmax.f32 %v4365_v9, 0.0 }
 0x51a   :  { %5592 = vmatpush2.msra.mxu0 %v5023_v59  ;;  %5667 = vmatpush2.msra.mxu1 %v5233_v23  ;;  %v4487_v59 = vld [vmem:[%s18409_s6 + $0x360] sm:$0xff]  ;;  %v4946_v23 = vld [vmem:[%s18409_s6 + $0x11b8] sm:$0xff] }
 0x51b   :  { %5593 = vmatprep.subr.mxu0 %v5017_v0  ;;  %5668 = vmatprep.subr.mxu1 %v5227_v37  ;;  %v4318_v0 = vmul.f32 %v4308_v47, %v13791_v39  ;;  %v4486_v37 = vld [vmem:[%s18409_s6 + $0x358] sm:$0xff]  ;;  %v4939_v39 = vld [vmem:[%s18409_s6 + $0x1180] sm:$0xff]  ;;  %v5324_v47 = vld [vmem:[%s18409_s6 + $0x1d88] sm:$0xff] }
 0x51c   :  { %5594 = vmatpush2.msra.mxu0 %v5016_v35  ;;  %5669 = vmatpush2.msra.mxu1 %v5226_v33  ;;  %v4940_v35 = vld [vmem:[%s18409_s6 + $0x1188] sm:$0xff]  ;;  %v5331_v9 = vld [vmem:[%s18409_s6 + $0x1dc0] sm:$0xff] }
 0x51d   :  { %5595 = vmatprep.subr.mxu0 %v5010_v10  ;;  %5670 = vmatprep.subr.mxu1 %v5220_v3  ;;  %v4480_v33 = vld [vmem:[%s18409_s6 + $0x328] sm:$0xff]  ;;  %v4368_v10 = vadd.f32 %v4358_v20, %v4318_v0  ;;  %v4479_v3 = vld [vmem:[%s18409_s6 + $0x320] sm:$0xff]  ;;  %v4409_v20 = vld [vmem:[%s18409_s6 + $0xf0] sm:$0xff] }
 0x51e   :  { %5596 = vmatpush2.msra.mxu0 %v5009_v55  ;;  %5671 = vmatpush2.msra.mxu1 %v5219_v52  ;;  %v5381_v55 = vld [vmem:[%s18409_s6 + $0x1f50] sm:$0xff]  ;;  %v14824_v52 = vmax.f32 %v14413_v34, 0.0  ;;  %v5374_v34 = vld [vmem:[%s18409_s6 + $0x1f18] sm:$0xff] }
 0x51f   :  { %5597 = vmatprep.subr.mxu0 %v5003_v58  ;;  %5672 = vmatprep.subr.mxu1 %v5213_v61  ;;  %v4473_v58 = vld [vmem:[%s18409_s6 + $0x2f0] sm:$0xff]  ;;  %v5380_v61 = vld [vmem:[%s18409_s6 + $0x1f48] sm:$0xff]  ;;  %v4402_v0 = vld [vmem:[%s18409_s6 + $0xb8] sm:$0xff] }
 0x520   :  { %5598 = vmatpush2.msra.mxu0 %v5002_v29  ;;  %5673 = vmatpush2.msra.mxu1 %v5212_v5  ;;  %v4472_v29 = vld [vmem:[%s18409_s6 + $0x2e8] sm:$0xff]  ;;  %v14835_v5 = vmax.f32 %v4368_v10, 0.0  ;;  %v4395_v10 = vld [vmem:[%s18409_s6 + $0x80] sm:$0xff] }
 0x521   :  { %5599 = vmatprep.subr.mxu0 %v4996_v30  ;;  %5674 = vmatprep.subr.mxu1 %v5206_v4  ;;  %v4466_v30 = vld [vmem:[%s18409_s6 + $0x2b8] sm:$0xff]  ;;  %v5373_v4 = vld [vmem:[%s18409_s6 + $0x1f10] sm:$0xff] }
 0x522   :  { %5600 = vmatpush2.msra.mxu0 %v4995_v11  ;;  %5675 = vmatpush2.msra.mxu1 %v5205_v25  ;;  %v4465_v11 = vld [vmem:[%s18409_s6 + $0x2b0] sm:$0xff]  ;;  %v5367_v25 = vld [vmem:[%s18409_s6 + $0x1ee0] sm:$0xff] }
 0x523   :  { %5601 = vmatprep.subr.mxu0 %v4989_v38  ;;  %5676 = vmatprep.subr.mxu1 %v5199_v32  ;;  %v4459_v38 = vld [vmem:[%s18409_s6 + $0x280] sm:$0xff]  ;;  %v5366_v32 = vld [vmem:[%s18409_s6 + $0x1ed8] sm:$0xff] }
 0x524   :  { %5602 = vmatpush2.msra.mxu0 %v4988_v8  ;;  %5677 = vmatpush2.msra.mxu1 %v5198_v41  ;;  %v4458_v8 = vld [vmem:[%s18409_s6 + $0x278] sm:$0xff]  ;;  %v5360_v41 = vld [vmem:[%s18409_s6 + $0x1ea8] sm:$0xff] }
 0x525   :  { %5603 = vmatprep.subr.mxu0 %v4982_v44  ;;  %5678 = vmatprep.subr.mxu1 %v5192_v48  ;;  %v4452_v44 = vld [vmem:[%s18409_s6 + $0x248] sm:$0xff]  ;;  %v5359_v48 = vld [vmem:[%s18409_s6 + $0x1ea0] sm:$0xff] }
 0x526   :  { %5604 = vmatpush2.msra.mxu0 %v4981_v60  ;;  %5679 = vmatpush2.msra.mxu1 %v5191_v2  ;;  %v5353_v60 = vld [vmem:[%s18409_s6 + $0x1e70] sm:$0xff] }
 0x527   :  { %5605 = vmatprep.subr.mxu0 %v4975_v12  ;;  %5680 = vmatprep.subr.mxu1 %v5185_v14  ;;  %v4445_v2 = vld [vmem:[%s18409_s6 + $0x210] sm:$0xff]  ;;  %v5352_v12 = vld [vmem:[%s18409_s6 + $0x1e68] sm:$0xff] }
 0x528   :  { %5606 = vmatpush2.msra.mxu0 %v4974_v26  ;;  %5681 = vmatpush2.msra.mxu1 %v5184_v36  ;;  %v4444_v14 = vld [vmem:[%s18409_s6 + $0x208] sm:$0xff]  ;;  %v4438_v26 = vld [vmem:[%s18409_s6 + $0x1d8] sm:$0xff]  ;;  %v5345_v36 = vld [vmem:[%s18409_s6 + $0x1e30] sm:$0xff] }
 0x529   :  { %5607 = vmatprep.subr.mxu0 %v4968_v62  ;;  %5682 = vmatprep.subr.mxu1 %v5178_v53  ;;  %v4437_v62 = vld [vmem:[%s18409_s6 + $0x1d0] sm:$0xff]  ;;  %v5339_v53 = vld [vmem:[%s18409_s6 + $0x1e00] sm:$0xff] }
 0x52a   :  { %5608 = vmatpush2.msra.mxu0 %v4967_v49  ;;  %5683 = vmatpush2.msra.mxu1 %v5177_v6  ;;  %v5338_v49 = vld [vmem:[%s18409_s6 + $0x1df8] sm:$0xff] }
 0x52b   :  { %5609 = vmatprep.subr.mxu0 %v4961_v46  ;;  %5684 = vmatprep.subr.mxu1 %v5171_v63  ;;  %v4430_v6 = vld [vmem:[%s18409_s6 + $0x198] sm:$0xff]  ;;  %v5332_v46 = vld [vmem:[%s18409_s6 + $0x1dc8] sm:$0xff] }
 0x52c   :  { %5610 = vmatpush2.msra.mxu0 %v4960_v50  ;;  %5685 = vmatpush2.msra.mxu1 %v5170_v17  ;;  %v4424_v63 = vld [vmem:[%s18409_s6 + $0x168] sm:$0xff]  ;;  %v5325_v50 = vld [vmem:[%s18409_s6 + $0x1d90] sm:$0xff] }
 0x52d   :  { %5611 = vmatprep.subr.mxu0 %v4954_v24  ;;  %5686 = vmatprep.subr.mxu1 %v5164_v19  ;;  %v4417_v17 = vld [vmem:[%s18409_s6 + $0x130] sm:$0xff]  ;;  %v4416_v24 = vld [vmem:[%s18409_s6 + $0x128] sm:$0xff]  ;;  %v5318_v19 = vld [vmem:[%s18409_s6 + $0x1d58] sm:$0xff] }
 0x52e   :  { %5612 = vmatpush2.msra.mxu0 %v4953_v13  ;;  %5687 = vmatpush2.msra.mxu1 %v5163_v7  ;;  %v4410_v13 = vld [vmem:[%s18409_s6 + $0xf8] sm:$0xff]  ;;  %v5317_v7 = vld [vmem:[%s18409_s6 + $0x1d50] sm:$0xff] }
 0x52f   :  { %5613 = vmatprep.subr.mxu0 %v4947_v31  ;;  %5689 = vmatmul.mubr.f32.vlgmr.msra.gmra.mxu1 %v14794_v57  ;;  %v5311_v31 = vld [vmem:[%s18409_s6 + $0x1d20] sm:$0xff] }
 0x530   :  { %5766 = vmatprep.subr.mxu1 %v4487_v59  ;;  %5614 = vmatpush2.msra.mxu0 %v4946_v23  ;;  %v4403_v59 = vld [vmem:[%s18409_s6 + $0xc0] sm:$0xff]  ;;  %v5310_v23 = vld [vmem:[%s18409_s6 + $0x1d18] sm:$0xff] }
 0x531   :  { %5767 = vmatpush1.msra.mxu1 %v4486_v37  ;;  %5830 = vmatprep.mubr.f32.mxu1 %v14409_v16  ;;  %v5304_v37 = vld [vmem:[%s18409_s6 + $0x1ce8] sm:$0xff] }
 0x532   :  { %5615 = vmatprep.subr.mxu0 %v4940_v35  ;;  %5768 = vmatprep.subr.mxu1 %v4480_v33  ;;  %v4396_v35 = vld [vmem:[%s18409_s6 + $0x88] sm:$0xff]  ;;  %v5303_v33 = vld [vmem:[%s18409_s6 + $0x1ce0] sm:$0xff] }
 0x533   :  { %5616 = vmatpush2.msra.mxu0 %v4939_v39  ;;  %5769 = vmatpush1.msra.mxu1 %v4479_v3  ;;  %v5297_v39 = vld [vmem:[%s18409_s6 + $0x1cb0] sm:$0xff] }
 0x534   :  { %5618 = vmatmul.mubr.f32.vlgmr.msra.gmra.mxu0 %v14824_v52  ;;  %5695 = vmatprep.subr.mxu0 %v5381_v55  ;;  %v4389_v3 = vld [vmem:[%s18409_s6 + $0x50] sm:$0xff]  ;;  %v5296_v55 = vld [vmem:[%s18409_s6 + $0x1ca8] sm:$0xff] }
 0x535   :  { %5770 = vmatprep.subr.mxu1 %v4473_v58  ;;  %5696 = vmatpush1.msra.mxu0 %v5380_v61  ;;  %v4388_v58 = vld [vmem:[%s18409_s6 + $0x48] sm:$0xff]  ;;  %v5290_v61 = vld [vmem:[%s18409_s6 + $0x1c78] sm:$0xff] }
 0x536   :  { %8739 = vmatprep.mubr.msk.f32.mxu0 %vm2805_vm3, %v14835_v5  ;;  %5771 = vmatpush1.msra.mxu1 %v4472_v29  ;;  %v4382_v29 = vld [vmem:[%s18409_s6 + $0x18] sm:$0xff] }
 0x537   :  { %5697 = vmatprep.subr.mxu0 %v5374_v34  ;;  %5772 = vmatprep.subr.mxu1 %v4466_v30  ;;  %v5289_v34 = vld [vmem:[%s18409_s6 + $0x1c70] sm:$0xff] }
 0x538   :  { %5698 = vmatpush1.msra.mxu0 %v5373_v4  ;;  %5773 = vmatpush1.msra.mxu1 %v4465_v11  ;;  %v4381_v30 = vld [vmem:[%s18409_s6 + $0x10] sm:$0xff]  ;;  %v5283_v4 = vld [vmem:[%s18409_s6 + $0x1c40] sm:$0xff] }
 0x539   :  { %5699 = vmatprep.subr.mxu0 %v5367_v25  ;;  %5774 = vmatprep.subr.mxu1 %v4459_v38  ;;  %v4599_v11 = vld [vmem:[%s18409_s6 + $0x6e0] sm:$0xff]  ;;  %v4304_v25 = vrot.slane %v14366_v54, %v14364_v51  ;;  %v5282_v38 = vld [vmem:[%s18409_s6 + $0x1c38] sm:$0xff]  ;;  %v4592_v54 = vld [vmem:[%s18409_s6 + $0x6a8] sm:$0xff] }
 0x53a   :  { %5700 = vmatpush1.msra.mxu0 %v5366_v32  ;;  %5775 = vmatpush1.msra.mxu1 %v4458_v8  ;;  %v4598_v32 = vld [vmem:[%s18409_s6 + $0x6d8] sm:$0xff]  ;;  %v5276_v8 = vld [vmem:[%s18409_s6 + $0x1c08] sm:$0xff] }
 0x53b   :  { %5701 = vmatprep.subr.mxu0 %v5360_v41  ;;  %5776 = vmatprep.subr.mxu1 %v4452_v44  ;;  %v4354_v41 = vrot.slane %v14743_v22, %v14364_v51  ;;  %v5275_v44 = vld [vmem:[%s18409_s6 + $0x1c00] sm:$0xff]  ;;  %v4585_v22 = vld [vmem:[%s18409_s6 + $0x670] sm:$0xff] }
 0x53c   :  { %5702 = vmatpush1.msra.mxu0 %v5359_v48  ;;  %5777 = vmatpush1.msra.mxu1 %v4451_v1  ;;  %v4591_v48 = vld [vmem:[%s18409_s6 + $0x6a0] sm:$0xff]  ;;  %v5402_v1 = vld [vmem:[%s18409_s6 + $0x1ff8] sm:$0xff] }
 0x53d   :  { %5703 = vmatprep.subr.mxu0 %v5353_v60  ;;  %5778 = vmatprep.subr.mxu1 %v4445_v2  ;;  %v4317_v60 = vmul.f32 %v4304_v25, %v13787_v28  ;;  %v5401_v2 = vld [vmem:[%s18409_s6 + $0x1ff0] sm:$0xff]  ;;  %v4578_v28 = vld [vmem:[%s18409_s6 + $0x638] sm:$0xff] }
 0x53e   :  { %5704 = vmatpush1.msra.mxu0 %v5352_v12  ;;  %5779 = vmatpush1.msra.mxu1 %v4444_v14  ;;  %v4584_v12 = vld [vmem:[%s18409_s6 + $0x668] sm:$0xff]  ;;  %v5395_v14 = vld [vmem:[%s18409_s6 + $0x1fc0] sm:$0xff]  ;;  %v4514_v25 = vld [vmem:[%s18409_s6 + $0x438] sm:$0xff] }
 0x53f   :  { %5705 = vmatprep.subr.mxu0 %v5346_v18  ;;  %5780 = vmatprep.subr.mxu1 %v4438_v26  ;;  %v4367_v18 = vadd.f32 %v4354_v41, %v4317_v60  ;;  %v5394_v26 = vld [vmem:[%s18409_s6 + $0x1fb8] sm:$0xff] }
 0x540   :  { %5706 = vmatpush1.msra.mxu0 %v5345_v36  ;;  %5781 = vmatpush1.msra.mxu1 %v4437_v62  ;;  %v4577_v36 = vld [vmem:[%s18409_s6 + $0x630] sm:$0xff]  ;;  %v5388_v62 = vld [vmem:[%s18409_s6 + $0x1f88] sm:$0xff]  ;;  %v4654_v41 = vld [vmem:[%s18409_s6 + $0x898] sm:$0xff] }
 0x541   :  { %5707 = vmatprep.subr.mxu0 %v5339_v53  ;;  %5782 = vmatprep.subr.mxu1 %v4431_v43  ;;  %v4571_v53 = vld [vmem:[%s18409_s6 + $0x600] sm:$0xff]  ;;  %v4494_v60 = vld [vmem:[%s18409_s6 + $0x398] sm:$0xff] }
 0x542   :  { %5708 = vmatpush1.msra.mxu0 %v5338_v49  ;;  %5783 = vmatpush1.msra.mxu1 %v4430_v6  ;;  %v5387_v43 = vld [vmem:[%s18409_s6 + $0x1f80] sm:$0xff]  ;;  %v4570_v49 = vld [vmem:[%s18409_s6 + $0x5f8] sm:$0xff]  ;;  %v4564_v6 = vld [vmem:[%s18409_s6 + $0x5c8] sm:$0xff] }
 0x543   :  { %5709 = vmatprep.subr.mxu0 %v5332_v46  ;;  %5784 = vmatprep.subr.mxu1 %v4424_v63  ;;  %v15064_v46 = vmax.f32 %v4367_v18, 0.0  ;;  %v4711_v63 = vld [vmem:[%s18409_s6 + $0xa60] sm:$0xff] }
 0x544   :  { %5710 = vmatpush1.msra.mxu0 %v5331_v9  ;;  %5785 = vmatpush1.msra.mxu1 %v4423_v40  ;;  %v4563_v9 = vld [vmem:[%s18409_s6 + $0x5c0] sm:$0xff]  ;;  %v4710_v40 = vld [vmem:[%s18409_s6 + $0xa58] sm:$0xff] }
 0x545   :  { %5711 = vmatprep.subr.mxu0 %v5325_v50  ;;  %5786 = vmatprep.subr.mxu1 %v4417_v17  ;;  %v4557_v50 = vld [vmem:[%s18409_s6 + $0x590] sm:$0xff]  ;;  %v4704_v17 = vld [vmem:[%s18409_s6 + $0xa28] sm:$0xff]  ;;  %v4935_v18 = vld [vmem:[%s18409_s6 + $0x1160] sm:$0xff] }
 0x546   :  { %5712 = vmatpush1.msra.mxu0 %v5324_v47  ;;  %5787 = vmatpush1.msra.mxu1 %v4416_v24  ;;  %v4556_v47 = vld [vmem:[%s18409_s6 + $0x588] sm:$0xff]  ;;  %v4703_v24 = vld [vmem:[%s18409_s6 + $0xa20] sm:$0xff] }
 0x547   :  { %5713 = vmatprep.subr.mxu0 %v5318_v19  ;;  %5788 = vmatprep.subr.mxu1 %v4410_v13  ;;  %v4550_v19 = vld [vmem:[%s18409_s6 + $0x558] sm:$0xff]  ;;  %v4697_v13 = vld [vmem:[%s18409_s6 + $0x9f0] sm:$0xff] }
 0x548   :  { %5714 = vmatpush1.msra.mxu0 %v5317_v7  ;;  %5789 = vmatpush1.msra.mxu1 %v4409_v20  ;;  %v4549_v7 = vld [vmem:[%s18409_s6 + $0x550] sm:$0xff]  ;;  %v4696_v20 = vld [vmem:[%s18409_s6 + $0x9e8] sm:$0xff] }
 0x549   :  { %5715 = vmatprep.subr.mxu0 %v5311_v31  ;;  %5790 = vmatprep.subr.mxu1 %v4403_v59  ;;  %v4543_v31 = vld [vmem:[%s18409_s6 + $0x520] sm:$0xff]  ;;  %v4690_v59 = vld [vmem:[%s18409_s6 + $0x9b8] sm:$0xff] }
 0x54a   :  { %5716 = vmatpush1.msra.mxu0 %v5310_v23  ;;  %5791 = vmatpush1.msra.mxu1 %v4402_v0  ;;  %v4542_v23 = vld [vmem:[%s18409_s6 + $0x518] sm:$0xff]  ;;  %v4689_v0 = vld [vmem:[%s18409_s6 + $0x9b0] sm:$0xff] }
 0x54b   :  { %5717 = vmatprep.subr.mxu0 %v5304_v37  ;;  %5792 = vmatprep.subr.mxu1 %v4396_v35  ;;  %v4536_v37 = vld [vmem:[%s18409_s6 + $0x4e8] sm:$0xff]  ;;  %v4683_v35 = vld [vmem:[%s18409_s6 + $0x980] sm:$0xff] }
 0x54c   :  { %5718 = vmatpush1.msra.mxu0 %v5303_v33  ;;  %5793 = vmatpush1.msra.mxu1 %v4395_v10  ;;  %v4535_v33 = vld [vmem:[%s18409_s6 + $0x4e0] sm:$0xff]  ;;  %v4682_v10 = vld [vmem:[%s18409_s6 + $0x978] sm:$0xff] }
 0x54d   :  { %5719 = vmatprep.subr.mxu0 %v5297_v39  ;;  %5794 = vmatprep.subr.mxu1 %v4389_v3  ;;  %v4529_v39 = vld [vmem:[%s18409_s6 + $0x4b0] sm:$0xff]  ;;  %v4676_v3 = vld [vmem:[%s18409_s6 + $0x948] sm:$0xff] }
 0x54e   :  { %5720 = vmatpush1.msra.mxu0 %v5296_v55  ;;  %5795 = vmatpush1.msra.mxu1 %v4388_v58  ;;  %v4528_v55 = vld [vmem:[%s18409_s6 + $0x4a8] sm:$0xff]  ;;  %v4675_v58 = vld [vmem:[%s18409_s6 + $0x940] sm:$0xff] }
 0x54f   :  { %5721 = vmatprep.subr.mxu0 %v5290_v61  ;;  %5796 = vmatprep.subr.mxu1 %v4382_v29  ;;  %v4522_v61 = vld [vmem:[%s18409_s6 + $0x478] sm:$0xff]  ;;  %v4669_v29 = vld [vmem:[%s18409_s6 + $0x910] sm:$0xff] }
 0x550   :  { %5722 = vmatpush1.msra.mxu0 %v5289_v34  ;;  %5797 = vmatpush1.msra.mxu1 %v4381_v30  ;;  %v4521_v34 = vld [vmem:[%s18409_s6 + $0x470] sm:$0xff]  ;;  %v4668_v30 = vld [vmem:[%s18409_s6 + $0x908] sm:$0xff] }
 0x551   :  { %5723 = vmatprep.subr.mxu0 %v5283_v4  ;;  %5798 = vmatprep.subr.mxu1 %v4599_v11  ;;  %v4515_v4 = vld [vmem:[%s18409_s6 + $0x440] sm:$0xff]  ;;  %v4662_v11 = vld [vmem:[%s18409_s6 + $0x8d8] sm:$0xff] }
 0x552   :  { %5724 = vmatpush1.msra.mxu0 %v5282_v38  ;;  %5799 = vmatpush2.msra.mxu1 %v4598_v32  ;;  %v4661_v38 = vld [vmem:[%s18409_s6 + $0x8d0] sm:$0xff]  ;;  %v4508_v32 = vld [vmem:[%s18409_s6 + $0x408] sm:$0xff] }
 0x553   :  { %5725 = vmatprep.subr.mxu0 %v5276_v8  ;;  %5800 = vmatprep.subr.mxu1 %v4592_v54  ;;  %v4655_v8 = vld [vmem:[%s18409_s6 + $0x8a0] sm:$0xff] }
 0x554   :  { %5726 = vmatpush1.msra.mxu0 %v5275_v44  ;;  %5801 = vmatpush2.msra.mxu1 %v4591_v48  ;;  %v4507_v54 = vld [vmem:[%s18409_s6 + $0x400] sm:$0xff]  ;;  %v4501_v44 = vld [vmem:[%s18409_s6 + $0x3d0] sm:$0xff]  ;;  %v4648_v48 = vld [vmem:[%s18409_s6 + $0x868] sm:$0xff] }
 0x555   :  { %5753 = vmatprep.subr.mxu0 %v5402_v1  ;;  %5802 = vmatprep.subr.mxu1 %v4585_v22  ;;  %v4500_v1 = vld [vmem:[%s18409_s6 + $0x3c8] sm:$0xff]  ;;  %v4647_v22 = vld [vmem:[%s18409_s6 + $0x860] sm:$0xff] }
 0x556   :  { %5754 = vmatpush2.msra.mxu0 %v5401_v2  ;;  %5803 = vmatpush2.msra.mxu1 %v4584_v12  ;;  %v4641_v2 = vld [vmem:[%s18409_s6 + $0x830] sm:$0xff] }
 0x557   :  { %5755 = vmatprep.subr.mxu0 %v5395_v14  ;;  %5804 = vmatprep.subr.mxu1 %v4578_v28  ;;  %v4493_v12 = vld [vmem:[%s18409_s6 + $0x390] sm:$0xff]  ;;  %v4640_v14 = vld [vmem:[%s18409_s6 + $0x828] sm:$0xff]  ;;  %v4634_v28 = vld [vmem:[%s18409_s6 + $0x7f8] sm:$0xff] }
 0x558   :  { %5756 = vmatpush2.msra.mxu0 %v5394_v26  ;;  %5805 = vmatpush2.msra.mxu1 %v4577_v36  ;;  %v4633_v26 = vld [vmem:[%s18409_s6 + $0x7f0] sm:$0xff]  ;;  %v4934_v36 = vld [vmem:[%s18409_s6 + $0x1158] sm:$0xff] }
 0x559   :  { %5757 = vmatprep.subr.mxu0 %v5388_v62  ;;  %5806 = vmatprep.subr.mxu1 %v4571_v53  ;;  %v4627_v62 = vld [vmem:[%s18409_s6 + $0x7c0] sm:$0xff]  ;;  %v4928_v53 = vld [vmem:[%s18409_s6 + $0x1128] sm:$0xff] }
 0x55a   :  { %5758 = vmatpush2.msra.mxu0 %v5387_v43  ;;  %5807 = vmatpush2.msra.mxu1 %v4570_v49  ;;  %v4626_v43 = vld [vmem:[%s18409_s6 + $0x7b8] sm:$0xff]  ;;  %v4927_v49 = vld [vmem:[%s18409_s6 + $0x1120] sm:$0xff] }
 0x55b   :  { %5760 = vmatmul.mubr.f32.vlgmr.msra.gmra.mxu0 %v15064_v46  ;;  %5808 = vmatprep.subr.mxu1 %v4564_v6  ;;  %v4620_v6 = vld [vmem:[%s18409_s6 + $0x788] sm:$0xff] }
 0x55c   :  { %5837 = vmatprep.subr.mxu0 %v4711_v63  ;;  %5809 = vmatpush2.msra.mxu1 %v4563_v9  ;;  %v4921_v63 = vld [vmem:[%s18409_s6 + $0x10f0] sm:$0xff]  ;;  %v4619_v9 = vld [vmem:[%s18409_s6 + $0x780] sm:$0xff] }
 0x55d   :  { %5838 = vmatpush1.msra.mxu0 %v4710_v40  ;;  %5901 = vmatprep.mubr.f32.mxu0 %v14389_v27  ;;  %v4920_v40 = vld [vmem:[%s18409_s6 + $0x10e8] sm:$0xff] }
 0x55e   :  { %5810 = vmatprep.subr.mxu1 %v4557_v50  ;;  %5839 = vmatprep.subr.mxu0 %v4704_v17  ;;  %v4613_v50 = vld [vmem:[%s18409_s6 + $0x750] sm:$0xff]  ;;  %v4914_v17 = vld [vmem:[%s18409_s6 + $0x10b8] sm:$0xff] }
 0x55f   :  { %5811 = vmatpush2.msra.mxu1 %v4556_v47  ;;  %5840 = vmatpush1.msra.mxu0 %v4703_v24  ;;  %v4612_v47 = vld [vmem:[%s18409_s6 + $0x748] sm:$0xff]  ;;  %v4913_v24 = vld [vmem:[%s18409_s6 + $0x10b0] sm:$0xff] }
 0x560   :  { %5812 = vmatprep.subr.mxu1 %v4550_v19  ;;  %5841 = vmatprep.subr.mxu0 %v4697_v13  ;;  %v4606_v19 = vld [vmem:[%s18409_s6 + $0x718] sm:$0xff]  ;;  %v4907_v13 = vld [vmem:[%s18409_s6 + $0x1080] sm:$0xff] }
 0x561   :  { %5813 = vmatpush2.msra.mxu1 %v4549_v7  ;;  %5842 = vmatpush1.msra.mxu0 %v4696_v20  ;;  %v4605_v7 = vld [vmem:[%s18409_s6 + $0x710] sm:$0xff]  ;;  %v4906_v20 = vld [vmem:[%s18409_s6 + $0x1078] sm:$0xff] }
 0x562   :  { %5814 = vmatprep.subr.mxu1 %v4543_v31  ;;  %5843 = vmatprep.subr.mxu0 %v4690_v59  ;;  %v4823_v31 = vld [vmem:[%s18409_s6 + $0xde0] sm:$0xff]  ;;  %v4900_v59 = vld [vmem:[%s18409_s6 + $0x1048] sm:$0xff] }
 0x563   :  { %5815 = vmatpush2.msra.mxu1 %v4542_v23  ;;  %5844 = vmatpush1.msra.mxu0 %v4689_v0  ;;  %v4822_v23 = vld [vmem:[%s18409_s6 + $0xdd8] sm:$0xff]  ;;  %v4899_v0 = vld [vmem:[%s18409_s6 + $0x1040] sm:$0xff] }
 0x564   :  { %5816 = vmatprep.subr.mxu1 %v4536_v37  ;;  %5845 = vmatprep.subr.mxu0 %v4683_v35  ;;  %v4816_v37 = vld [vmem:[%s18409_s6 + $0xda8] sm:$0xff]  ;;  %v4893_v35 = vld [vmem:[%s18409_s6 + $0x1010] sm:$0xff] }
 0x565   :  { %5817 = vmatpush2.msra.mxu1 %v4535_v33  ;;  %5846 = vmatpush1.msra.mxu0 %v4682_v10  ;;  %v4815_v33 = vld [vmem:[%s18409_s6 + $0xda0] sm:$0xff]  ;;  %v4892_v10 = vld [vmem:[%s18409_s6 + $0x1008] sm:$0xff] }
 0x566   :  { %5818 = vmatprep.subr.mxu1 %v4529_v39  ;;  %5847 = vmatprep.subr.mxu0 %v4676_v3  ;;  %v4809_v39 = vld [vmem:[%s18409_s6 + $0xd70] sm:$0xff]  ;;  %v4886_v3 = vld [vmem:[%s18409_s6 + $0xfd8] sm:$0xff] }
 0x567   :  { %5819 = vmatpush2.msra.mxu1 %v4528_v55  ;;  %5848 = vmatpush1.msra.mxu0 %v4675_v58  ;;  %v4808_v55 = vld [vmem:[%s18409_s6 + $0xd68] sm:$0xff]  ;;  %v4885_v58 = vld [vmem:[%s18409_s6 + $0xfd0] sm:$0xff] }
 0x568   :  { %5820 = vmatprep.subr.mxu1 %v4522_v61  ;;  %5849 = vmatprep.subr.mxu0 %v4669_v29  ;;  %v4802_v61 = vld [vmem:[%s18409_s6 + $0xd38] sm:$0xff]  ;;  %v4879_v29 = vld [vmem:[%s18409_s6 + $0xfa0] sm:$0xff] }
 0x569   :  { %5821 = vmatpush2.msra.mxu1 %v4521_v34  ;;  %5850 = vmatpush1.msra.mxu0 %v4668_v30  ;;  %v4801_v34 = vld [vmem:[%s18409_s6 + $0xd30] sm:$0xff]  ;;  %v4878_v30 = vld [vmem:[%s18409_s6 + $0xf98] sm:$0xff] }
 0x56a   :  { %5822 = vmatprep.subr.mxu1 %v4515_v4  ;;  %5851 = vmatprep.subr.mxu0 %v4662_v11  ;;  %v4795_v4 = vld [vmem:[%s18409_s6 + $0xd00] sm:$0xff]  ;;  %v4872_v11 = vld [vmem:[%s18409_s6 + $0xf68] sm:$0xff] }
 0x56b   :  { %5823 = vmatpush2.msra.mxu1 %v4514_v25  ;;  %5852 = vmatpush1.msra.mxu0 %v4661_v38  ;;  %v4794_v25 = vld [vmem:[%s18409_s6 + $0xcf8] sm:$0xff]  ;;  %v4871_v38 = vld [vmem:[%s18409_s6 + $0xf60] sm:$0xff] }
 0x56c   :  { %5824 = vmatprep.subr.mxu1 %v4508_v32  ;;  %5853 = vmatprep.subr.mxu0 %v4655_v8  ;;  %v4788_v32 = vld [vmem:[%s18409_s6 + $0xcc8] sm:$0xff]  ;;  %v4865_v8 = vld [vmem:[%s18409_s6 + $0xf30] sm:$0xff] }
 0x56d   :  { %5825 = vmatpush2.msra.mxu1 %v4507_v54  ;;  %5854 = vmatpush1.msra.mxu0 %v4654_v41  ;;  %v4787_v54 = vld [vmem:[%s18409_s6 + $0xcc0] sm:$0xff]  ;;  %v4864_v41 = vld [vmem:[%s18409_s6 + $0xf28] sm:$0xff] }
 0x56e   :  { %5826 = vmatprep.subr.mxu1 %v4501_v44  ;;  %5855 = vmatprep.subr.mxu0 %v4648_v48  ;;  %v4781_v44 = vld [vmem:[%s18409_s6 + $0xc90] sm:$0xff]  ;;  %v4858_v48 = vld [vmem:[%s18409_s6 + $0xef8] sm:$0xff] }
 0x56f   :  { %5827 = vmatpush2.msra.mxu1 %v4500_v1  ;;  %5856 = vmatpush1.msra.mxu0 %v4647_v22  ;;  %v4780_v1 = vld [vmem:[%s18409_s6 + $0xc88] sm:$0xff]  ;;  %v4857_v22 = vld [vmem:[%s18409_s6 + $0xef0] sm:$0xff] }
 0x570   :  { %5828 = vmatprep.subr.mxu1 %v4494_v60  ;;  %5857 = vmatprep.subr.mxu0 %v4641_v2  ;;  %v4774_v60 = vld [vmem:[%s18409_s6 + $0xc58] sm:$0xff]  ;;  %v4851_v2 = vld [vmem:[%s18409_s6 + $0xec0] sm:$0xff] }
 0x571   :  { %5829 = vmatpush2.msra.mxu1 %v4493_v12  ;;  %5858 = vmatpush1.msra.mxu0 %v4640_v14  ;;  %v4773_v12 = vld [vmem:[%s18409_s6 + $0xc50] sm:$0xff]  ;;  %v4850_v14 = vld [vmem:[%s18409_s6 + $0xeb8] sm:$0xff] }
 0x572   :  { %5831 = vmatmul.mubr.f32.vlgmr.msra.gmra.mxu1 %v14422_v45  ;;  %5859 = vmatprep.subr.mxu0 %v4634_v28  ;;  %v4767_v28 = vld [vmem:[%s18409_s6 + $0xc20] sm:$0xff] }
 0x573   :  { %5908 = vmatprep.subr.mxu1 %v4935_v18  ;;  %5860 = vmatpush1.msra.mxu0 %v4633_v26  ;;  %v4844_v18 = vld [vmem:[%s18409_s6 + $0xe88] sm:$0xff]  ;;  %v4766_v26 = vld [vmem:[%s18409_s6 + $0xc18] sm:$0xff] }
 0x574   :  { %5909 = vmatpush1.msra.mxu1 %v4934_v36  ;;  %5972 = vmatprep.mubr.f32.mxu1 %v14438_v56  ;;  %v4843_v36 = vld [vmem:[%s18409_s6 + $0xe80] sm:$0xff] }
 0x575   :  { %5861 = vmatprep.subr.mxu0 %v4627_v62  ;;  %5910 = vmatprep.subr.mxu1 %v4928_v53  ;;  %v4760_v62 = vld [vmem:[%s18409_s6 + $0xbe8] sm:$0xff]  ;;  %v4837_v53 = vld [vmem:[%s18409_s6 + $0xe50] sm:$0xff] }
 0x576   :  { %5862 = vmatpush1.msra.mxu0 %v4626_v43  ;;  %5911 = vmatpush1.msra.mxu1 %v4927_v49  ;;  %v4759_v43 = vld [vmem:[%s18409_s6 + $0xbe0] sm:$0xff]  ;;  %v4836_v49 = vld [vmem:[%s18409_s6 + $0xe48] sm:$0xff] }
 0x577   :  { %5863 = vmatprep.subr.mxu0 %v4620_v6  ;;  %5912 = vmatprep.subr.mxu1 %v4921_v63  ;;  %v4753_v6 = vld [vmem:[%s18409_s6 + $0xbb0] sm:$0xff]  ;;  %v4830_v63 = vld [vmem:[%s18409_s6 + $0xe18] sm:$0xff] }
 0x578   :  { %5864 = vmatpush1.msra.mxu0 %v4619_v9  ;;  %5913 = vmatpush1.msra.mxu1 %v4920_v40  ;;  %v4752_v9 = vld [vmem:[%s18409_s6 + $0xba8] sm:$0xff]  ;;  %v4829_v40 = vld [vmem:[%s18409_s6 + $0xe10] sm:$0xff] }
 0x579   :  { %5865 = vmatprep.subr.mxu0 %v4613_v50  ;;  %5914 = vmatprep.subr.mxu1 %v4914_v17  ;;  %v4746_v50 = vld [vmem:[%s18409_s6 + $0xb78] sm:$0xff]  ;;  %v5047_v17 = vld [vmem:[%s18409_s6 + $0x14e0] sm:$0xff] }
 0x57a   :  { %5866 = vmatpush1.msra.mxu0 %v4612_v47  ;;  %5915 = vmatpush1.msra.mxu1 %v4913_v24  ;;  %v4745_v47 = vld [vmem:[%s18409_s6 + $0xb70] sm:$0xff]  ;;  %v5046_v24 = vld [vmem:[%s18409_s6 + $0x14d8] sm:$0xff] }
 0x57b   :  { %5867 = vmatprep.subr.mxu0 %v4606_v19  ;;  %5916 = vmatprep.subr.mxu1 %v4907_v13  ;;  %v4739_v19 = vld [vmem:[%s18409_s6 + $0xb40] sm:$0xff]  ;;  %v5040_v13 = vld [vmem:[%s18409_s6 + $0x14a8] sm:$0xff] }
 0x57c   :  { %5868 = vmatpush1.msra.mxu0 %v4605_v7  ;;  %5917 = vmatpush1.msra.mxu1 %v4906_v20  ;;  %v4738_v7 = vld [vmem:[%s18409_s6 + $0xb38] sm:$0xff]  ;;  %v5039_v20 = vld [vmem:[%s18409_s6 + $0x14a0] sm:$0xff] }
 0x57d   :  { %5869 = vmatprep.subr.mxu0 %v4823_v31  ;;  %5918 = vmatprep.subr.mxu1 %v4900_v59  ;;  %v4732_v31 = vld [vmem:[%s18409_s6 + $0xb08] sm:$0xff]  ;;  %v5033_v59 = vld [vmem:[%s18409_s6 + $0x1470] sm:$0xff] }
 0x57e   :  { %5870 = vmatpush2.msra.mxu0 %v4822_v23  ;;  %5919 = vmatpush1.msra.mxu1 %v4899_v0  ;;  %v4731_v23 = vld [vmem:[%s18409_s6 + $0xb00] sm:$0xff]  ;;  %v5032_v0 = vld [vmem:[%s18409_s6 + $0x1468] sm:$0xff] }
 0x57f   :  { %5871 = vmatprep.subr.mxu0 %v4816_v37  ;;  %5920 = vmatprep.subr.mxu1 %v4893_v35  ;;  %v4725_v37 = vld [vmem:[%s18409_s6 + $0xad0] sm:$0xff]  ;;  %v5026_v35 = vld [vmem:[%s18409_s6 + $0x1438] sm:$0xff] }
 0x580   :  { %5872 = vmatpush2.msra.mxu0 %v4815_v33  ;;  %5921 = vmatpush1.msra.mxu1 %v4892_v10  ;;  %v4724_v33 = vld [vmem:[%s18409_s6 + $0xac8] sm:$0xff]  ;;  %v5025_v10 = vld [vmem:[%s18409_s6 + $0x1430] sm:$0xff] }
 0x581   :  { %5873 = vmatprep.subr.mxu0 %v4809_v39  ;;  %5922 = vmatprep.subr.mxu1 %v4886_v3  ;;  %v4718_v39 = vld [vmem:[%s18409_s6 + $0xa98] sm:$0xff]  ;;  %v5019_v3 = vld [vmem:[%s18409_s6 + $0x1400] sm:$0xff] }
 0x582   :  { %5874 = vmatpush2.msra.mxu0 %v4808_v55  ;;  %5923 = vmatpush1.msra.mxu1 %v4885_v58  ;;  %v4717_v55 = vld [vmem:[%s18409_s6 + $0xa90] sm:$0xff]  ;;  %v5018_v58 = vld [vmem:[%s18409_s6 + $0x13f8] sm:$0xff] }
 0x583   :  { %5875 = vmatprep.subr.mxu0 %v4802_v61  ;;  %5924 = vmatprep.subr.mxu1 %v4879_v29  ;;  %v5012_v61 = vld [vmem:[%s18409_s6 + $0x13c8] sm:$0xff]  ;;  %v5159_v29 = vld [vmem:[%s18409_s6 + $0x1860] sm:$0xff] }
 0x584   :  { %5876 = vmatpush2.msra.mxu0 %v4801_v34  ;;  %5925 = vmatpush1.msra.mxu1 %v4878_v30  ;;  %v5011_v34 = vld [vmem:[%s18409_s6 + $0x13c0] sm:$0xff]  ;;  %v5158_v30 = vld [vmem:[%s18409_s6 + $0x1858] sm:$0xff] }
 0x585   :  { %5877 = vmatprep.subr.mxu0 %v4795_v4  ;;  %5926 = vmatprep.subr.mxu1 %v4872_v11  ;;  %v5005_v4 = vld [vmem:[%s18409_s6 + $0x1390] sm:$0xff]  ;;  %v5152_v11 = vld [vmem:[%s18409_s6 + $0x1828] sm:$0xff] }
 0x586   :  { %5878 = vmatpush2.msra.mxu0 %v4794_v25  ;;  %5927 = vmatpush1.msra.mxu1 %v4871_v38  ;;  %v5004_v25 = vld [vmem:[%s18409_s6 + $0x1388] sm:$0xff]  ;;  %v5151_v38 = vld [vmem:[%s18409_s6 + $0x1820] sm:$0xff] }
 0x587   :  { %5879 = vmatprep.subr.mxu0 %v4788_v32  ;;  %5928 = vmatprep.subr.mxu1 %v4865_v8  ;;  %v4998_v32 = vld [vmem:[%s18409_s6 + $0x1358] sm:$0xff]  ;;  %v5145_v8 = vld [vmem:[%s18409_s6 + $0x17f0] sm:$0xff] }
 0x588   :  { %5880 = vmatpush2.msra.mxu0 %v4787_v54  ;;  %5929 = vmatpush1.msra.mxu1 %v4864_v41  ;;  %v4997_v54 = vld [vmem:[%s18409_s6 + $0x1350] sm:$0xff]  ;;  %v5144_v41 = vld [vmem:[%s18409_s6 + $0x17e8] sm:$0xff] }
 0x589   :  { %5881 = vmatprep.subr.mxu0 %v4781_v44  ;;  %5930 = vmatprep.subr.mxu1 %v4858_v48  ;;  %v4991_v44 = vld [vmem:[%s18409_s6 + $0x1320] sm:$0xff]  ;;  %v5138_v48 = vld [vmem:[%s18409_s6 + $0x17b8] sm:$0xff] }
 0x58a   :  { %5882 = vmatpush2.msra.mxu0 %v4780_v1  ;;  %5931 = vmatpush1.msra.mxu1 %v4857_v22  ;;  %v4990_v1 = vld [vmem:[%s18409_s6 + $0x1318] sm:$0xff]  ;;  %v5137_v22 = vld [vmem:[%s18409_s6 + $0x17b0] sm:$0xff] }
 0x58b   :  { %5883 = vmatprep.subr.mxu0 %v4774_v60  ;;  %5932 = vmatprep.subr.mxu1 %v4851_v2  ;;  %v4984_v60 = vld [vmem:[%s18409_s6 + $0x12e8] sm:$0xff]  ;;  %v5131_v2 = vld [vmem:[%s18409_s6 + $0x1780] sm:$0xff] }
 0x58c   :  { %5884 = vmatpush2.msra.mxu0 %v4773_v12  ;;  %5933 = vmatpush1.msra.mxu1 %v4850_v14  ;;  %v4983_v12 = vld [vmem:[%s18409_s6 + $0x12e0] sm:$0xff]  ;;  %v5130_v14 = vld [vmem:[%s18409_s6 + $0x1778] sm:$0xff] }
 0x58d   :  { %5885 = vmatprep.subr.mxu0 %v4767_v28  ;;  %5934 = vmatprep.subr.mxu1 %v4844_v18  ;;  %v4977_v28 = vld [vmem:[%s18409_s6 + $0x12b0] sm:$0xff]  ;;  %v5124_v18 = vld [vmem:[%s18409_s6 + $0x1748] sm:$0xff] }
 0x58e   :  { %5886 = vmatpush2.msra.mxu0 %v4766_v26  ;;  %5935 = vmatpush1.msra.mxu1 %v4843_v36  ;;  %v4976_v26 = vld [vmem:[%s18409_s6 + $0x12a8] sm:$0xff]  ;;  %v5123_v36 = vld [vmem:[%s18409_s6 + $0x1740] sm:$0xff] }
 0x58f   :  { %5887 = vmatprep.subr.mxu0 %v4760_v62  ;;  %5936 = vmatprep.subr.mxu1 %v4837_v53  ;;  %v4970_v62 = vld [vmem:[%s18409_s6 + $0x1278] sm:$0xff]  ;;  %v5117_v53 = vld [vmem:[%s18409_s6 + $0x1710] sm:$0xff] }
 0x590   :  { %5888 = vmatpush2.msra.mxu0 %v4759_v43  ;;  %5937 = vmatpush1.msra.mxu1 %v4836_v49  ;;  %v4969_v43 = vld [vmem:[%s18409_s6 + $0x1270] sm:$0xff]  ;;  %v5116_v49 = vld [vmem:[%s18409_s6 + $0x1708] sm:$0xff] }
 0x591   :  { %5889 = vmatprep.subr.mxu0 %v4753_v6  ;;  %5938 = vmatprep.subr.mxu1 %v4830_v63  ;;  %v4963_v6 = vld [vmem:[%s18409_s6 + $0x1240] sm:$0xff]  ;;  %v5110_v63 = vld [vmem:[%s18409_s6 + $0x16d8] sm:$0xff] }
 0x592   :  { %5890 = vmatpush2.msra.mxu0 %v4752_v9  ;;  %5939 = vmatpush1.msra.mxu1 %v4829_v40  ;;  %v4962_v9 = vld [vmem:[%s18409_s6 + $0x1238] sm:$0xff]  ;;  %v5109_v40 = vld [vmem:[%s18409_s6 + $0x16d0] sm:$0xff] }
 0x593   :  { %5891 = vmatprep.subr.mxu0 %v4746_v50  ;;  %5940 = vmatprep.subr.mxu1 %v5047_v17  ;;  %v4956_v50 = vld [vmem:[%s18409_s6 + $0x1208] sm:$0xff]  ;;  %v5103_v17 = vld [vmem:[%s18409_s6 + $0x16a0] sm:$0xff] }
 0x594   :  { %5892 = vmatpush2.msra.mxu0 %v4745_v47  ;;  %5941 = vmatpush2.msra.mxu1 %v5046_v24  ;;  %v4955_v47 = vld [vmem:[%s18409_s6 + $0x1200] sm:$0xff]  ;;  %v5102_v24 = vld [vmem:[%s18409_s6 + $0x1698] sm:$0xff] }
 0x595   :  { %5893 = vmatprep.subr.mxu0 %v4739_v19  ;;  %5942 = vmatprep.subr.mxu1 %v5040_v13  ;;  %v4949_v19 = vld [vmem:[%s18409_s6 + $0x11d0] sm:$0xff]  ;;  %v5096_v13 = vld [vmem:[%s18409_s6 + $0x1668] sm:$0xff] }
 0x596   :  { %5894 = vmatpush2.msra.mxu0 %v4738_v7  ;;  %5943 = vmatpush2.msra.mxu1 %v5039_v20  ;;  %v4948_v7 = vld [vmem:[%s18409_s6 + $0x11c8] sm:$0xff]  ;;  %v5095_v20 = vld [vmem:[%s18409_s6 + $0x1660] sm:$0xff] }
 0x597   :  { %5895 = vmatprep.subr.mxu0 %v4732_v31  ;;  %5944 = vmatprep.subr.mxu1 %v5033_v59  ;;  %v4942_v31 = vld [vmem:[%s18409_s6 + $0x1198] sm:$0xff]  ;;  %v5089_v59 = vld [vmem:[%s18409_s6 + $0x1630] sm:$0xff] }
 0x598   :  { %5896 = vmatpush2.msra.mxu0 %v4731_v23  ;;  %5945 = vmatpush2.msra.mxu1 %v5032_v0  ;;  %v4941_v23 = vld [vmem:[%s18409_s6 + $0x1190] sm:$0xff]  ;;  %v5088_v0 = vld [vmem:[%s18409_s6 + $0x1628] sm:$0xff] }
 0x599   :  { %5897 = vmatprep.subr.mxu0 %v4725_v37  ;;  %5946 = vmatprep.subr.mxu1 %v5026_v35  ;;  %v5082_v37 = vld [vmem:[%s18409_s6 + $0x15f8] sm:$0xff]  ;;  %v5383_v35 = vld [vmem:[%s18409_s6 + $0x1f60] sm:$0xff] }
 0x59a   :  { %5898 = vmatpush2.msra.mxu0 %v4724_v33  ;;  %5947 = vmatpush2.msra.mxu1 %v5025_v10  ;;  %v5081_v33 = vld [vmem:[%s18409_s6 + $0x15f0] sm:$0xff]  ;;  %v5382_v10 = vld [vmem:[%s18409_s6 + $0x1f58] sm:$0xff] }
 0x59b   :  { %5899 = vmatprep.subr.mxu0 %v4718_v39  ;;  %5948 = vmatprep.subr.mxu1 %v5019_v3  ;;  %v5075_v39 = vld [vmem:[%s18409_s6 + $0x15c0] sm:$0xff]  ;;  %v5376_v3 = vld [vmem:[%s18409_s6 + $0x1f28] sm:$0xff] }
 0x59c   :  { %5900 = vmatpush2.msra.mxu0 %v4717_v55  ;;  %5949 = vmatpush2.msra.mxu1 %v5018_v58  ;;  %v5074_v55 = vld [vmem:[%s18409_s6 + $0x15b8] sm:$0xff]  ;;  %v5375_v58 = vld [vmem:[%s18409_s6 + $0x1f20] sm:$0xff] }
 0x59d   :  { %5902 = vmatmul.mubr.f32.vlgmr.msra.gmra.mxu0 %v14394_v15  ;;  %5950 = vmatprep.subr.mxu1 %v5012_v61  ;;  %v5068_v61 = vld [vmem:[%s18409_s6 + $0x1588] sm:$0xff] }
 0x59e   :  { %5979 = vmatprep.subr.mxu0 %v5159_v29  ;;  %5951 = vmatpush2.msra.mxu1 %v5011_v34  ;;  %v5369_v29 = vld [vmem:[%s18409_s6 + $0x1ef0] sm:$0xff]  ;;  %v5067_v34 = vld [vmem:[%s18409_s6 + $0x1580] sm:$0xff] }
 0x59f   :  { %5980 = vmatpush1.msra.mxu0 %v5158_v30  ;;  %6043 = vmatprep.mubr.f32.mxu0 %v14411_v21  ;;  %v5368_v30 = vld [vmem:[%s18409_s6 + $0x1ee8] sm:$0xff] }
 0x5a0   :  { %5952 = vmatprep.subr.mxu1 %v5005_v4  ;;  %5981 = vmatprep.subr.mxu0 %v5152_v11  ;;  %v5061_v4 = vld [vmem:[%s18409_s6 + $0x1550] sm:$0xff]  ;;  %v5362_v11 = vld [vmem:[%s18409_s6 + $0x1eb8] sm:$0xff] }
 0x5a1   :  { %5953 = vmatpush2.msra.mxu1 %v5004_v25  ;;  %5982 = vmatpush1.msra.mxu0 %v5151_v38  ;;  %v5060_v25 = vld [vmem:[%s18409_s6 + $0x1548] sm:$0xff]  ;;  %v5361_v38 = vld [vmem:[%s18409_s6 + $0x1eb0] sm:$0xff] }
 0x5a2   :  { %5954 = vmatprep.subr.mxu1 %v4998_v32  ;;  %5983 = vmatprep.subr.mxu0 %v5145_v8  ;;  %v5054_v32 = vld [vmem:[%s18409_s6 + $0x1518] sm:$0xff]  ;;  %v5355_v8 = vld [vmem:[%s18409_s6 + $0x1e80] sm:$0xff] }
 0x5a3   :  { %5955 = vmatpush2.msra.mxu1 %v4997_v54  ;;  %5984 = vmatpush1.msra.mxu0 %v5144_v41  ;;  %v5053_v54 = vld [vmem:[%s18409_s6 + $0x1510] sm:$0xff]  ;;  %v5354_v41 = vld [vmem:[%s18409_s6 + $0x1e78] sm:$0xff] }
 0x5a4   :  { %5956 = vmatprep.subr.mxu1 %v4991_v44  ;;  %5985 = vmatprep.subr.mxu0 %v5138_v48  ;;  %v5271_v44 = vld [vmem:[%s18409_s6 + $0x1be0] sm:$0xff]  ;;  %v5348_v48 = vld [vmem:[%s18409_s6 + $0x1e48] sm:$0xff] }
 0x5a5   :  { %5957 = vmatpush2.msra.mxu1 %v4990_v1  ;;  %5986 = vmatpush1.msra.mxu0 %v5137_v22  ;;  %v5270_v1 = vld [vmem:[%s18409_s6 + $0x1bd8] sm:$0xff]  ;;  %v5347_v22 = vld [vmem:[%s18409_s6 + $0x1e40] sm:$0xff] }
 0x5a6   :  { %5958 = vmatprep.subr.mxu1 %v4984_v60  ;;  %5987 = vmatprep.subr.mxu0 %v5131_v2  ;;  %v5264_v60 = vld [vmem:[%s18409_s6 + $0x1ba8] sm:$0xff]  ;;  %v5341_v2 = vld [vmem:[%s18409_s6 + $0x1e10] sm:$0xff] }
 0x5a7   :  { %5959 = vmatpush2.msra.mxu1 %v4983_v12  ;;  %5988 = vmatpush1.msra.mxu0 %v5130_v14  ;;  %v5263_v12 = vld [vmem:[%s18409_s6 + $0x1ba0] sm:$0xff]  ;;  %v5340_v14 = vld [vmem:[%s18409_s6 + $0x1e08] sm:$0xff] }
 0x5a8   :  { %5960 = vmatprep.subr.mxu1 %v4977_v28  ;;  %5989 = vmatprep.subr.mxu0 %v5124_v18  ;;  %v5257_v28 = vld [vmem:[%s18409_s6 + $0x1b70] sm:$0xff]  ;;  %v5334_v18 = vld [vmem:[%s18409_s6 + $0x1dd8] sm:$0xff] }
 0x5a9   :  { %5961 = vmatpush2.msra.mxu1 %v4976_v26  ;;  %5990 = vmatpush1.msra.mxu0 %v5123_v36  ;;  %v5256_v26 = vld [vmem:[%s18409_s6 + $0x1b68] sm:$0xff]  ;;  %v5333_v36 = vld [vmem:[%s18409_s6 + $0x1dd0] sm:$0xff] }
 0x5aa   :  { %5962 = vmatprep.subr.mxu1 %v4970_v62  ;;  %5991 = vmatprep.subr.mxu0 %v5117_v53  ;;  %v5250_v62 = vld [vmem:[%s18409_s6 + $0x1b38] sm:$0xff]  ;;  %v5327_v53 = vld [vmem:[%s18409_s6 + $0x1da0] sm:$0xff] }
 0x5ab   :  { %5963 = vmatpush2.msra.mxu1 %v4969_v43  ;;  %5992 = vmatpush1.msra.mxu0 %v5116_v49  ;;  %v5249_v43 = vld [vmem:[%s18409_s6 + $0x1b30] sm:$0xff]  ;;  %v5326_v49 = vld [vmem:[%s18409_s6 + $0x1d98] sm:$0xff] }
 0x5ac   :  { %5964 = vmatprep.subr.mxu1 %v4963_v6  ;;  %5993 = vmatprep.subr.mxu0 %v5110_v63  ;;  %v5243_v6 = vld [vmem:[%s18409_s6 + $0x1b00] sm:$0xff]  ;;  %v5320_v63 = vld [vmem:[%s18409_s6 + $0x1d68] sm:$0xff] }
 0x5ad   :  { %5965 = vmatpush2.msra.mxu1 %v4962_v9  ;;  %5994 = vmatpush1.msra.mxu0 %v5109_v40  ;;  %v5242_v9 = vld [vmem:[%s18409_s6 + $0x1af8] sm:$0xff]  ;;  %v5319_v40 = vld [vmem:[%s18409_s6 + $0x1d60] sm:$0xff] }
 0x5ae   :  { %5966 = vmatprep.subr.mxu1 %v4956_v50  ;;  %5995 = vmatprep.subr.mxu0 %v5103_v17  ;;  %v5236_v50 = vld [vmem:[%s18409_s6 + $0x1ac8] sm:$0xff]  ;;  %v5313_v17 = vld [vmem:[%s18409_s6 + $0x1d30] sm:$0xff] }
 0x5af   :  { %5967 = vmatpush2.msra.mxu1 %v4955_v47  ;;  %5996 = vmatpush1.msra.mxu0 %v5102_v24  ;;  %v5235_v47 = vld [vmem:[%s18409_s6 + $0x1ac0] sm:$0xff]  ;;  %v5312_v24 = vld [vmem:[%s18409_s6 + $0x1d28] sm:$0xff] }
 0x5b0   :  { %5968 = vmatprep.subr.mxu1 %v4949_v19  ;;  %5997 = vmatprep.subr.mxu0 %v5096_v13  ;;  %v5229_v19 = vld [vmem:[%s18409_s6 + $0x1a90] sm:$0xff]  ;;  %v5306_v13 = vld [vmem:[%s18409_s6 + $0x1cf8] sm:$0xff] }
 0x5b1   :  { %5969 = vmatpush2.msra.mxu1 %v4948_v7  ;;  %5998 = vmatpush1.msra.mxu0 %v5095_v20  ;;  %v5228_v7 = vld [vmem:[%s18409_s6 + $0x1a88] sm:$0xff]  ;;  %v5305_v20 = vld [vmem:[%s18409_s6 + $0x1cf0] sm:$0xff] }
 0x5b2   :  { %5970 = vmatprep.subr.mxu1 %v4942_v31  ;;  %5999 = vmatprep.subr.mxu0 %v5089_v59  ;;  %v5222_v31 = vld [vmem:[%s18409_s6 + $0x1a58] sm:$0xff]  ;;  %v5299_v59 = vld [vmem:[%s18409_s6 + $0x1cc0] sm:$0xff] }
 0x5b3   :  { %5971 = vmatpush2.msra.mxu1 %v4941_v23  ;;  %6000 = vmatpush1.msra.mxu0 %v5088_v0  ;;  %v5221_v23 = vld [vmem:[%s18409_s6 + $0x1a50] sm:$0xff]  ;;  %v5298_v0 = vld [vmem:[%s18409_s6 + $0x1cb8] sm:$0xff] }
 0x5b4   :  { %5973 = vmatmul.mubr.f32.vlgmr.msra.gmra.mxu1 %v14824_v52  ;;  %6001 = vmatprep.subr.mxu0 %v5082_v37  ;;  %v5215_v37 = vld [vmem:[%s18409_s6 + $0x1a20] sm:$0xff] }
 0x5b5   :  { %6050 = vmatprep.subr.mxu1 %v5383_v35  ;;  %6002 = vmatpush1.msra.mxu0 %v5081_v33  ;;  %v5292_v35 = vld [vmem:[%s18409_s6 + $0x1c88] sm:$0xff]  ;;  %v5214_v33 = vld [vmem:[%s18409_s6 + $0x1a18] sm:$0xff] }
 0x5b6   :  { %6051 = vmatpush1.msra.mxu1 %v5382_v10  ;;  %8740 = vmatprep.mubr.msk.f32.mxu1 %vm2805_vm3, %v14835_v5  ;;  %v5291_v10 = vld [vmem:[%s18409_s6 + $0x1c80] sm:$0xff] }
 0x5b7   :  { %6003 = vmatprep.subr.mxu0 %v5075_v39  ;;  %6052 = vmatprep.subr.mxu1 %v5376_v3  ;;  %v5208_v39 = vld [vmem:[%s18409_s6 + $0x19e8] sm:$0xff]  ;;  %v5285_v3 = vld [vmem:[%s18409_s6 + $0x1c50] sm:$0xff] }
 0x5b8   :  { %6004 = vmatpush1.msra.mxu0 %v5074_v55  ;;  %6053 = vmatpush1.msra.mxu1 %v5375_v58  ;;  %v5207_v55 = vld [vmem:[%s18409_s6 + $0x19e0] sm:$0xff]  ;;  %v5284_v58 = vld [vmem:[%s18409_s6 + $0x1c48] sm:$0xff] }
 0x5b9   :  { %6005 = vmatprep.subr.mxu0 %v5068_v61  ;;  %6054 = vmatprep.subr.mxu1 %v5369_v29  ;;  %v5201_v61 = vld [vmem:[%s18409_s6 + $0x19b0] sm:$0xff]  ;;  %v5278_v29 = vld [vmem:[%s18409_s6 + $0x1c18] sm:$0xff] }
 0x5ba   :  { %6006 = vmatpush1.msra.mxu0 %v5067_v34  ;;  %6055 = vmatpush1.msra.mxu1 %v5368_v30  ;;  %v5200_v34 = vld [vmem:[%s18409_s6 + $0x19a8] sm:$0xff]  ;;  %v5277_v30 = vld [vmem:[%s18409_s6 + $0x1c10] sm:$0xff] }
 0x5bb   :  { %6007 = vmatprep.subr.mxu0 %v5061_v4  ;;  %6056 = vmatprep.subr.mxu1 %v5362_v11  ;;  %v5194_v4 = vld [vmem:[%s18409_s6 + $0x1978] sm:$0xff]  ;;  %v5404_v11 = vld [vmem:[%s18409_s6 + $0x2008] sm:$0xff] }
 0x5bc   :  { %6008 = vmatpush1.msra.mxu0 %v5060_v25  ;;  %6057 = vmatpush1.msra.mxu1 %v5361_v38  ;;  %v5193_v25 = vld [vmem:[%s18409_s6 + $0x1970] sm:$0xff]  ;;  %v5403_v38 = vld [vmem:[%s18409_s6 + $0x2000] sm:$0xff] }
 0x5bd   :  { %6009 = vmatprep.subr.mxu0 %v5054_v32  ;;  %6058 = vmatprep.subr.mxu1 %v5355_v8  ;;  %v5187_v32 = vld [vmem:[%s18409_s6 + $0x1940] sm:$0xff]  ;;  %v5397_v8 = vld [vmem:[%s18409_s6 + $0x1fd0] sm:$0xff] }
 0x5be   :  { %6010 = vmatpush1.msra.mxu0 %v5053_v54  ;;  %6059 = vmatpush1.msra.mxu1 %v5354_v41  ;;  %v5186_v54 = vld [vmem:[%s18409_s6 + $0x1938] sm:$0xff]  ;;  %v5396_v41 = vld [vmem:[%s18409_s6 + $0x1fc8] sm:$0xff] }
 0x5bf   :  { %6011 = vmatprep.subr.mxu0 %v5271_v44  ;;  %6060 = vmatprep.subr.mxu1 %v5348_v48  ;;  %v5180_v44 = vld [vmem:[%s18409_s6 + $0x1908] sm:$0xff]  ;;  %v5390_v48 = vld [vmem:[%s18409_s6 + $0x1f98] sm:$0xff] }
 0x5c0   :  { %6012 = vmatpush2.msra.mxu0 %v5270_v1  ;;  %6061 = vmatpush1.msra.mxu1 %v5347_v22  ;;  %v5179_v1 = vld [vmem:[%s18409_s6 + $0x1900] sm:$0xff]  ;;  %v5389_v22 = vld [vmem:[%s18409_s6 + $0x1f90] sm:$0xff] }
 0x5c1   :  { %6013 = vmatprep.subr.mxu0 %v5264_v60  ;;  %6062 = vmatprep.subr.mxu1 %v5341_v2  ;;  %v5173_v60 = vld [vmem:[%s18409_s6 + $0x18d0] sm:$0xff] }
 0x5c2   :  { %6014 = vmatpush2.msra.mxu0 %v5263_v12  ;;  %6063 = vmatpush1.msra.mxu1 %v5340_v14  ;;  %v4713_v2 = vld [vmem:[%s18409_s6 + $0xa70] sm:$0xff]  ;;  %v5172_v12 = vld [vmem:[%s18409_s6 + $0x18c8] sm:$0xff] }
 0x5c3   :  { %6015 = vmatprep.subr.mxu0 %v5257_v28  ;;  %6064 = vmatprep.subr.mxu1 %v5334_v18  ;;  %v4712_v14 = vld [vmem:[%s18409_s6 + $0xa68] sm:$0xff]  ;;  %v5166_v28 = vld [vmem:[%s18409_s6 + $0x1898] sm:$0xff] }
 0x5c4   :  { %6016 = vmatpush2.msra.mxu0 %v5256_v26  ;;  %6065 = vmatpush1.msra.mxu1 %v5333_v36  ;;  %v4706_v18 = vld [vmem:[%s18409_s6 + $0xa38] sm:$0xff]  ;;  %v5165_v26 = vld [vmem:[%s18409_s6 + $0x1890] sm:$0xff] }
 0x5c5   :  { %6017 = vmatprep.subr.mxu0 %v5250_v62  ;;  %6066 = vmatprep.subr.mxu1 %v5327_v53  ;;  %v4705_v36 = vld [vmem:[%s18409_s6 + $0xa30] sm:$0xff]  ;;  %v4699_v53 = vld [vmem:[%s18409_s6 + $0xa00] sm:$0xff] }
 0x5c6   :  { %6018 = vmatpush2.msra.mxu0 %v5249_v43  ;;  %6067 = vmatpush1.msra.mxu1 %v5326_v49  ;;  %v4489_v62 = vld [vmem:[%s18409_s6 + $0x370] sm:$0xff]  ;;  %v4488_v43 = vld [vmem:[%s18409_s6 + $0x368] sm:$0xff]  ;;  %v4698_v49 = vld [vmem:[%s18409_s6 + $0x9f8] sm:$0xff] }
 0x5c7   :  { %6019 = vmatprep.subr.mxu0 %v5243_v6  ;;  %6068 = vmatprep.subr.mxu1 %v5320_v63  ;;  %v4482_v6 = vld [vmem:[%s18409_s6 + $0x338] sm:$0xff]  ;;  %v4692_v63 = vld [vmem:[%s18409_s6 + $0x9c8] sm:$0xff] }
 0x5c8   :  { %6020 = vmatpush2.msra.mxu0 %v5242_v9  ;;  %6069 = vmatpush1.msra.mxu1 %v5319_v40  ;;  %v4481_v9 = vld [vmem:[%s18409_s6 + $0x330] sm:$0xff]  ;;  %v4691_v40 = vld [vmem:[%s18409_s6 + $0x9c0] sm:$0xff] }
 0x5c9   :  { %6021 = vmatprep.subr.mxu0 %v5236_v50  ;;  %6070 = vmatprep.subr.mxu1 %v5313_v17  ;;  %v4475_v50 = vld [vmem:[%s18409_s6 + $0x300] sm:$0xff]  ;;  %v4685_v17 = vld [vmem:[%s18409_s6 + $0x990] sm:$0xff] }
 0x5ca   :  { %6022 = vmatpush2.msra.mxu0 %v5235_v47  ;;  %6071 = vmatpush1.msra.mxu1 %v5312_v24  ;;  %v4474_v47 = vld [vmem:[%s18409_s6 + $0x2f8] sm:$0xff]  ;;  %v4684_v24 = vld [vmem:[%s18409_s6 + $0x988] sm:$0xff] }
 0x5cb   :  { %6023 = vmatprep.subr.mxu0 %v5229_v19  ;;  %6072 = vmatprep.subr.mxu1 %v5306_v13  ;;  %v4468_v19 = vld [vmem:[%s18409_s6 + $0x2c8] sm:$0xff]  ;;  %v4678_v13 = vld [vmem:[%s18409_s6 + $0x958] sm:$0xff] }
 0x5cc   :  { %6024 = vmatpush2.msra.mxu0 %v5228_v7  ;;  %6073 = vmatpush1.msra.mxu1 %v5305_v20  ;;  %v4467_v7 = vld [vmem:[%s18409_s6 + $0x2c0] sm:$0xff]  ;;  %v4677_v20 = vld [vmem:[%s18409_s6 + $0x950] sm:$0xff] }
 0x5cd   :  { %6025 = vmatprep.subr.mxu0 %v5222_v31  ;;  %6074 = vmatprep.subr.mxu1 %v5299_v59  ;;  %v4461_v31 = vld [vmem:[%s18409_s6 + $0x290] sm:$0xff]  ;;  %v4671_v59 = vld [vmem:[%s18409_s6 + $0x920] sm:$0xff] }
 0x5ce   :  { %6026 = vmatpush2.msra.mxu0 %v5221_v23  ;;  %6075 = vmatpush1.msra.mxu1 %v5298_v0  ;;  %v4460_v23 = vld [vmem:[%s18409_s6 + $0x288] sm:$0xff]  ;;  %v4670_v0 = vld [vmem:[%s18409_s6 + $0x918] sm:$0xff] }
 0x5cf   :  { %6027 = vmatprep.subr.mxu0 %v5215_v37  ;;  %6076 = vmatprep.subr.mxu1 %v5292_v35  ;;  %v4454_v37 = vld [vmem:[%s18409_s6 + $0x258] sm:$0xff]  ;;  %v4664_v35 = vld [vmem:[%s18409_s6 + $0x8e8] sm:$0xff] }
 0x5d0   :  { %6028 = vmatpush2.msra.mxu0 %v5214_v33  ;;  %6077 = vmatpush1.msra.mxu1 %v5291_v10  ;;  %v4453_v33 = vld [vmem:[%s18409_s6 + $0x250] sm:$0xff]  ;;  %v4663_v10 = vld [vmem:[%s18409_s6 + $0x8e0] sm:$0xff] }
 0x5d1   :  { %6029 = vmatprep.subr.mxu0 %v5208_v39  ;;  %6078 = vmatprep.subr.mxu1 %v5285_v3  ;;  %v4447_v39 = vld [vmem:[%s18409_s6 + $0x220] sm:$0xff]  ;;  %v4657_v3 = vld [vmem:[%s18409_s6 + $0x8b0] sm:$0xff] }
 0x5d2   :  { %6030 = vmatpush2.msra.mxu0 %v5207_v55  ;;  %6079 = vmatpush1.msra.mxu1 %v5284_v58  ;;  %v4446_v55 = vld [vmem:[%s18409_s6 + $0x218] sm:$0xff]  ;;  %v4656_v58 = vld [vmem:[%s18409_s6 + $0x8a8] sm:$0xff] }
 0x5d3   :  { %6031 = vmatprep.subr.mxu0 %v5201_v61  ;;  %6080 = vmatprep.subr.mxu1 %v5278_v29  ;;  %v4440_v61 = vld [vmem:[%s18409_s6 + $0x1e8] sm:$0xff]  ;;  %v4650_v29 = vld [vmem:[%s18409_s6 + $0x878] sm:$0xff] }
 0x5d4   :  { %6032 = vmatpush2.msra.mxu0 %v5200_v34  ;;  %6081 = vmatpush1.msra.mxu1 %v5277_v30  ;;  %v4439_v34 = vld [vmem:[%s18409_s6 + $0x1e0] sm:$0xff]  ;;  %v4649_v30 = vld [vmem:[%s18409_s6 + $0x870] sm:$0xff] }
 0x5d5   :  { %6033 = vmatprep.subr.mxu0 %v5194_v4  ;;  %6108 = vmatprep.subr.mxu1 %v5404_v11  ;;  %v4433_v4 = vld [vmem:[%s18409_s6 + $0x1b0] sm:$0xff]  ;;  %v4643_v11 = vld [vmem:[%s18409_s6 + $0x840] sm:$0xff] }
 0x5d6   :  { %6034 = vmatpush2.msra.mxu0 %v5193_v25  ;;  %6109 = vmatpush2.msra.mxu1 %v5403_v38  ;;  %v4432_v25 = vld [vmem:[%s18409_s6 + $0x1a8] sm:$0xff]  ;;  %v4642_v38 = vld [vmem:[%s18409_s6 + $0x838] sm:$0xff] }
 0x5d7   :  { %6035 = vmatprep.subr.mxu0 %v5187_v32  ;;  %6110 = vmatprep.subr.mxu1 %v5397_v8  ;;  %v4426_v32 = vld [vmem:[%s18409_s6 + $0x178] sm:$0xff]  ;;  %v4636_v8 = vld [vmem:[%s18409_s6 + $0x808] sm:$0xff] }
 0x5d8   :  { %6036 = vmatpush2.msra.mxu0 %v5186_v54  ;;  %6111 = vmatpush2.msra.mxu1 %v5396_v41  ;;  %v4425_v54 = vld [vmem:[%s18409_s6 + $0x170] sm:$0xff]  ;;  %v4635_v41 = vld [vmem:[%s18409_s6 + $0x800] sm:$0xff] }
 0x5d9   :  { %6037 = vmatprep.subr.mxu0 %v5180_v44  ;;  %6112 = vmatprep.subr.mxu1 %v5390_v48  ;;  %v4419_v44 = vld [vmem:[%s18409_s6 + $0x140] sm:$0xff]  ;;  %v4629_v48 = vld [vmem:[%s18409_s6 + $0x7d0] sm:$0xff] }
 0x5da   :  { %6038 = vmatpush2.msra.mxu0 %v5179_v1  ;;  %6113 = vmatpush2.msra.mxu1 %v5389_v22  ;;  %v4418_v1 = vld [vmem:[%s18409_s6 + $0x138] sm:$0xff]  ;;  %v4628_v22 = vld [vmem:[%s18409_s6 + $0x7c8] sm:$0xff] }
 0x5db   :  { %6039 = vmatprep.subr.mxu0 %v5173_v60  ;;  %6115 = vmatmul.mubr.f32.vlgmr.msra.gmra.mxu1 %v15064_v46  ;;  %v4412_v60 = vld [vmem:[%s18409_s6 + $0x108] sm:$0xff] }
 0x5dc   :  { %6192 = vmatprep.subr.mxu1 %v4713_v2  ;;  %6040 = vmatpush2.msra.mxu0 %v5172_v12  ;;  %v4622_v2 = vld [vmem:[%s18409_s6 + $0x798] sm:$0xff]  ;;  %v4411_v12 = vld [vmem:[%s18409_s6 + $0x100] sm:$0xff] }
 0x5dd   :  { %6193 = vmatpush1.msra.mxu1 %v4712_v14  ;;  %6256 = vmatprep.mubr.f32.mxu1 %v14389_v27  ;;  %v4621_v14 = vld [vmem:[%s18409_s6 + $0x790] sm:$0xff] }
 0x5de   :  { %6041 = vmatprep.subr.mxu0 %v5166_v28  ;;  %6194 = vmatprep.subr.mxu1 %v4706_v18  ;;  %v4405_v28 = vld [vmem:[%s18409_s6 + $0xd0] sm:$0xff]  ;;  %v4615_v18 = vld [vmem:[%s18409_s6 + $0x760] sm:$0xff] }
 0x5df   :  { %6042 = vmatpush2.msra.mxu0 %v5165_v26  ;;  %6195 = vmatpush1.msra.mxu1 %v4705_v36  ;;  %v4404_v26 = vld [vmem:[%s18409_s6 + $0xc8] sm:$0xff]  ;;  %v4614_v36 = vld [vmem:[%s18409_s6 + $0x758] sm:$0xff] }
 0x5e0   :  { %6044 = vmatmul.mubr.f32.vlgmr.msra.gmra.mxu0 %v14794_v57  ;;  %6121 = vmatprep.subr.mxu0 %v4489_v62  ;;  %v4398_v62 = vld [vmem:[%s18409_s6 + $0x98] sm:$0xff] }
 0x5e1   :  { %6196 = vmatprep.subr.mxu1 %v4699_v53  ;;  %6122 = vmatpush1.msra.mxu0 %v4488_v43  ;;  %v4608_v53 = vld [vmem:[%s18409_s6 + $0x728] sm:$0xff]  ;;  %v4397_v43 = vld [vmem:[%s18409_s6 + $0x90] sm:$0xff] }
 0x5e2   :  { %6185 = vmatprep.mubr.f32.mxu0 %v14409_v16  ;;  %6197 = vmatpush1.msra.mxu1 %v4698_v49  ;;  %v4607_v49 = vld [vmem:[%s18409_s6 + $0x720] sm:$0xff] }
 0x5e3   :  { %6123 = vmatprep.subr.mxu0 %v4482_v6  ;;  %6198 = vmatprep.subr.mxu1 %v4692_v63  ;;  %v4391_v6 = vld [vmem:[%s18409_s6 + $0x60] sm:$0xff]  ;;  %v4825_v63 = vld [vmem:[%s18409_s6 + $0xdf0] sm:$0xff] }
 0x5e4   :  { %6124 = vmatpush1.msra.mxu0 %v4481_v9  ;;  %6199 = vmatpush1.msra.mxu1 %v4691_v40  ;;  %v4390_v9 = vld [vmem:[%s18409_s6 + $0x58] sm:$0xff]  ;;  %v4824_v40 = vld [vmem:[%s18409_s6 + $0xde8] sm:$0xff] }
 0x5e5   :  { %6125 = vmatprep.subr.mxu0 %v4475_v50  ;;  %6200 = vmatprep.subr.mxu1 %v4685_v17  ;;  %v4384_v50 = vld [vmem:[%s18409_s6 + $0x28] sm:$0xff]  ;;  %v4818_v17 = vld [vmem:[%s18409_s6 + $0xdb8] sm:$0xff] }
 0x5e6   :  { %6126 = vmatpush1.msra.mxu0 %v4474_v47  ;;  %6201 = vmatpush1.msra.mxu1 %v4684_v24  ;;  %v4383_v47 = vld [vmem:[%s18409_s6 + $0x20] sm:$0xff]  ;;  %v4817_v24 = vld [vmem:[%s18409_s6 + $0xdb0] sm:$0xff] }
 0x5e7   :  { %6127 = vmatprep.subr.mxu0 %v4468_v19  ;;  %6202 = vmatprep.subr.mxu1 %v4678_v13  ;;  %v4601_v19 = vld [vmem:[%s18409_s6 + $0x6f0] sm:$0xff]  ;;  %v4811_v13 = vld [vmem:[%s18409_s6 + $0xd80] sm:$0xff] }
 0x5e8   :  { %6128 = vmatpush1.msra.mxu0 %v4467_v7  ;;  %6203 = vmatpush1.msra.mxu1 %v4677_v20  ;;  %v4600_v7 = vld [vmem:[%s18409_s6 + $0x6e8] sm:$0xff]  ;;  %v4810_v20 = vld [vmem:[%s18409_s6 + $0xd78] sm:$0xff] }
 0x5e9   :  { %6129 = vmatprep.subr.mxu0 %v4461_v31  ;;  %6204 = vmatprep.subr.mxu1 %v4671_v59  ;;  %v4594_v31 = vld [vmem:[%s18409_s6 + $0x6b8] sm:$0xff]  ;;  %v4804_v59 = vld [vmem:[%s18409_s6 + $0xd48] sm:$0xff] }
 0x5ea   :  { %6130 = vmatpush1.msra.mxu0 %v4460_v23  ;;  %6205 = vmatpush1.msra.mxu1 %v4670_v0  ;;  %v4593_v23 = vld [vmem:[%s18409_s6 + $0x6b0] sm:$0xff]  ;;  %v4803_v0 = vld [vmem:[%s18409_s6 + $0xd40] sm:$0xff] }
 0x5eb   :  { %6131 = vmatprep.subr.mxu0 %v4454_v37  ;;  %6206 = vmatprep.subr.mxu1 %v4664_v35  ;;  %v4587_v37 = vld [vmem:[%s18409_s6 + $0x680] sm:$0xff]  ;;  %v4797_v35 = vld [vmem:[%s18409_s6 + $0xd10] sm:$0xff] }
 0x5ec   :  { %6132 = vmatpush1.msra.mxu0 %v4453_v33  ;;  %6207 = vmatpush1.msra.mxu1 %v4663_v10  ;;  %v4586_v33 = vld [vmem:[%s18409_s6 + $0x678] sm:$0xff]  ;;  %v4796_v10 = vld [vmem:[%s18409_s6 + $0xd08] sm:$0xff] }
 0x5ed   :  { %6133 = vmatprep.subr.mxu0 %v4447_v39  ;;  %6208 = vmatprep.subr.mxu1 %v4657_v3  ;;  %v4580_v39 = vld [vmem:[%s18409_s6 + $0x648] sm:$0xff]  ;;  %v4790_v3 = vld [vmem:[%s18409_s6 + $0xcd8] sm:$0xff] }
 0x5ee   :  { %6134 = vmatpush1.msra.mxu0 %v4446_v55  ;;  %6209 = vmatpush1.msra.mxu1 %v4656_v58  ;;  %v4579_v55 = vld [vmem:[%s18409_s6 + $0x640] sm:$0xff]  ;;  %v4789_v58 = vld [vmem:[%s18409_s6 + $0xcd0] sm:$0xff] }
 0x5ef   :  { %6135 = vmatprep.subr.mxu0 %v4440_v61  ;;  %6210 = vmatprep.subr.mxu1 %v4650_v29  ;;  %v4573_v61 = vld [vmem:[%s18409_s6 + $0x610] sm:$0xff]  ;;  %v4783_v29 = vld [vmem:[%s18409_s6 + $0xca0] sm:$0xff] }
 0x5f0   :  { %6136 = vmatpush1.msra.mxu0 %v4439_v34  ;;  %6211 = vmatpush1.msra.mxu1 %v4649_v30  ;;  %v4572_v34 = vld [vmem:[%s18409_s6 + $0x608] sm:$0xff]  ;;  %v4782_v30 = vld [vmem:[%s18409_s6 + $0xc98] sm:$0xff] }
 0x5f1   :  { %6137 = vmatprep.subr.mxu0 %v4433_v4  ;;  %6212 = vmatprep.subr.mxu1 %v4643_v11  ;;  %v4566_v4 = vld [vmem:[%s18409_s6 + $0x5d8] sm:$0xff]  ;;  %v4776_v11 = vld [vmem:[%s18409_s6 + $0xc68] sm:$0xff] }
 0x5f2   :  { %6138 = vmatpush1.msra.mxu0 %v4432_v25  ;;  %6213 = vmatpush1.msra.mxu1 %v4642_v38  ;;  %v4565_v25 = vld [vmem:[%s18409_s6 + $0x5d0] sm:$0xff]  ;;  %v4775_v38 = vld [vmem:[%s18409_s6 + $0xc60] sm:$0xff] }
 0x5f3   :  { %6139 = vmatprep.subr.mxu0 %v4426_v32  ;;  %6214 = vmatprep.subr.mxu1 %v4636_v8  ;;  %v4559_v32 = vld [vmem:[%s18409_s6 + $0x5a0] sm:$0xff]  ;;  %v4769_v8 = vld [vmem:[%s18409_s6 + $0xc30] sm:$0xff] }
 0x5f4   :  { %6140 = vmatpush1.msra.mxu0 %v4425_v54  ;;  %6215 = vmatpush1.msra.mxu1 %v4635_v41  ;;  %v4558_v54 = vld [vmem:[%s18409_s6 + $0x598] sm:$0xff]  ;;  %v4768_v41 = vld [vmem:[%s18409_s6 + $0xc28] sm:$0xff] }
 0x5f5   :  { %6141 = vmatprep.subr.mxu0 %v4419_v44  ;;  %6216 = vmatprep.subr.mxu1 %v4629_v48  ;;  %v4552_v44 = vld [vmem:[%s18409_s6 + $0x568] sm:$0xff]  ;;  %v4762_v48 = vld [vmem:[%s18409_s6 + $0xbf8] sm:$0xff] }
 0x5f6   :  { %6142 = vmatpush1.msra.mxu0 %v4418_v1  ;;  %6217 = vmatpush1.msra.mxu1 %v4628_v22  ;;  %v4551_v1 = vld [vmem:[%s18409_s6 + $0x560] sm:$0xff]  ;;  %v4761_v22 = vld [vmem:[%s18409_s6 + $0xbf0] sm:$0xff] }
 0x5f7   :  { %6143 = vmatprep.subr.mxu0 %v4412_v60  ;;  %6218 = vmatprep.subr.mxu1 %v4622_v2  ;;  %v4545_v60 = vld [vmem:[%s18409_s6 + $0x530] sm:$0xff]  ;;  %v4755_v2 = vld [vmem:[%s18409_s6 + $0xbc0] sm:$0xff] }
 0x5f8   :  { %6144 = vmatpush1.msra.mxu0 %v4411_v12  ;;  %6219 = vmatpush1.msra.mxu1 %v4621_v14  ;;  %v4544_v12 = vld [vmem:[%s18409_s6 + $0x528] sm:$0xff]  ;;  %v4754_v14 = vld [vmem:[%s18409_s6 + $0xbb8] sm:$0xff] }
 0x5f9   :  { %6145 = vmatprep.subr.mxu0 %v4405_v28  ;;  %6220 = vmatprep.subr.mxu1 %v4615_v18  ;;  %v4538_v28 = vld [vmem:[%s18409_s6 + $0x4f8] sm:$0xff]  ;;  %v4748_v18 = vld [vmem:[%s18409_s6 + $0xb88] sm:$0xff] }
 0x5fa   :  { %6146 = vmatpush1.msra.mxu0 %v4404_v26  ;;  %6221 = vmatpush1.msra.mxu1 %v4614_v36  ;;  %v4537_v26 = vld [vmem:[%s18409_s6 + $0x4f0] sm:$0xff]  ;;  %v4747_v36 = vld [vmem:[%s18409_s6 + $0xb80] sm:$0xff] }
 0x5fb   :  { %6147 = vmatprep.subr.mxu0 %v4398_v62  ;;  %6222 = vmatprep.subr.mxu1 %v4608_v53  ;;  %v4531_v62 = vld [vmem:[%s18409_s6 + $0x4c0] sm:$0xff]  ;;  %v4741_v53 = vld [vmem:[%s18409_s6 + $0xb50] sm:$0xff] }
 0x5fc   :  { %6148 = vmatpush1.msra.mxu0 %v4397_v43  ;;  %6223 = vmatpush1.msra.mxu1 %v4607_v49  ;;  %v4530_v43 = vld [vmem:[%s18409_s6 + $0x4b8] sm:$0xff]  ;;  %v4740_v49 = vld [vmem:[%s18409_s6 + $0xb48] sm:$0xff] }
 0x5fd   :  { %6149 = vmatprep.subr.mxu0 %v4391_v6  ;;  %6224 = vmatprep.subr.mxu1 %v4825_v63  ;;  %v4524_v6 = vld [vmem:[%s18409_s6 + $0x488] sm:$0xff]  ;;  %v4734_v63 = vld [vmem:[%s18409_s6 + $0xb18] sm:$0xff] }
 0x5fe   :  { %6150 = vmatpush1.msra.mxu0 %v4390_v9  ;;  %6225 = vmatpush2.msra.mxu1 %v4824_v40  ;;  %v4523_v9 = vld [vmem:[%s18409_s6 + $0x480] sm:$0xff]  ;;  %v4733_v40 = vld [vmem:[%s18409_s6 + $0xb10] sm:$0xff] }
 0x5ff   :  { %6151 = vmatprep.subr.mxu0 %v4384_v50  ;;  %6226 = vmatprep.subr.mxu1 %v4818_v17  ;;  %v4517_v50 = vld [vmem:[%s18409_s6 + $0x450] sm:$0xff]  ;;  %v4727_v17 = vld [vmem:[%s18409_s6 + $0xae0] sm:$0xff] }
 0x600   :  { %6152 = vmatpush1.msra.mxu0 %v4383_v47  ;;  %6227 = vmatpush2.msra.mxu1 %v4817_v24  ;;  %v4516_v47 = vld [vmem:[%s18409_s6 + $0x448] sm:$0xff]  ;;  %v4726_v24 = vld [vmem:[%s18409_s6 + $0xad8] sm:$0xff] }
 0x601   :  { %6153 = vmatprep.subr.mxu0 %v4601_v19  ;;  %6228 = vmatprep.subr.mxu1 %v4811_v13  ;;  %v4510_v19 = vld [vmem:[%s18409_s6 + $0x418] sm:$0xff]  ;;  %v4720_v13 = vld [vmem:[%s18409_s6 + $0xaa8] sm:$0xff] }
 0x602   :  { %6154 = vmatpush2.msra.mxu0 %v4600_v7  ;;  %6229 = vmatpush2.msra.mxu1 %v4810_v20  ;;  %v4509_v7 = vld [vmem:[%s18409_s6 + $0x410] sm:$0xff]  ;;  %v4719_v20 = vld [vmem:[%s18409_s6 + $0xaa0] sm:$0xff] }
 0x603   :  { %6155 = vmatprep.subr.mxu0 %v4594_v31  ;;  %6230 = vmatprep.subr.mxu1 %v4804_v59  ;;  %v4503_v31 = vld [vmem:[%s18409_s6 + $0x3e0] sm:$0xff]  ;;  %v5161_v59 = vld [vmem:[%s18409_s6 + $0x1870] sm:$0xff] }
 0x604   :  { %6156 = vmatpush2.msra.mxu0 %v4593_v23  ;;  %6231 = vmatpush2.msra.mxu1 %v4803_v0  ;;  %v4502_v23 = vld [vmem:[%s18409_s6 + $0x3d8] sm:$0xff]  ;;  %v5160_v0 = vld [vmem:[%s18409_s6 + $0x1868] sm:$0xff] }
 0x605   :  { %6157 = vmatprep.subr.mxu0 %v4587_v37  ;;  %6232 = vmatprep.subr.mxu1 %v4797_v35  ;;  %v4496_v37 = vld [vmem:[%s18409_s6 + $0x3a8] sm:$0xff]  ;;  %v5154_v35 = vld [vmem:[%s18409_s6 + $0x1838] sm:$0xff] }
 0x606   :  { %6158 = vmatpush2.msra.mxu0 %v4586_v33  ;;  %6233 = vmatpush2.msra.mxu1 %v4796_v10  ;;  %v4495_v33 = vld [vmem:[%s18409_s6 + $0x3a0] sm:$0xff]  ;;  %v5153_v10 = vld [vmem:[%s18409_s6 + $0x1830] sm:$0xff] }
 0x607   :  { %6159 = vmatprep.subr.mxu0 %v4580_v39  ;;  %6234 = vmatprep.subr.mxu1 %v4790_v3  ;;  %v4937_v39 = vld [vmem:[%s18409_s6 + $0x1170] sm:$0xff]  ;;  %v5147_v3 = vld [vmem:[%s18409_s6 + $0x1800] sm:$0xff] }
 0x608   :  { %6160 = vmatpush2.msra.mxu0 %v4579_v55  ;;  %6235 = vmatpush2.msra.mxu1 %v4789_v58  ;;  %v4936_v55 = vld [vmem:[%s18409_s6 + $0x1168] sm:$0xff]  ;;  %v5146_v58 = vld [vmem:[%s18409_s6 + $0x17f8] sm:$0xff] }
 0x609   :  { %6161 = vmatprep.subr.mxu0 %v4573_v61  ;;  %6236 = vmatprep.subr.mxu1 %v4783_v29  ;;  %v4930_v61 = vld [vmem:[%s18409_s6 + $0x1138] sm:$0xff]  ;;  %v5140_v29 = vld [vmem:[%s18409_s6 + $0x17c8] sm:$0xff] }
 0x60a   :  { %6162 = vmatpush2.msra.mxu0 %v4572_v34  ;;  %6237 = vmatpush2.msra.mxu1 %v4782_v30  ;;  %v4929_v34 = vld [vmem:[%s18409_s6 + $0x1130] sm:$0xff]  ;;  %v5139_v30 = vld [vmem:[%s18409_s6 + $0x17c0] sm:$0xff] }
 0x60b   :  { %6163 = vmatprep.subr.mxu0 %v4566_v4  ;;  %6238 = vmatprep.subr.mxu1 %v4776_v11  ;;  %v4923_v4 = vld [vmem:[%s18409_s6 + $0x1100] sm:$0xff]  ;;  %v5133_v11 = vld [vmem:[%s18409_s6 + $0x1790] sm:$0xff] }
 0x60c   :  { %6164 = vmatpush2.msra.mxu0 %v4565_v25  ;;  %6239 = vmatpush2.msra.mxu1 %v4775_v38  ;;  %v4922_v25 = vld [vmem:[%s18409_s6 + $0x10f8] sm:$0xff]  ;;  %v5132_v38 = vld [vmem:[%s18409_s6 + $0x1788] sm:$0xff] }
 0x60d   :  { %6165 = vmatprep.subr.mxu0 %v4559_v32  ;;  %6240 = vmatprep.subr.mxu1 %v4769_v8  ;;  %v4916_v32 = vld [vmem:[%s18409_s6 + $0x10c8] sm:$0xff]  ;;  %v5126_v8 = vld [vmem:[%s18409_s6 + $0x1758] sm:$0xff] }
 0x60e   :  { %6166 = vmatpush2.msra.mxu0 %v4558_v54  ;;  %6241 = vmatpush2.msra.mxu1 %v4768_v41  ;;  %v4915_v54 = vld [vmem:[%s18409_s6 + $0x10c0] sm:$0xff]  ;;  %v5125_v41 = vld [vmem:[%s18409_s6 + $0x1750] sm:$0xff] }
 0x60f   :  { %6167 = vmatprep.subr.mxu0 %v4552_v44  ;;  %6242 = vmatprep.subr.mxu1 %v4762_v48  ;;  %v4909_v44 = vld [vmem:[%s18409_s6 + $0x1090] sm:$0xff]  ;;  %v5119_v48 = vld [vmem:[%s18409_s6 + $0x1720] sm:$0xff] }
 0x610   :  { %6168 = vmatpush2.msra.mxu0 %v4551_v1  ;;  %6243 = vmatpush2.msra.mxu1 %v4761_v22  ;;  %v4908_v1 = vld [vmem:[%s18409_s6 + $0x1088] sm:$0xff]  ;;  %v5118_v22 = vld [vmem:[%s18409_s6 + $0x1718] sm:$0xff] }
 0x611   :  { %6169 = vmatprep.subr.mxu0 %v4545_v60  ;;  %6244 = vmatprep.subr.mxu1 %v4755_v2  ;;  %v4902_v60 = vld [vmem:[%s18409_s6 + $0x1058] sm:$0xff]  ;;  %v5112_v2 = vld [vmem:[%s18409_s6 + $0x16e8] sm:$0xff] }
 0x612   :  { %6170 = vmatpush2.msra.mxu0 %v4544_v12  ;;  %6245 = vmatpush2.msra.mxu1 %v4754_v14  ;;  %v4901_v12 = vld [vmem:[%s18409_s6 + $0x1050] sm:$0xff]  ;;  %v5111_v14 = vld [vmem:[%s18409_s6 + $0x16e0] sm:$0xff] }
 0x613   :  { %6171 = vmatprep.subr.mxu0 %v4538_v28  ;;  %6246 = vmatprep.subr.mxu1 %v4748_v18  ;;  %v4895_v28 = vld [vmem:[%s18409_s6 + $0x1020] sm:$0xff]  ;;  %v5105_v18 = vld [vmem:[%s18409_s6 + $0x16b0] sm:$0xff] }
 0x614   :  { %6172 = vmatpush2.msra.mxu0 %v4537_v26  ;;  %6247 = vmatpush2.msra.mxu1 %v4747_v36  ;;  %v4894_v26 = vld [vmem:[%s18409_s6 + $0x1018] sm:$0xff]  ;;  %v5104_v36 = vld [vmem:[%s18409_s6 + $0x16a8] sm:$0xff] }
 0x615   :  { %6173 = vmatprep.subr.mxu0 %v4531_v62  ;;  %6248 = vmatprep.subr.mxu1 %v4741_v53  ;;  %v4888_v62 = vld [vmem:[%s18409_s6 + $0xfe8] sm:$0xff]  ;;  %v5098_v53 = vld [vmem:[%s18409_s6 + $0x1678] sm:$0xff] }
 0x616   :  { %6174 = vmatpush2.msra.mxu0 %v4530_v43  ;;  %6249 = vmatpush2.msra.mxu1 %v4740_v49  ;;  %v4887_v43 = vld [vmem:[%s18409_s6 + $0xfe0] sm:$0xff]  ;;  %v5097_v49 = vld [vmem:[%s18409_s6 + $0x1670] sm:$0xff] }
 0x617   :  { %6175 = vmatprep.subr.mxu0 %v4524_v6  ;;  %6250 = vmatprep.subr.mxu1 %v4734_v63  ;;  %v4881_v6 = vld [vmem:[%s18409_s6 + $0xfb0] sm:$0xff]  ;;  %v5091_v63 = vld [vmem:[%s18409_s6 + $0x1640] sm:$0xff] }
 0x618   :  { %6176 = vmatpush2.msra.mxu0 %v4523_v9  ;;  %6251 = vmatpush2.msra.mxu1 %v4733_v40  ;;  %v4880_v9 = vld [vmem:[%s18409_s6 + $0xfa8] sm:$0xff]  ;;  %v5090_v40 = vld [vmem:[%s18409_s6 + $0x1638] sm:$0xff] }
 0x619   :  { %6177 = vmatprep.subr.mxu0 %v4517_v50  ;;  %6252 = vmatprep.subr.mxu1 %v4727_v17  ;;  %v4874_v50 = vld [vmem:[%s18409_s6 + $0xf78] sm:$0xff]  ;;  %v5084_v17 = vld [vmem:[%s18409_s6 + $0x1608] sm:$0xff] }
 0x61a   :  { %6178 = vmatpush2.msra.mxu0 %v4516_v47  ;;  %6253 = vmatpush2.msra.mxu1 %v4726_v24  ;;  %v4873_v47 = vld [vmem:[%s18409_s6 + $0xf70] sm:$0xff]  ;;  %v5083_v24 = vld [vmem:[%s18409_s6 + $0x1600] sm:$0xff] }
 0x61b   :  { %6179 = vmatprep.subr.mxu0 %v4510_v19  ;;  %6254 = vmatprep.subr.mxu1 %v4720_v13  ;;  %v4867_v19 = vld [vmem:[%s18409_s6 + $0xf40] sm:$0xff]  ;;  %v5077_v13 = vld [vmem:[%s18409_s6 + $0x15d0] sm:$0xff] }
 0x61c   :  { %6180 = vmatpush2.msra.mxu0 %v4509_v7  ;;  %6255 = vmatpush2.msra.mxu1 %v4719_v20  ;;  %v4866_v7 = vld [vmem:[%s18409_s6 + $0xf38] sm:$0xff]  ;;  %v5076_v20 = vld [vmem:[%s18409_s6 + $0x15c8] sm:$0xff] }
 0x61d   :  { %6181 = vmatprep.subr.mxu0 %v4503_v31  ;;  %6257 = vmatmul.mubr.f32.vlgmr.msra.gmra.mxu1 %v14394_v15  ;;  %v4860_v31 = vld [vmem:[%s18409_s6 + $0xf08] sm:$0xff] }
 0x61e   :  { %6334 = vmatprep.subr.mxu1 %v5161_v59  ;;  %6182 = vmatpush2.msra.mxu0 %v4502_v23  ;;  %v5070_v59 = vld [vmem:[%s18409_s6 + $0x1598] sm:$0xff]  ;;  %v4859_v23 = vld [vmem:[%s18409_s6 + $0xf00] sm:$0xff] }
 0x61f   :  { %6335 = vmatpush1.msra.mxu1 %v5160_v0  ;;  %6398 = vmatprep.mubr.f32.mxu1 %v14411_v21  ;;  %v5069_v0 = vld [vmem:[%s18409_s6 + $0x1590] sm:$0xff] }
 0x620   :  { %6183 = vmatprep.subr.mxu0 %v4496_v37  ;;  %6336 = vmatprep.subr.mxu1 %v5154_v35  ;;  %v4853_v37 = vld [vmem:[%s18409_s6 + $0xed0] sm:$0xff]  ;;  %v5063_v35 = vld [vmem:[%s18409_s6 + $0x1560] sm:$0xff] }
 0x621   :  { %6184 = vmatpush2.msra.mxu0 %v4495_v33  ;;  %6337 = vmatpush1.msra.mxu1 %v5153_v10  ;;  %v4852_v33 = vld [vmem:[%s18409_s6 + $0xec8] sm:$0xff]  ;;  %v5062_v10 = vld [vmem:[%s18409_s6 + $0x1558] sm:$0xff] }
 0x622   :  { %6186 = vmatmul.mubr.f32.vlgmr.msra.gmra.mxu0 %v14422_v45  ;;  %6263 = vmatprep.subr.mxu0 %v4937_v39  ;;  %v4846_v39 = vld [vmem:[%s18409_s6 + $0xe98] sm:$0xff] }
 0x623   :  { %6338 = vmatprep.subr.mxu1 %v5147_v3  ;;  %6264 = vmatpush1.msra.mxu0 %v4936_v55  ;;  %v5056_v3 = vld [vmem:[%s18409_s6 + $0x1528] sm:$0xff]  ;;  %v4845_v55 = vld [vmem:[%s18409_s6 + $0xe90] sm:$0xff] }
 0x624   :  { %6327 = vmatprep.mubr.f32.mxu0 %v14438_v56  ;;  %6339 = vmatpush1.msra.mxu1 %v5146_v58  ;;  %v5055_v58 = vld [vmem:[%s18409_s6 + $0x1520] sm:$0xff] }
 0x625   :  { %6265 = vmatprep.subr.mxu0 %v4930_v61  ;;  %6340 = vmatprep.subr.mxu1 %v5140_v29  ;;  %v4839_v61 = vld [vmem:[%s18409_s6 + $0xe60] sm:$0xff]  ;;  %v5273_v29 = vld [vmem:[%s18409_s6 + $0x1bf0] sm:$0xff] }
 0x626   :  { %6266 = vmatpush1.msra.mxu0 %v4929_v34  ;;  %6341 = vmatpush1.msra.mxu1 %v5139_v30  ;;  %v4838_v34 = vld [vmem:[%s18409_s6 + $0xe58] sm:$0xff]  ;;  %v5272_v30 = vld [vmem:[%s18409_s6 + $0x1be8] sm:$0xff] }
 0x627   :  { %6267 = vmatprep.subr.mxu0 %v4923_v4  ;;  %6342 = vmatprep.subr.mxu1 %v5133_v11  ;;  %v4832_v4 = vld [vmem:[%s18409_s6 + $0xe28] sm:$0xff]  ;;  %v5266_v11 = vld [vmem:[%s18409_s6 + $0x1bb8] sm:$0xff] }
 0x628   :  { %6268 = vmatpush1.msra.mxu0 %v4922_v25  ;;  %6343 = vmatpush1.msra.mxu1 %v5132_v38  ;;  %v4831_v25 = vld [vmem:[%s18409_s6 + $0xe20] sm:$0xff]  ;;  %v5265_v38 = vld [vmem:[%s18409_s6 + $0x1bb0] sm:$0xff] }
 0x629   :  { %6269 = vmatprep.subr.mxu0 %v4916_v32  ;;  %6344 = vmatprep.subr.mxu1 %v5126_v8  ;;  %v5049_v32 = vld [vmem:[%s18409_s6 + $0x14f0] sm:$0xff]  ;;  %v5259_v8 = vld [vmem:[%s18409_s6 + $0x1b80] sm:$0xff] }
 0x62a   :  { %6270 = vmatpush1.msra.mxu0 %v4915_v54  ;;  %6345 = vmatpush1.msra.mxu1 %v5125_v41  ;;  %v5048_v54 = vld [vmem:[%s18409_s6 + $0x14e8] sm:$0xff]  ;;  %v5258_v41 = vld [vmem:[%s18409_s6 + $0x1b78] sm:$0xff] }
 0x62b   :  { %6271 = vmatprep.subr.mxu0 %v4909_v44  ;;  %6346 = vmatprep.subr.mxu1 %v5119_v48  ;;  %v5042_v44 = vld [vmem:[%s18409_s6 + $0x14b8] sm:$0xff]  ;;  %v5252_v48 = vld [vmem:[%s18409_s6 + $0x1b48] sm:$0xff] }
 0x62c   :  { %6272 = vmatpush1.msra.mxu0 %v4908_v1  ;;  %6347 = vmatpush1.msra.mxu1 %v5118_v22  ;;  %v5041_v1 = vld [vmem:[%s18409_s6 + $0x14b0] sm:$0xff]  ;;  %v5251_v22 = vld [vmem:[%s18409_s6 + $0x1b40] sm:$0xff] }
 0x62d   :  { %6273 = vmatprep.subr.mxu0 %v4902_v60  ;;  %6348 = vmatprep.subr.mxu1 %v5112_v2  ;;  %v5035_v60 = vld [vmem:[%s18409_s6 + $0x1480] sm:$0xff]  ;;  %v5245_v2 = vld [vmem:[%s18409_s6 + $0x1b10] sm:$0xff] }
 0x62e   :  { %6274 = vmatpush1.msra.mxu0 %v4901_v12  ;;  %6349 = vmatpush1.msra.mxu1 %v5111_v14  ;;  %v5034_v12 = vld [vmem:[%s18409_s6 + $0x1478] sm:$0xff]  ;;  %v5244_v14 = vld [vmem:[%s18409_s6 + $0x1b08] sm:$0xff] }
 0x62f   :  { %6275 = vmatprep.subr.mxu0 %v4895_v28  ;;  %6350 = vmatprep.subr.mxu1 %v5105_v18  ;;  %v5028_v28 = vld [vmem:[%s18409_s6 + $0x1448] sm:$0xff]  ;;  %v5238_v18 = vld [vmem:[%s18409_s6 + $0x1ad8] sm:$0xff] }
 0x630   :  { %6276 = vmatpush1.msra.mxu0 %v4894_v26  ;;  %6351 = vmatpush1.msra.mxu1 %v5104_v36  ;;  %v5027_v26 = vld [vmem:[%s18409_s6 + $0x1440] sm:$0xff]  ;;  %v5237_v36 = vld [vmem:[%s18409_s6 + $0x1ad0] sm:$0xff] }
 0x631   :  { %6277 = vmatprep.subr.mxu0 %v4888_v62  ;;  %6352 = vmatprep.subr.mxu1 %v5098_v53  ;;  %v5021_v62 = vld [vmem:[%s18409_s6 + $0x1410] sm:$0xff]  ;;  %v5231_v53 = vld [vmem:[%s18409_s6 + $0x1aa0] sm:$0xff] }
 0x632   :  { %6278 = vmatpush1.msra.mxu0 %v4887_v43  ;;  %6353 = vmatpush1.msra.mxu1 %v5097_v49  ;;  %v5020_v43 = vld [vmem:[%s18409_s6 + $0x1408] sm:$0xff]  ;;  %v5230_v49 = vld [vmem:[%s18409_s6 + $0x1a98] sm:$0xff] }
 0x633   :  { %6279 = vmatprep.subr.mxu0 %v4881_v6  ;;  %6354 = vmatprep.subr.mxu1 %v5091_v63  ;;  %v5014_v6 = vld [vmem:[%s18409_s6 + $0x13d8] sm:$0xff]  ;;  %v5224_v63 = vld [vmem:[%s18409_s6 + $0x1a68] sm:$0xff] }
 0x634   :  { %6280 = vmatpush1.msra.mxu0 %v4880_v9  ;;  %6355 = vmatpush1.msra.mxu1 %v5090_v40  ;;  %v5013_v9 = vld [vmem:[%s18409_s6 + $0x13d0] sm:$0xff]  ;;  %v5223_v40 = vld [vmem:[%s18409_s6 + $0x1a60] sm:$0xff] }
 0x635   :  { %6281 = vmatprep.subr.mxu0 %v4874_v50  ;;  %6356 = vmatprep.subr.mxu1 %v5084_v17  ;;  %v5007_v50 = vld [vmem:[%s18409_s6 + $0x13a0] sm:$0xff]  ;;  %v5217_v17 = vld [vmem:[%s18409_s6 + $0x1a30] sm:$0xff] }
 0x636   :  { %6282 = vmatpush1.msra.mxu0 %v4873_v47  ;;  %6357 = vmatpush1.msra.mxu1 %v5083_v24  ;;  %v5006_v47 = vld [vmem:[%s18409_s6 + $0x1398] sm:$0xff]  ;;  %v5216_v24 = vld [vmem:[%s18409_s6 + $0x1a28] sm:$0xff] }
 0x637   :  { %6283 = vmatprep.subr.mxu0 %v4867_v19  ;;  %6358 = vmatprep.subr.mxu1 %v5077_v13  ;;  %v5000_v19 = vld [vmem:[%s18409_s6 + $0x1368] sm:$0xff]  ;;  %v5210_v13 = vld [vmem:[%s18409_s6 + $0x19f8] sm:$0xff] }
 0x638   :  { %6284 = vmatpush1.msra.mxu0 %v4866_v7  ;;  %6359 = vmatpush1.msra.mxu1 %v5076_v20  ;;  %v4999_v7 = vld [vmem:[%s18409_s6 + $0x1360] sm:$0xff]  ;;  %v5209_v20 = vld [vmem:[%s18409_s6 + $0x19f0] sm:$0xff] }
 0x639   :  { %6285 = vmatprep.subr.mxu0 %v4860_v31  ;;  %6360 = vmatprep.subr.mxu1 %v5070_v59  ;;  %v4993_v31 = vld [vmem:[%s18409_s6 + $0x1330] sm:$0xff]  ;;  %v5203_v59 = vld [vmem:[%s18409_s6 + $0x19c0] sm:$0xff] }
 0x63a   :  { %6286 = vmatpush1.msra.mxu0 %v4859_v23  ;;  %6361 = vmatpush1.msra.mxu1 %v5069_v0  ;;  %v4992_v23 = vld [vmem:[%s18409_s6 + $0x1328] sm:$0xff]  ;;  %v5202_v0 = vld [vmem:[%s18409_s6 + $0x19b8] sm:$0xff] }
 0x63b   :  { %6287 = vmatprep.subr.mxu0 %v4853_v37  ;;  %6362 = vmatprep.subr.mxu1 %v5063_v35  ;;  %v4986_v37 = vld [vmem:[%s18409_s6 + $0x12f8] sm:$0xff]  ;;  %v5196_v35 = vld [vmem:[%s18409_s6 + $0x1988] sm:$0xff] }
 0x63c   :  { %6288 = vmatpush1.msra.mxu0 %v4852_v33  ;;  %6363 = vmatpush1.msra.mxu1 %v5062_v10  ;;  %v4985_v33 = vld [vmem:[%s18409_s6 + $0x12f0] sm:$0xff]  ;;  %v5195_v10 = vld [vmem:[%s18409_s6 + $0x1980] sm:$0xff] }
 0x63d   :  { %6289 = vmatprep.subr.mxu0 %v4846_v39  ;;  %6364 = vmatprep.subr.mxu1 %v5056_v3  ;;  %v4979_v39 = vld [vmem:[%s18409_s6 + $0x12c0] sm:$0xff]  ;;  %v5189_v3 = vld [vmem:[%s18409_s6 + $0x1950] sm:$0xff] }
 0x63e   :  { %6290 = vmatpush1.msra.mxu0 %v4845_v55  ;;  %6365 = vmatpush1.msra.mxu1 %v5055_v58  ;;  %v4978_v55 = vld [vmem:[%s18409_s6 + $0x12b8] sm:$0xff]  ;;  %v5188_v58 = vld [vmem:[%s18409_s6 + $0x1948] sm:$0xff] }
 0x63f   :  { %6291 = vmatprep.subr.mxu0 %v4839_v61  ;;  %6366 = vmatprep.subr.mxu1 %v5273_v29  ;;  %v4972_v61 = vld [vmem:[%s18409_s6 + $0x1288] sm:$0xff]  ;;  %v5182_v29 = vld [vmem:[%s18409_s6 + $0x1918] sm:$0xff] }
 0x640   :  { %6292 = vmatpush1.msra.mxu0 %v4838_v34  ;;  %6367 = vmatpush2.msra.mxu1 %v5272_v30  ;;  %v4971_v34 = vld [vmem:[%s18409_s6 + $0x1280] sm:$0xff]  ;;  %v5181_v30 = vld [vmem:[%s18409_s6 + $0x1910] sm:$0xff] }
 0x641   :  { %6293 = vmatprep.subr.mxu0 %v4832_v4  ;;  %6368 = vmatprep.subr.mxu1 %v5266_v11  ;;  %v4965_v4 = vld [vmem:[%s18409_s6 + $0x1250] sm:$0xff]  ;;  %v5175_v11 = vld [vmem:[%s18409_s6 + $0x18e0] sm:$0xff] }
 0x642   :  { %6294 = vmatpush1.msra.mxu0 %v4831_v25  ;;  %6369 = vmatpush2.msra.mxu1 %v5265_v38  ;;  %v4964_v25 = vld [vmem:[%s18409_s6 + $0x1248] sm:$0xff]  ;;  %v5174_v38 = vld [vmem:[%s18409_s6 + $0x18d8] sm:$0xff] }
 0x643   :  { %6295 = vmatprep.subr.mxu0 %v5049_v32  ;;  %6370 = vmatprep.subr.mxu1 %v5259_v8  ;;  %v4958_v32 = vld [vmem:[%s18409_s6 + $0x1218] sm:$0xff]  ;;  %v5168_v8 = vld [vmem:[%s18409_s6 + $0x18a8] sm:$0xff] }
 0x644   :  { %6296 = vmatpush2.msra.mxu0 %v5048_v54  ;;  %6371 = vmatpush2.msra.mxu1 %v5258_v41  ;;  %v4957_v54 = vld [vmem:[%s18409_s6 + $0x1210] sm:$0xff]  ;;  %v5167_v41 = vld [vmem:[%s18409_s6 + $0x18a0] sm:$0xff] }
 0x645   :  { %6297 = vmatprep.subr.mxu0 %v5042_v44  ;;  %6372 = vmatprep.subr.mxu1 %v5252_v48  ;;  %v4951_v44 = vld [vmem:[%s18409_s6 + $0x11e0] sm:$0xff]  ;;  %v4602_v48 = vld [vmem:[%s18409_s6 + $0x6f8] sm:$0xff] }
 0x646   :  { %6298 = vmatpush2.msra.mxu0 %v5041_v1  ;;  %6373 = vmatpush2.msra.mxu1 %v5251_v22  ;;  %v4950_v1 = vld [vmem:[%s18409_s6 + $0x11d8] sm:$0xff] }
 0x647   :  { %6299 = vmatprep.subr.mxu0 %v5035_v60  ;;  %6374 = vmatprep.subr.mxu1 %v5245_v2  ;;  %v4490_v22 = vld [vmem:[%s18409_s6 + $0x378] sm:$0xff]  ;;  %v4944_v60 = vld [vmem:[%s18409_s6 + $0x11a8] sm:$0xff]  ;;  %v4595_v2 = vld [vmem:[%s18409_s6 + $0x6c0] sm:$0xff] }
 0x648   :  { %6300 = vmatpush2.msra.mxu0 %v5034_v12  ;;  %6375 = vmatpush2.msra.mxu1 %v5244_v14  ;;  %v4943_v12 = vld [vmem:[%s18409_s6 + $0x11a0] sm:$0xff] }
 0x649   :  { %6301 = vmatprep.subr.mxu0 %v5028_v28  ;;  %6376 = vmatprep.subr.mxu1 %v5238_v18  ;;  %v4483_v14 = vld [vmem:[%s18409_s6 + $0x340] sm:$0xff]  ;;  %v5385_v28 = vld [vmem:[%s18409_s6 + $0x1f70] sm:$0xff]  ;;  %v4588_v18 = vld [vmem:[%s18409_s6 + $0x688] sm:$0xff] }
 0x64a   :  { %6302 = vmatpush2.msra.mxu0 %v5027_v26  ;;  %6377 = vmatpush2.msra.mxu1 %v5237_v36  ;;  %v5384_v26 = vld [vmem:[%s18409_s6 + $0x1f68] sm:$0xff]  ;;  %v5378_v36 = vld [vmem:[%s18409_s6 + $0x1f38] sm:$0xff] }
 0x64b   :  { %6303 = vmatprep.subr.mxu0 %v5021_v62  ;;  %6378 = vmatprep.subr.mxu1 %v5231_v53  ;;  %v4581_v62 = vld [vmem:[%s18409_s6 + $0x650] sm:$0xff] }
 0x64c   :  { %6304 = vmatpush2.msra.mxu0 %v5020_v43  ;;  %6379 = vmatpush2.msra.mxu1 %v5230_v49  ;;  %v5377_v53 = vld [vmem:[%s18409_s6 + $0x1f30] sm:$0xff]  ;;  %v5371_v49 = vld [vmem:[%s18409_s6 + $0x1f00] sm:$0xff] }
 0x64d   :  { %6305 = vmatprep.subr.mxu0 %v5014_v6  ;;  %6380 = vmatprep.subr.mxu1 %v5224_v63  ;;  %v4469_v43 = vld [vmem:[%s18409_s6 + $0x2d0] sm:$0xff]  ;;  %v4574_v6 = vld [vmem:[%s18409_s6 + $0x618] sm:$0xff] }
 0x64e   :  { %6306 = vmatpush2.msra.mxu0 %v5013_v9  ;;  %6381 = vmatpush2.msra.mxu1 %v5223_v40  ;;  %v5370_v63 = vld [vmem:[%s18409_s6 + $0x1ef8] sm:$0xff]  ;;  %v5364_v40 = vld [vmem:[%s18409_s6 + $0x1ec8] sm:$0xff] }
 0x64f   :  { %6307 = vmatprep.subr.mxu0 %v5007_v50  ;;  %6382 = vmatprep.subr.mxu1 %v5217_v17  ;;  %v4462_v9 = vld [vmem:[%s18409_s6 + $0x298] sm:$0xff]  ;;  %v4567_v50 = vld [vmem:[%s18409_s6 + $0x5e0] sm:$0xff] }
 0x650   :  { %6308 = vmatpush2.msra.mxu0 %v5006_v47  ;;  %6383 = vmatpush2.msra.mxu1 %v5216_v24  ;;  %v5363_v17 = vld [vmem:[%s18409_s6 + $0x1ec0] sm:$0xff]  ;;  %v5357_v24 = vld [vmem:[%s18409_s6 + $0x1e90] sm:$0xff] }
 0x651   :  { %6309 = vmatprep.subr.mxu0 %v5000_v19  ;;  %6384 = vmatprep.subr.mxu1 %v5210_v13  ;;  %v4455_v47 = vld [vmem:[%s18409_s6 + $0x260] sm:$0xff]  ;;  %v4560_v19 = vld [vmem:[%s18409_s6 + $0x5a8] sm:$0xff] }
 0x652   :  { %6310 = vmatpush2.msra.mxu0 %v4999_v7  ;;  %6385 = vmatpush2.msra.mxu1 %v5209_v20  ;;  %v5356_v13 = vld [vmem:[%s18409_s6 + $0x1e88] sm:$0xff]  ;;  %v5350_v20 = vld [vmem:[%s18409_s6 + $0x1e58] sm:$0xff] }
 0x653   :  { %6311 = vmatprep.subr.mxu0 %v4993_v31  ;;  %6386 = vmatprep.subr.mxu1 %v5203_v59  ;;  %v4448_v7 = vld [vmem:[%s18409_s6 + $0x228] sm:$0xff]  ;;  %v4553_v31 = vld [vmem:[%s18409_s6 + $0x570] sm:$0xff] }
 0x654   :  { %6312 = vmatpush2.msra.mxu0 %v4992_v23  ;;  %6387 = vmatpush2.msra.mxu1 %v5202_v0  ;;  %v5349_v59 = vld [vmem:[%s18409_s6 + $0x1e50] sm:$0xff]  ;;  %v5343_v0 = vld [vmem:[%s18409_s6 + $0x1e20] sm:$0xff] }
 0x655   :  { %6313 = vmatprep.subr.mxu0 %v4986_v37  ;;  %6388 = vmatprep.subr.mxu1 %v5196_v35  ;;  %v4441_v23 = vld [vmem:[%s18409_s6 + $0x1f0] sm:$0xff]  ;;  %v4546_v37 = vld [vmem:[%s18409_s6 + $0x538] sm:$0xff] }
 0x656   :  { %6314 = vmatpush2.msra.mxu0 %v4985_v33  ;;  %6389 = vmatpush2.msra.mxu1 %v5195_v10  ;;  %v5342_v35 = vld [vmem:[%s18409_s6 + $0x1e18] sm:$0xff]  ;;  %v5336_v10 = vld [vmem:[%s18409_s6 + $0x1de8] sm:$0xff] }
 0x657   :  { %6315 = vmatprep.subr.mxu0 %v4979_v39  ;;  %6390 = vmatprep.subr.mxu1 %v5189_v3  ;;  %v4434_v33 = vld [vmem:[%s18409_s6 + $0x1b8] sm:$0xff]  ;;  %v4539_v39 = vld [vmem:[%s18409_s6 + $0x500] sm:$0xff] }
 0x658   :  { %6316 = vmatpush2.msra.mxu0 %v4978_v55  ;;  %6391 = vmatpush2.msra.mxu1 %v5188_v58  ;;  %v5335_v3 = vld [vmem:[%s18409_s6 + $0x1de0] sm:$0xff]  ;;  %v5329_v58 = vld [vmem:[%s18409_s6 + $0x1db0] sm:$0xff] }
 0x659   :  { %6317 = vmatprep.subr.mxu0 %v4972_v61  ;;  %6392 = vmatprep.subr.mxu1 %v5182_v29  ;;  %v4427_v55 = vld [vmem:[%s18409_s6 + $0x180] sm:$0xff]  ;;  %v4532_v61 = vld [vmem:[%s18409_s6 + $0x4c8] sm:$0xff] }
 0x65a   :  { %6318 = vmatpush2.msra.mxu0 %v4971_v34  ;;  %6393 = vmatpush2.msra.mxu1 %v5181_v30  ;;  %v5328_v29 = vld [vmem:[%s18409_s6 + $0x1da8] sm:$0xff]  ;;  %v5322_v30 = vld [vmem:[%s18409_s6 + $0x1d78] sm:$0xff] }
 0x65b   :  { %6319 = vmatprep.subr.mxu0 %v4965_v4  ;;  %6394 = vmatprep.subr.mxu1 %v5175_v11  ;;  %v4420_v34 = vld [vmem:[%s18409_s6 + $0x148] sm:$0xff]  ;;  %v4525_v4 = vld [vmem:[%s18409_s6 + $0x490] sm:$0xff] }
 0x65c   :  { %6320 = vmatpush2.msra.mxu0 %v4964_v25  ;;  %6395 = vmatpush2.msra.mxu1 %v5174_v38  ;;  %v5321_v11 = vld [vmem:[%s18409_s6 + $0x1d70] sm:$0xff]  ;;  %v5315_v38 = vld [vmem:[%s18409_s6 + $0x1d40] sm:$0xff] }
 0x65d   :  { %6321 = vmatprep.subr.mxu0 %v4958_v32  ;;  %6396 = vmatprep.subr.mxu1 %v5168_v8  ;;  %v4413_v25 = vld [vmem:[%s18409_s6 + $0x110] sm:$0xff]  ;;  %v4518_v32 = vld [vmem:[%s18409_s6 + $0x458] sm:$0xff] }
 0x65e   :  { %6322 = vmatpush2.msra.mxu0 %v4957_v54  ;;  %6397 = vmatpush2.msra.mxu1 %v5167_v41  ;;  %v5314_v8 = vld [vmem:[%s18409_s6 + $0x1d38] sm:$0xff]  ;;  %v5308_v41 = vld [vmem:[%s18409_s6 + $0x1d08] sm:$0xff] }
 0x65f   :  { %6323 = vmatprep.subr.mxu0 %v4951_v44  ;;  %6399 = vmatmul.mubr.f32.vlgmr.msra.gmra.mxu1 %v14794_v57  ;;  %v4406_v54 = vld [vmem:[%s18409_s6 + $0xd8] sm:$0xff]  ;;  %v4511_v44 = vld [vmem:[%s18409_s6 + $0x420] sm:$0xff] }
 0x660   :  { %9035 = vmatprep.subr.mxu1 %v4602_v48  ;;  %6324 = vmatpush2.msra.mxu0 %v4950_v1  ;;  %v5307_v48 = vld [vmem:[%s18409_s6 + $0x1d00] sm:$0xff] }
 0x661   :  { %9036 = vmatpush3.msra.mxu1 %v4490_v22  ;;  %6540 = vmatprep.mubr.f32.mxu1 %v14409_v16  ;;  %v4476_v16 = vld [vmem:[%s18409_s6 + $0x308] sm:$0xff]  ;;  %v4399_v1 = vld [vmem:[%s18409_s6 + $0xa0] sm:$0xff]  ;;  %v5301_v22 = vld [vmem:[%s18409_s6 + $0x1cd0] sm:$0xff] }
 0x662   :  { %6325 = vmatprep.subr.mxu0 %v4944_v60  ;;  %9037 = vmatprep.subr.mxu1 %v4595_v2  ;;  %v4504_v60 = vld [vmem:[%s18409_s6 + $0x3e8] sm:$0xff] }
 0x663   :  { %6326 = vmatpush2.msra.mxu0 %v4943_v12  ;;  %9038 = vmatpush3.msra.mxu1 %v4483_v14  ;;  %v5300_v2 = vld [vmem:[%s18409_s6 + $0x1cc8] sm:$0xff]  ;;  %v5294_v14 = vld [vmem:[%s18409_s6 + $0x1c98] sm:$0xff] }
 0x664   :  { %6328 = vmatmul.mubr.f32.vlgmr.msra.gmra.mxu0 %v14824_v52  ;;  %6405 = vmatprep.subr.mxu0 %v5385_v28  ;;  %v4392_v12 = vld [vmem:[%s18409_s6 + $0x68] sm:$0xff]  ;;  %v4497_v28 = vld [vmem:[%s18409_s6 + $0x3b0] sm:$0xff] }
 0x665   :  { %9039 = vmatprep.subr.mxu1 %v4588_v18  ;;  %6406 = vmatpush1.msra.mxu0 %v5384_v26  ;;  %v5293_v18 = vld [vmem:[%s18409_s6 + $0x1c90] sm:$0xff] }
 0x666   :  { %8741 = vmatprep.mubr.msk.f32.mxu0 %vm2805_vm3, %v14835_v5  ;;  %9040 = vmatpush3.msra.mxu1 %v4476_v16  ;;  %v4385_v26 = vld [vmem:[%s18409_s6 + $0x30] sm:$0xff]  ;;  %v5287_v16 = vld [vmem:[%s18409_s6 + $0x1c60] sm:$0xff] }
 0x667   :  { %6407 = vmatprep.subr.mxu0 %v5378_v36  ;;  %9041 = vmatprep.subr.mxu1 %v4581_v62  ;;  %v4826_v36 = vld [vmem:[%s18409_s6 + $0xdf8] sm:$0xff] }
 0x668   :  { %6408 = vmatpush1.msra.mxu0 %v5377_v53  ;;  %9042 = vmatpush3.msra.mxu1 %v4469_v43  ;;  %v5286_v62 = vld [vmem:[%s18409_s6 + $0x1c58] sm:$0xff]  ;;  %v5280_v43 = vld [vmem:[%s18409_s6 + $0x1c28] sm:$0xff] }
 0x669   :  { %6409 = vmatprep.subr.mxu0 %v5371_v49  ;;  %9043 = vmatprep.subr.mxu1 %v4574_v6  ;;  %v4714_v53 = vld [vmem:[%s18409_s6 + $0xa78] sm:$0xff]  ;;  %v4819_v49 = vld [vmem:[%s18409_s6 + $0xdc0] sm:$0xff] }
 0x66a   :  { %6410 = vmatpush1.msra.mxu0 %v5370_v63  ;;  %9044 = vmatpush3.msra.mxu1 %v4462_v9  ;;  %v5279_v6 = vld [vmem:[%s18409_s6 + $0x1c20] sm:$0xff]  ;;  %v4812_v9 = vld [vmem:[%s18409_s6 + $0xd88] sm:$0xff] }
 0x66b   :  { %6411 = vmatprep.subr.mxu0 %v5364_v40  ;;  %9045 = vmatprep.subr.mxu1 %v4567_v50  ;;  %v4707_v63 = vld [vmem:[%s18409_s6 + $0xa40] sm:$0xff]  ;;  %v5405_v40 = vld [vmem:[%s18409_s6 + $0x2010] sm:$0xff]  ;;  %v4700_v50 = vld [vmem:[%s18409_s6 + $0xa08] sm:$0xff] }
 0x66c   :  { %6412 = vmatpush1.msra.mxu0 %v5363_v17  ;;  %9046 = vmatpush3.msra.mxu1 %v4455_v47  ;;  %v4805_v17 = vld [vmem:[%s18409_s6 + $0xd50] sm:$0xff]  ;;  %v5398_v47 = vld [vmem:[%s18409_s6 + $0x1fd8] sm:$0xff] }
 0x66d   :  { %6413 = vmatprep.subr.mxu0 %v5357_v24  ;;  %9047 = vmatprep.subr.mxu1 %v4560_v19  ;;  %v4693_v24 = vld [vmem:[%s18409_s6 + $0x9d0] sm:$0xff]  ;;  %v5392_v19 = vld [vmem:[%s18409_s6 + $0x1fa8] sm:$0xff] }
 0x66e   :  { %6414 = vmatpush1.msra.mxu0 %v5356_v13  ;;  %9048 = vmatpush3.msra.mxu1 %v4448_v7  ;;  %v4798_v13 = vld [vmem:[%s18409_s6 + $0xd18] sm:$0xff]  ;;  %v5391_v7 = vld [vmem:[%s18409_s6 + $0x1fa0] sm:$0xff] }
 0x66f   :  { %6415 = vmatprep.subr.mxu0 %v5350_v20  ;;  %9049 = vmatprep.subr.mxu1 %v4553_v31  ;;  %v4686_v20 = vld [vmem:[%s18409_s6 + $0x998] sm:$0xff]  ;;  %v4791_v31 = vld [vmem:[%s18409_s6 + $0xce0] sm:$0xff] }
 0x670   :  { %6416 = vmatpush1.msra.mxu0 %v5349_v59  ;;  %9050 = vmatpush3.msra.mxu1 %v4441_v23  ;;  %v5050_v59 = vld [vmem:[%s18409_s6 + $0x14f8] sm:$0xff]  ;;  %v4679_v23 = vld [vmem:[%s18409_s6 + $0x960] sm:$0xff] }
 0x671   :  { %6417 = vmatprep.subr.mxu0 %v5343_v0  ;;  %9051 = vmatprep.subr.mxu1 %v4546_v37  ;;  %v4938_v0 = vld [vmem:[%s18409_s6 + $0x1178] sm:$0xff]  ;;  %v4784_v37 = vld [vmem:[%s18409_s6 + $0xca8] sm:$0xff] }
 0x672   :  { %6418 = vmatpush1.msra.mxu0 %v5342_v35  ;;  %9052 = vmatpush3.msra.mxu1 %v4434_v33  ;;  %v5043_v35 = vld [vmem:[%s18409_s6 + $0x14c0] sm:$0xff]  ;;  %v4672_v33 = vld [vmem:[%s18409_s6 + $0x928] sm:$0xff] }
 0x673   :  { %6419 = vmatprep.subr.mxu0 %v5336_v10  ;;  %9053 = vmatprep.subr.mxu1 %v4539_v39  ;;  %v4931_v10 = vld [vmem:[%s18409_s6 + $0x1140] sm:$0xff]  ;;  %v4777_v39 = vld [vmem:[%s18409_s6 + $0xc70] sm:$0xff] }
 0x674   :  { %6420 = vmatpush1.msra.mxu0 %v5335_v3  ;;  %9054 = vmatpush3.msra.mxu1 %v4427_v55  ;;  %v5036_v3 = vld [vmem:[%s18409_s6 + $0x1488] sm:$0xff]  ;;  %v4665_v55 = vld [vmem:[%s18409_s6 + $0x8f0] sm:$0xff] }
 0x675   :  { %6421 = vmatprep.subr.mxu0 %v5329_v58  ;;  %9055 = vmatprep.subr.mxu1 %v4532_v61  ;;  %v4924_v58 = vld [vmem:[%s18409_s6 + $0x1108] sm:$0xff]  ;;  %v5029_v61 = vld [vmem:[%s18409_s6 + $0x1450] sm:$0xff] }
 0x676   :  { %6422 = vmatpush1.msra.mxu0 %v5328_v29  ;;  %9056 = vmatpush3.msra.mxu1 %v4420_v34  ;;  %v4658_v29 = vld [vmem:[%s18409_s6 + $0x8b8] sm:$0xff]  ;;  %v4917_v34 = vld [vmem:[%s18409_s6 + $0x10d0] sm:$0xff] }
 0x677   :  { %6423 = vmatprep.subr.mxu0 %v5322_v30  ;;  %9057 = vmatprep.subr.mxu1 %v4525_v4  ;;  %v4763_v30 = vld [vmem:[%s18409_s6 + $0xc00] sm:$0xff]  ;;  %v5022_v4 = vld [vmem:[%s18409_s6 + $0x1418] sm:$0xff] }
 0x678   :  { %6424 = vmatpush1.msra.mxu0 %v5321_v11  ;;  %9058 = vmatpush3.msra.mxu1 %v4413_v25  ;;  %v4651_v11 = vld [vmem:[%s18409_s6 + $0x880] sm:$0xff]  ;;  %v4910_v25 = vld [vmem:[%s18409_s6 + $0x1098] sm:$0xff] }
 0x679   :  { %6425 = vmatprep.subr.mxu0 %v5315_v38  ;;  %9059 = vmatprep.subr.mxu1 %v4518_v32  ;;  %v4756_v38 = vld [vmem:[%s18409_s6 + $0xbc8] sm:$0xff]  ;;  %v5015_v32 = vld [vmem:[%s18409_s6 + $0x13e0] sm:$0xff] }
 0x67a   :  { %6426 = vmatpush1.msra.mxu0 %v5314_v8  ;;  %9060 = vmatpush3.msra.mxu1 %v4406_v54  ;;  %v4644_v8 = vld [vmem:[%s18409_s6 + $0x848] sm:$0xff]  ;;  %v4903_v54 = vld [vmem:[%s18409_s6 + $0x1060] sm:$0xff] }
 0x67b   :  { %6427 = vmatprep.subr.mxu0 %v5308_v41  ;;  %9061 = vmatprep.subr.mxu1 %v4511_v44  ;;  %v4749_v41 = vld [vmem:[%s18409_s6 + $0xb90] sm:$0xff]  ;;  %v5008_v44 = vld [vmem:[%s18409_s6 + $0x13a8] sm:$0xff] }
 0x67c   :  { %6428 = vmatpush1.msra.mxu0 %v5307_v48  ;;  %9062 = vmatpush3.msra.mxu1 %v4399_v1  ;;  %v16931_v48 = vpop.f32.mrf.mxu0  ;;  %v4637_v1 = vld [vmem:[%s18409_s6 + $0x810] sm:$0xff] }
 0x67d   :  { %6429 = vmatprep.subr.mxu0 %v5301_v22  ;;  %9063 = vmatprep.subr.mxu1 %v4504_v60  ;;  %v4896_v22 = vld [vmem:[%s18409_s6 + $0x1028] sm:$0xff]  ;;  %v4742_v60 = vld [vmem:[%s18409_s6 + $0xb58] sm:$0xff] }
 0x67e   :  { %6430 = vmatpush1.msra.mxu0 %v5300_v2  ;;  %9064 = vmatpush3.msra.mxu1 %v4392_v12  ;;  %v5001_v2 = vld [vmem:[%s18409_s6 + $0x1370] sm:$0xff]  ;;  %v4630_v12 = vld [vmem:[%s18409_s6 + $0x7d8] sm:$0xff] }
 0x67f   :  { %6431 = vmatprep.subr.mxu0 %v5294_v14  ;;  %9065 = vmatprep.subr.mxu1 %v4497_v28  ;;  %v4889_v14 = vld [vmem:[%s18409_s6 + $0xff0] sm:$0xff]  ;;  %v4735_v28 = vld [vmem:[%s18409_s6 + $0xb20] sm:$0xff] }
 0x680   :  { %6432 = vmatpush1.msra.mxu0 %v5293_v18  ;;  %9066 = vmatpush3.msra.mxu1 %v4385_v26  ;;  %v4994_v18 = vld [vmem:[%s18409_s6 + $0x1338] sm:$0xff]  ;;  %v5479_v26 = vpop.f32.mrf.mxu0 }
 0x681   :  { %6433 = vmatprep.subr.mxu0 %v5287_v16  ;;  %6541 = vmatmul.mubr.f32.vlgmr.msra.gmra.mxu1 %v14422_v45  ;;  %v5406_v45 = vld [vmem:[%s18409_s6 + $0x2018] sm:$0xff]  ;;  %v4623_v16 = vld [vmem:[%s18409_s6 + $0x7a0] sm:$0xff] }
 0x682   :  { %9070 = vmatprep.subr.mxu1 %v4826_v36  ;;  %6434 = vmatpush1.msra.mxu0 %v5286_v62  ;;  %v4882_v36 = vld [vmem:[%s18409_s6 + $0xfb8] sm:$0xff]  ;;  %v16963_v62 = vpop.f32.mrf.mxu1 }
 0x683   :  { %9071 = vmatpush3.msra.mxu1 %v4714_v53  ;;  %6610 = vmatprep.mubr.f32.mxu1 %v14389_v27  ;;  %v5399_v27 = vld [vmem:[%s18409_s6 + $0x1fe0] sm:$0xff]  ;;  %v4728_v53 = vld [vmem:[%s18409_s6 + $0xae8] sm:$0xff] }
 0x684   :  { %6435 = vmatprep.subr.mxu0 %v5280_v43  ;;  %9072 = vmatprep.subr.mxu1 %v4819_v49  ;;  %v4987_v43 = vld [vmem:[%s18409_s6 + $0x1300] sm:$0xff]  ;;  %v16971_v49 = vpop.f32.mrf.mxu0 }
 0x685   :  { %6436 = vmatpush1.msra.mxu0 %v5279_v6  ;;  %9073 = vmatpush3.msra.mxu1 %v4707_v63  ;;  %v4616_v6 = vld [vmem:[%s18409_s6 + $0x768] sm:$0xff]  ;;  %v4875_v63 = vld [vmem:[%s18409_s6 + $0xf80] sm:$0xff] }
 0x686   :  { %6463 = vmatprep.subr.mxu0 %v5406_v45  ;;  %9074 = vmatprep.subr.mxu1 %v4812_v9  ;;  %v4721_v45 = vld [vmem:[%s18409_s6 + $0xab0] sm:$0xff]  ;;  %v4980_v9 = vld [vmem:[%s18409_s6 + $0x12c8] sm:$0xff] }
 0x687   :  { %6464 = vmatpush2.msra.mxu0 %v5405_v40  ;;  %9075 = vmatpush3.msra.mxu1 %v4700_v50  ;;  %v4609_v40 = vld [vmem:[%s18409_s6 + $0x730] sm:$0xff]  ;;  %v4868_v50 = vld [vmem:[%s18409_s6 + $0xf48] sm:$0xff] }
 0x688   :  { %6465 = vmatprep.subr.mxu0 %v5399_v27  ;;  %9076 = vmatprep.subr.mxu1 %v4805_v17  ;;  %v5550_v27 = vpop.f32.mrf.mxu1  ;;  %v4973_v17 = vld [vmem:[%s18409_s6 + $0x1290] sm:$0xff] }
 0x689   :  { %6466 = vmatpush2.msra.mxu0 %v5398_v47  ;;  %9077 = vmatpush3.msra.mxu1 %v4693_v24  ;;  %v5621_v47 = vpop.f32.mrf.mxu0  ;;  %v5274_v24 = vld [vmem:[%s18409_s6 + $0x1bf8] sm:$0xff] }
 0x68a   :  { %6467 = vmatprep.subr.mxu0 %v5392_v19  ;;  %9078 = vmatprep.subr.mxu1 %v4798_v13  ;;  %v4861_v19 = vld [vmem:[%s18409_s6 + $0xf10] sm:$0xff]  ;;  %v5551_v13 = vadd.f32 %v5550_v27, %v5479_v26  ;;  %v5358_v27 = vld [vmem:[%s18409_s6 + $0x1e98] sm:$0xff] }
 0x68b   :  { %6468 = vmatpush2.msra.mxu0 %v5391_v7  ;;  %9079 = vmatpush3.msra.mxu1 %v4686_v20  ;;  %v17000_v7 = vpop.f32.mrf.mxu1  ;;  %v5162_v20 = vld [vmem:[%s18409_s6 + $0x1878] sm:$0xff]  ;;  %v5113_v26 = vld [vmem:[%s18409_s6 + $0x16f0] sm:$0xff] }
 0x68c   :  { %6470 = vmatmul.mubr.f32.vlgmr.msra.gmra.mxu0 %v15064_v46  ;;  %9080 = vmatprep.subr.mxu1 %v4791_v31  ;;  %v17005_v31 = vpop.f32.mrf.mxu0 }
 0x68d   :  { %9105 = vmatprep.subr.mxu0 %v5050_v59  ;;  %9081 = vmatpush3.msra.mxu1 %v4679_v23  ;;  %v4966_v59 = vld [vmem:[%s18409_s6 + $0x1258] sm:$0xff]  ;;  %v5267_v23 = vld [vmem:[%s18409_s6 + $0x1bc0] sm:$0xff] }
 0x68e   :  { %9106 = vmatpush3.msra.mxu0 %v4938_v0  ;;  %6680 = vmatprep.mubr.f32.mxu0 %v14438_v56  ;;  %v4770_v56 = vld [vmem:[%s18409_s6 + $0xc38] sm:$0xff]  ;;  %v5622_v0 = vadd.f32 %v5621_v47, %v5551_v13  ;;  %v5204_v47 = vld [vmem:[%s18409_s6 + $0x19c8] sm:$0xff]  ;;  %v5351_v13 = vld [vmem:[%s18409_s6 + $0x1e60] sm:$0xff] }
 0x68f   :  { %9082 = vmatprep.subr.mxu1 %v4784_v37  ;;  %9107 = vmatprep.subr.mxu0 %v5043_v35  ;;  %v4854_v37 = vld [vmem:[%s18409_s6 + $0xed8] sm:$0xff]  ;;  %v4959_v35 = vld [vmem:[%s18409_s6 + $0x1220] sm:$0xff] }
 0x690   :  { %9083 = vmatpush3.msra.mxu1 %v4672_v33  ;;  %9108 = vmatpush3.msra.mxu0 %v4931_v10  ;;  %v5260_v33 = vld [vmem:[%s18409_s6 + $0x1b88] sm:$0xff]  ;;  %v5692_v10 = vpop.f32.mrf.mxu1 }
 0x691   :  { %9084 = vmatprep.subr.mxu1 %v4777_v39  ;;  %9109 = vmatprep.subr.mxu0 %v5036_v3  ;;  %v4847_v39 = vld [vmem:[%s18409_s6 + $0xea0] sm:$0xff]  ;;  %v5148_v3 = vld [vmem:[%s18409_s6 + $0x1808] sm:$0xff] }
 0x692   :  { %9085 = vmatpush3.msra.mxu1 %v4665_v55  ;;  %9110 = vmatpush3.msra.mxu0 %v4924_v58  ;;  %v4952_v55 = vld [vmem:[%s18409_s6 + $0x11e8] sm:$0xff]  ;;  %v5253_v58 = vld [vmem:[%s18409_s6 + $0x1b50] sm:$0xff] }
 0x693   :  { %9086 = vmatprep.subr.mxu1 %v4770_v56  ;;  %9111 = vmatprep.subr.mxu0 %v5029_v61  ;;  %v5693_v56 = vadd.f32 %v5692_v10, %v5622_v0  ;;  %v17039_v61 = vpop.f32.mrf.mxu1  ;;  %v5337_v10 = vld [vmem:[%s18409_s6 + $0x1df0] sm:$0xff] }
 0x694   :  { %9087 = vmatpush3.msra.mxu1 %v4658_v29  ;;  %9112 = vmatpush3.msra.mxu0 %v4917_v34  ;;  %v4840_v29 = vld [vmem:[%s18409_s6 + $0xe68] sm:$0xff]  ;;  %v5141_v34 = vld [vmem:[%s18409_s6 + $0x17d0] sm:$0xff] }
 0x695   :  { %9088 = vmatprep.subr.mxu1 %v4763_v30  ;;  %9113 = vmatprep.subr.mxu0 %v5022_v4  ;;  %v4945_v30 = vld [vmem:[%s18409_s6 + $0x11b0] sm:$0xff]  ;;  %v5246_v4 = vld [vmem:[%s18409_s6 + $0x1b18] sm:$0xff] }
 0x696   :  { %9089 = vmatpush3.msra.mxu1 %v4651_v11  ;;  %9114 = vmatpush3.msra.mxu0 %v4910_v25 }
 0x697   :  { %9090 = vmatprep.subr.mxu1 %v4756_v38  ;;  %9115 = vmatprep.subr.mxu0 %v5015_v32  ;;  %v4833_v38 = vld [vmem:[%s18409_s6 + $0xe30] sm:$0xff]  ;;  %v5134_v32 = vld [vmem:[%s18409_s6 + $0x1798] sm:$0xff] }
 0x698   :  { %9091 = vmatpush3.msra.mxu1 %v4644_v8  ;;  %9116 = vmatpush3.msra.mxu0 %v4903_v54  ;;  %v5239_v8 = vld [vmem:[%s18409_s6 + $0x1ae0] sm:$0xff]  ;;  %v5834_v54 = vpop.f32.mrf.mxu1 }
 0x699   :  { %9092 = vmatprep.subr.mxu1 %v4749_v41  ;;  %9117 = vmatprep.subr.mxu0 %v5008_v44  ;;  %v5127_v41 = vld [vmem:[%s18409_s6 + $0x1760] sm:$0xff]  ;;  %v5386_v44 = vld [vmem:[%s18409_s6 + $0x1f78] sm:$0xff] }
 0x69a   :  { %9093 = vmatpush3.msra.mxu1 %v4637_v1  ;;  %9118 = vmatpush3.msra.mxu0 %v4896_v22 }
 0x69b   :  { %9094 = vmatprep.subr.mxu1 %v4742_v60  ;;  %9119 = vmatprep.subr.mxu0 %v5001_v2  ;;  %v17074_v60 = vpop.f32.mrf.mxu1  ;;  %v5232_v2 = vld [vmem:[%s18409_s6 + $0x1aa8] sm:$0xff] }
 0x69c   :  { %9095 = vmatpush3.msra.mxu1 %v4630_v12  ;;  %9120 = vmatpush3.msra.mxu0 %v4889_v14  ;;  %v5120_v12 = vld [vmem:[%s18409_s6 + $0x1728] sm:$0xff]  ;;  %v5379_v14 = vld [vmem:[%s18409_s6 + $0x1f40] sm:$0xff] }
 0x69d   :  { %9096 = vmatprep.subr.mxu1 %v4735_v28  ;;  %9121 = vmatprep.subr.mxu0 %v4994_v18 }
 0x69e   :  { %9097 = vmatpush3.msra.mxu1 %v4623_v16  ;;  %9122 = vmatpush3.msra.mxu0 %v4882_v36  ;;  %v5372_v16 = vld [vmem:[%s18409_s6 + $0x1f08] sm:$0xff]  ;;  %v5976_v36 = vpop.f32.mrf.mxu1 }
 0x69f   :  { %9098 = vmatprep.subr.mxu1 %v4728_v53  ;;  %9123 = vmatprep.subr.mxu0 %v4987_v43  ;;  %v5106_v43 = vld [vmem:[%s18409_s6 + $0x16b8] sm:$0xff] }
 0x6a0   :  { %9099 = vmatpush3.msra.mxu1 %v4616_v6  ;;  %9124 = vmatpush3.msra.mxu0 %v4875_v63  ;;  %v5365_v6 = vld [vmem:[%s18409_s6 + $0x1ed0] sm:$0xff] }
 0x6a1   :  { %9100 = vmatprep.subr.mxu1 %v4721_v45  ;;  %9125 = vmatprep.subr.mxu0 %v4980_v9  ;;  %v5211_v45 = vld [vmem:[%s18409_s6 + $0x1a00] sm:$0xff] }
 0x6a2   :  { %9101 = vmatpush3.msra.mxu1 %v4609_v40  ;;  %9126 = vmatpush3.msra.mxu0 %v4868_v50  ;;  %v5099_v50 = vld [vmem:[%s18409_s6 + $0x1680] sm:$0xff] }
 0x6a3   :  { %6611 = vmatmul.mubr.f32.vlgmr.msra.gmra.mxu1 %v14394_v15  ;;  %9127 = vmatprep.subr.mxu0 %v4973_v17  ;;  %v5155_v15 = vld [vmem:[%s18409_s6 + $0x1840] sm:$0xff]  ;;  %v17121_v17 = vpop.f32.mrf.mxu1 }
 0x6a4   :  { %9140 = vmatprep.subr.mxu1 %v5274_v24  ;;  %9128 = vmatpush3.msra.mxu0 %v4861_v19  ;;  %v5092_v19 = vld [vmem:[%s18409_s6 + $0x1648] sm:$0xff] }
 0x6a5   :  { %9141 = vmatpush3.msra.mxu1 %v5162_v20  ;;  %6750 = vmatprep.mubr.f32.mxu1 %v14411_v21  ;;  %v5763_v21 = vpop.f32.mrf.mxu0  ;;  %v5197_v20 = vld [vmem:[%s18409_s6 + $0x1990] sm:$0xff] }
 0x6a6   :  { %9129 = vmatprep.subr.mxu0 %v4966_v59  ;;  %9142 = vmatprep.subr.mxu1 %v5267_v23  ;;  %v17053_v11 = vadd.f32 %v5763_v21, %v5693_v56  ;;  %v5085_v59 = vld [vmem:[%s18409_s6 + $0x1610] sm:$0xff]  ;;  %v5344_v23 = vld [vmem:[%s18409_s6 + $0x1e28] sm:$0xff]  ;;  %v5330_v21 = vld [vmem:[%s18409_s6 + $0x1db8] sm:$0xff] }
 0x6a7   :  { %9130 = vmatpush3.msra.mxu0 %v4854_v37  ;;  %9143 = vmatpush3.msra.mxu1 %v5155_v15  ;;  %v17055_v25 = vpop.f32.mrf.mxu0  ;;  %v6118_v37 = vpop.f32.mrf.mxu1  ;;  %v5190_v15 = vld [vmem:[%s18409_s6 + $0x1958] sm:$0xff] }
 0x6a8   :  { %9131 = vmatprep.subr.mxu0 %v4959_v35  ;;  %9144 = vmatprep.subr.mxu1 %v5260_v33  ;;  %v6947_v1 = vsel %vm2653_vm1, %v17053_v11, 0.0  ;;  %v5078_v33 = vld [vmem:[%s18409_s6 + $0x15d8] sm:$0xff] }
 0x6a9   :  { %9132 = vmatpush3.msra.mxu0 %v4847_v39  ;;  %9145 = vmatpush3.msra.mxu1 %v5148_v3  ;;  %v5905_v22 = vpop.f32.mrf.mxu0  ;;  %v6948_v18 = vrot.slane %v6947_v1, 4  ;;  %v5183_v39 = vld [vmem:[%s18409_s6 + $0x1920] sm:$0xff] }
 0x6aa   :  { %9133 = vmatprep.subr.mxu0 %v4952_v55  ;;  %9146 = vmatprep.subr.mxu1 %v5253_v58  ;;  %v5906_v53 = vadd.f32 %v5905_v22, %v5834_v54  ;;  %v5071_v3 = vld [vmem:[%s18409_s6 + $0x15a0] sm:$0xff]  ;;  %v5176_v58 = vld [vmem:[%s18409_s6 + $0x18e8] sm:$0xff]  ;;  %v17209_v22 = vld [vmem:[%s18411_s8 + $0xf0] sm:$0xff] }
 0x6ab   :  { %9134 = vmatpush3.msra.mxu0 %v4840_v29  ;;  %9147 = vmatpush3.msra.mxu1 %v5141_v34  ;;  %v17087_v28 = vpop.f32.mrf.mxu0  ;;  %v6949_v9 = vadd.f32 %v6948_v18, %v6947_v1  ;;  %v5064_v29 = vld [vmem:[%s18409_s6 + $0x1568] sm:$0xff]  ;;  %v5323_v34 = vld [vmem:[%s18409_s6 + $0x1d80] sm:$0xff] }
 0x6ac   :  { %9135 = vmatprep.subr.mxu0 %v4945_v30  ;;  %9148 = vmatprep.subr.mxu1 %v5246_v4  ;;  %v5977_v40 = vadd.f32 %v5976_v36, %v5906_v53  ;;  %v5169_v30 = vld [vmem:[%s18409_s6 + $0x18b0] sm:$0xff]  ;;  %v17235_v18 = vld [vmem:[%s18411_s8 + $0x68] sm:$0xff]  ;;  %v17254_v36 = vld [vmem:[%s18411_s8 + $0x60] sm:$0xff] }
 0x6ad   :  { %9136 = vmatpush3.msra.mxu0 %v4833_v38  ;;  %9149 = vmatpush3.msra.mxu1 %v5134_v32  ;;  %v6047_v63 = vpop.f32.mrf.mxu0  ;;  %v6950_v0 = vrot.slane %v6949_v9, 2  ;;  %v5057_v4 = vld [vmem:[%s18409_s6 + $0x1530] sm:$0xff]  ;;  %v5316_v38 = vld [vmem:[%s18409_s6 + $0x1d48] sm:$0xff]  ;;  %18715 = vst [vmem:[#allocation15_spill] sm:$0xff] %v17254_v36 }
 0x6ae   :  { %6681 = vmatmul.mubr.f32.vlgmr.msra.gmra.mxu0 %v14824_v52  ;;  %9150 = vmatprep.subr.mxu1 %v5239_v8  ;;  %v5225_v52 = vld [vmem:[%s18409_s6 + $0x1a70] sm:$0xff]  ;;  %v6048_v24 = vadd.f32 %v6047_v63, %v5977_v40  ;;  %v5549_v8 = vadd.f32 %v16963_v62, %v16931_v48  ;;  %v17202_v48 = vld [vmem:[%s18411_s8 + $0x78] sm:$0xff] }
 0x6af   :  { %6756 = vmatprep.subr.mxu0 %v18574_v42  ;;  %9151 = vmatpush3.msra.mxu1 %v5127_v41  ;;  %v6951_v55 = vadd.f32 %v6950_v0, %v6949_v9  ;;  %v17193_v41 = vld [vmem:[%s18411_s8 + $0xf8] sm:$0xff]  ;;  %v5281_v53 = vld [vmem:[%s18409_s6 + $0x1c30] sm:$0xff] }
 0x6b0   :  { %6757 = vmatpush1.msra.mxu0 %v5386_v44  ;;  %8742 = vmatprep.mubr.msk.f32.mxu0 %vm2805_vm3, %v14835_v5  ;;  %v5218_v5 = vld [vmem:[%s18409_s6 + $0x1a38] sm:$0xff]  ;;  %v17146_v35 = vadd.f32 %v6118_v37, %v6048_v24  ;;  %v5309_v44 = vld [vmem:[%s18409_s6 + $0x1d10] sm:$0xff]  ;;  %v5620_v1 = vadd.f32 %v16971_v49, %v5549_v8 }
 0x6b1   :  { %9152 = vmatprep.subr.mxu1 %v5232_v2  ;;  %6758 = vmatprep.subr.mxu0 %v18574_v42  ;;  %v6952_v32 = vrot.slane %v6951_v55, 1  ;;  %v5302_v49 = vld [vmem:[%s18409_s6 + $0x1cd8] sm:$0xff]  ;;  %v17218_v2 = vld [vmem:[%s18411_s8 + $0x70] sm:$0xff] }
 0x6b2   :  { %9153 = vmatpush3.msra.mxu1 %v5120_v12  ;;  %6759 = vmatpush1.msra.mxu0 %v5379_v14  ;;  %18713 = vst [vmem:[#allocation13_spill] sm:$0xff] %v17146_v35  ;;  %v6961_v56 = vsel %vm2653_vm1, %v17146_v35, 0.0  ;;  %v17224_v12 = vld [vmem:[%s18411_s8 + $0xe8] sm:$0xff]  ;;  %v5691_v14 = vadd.f32 %v17000_v7, %v5620_v1  ;;  %v17241_v7 = vld [vmem:[%s18411_s8 + $0xe0] sm:$0xff]  ;;  %v17288_v9 = vld [vmem:[%s18411_s8 + $0x50] sm:$0xff] }
 0x6b3   :  { %9154 = vmatprep.subr.mxu1 %v5225_v52  ;;  %6760 = vmatprep.subr.mxu0 %v18574_v42  ;;  %v6962_v54 = vrot.slane %v6961_v56, 4  ;;  %v6953_v62 = vadd.f32 %v6952_v32, %v6951_v55  ;;  %v5295_v52 = vld [vmem:[%s18409_s6 + $0x1ca0] sm:$0xff]  ;;  %18714 = vst [vmem:[#allocation14_spill] sm:$0xff] %v17241_v7  ;;  %18719 = vst [vmem:[#allocation20_spill] sm:$0xff] %v17288_v9  ;;  %v17336_v0 = vld [vmem:[%s18411_s8 + $0x1f8] sm:$0xff] }
 0x6b4   :  { %9155 = vmatpush3.msra.mxu1 %v5113_v26  ;;  %6761 = vmatpush1.msra.mxu0 %v5372_v16  ;;  %v17244_v26 = vadd.f32 %v17005_v31, %v5691_v14  ;;  %v5288_v16 = vld [vmem:[%s18409_s6 + $0x1c68] sm:$0xff]  ;;  %v17260_v31 = vld [vmem:[%s18411_s8 + $0xd8] sm:$0xff]  ;;  %v17467_v14 = vld [vmem:[%s18411_s8 + $0x10] sm:$0xff] }
 0x6b5   :  { %9156 = vmatprep.subr.mxu1 %v5218_v5  ;;  %6762 = vmatprep.subr.mxu0 %v18574_v42  ;;  %18716 = vst [vmem:[#allocation16_spill] sm:$0xff] %v17260_v31  ;;  %v17341_v37 = vld [vmem:[%s18411_s8 + $0x38] sm:$0xff]  ;;  %v17383_v55 = vld [vmem:[%s18411_s8 + $0x1e8] sm:$0xff]  ;;  %18735 = vst [vmem:[#allocation53_spill] sm:$0xff] %v17467_v14 }
 0x6b6   :  { %9157 = vmatpush3.msra.mxu1 %v5106_v43  ;;  %6763 = vmatpush1.msra.mxu0 %v5365_v6  ;;  %v17270_v43 = vld [vmem:[%s18411_s8 + $0x58] sm:$0xff]  ;;  %v17276_v6 = vld [vmem:[%s18411_s8 + $0xd0] sm:$0xff]  ;;  %v6940_v63 = vsel %vm2653_vm1, %v17244_v26, 0.0  ;;  %18725 = vst [vmem:[#allocation33_spill] sm:$0xff] %v17341_v37 }
 0x6b7   :  { %9158 = vmatprep.subr.mxu1 %v5211_v45  ;;  %6764 = vmatprep.subr.mxu0 %v18574_v42  ;;  %18717 = vst [vmem:[#allocation18_spill] sm:$0xff] %v17270_v43  ;;  %18718 = vst [vmem:[#allocation19_spill] sm:$0xff] %v17276_v6  ;;  %v5407_v45 = vld [vmem:[%s18409_s6 + $0x2020] sm:$0xff]  ;;  %v6941_v24 = vrot.slane %v6940_v63, 4  ;;  %v17429_v32 = vld [vmem:[%s18411_s8 + $0x98] sm:$0xff] }
 0x6b8   :  { %9159 = vmatpush3.msra.mxu1 %v5099_v50  ;;  %6765 = vmatpush1.msra.mxu0 %v5358_v27  ;;  %v17294_v50 = vld [vmem:[%s18411_s8 + $0xc8] sm:$0xff]  ;;  %18732 = vst [vmem:[#allocation47_spill] sm:$0xff] %v17429_v32  ;;  %v17434_v8 = vld [vmem:[%s18411_s8 + $0x1d8] sm:$0xff] }
 0x6b9   :  { %9160 = vmatprep.subr.mxu1 %v5204_v47  ;;  %6766 = vmatprep.subr.mxu0 %v18574_v42  ;;  %18720 = vst [vmem:[#allocation21_spill] sm:$0xff] %v17294_v50  ;;  %v5400_v27 = vld [vmem:[%s18409_s6 + $0x1fe8] sm:$0xff]  ;;  %v17446_v1 = vld [vmem:[%s18411_s8 + $0x158] sm:$0xff] }
 0x6ba   :  { %9161 = vmatpush3.msra.mxu1 %v5092_v19  ;;  %6767 = vmatpush1.msra.mxu0 %v5351_v13  ;;  %v17304_v47 = vld [vmem:[%s18411_s8 + $0x48] sm:$0xff]  ;;  %v17310_v19 = vld [vmem:[%s18411_s8 + $0xc0] sm:$0xff]  ;;  %v5904_v13 = vadd.f32 %v17055_v25, %v17039_v61  ;;  %v17328_v61 = vld [vmem:[%s18411_s8 + $0xb8] sm:$0xff] }
 0x6bb   :  { %9162 = vmatprep.subr.mxu1 %v5197_v20  ;;  %6768 = vmatprep.subr.mxu0 %v18574_v42  ;;  %18721 = vst [vmem:[#allocation22_spill] sm:$0xff] %v17304_v47  ;;  %18722 = vst [vmem:[#allocation25_spill] sm:$0xff] %v17310_v19  ;;  %v5393_v20 = vld [vmem:[%s18409_s6 + $0x1fb0] sm:$0xff] }
 0x6bc   :  { %9163 = vmatpush3.msra.mxu1 %v5085_v59  ;;  %6769 = vmatpush1.msra.mxu0 %v5344_v23  ;;  %v17322_v59 = vld [vmem:[%s18411_s8 + $0x40] sm:$0xff]  ;;  %18724 = vst [vmem:[#allocation30_spill] sm:$0xff] %v17328_v61  ;;  %v5975_v25 = vadd.f32 %v17074_v60, %v5904_v13  ;;  %v17347_v60 = vld [vmem:[%s18411_s8 + $0x178] sm:$0xff] }
 0x6bd   :  { %9164 = vmatprep.subr.mxu1 %v5190_v15  ;;  %6770 = vmatprep.subr.mxu0 %v18574_v42  ;;  %18723 = vst [vmem:[#allocation28_spill] sm:$0xff] %v17322_v59  ;;  %v6942_v15 = vadd.f32 %v6941_v24, %v6940_v63  ;;  %v17491_v63 = vld [vmem:[%s18411_s8 + $0x8] sm:$0xff]  ;;  %v17508_v24 = vld [vmem:[%s18411_s8 + $0x1c0] sm:$0xff] }
 0x6be   :  { %9165 = vmatpush3.msra.mxu1 %v5078_v33  ;;  %6771 = vmatpush1.msra.mxu0 %v5337_v10  ;;  %v6046_v33 = vadd.f32 %v17087_v28, %v5975_v25  ;;  %v17372_v28 = vld [vmem:[%s18411_s8 + $0x170] sm:$0xff]  ;;  %18737 = vst [vmem:[#allocation57_spill] sm:$0xff] %v17491_v63  ;;  %v17515_v13 = vld [vmem:[%s18411_s8] sm:$0xff] }
 0x6bf   :  { %9166 = vmatprep.subr.mxu1 %v5183_v39  ;;  %6772 = vmatprep.subr.mxu0 %v18574_v42  ;;  %v17355_v39 = vld [vmem:[%s18411_s8 + $0xb0] sm:$0xff]  ;;  %18739 = vst [vmem:[#allocation23_spill] sm:$0xff] %v17515_v13 }
 0x6c0   :  { %9167 = vmatpush3.msra.mxu1 %v5071_v3  ;;  %6773 = vmatpush1.msra.mxu0 %v5330_v21  ;;  %18726 = vst [vmem:[#allocation35_spill] sm:$0xff] %v17355_v39  ;;  %v17360_v3 = vld [vmem:[%s18411_s8 + $0x1f0] sm:$0xff]  ;;  %v17378_v21 = vld [vmem:[%s18411_s8 + $0xa8] sm:$0xff] }
 0x6c1   :  { %9168 = vmatprep.subr.mxu1 %v5176_v58  ;;  %6774 = vmatprep.subr.mxu0 %v18574_v42  ;;  %18728 = vst [vmem:[#allocation39_spill] sm:$0xff] %v17378_v21  ;;  %v6943_v58 = vrot.slane %v6942_v15, 2 }
 0x6c2   :  { %9169 = vmatpush3.msra.mxu1 %v5064_v29  ;;  %6775 = vmatpush1.msra.mxu0 %v5323_v34  ;;  %v17395_v29 = vld [vmem:[%s18411_s8 + $0x168] sm:$0xff]  ;;  %v17398_v34 = vadd.f32 %v17121_v17, %v6046_v33  ;;  %v17417_v17 = vld [vmem:[%s18411_s8 + $0x20] sm:$0xff]  ;;  %v17534_v33 = vld [vmem:[%s18411_s8 + $0x138] sm:$0xff] }
 0x6c3   :  { %9170 = vmatprep.subr.mxu1 %v5169_v30  ;;  %6776 = vmatprep.subr.mxu0 %v18574_v42  ;;  %v17405_v30 = vld [vmem:[%s18411_s8 + $0xa0] sm:$0xff]  ;;  %18731 = vst [vmem:[#allocation45_spill] sm:$0xff] %v17417_v17 }
 0x6c4   :  { %9171 = vmatpush3.msra.mxu1 %v5057_v4  ;;  %6777 = vmatpush1.msra.mxu0 %v5316_v38  ;;  %18730 = vst [vmem:[#allocation43_spill] sm:$0xff] %v17405_v30  ;;  %v17410_v4 = vld [vmem:[%s18411_s8 + $0x1e0] sm:$0xff] }
 0x6c5   :  { %6751 = vmatmul.mubr.f32.vlgmr.msra.gmra.mxu1 %v14794_v57  ;;  %6778 = vmatprep.subr.mxu0 %v18574_v42  ;;  %v6963_v57 = vadd.f32 %v6962_v54, %v6961_v56  ;;  %v17390_v56 = vld [vmem:[%s18411_s8 + $0x28] sm:$0xff]  ;;  %v17422_v38 = vld [vmem:[%s18411_s8 + $0x160] sm:$0xff]  ;;  %v6944_v54 = vadd.f32 %v6943_v58, %v6942_v15  ;;  %v17546_v58 = vld [vmem:[%s18411_s8 + $0x1b0] sm:$0xff] }
 0x6c6   :  { %9175 = vmatprep.subr.mxu1 %v17193_v41  ;;  %6779 = vmatpush1.msra.mxu0 %v5309_v44  ;;  %18729 = vst [vmem:[#allocation41_spill] sm:$0xff] %v17390_v56  ;;  %v17441_v44 = vld [vmem:[%s18411_s8 + $0x18] sm:$0xff] }
 0x6c7   :  { %9176 = vmatpush3.msra.mxu1 %v17202_v48  ;;  %7113 = vmatprep.mubr.f32.mxu1 %v6953_v62  ;;  %v6964_v5 = vrot.slane %v6963_v57, 2  ;;  %18733 = vst [vmem:[#allocation49_spill] sm:$0xff] %v17441_v44  ;;  %v6954_v62 = vsel %vm2653_vm1, %v17398_v34, 0.0 }
 0x6c8   :  { %6780 = vmatprep.subr.mxu0 %v18574_v42  ;;  %9177 = vmatprep.subr.mxu1 %v17209_v22 }
 0x6c9   :  { %6781 = vmatpush1.msra.mxu0 %v5302_v49  ;;  %9178 = vmatpush3.msra.mxu1 %v17218_v2  ;;  %v6965_v40 = vadd.f32 %v6964_v5, %v6963_v57  ;;  %v17455_v49 = vld [vmem:[%s18411_s8 + $0x90] sm:$0xff]  ;;  %v17484_v5 = vld [vmem:[%s18411_s8 + $0x1c8] sm:$0xff] }
 0x6ca   :  { %6782 = vmatprep.subr.mxu0 %v18574_v42  ;;  %9179 = vmatprep.subr.mxu1 %v17224_v12  ;;  %18734 = vst [vmem:[#allocation51_spill] sm:$0xff] %v17455_v49  ;;  %v17460_v57 = vld [vmem:[%s18411_s8 + $0x1d0] sm:$0xff] }
 0x6cb   :  { %6783 = vmatpush1.msra.mxu0 %v5295_v52  ;;  %9180 = vmatpush3.msra.mxu1 %v17235_v18  ;;  %v6966_v23 = vrot.slane %v6965_v40, 1  ;;  %v17472_v52 = vld [vmem:[%s18411_s8 + $0x150] sm:$0xff] }
 0x6cc   :  { %6784 = vmatprep.subr.mxu0 %v18574_v42  ;;  %9181 = vmatprep.subr.mxu1 %v17241_v7 }
 0x6cd   :  { %6785 = vmatpush1.msra.mxu0 %v5288_v16  ;;  %9182 = vmatpush3.msra.mxu1 %v17254_v36  ;;  %v6967_v10 = vadd.f32 %v6966_v23, %v6965_v40  ;;  %v17479_v16 = vld [vmem:[%s18411_s8 + $0x88] sm:$0xff]  ;;  %v6945_v40 = vrot.slane %v6944_v54, 1  ;;  %v17527_v23 = vld [vmem:[%s18411_s8 + $0x1b8] sm:$0xff] }
 0x6ce   :  { %6786 = vmatprep.subr.mxu0 %v18574_v42  ;;  %9183 = vmatprep.subr.mxu1 %v17260_v31  ;;  %18736 = vst [vmem:[#allocation55_spill] sm:$0xff] %v17479_v16 }
 0x6cf   :  { %6787 = vmatpush1.msra.mxu0 %v5281_v53  ;;  %9184 = vmatpush3.msra.mxu1 %v17270_v43  ;;  %v6955_v53 = vrot.slane %v6954_v62, 4  ;;  %v6946_v15 = vadd.f32 %v6945_v40, %v6944_v54  ;;  %v17551_v54 = vld [vmem:[%s18411_s8 + $0x278] sm:$0xff]  ;;  %v17568_v40 = vld [vmem:[%s18411_s8 + $0x1a8] sm:$0xff] }
 0x6d0   :  { %6814 = vmatprep.subr.mxu0 %v18574_v42  ;;  %9185 = vmatprep.subr.mxu1 %v17276_v6  ;;  %18741 = vst [vmem:[#allocation31_spill] sm:$0xff] %v17551_v54 }
 0x6d1   :  { %6815 = vmatpush2.msra.mxu0 %v5407_v45  ;;  %9186 = vmatpush3.msra.mxu1 %v17288_v9  ;;  %v17496_v45 = vld [vmem:[%s18411_s8 + $0x148] sm:$0xff]  ;;  %v6956_v25 = vadd.f32 %v6955_v53, %v6954_v62  ;;  %v17557_v62 = vld [vmem:[%s18411_s8 + $0x130] sm:$0xff] }
 0x6d2   :  { %6816 = vmatprep.subr.mxu0 %v18574_v42  ;;  %9187 = vmatprep.subr.mxu1 %v17294_v50  ;;  %v17562_v53 = vld [vmem:[%s18411_s8 + $0x2f0] sm:$0xff] }
 0x6d3   :  { %6817 = vmatpush2.msra.mxu0 %v5400_v27  ;;  %9188 = vmatpush3.msra.mxu1 %v17304_v47  ;;  %v17503_v27 = vld [vmem:[%s18411_s8 + $0x80] sm:$0xff]  ;;  %18742 = vst [vmem:[#allocation26_spill] sm:$0xff] %v17562_v53  ;;  %v6957_v51 = vrot.slane %v6956_v25, 2 }
 0x6d4   :  { %6818 = vmatprep.subr.mxu0 %v18574_v42  ;;  %9189 = vmatprep.subr.mxu1 %v17310_v19  ;;  %18738 = vst [vmem:[#allocation17_spill] sm:$0xff] %v17503_v27 }
 0x6d5   :  { %6819 = vmatpush2.msra.mxu0 %v5393_v20  ;;  %9190 = vmatpush3.msra.mxu1 %v17322_v59  ;;  %v17520_v20 = vld [vmem:[%s18411_s8 + $0x140] sm:$0xff] }
 0x6d6   :  { %6821 = vmatmul.mubr.f32.vlgmr.msra.gmra.mxu0 %v15064_v46  ;;  %9191 = vmatprep.subr.mxu1 %v17328_v61  ;;  %v17367_v46 = vld [vmem:[%s18411_s8 + $0x30] sm:$0xff] }
 0x6d7   :  { %9210 = vmatprep.subr.mxu0 %v17336_v0  ;;  %9192 = vmatpush3.msra.mxu1 %v17341_v37  ;;  %18727 = vst [vmem:[#allocation37_spill] sm:$0xff] %v17367_v46 }
 0x6d8   :  { %9211 = vmatpush3.msra.mxu0 %v17347_v60  ;;  %7183 = vmatprep.mubr.f32.mxu0 %v6967_v10  ;;  %v17539_v10 = vld [vmem:[%s18411_s8 + $0x2f8] sm:$0xff] }
 0x6d9   :  { %9193 = vmatprep.subr.mxu1 %v17355_v39  ;;  %9212 = vmatprep.subr.mxu0 %v17360_v3  ;;  %18740 = vst [vmem:[#allocation24_spill] sm:$0xff] %v17539_v10 }
 0x6da   :  { %9194 = vmatpush3.msra.mxu1 %v17367_v46  ;;  %9213 = vmatpush3.msra.mxu0 %v17372_v28 }
 0x6db   :  { %9195 = vmatprep.subr.mxu1 %v17378_v21  ;;  %9214 = vmatprep.subr.mxu0 %v17383_v55  ;;  %v17706_v21 = vld [vmem:[%s18411_s8 + $0x2c0] sm:$0xff] }
 0x6dc   :  { %9196 = vmatpush3.msra.mxu1 %v17390_v56  ;;  %9215 = vmatpush3.msra.mxu0 %v17395_v29  ;;  %v17694_v56 = vld [vmem:[%s18411_s8 + $0x248] sm:$0xff]  ;;  %18754 = vst [vmem:[#allocation50_spill] sm:$0xff] %v17706_v21 }
 0x6dd   :  { %9197 = vmatprep.subr.mxu1 %v17405_v30  ;;  %9216 = vmatprep.subr.mxu0 %v17410_v4  ;;  %v17682_v30 = vld [vmem:[%s18411_s8 + $0x2c8] sm:$0xff]  ;;  %18753 = vst [vmem:[#allocation48_spill] sm:$0xff] %v17694_v56 }
 0x6de   :  { %9198 = vmatpush3.msra.mxu1 %v17417_v17  ;;  %9217 = vmatpush3.msra.mxu0 %v17422_v38  ;;  %18752 = vst [vmem:[#allocation46_spill] sm:$0xff] %v17682_v30 }
 0x6df   :  { %9199 = vmatprep.subr.mxu1 %v17429_v32  ;;  %9218 = vmatprep.subr.mxu0 %v17434_v8  ;;  %v17670_v32 = vld [vmem:[%s18411_s8 + $0x250] sm:$0xff] }
 0x6e0   :  { %9200 = vmatpush3.msra.mxu1 %v17441_v44  ;;  %9219 = vmatpush3.msra.mxu0 %v17446_v1  ;;  %v17634_v44 = vld [vmem:[%s18411_s8 + $0x2d8] sm:$0xff]  ;;  %18751 = vst [vmem:[#allocation44_spill] sm:$0xff] %v17670_v32 }
 0x6e1   :  { %9201 = vmatprep.subr.mxu1 %v17455_v49  ;;  %9220 = vmatprep.subr.mxu0 %v17460_v57  ;;  %v6958_v49 = vadd.f32 %v6957_v51, %v6956_v25  ;;  %18748 = vst [vmem:[#allocation38_spill] sm:$0xff] %v17634_v44  ;;  %v17646_v51 = vld [vmem:[%s18411_s8 + $0x258] sm:$0xff]  ;;  %v17652_v25 = vld [vmem:[%s18411_s8 + $0x110] sm:$0xff] }
 0x6e2   :  { %9202 = vmatpush3.msra.mxu1 %v17467_v14  ;;  %9221 = vmatpush3.msra.mxu0 %v17472_v52  ;;  %v17622_v14 = vld [vmem:[%s18411_s8 + $0x260] sm:$0xff]  ;;  %18749 = vst [vmem:[#allocation40_spill] sm:$0xff] %v17646_v51 }
 0x6e3   :  { %9203 = vmatprep.subr.mxu1 %v17479_v16  ;;  %9222 = vmatprep.subr.mxu0 %v17484_v5  ;;  %v17610_v16 = vld [vmem:[%s18411_s8 + $0x2e0] sm:$0xff]  ;;  %18747 = vst [vmem:[#allocation36_spill] sm:$0xff] %v17622_v14  ;;  %v6959_v17 = vrot.slane %v6958_v49, 1 }
 0x6e4   :  { %9204 = vmatpush3.msra.mxu1 %v17491_v63  ;;  %9223 = vmatpush3.msra.mxu0 %v17496_v45  ;;  %v17598_v63 = vld [vmem:[%s18411_s8 + $0x268] sm:$0xff]  ;;  %18746 = vst [vmem:[#allocation34_spill] sm:$0xff] %v17610_v16 }
 0x6e5   :  { %9205 = vmatprep.subr.mxu1 %v17503_v27  ;;  %9224 = vmatprep.subr.mxu0 %v17508_v24  ;;  %v17586_v27 = vld [vmem:[%s18411_s8 + $0x2e8] sm:$0xff]  ;;  %18745 = vst [vmem:[#allocation32_spill] sm:$0xff] %v17598_v63  ;;  %v6960_v46 = vadd.f32 %v6959_v17, %v6958_v49  ;;  %v17733_v17 = vld [vmem:[%s18411_s8 + $0x2b0] sm:$0xff] }
 0x6e6   :  { %9206 = vmatpush3.msra.mxu1 %v17515_v13  ;;  %9225 = vmatpush3.msra.mxu0 %v17520_v20  ;;  %v17580_v13 = vld [vmem:[%s18411_s8 + $0x128] sm:$0xff]  ;;  %18744 = vst [vmem:[#allocation29_spill] sm:$0xff] %v17586_v27  ;;  %18758 = vst [vmem:[#allocation58_spill] sm:$0xff] %v17733_v17  ;;  %v17739_v49 = vld [vmem:[%s18411_s8 + $0x230] sm:$0xff] }
 0x6e7   :  { %7114 = vmatmul.mubr.f32.vlgmr.msra.gmra.mxu1 %v6946_v15  ;;  %9226 = vmatprep.subr.mxu0 %v17527_v23  ;;  %v17574_v15 = vld [vmem:[%s18411_s8 + $0x270] sm:$0xff]  ;;  %18759 = vst [vmem:[#allocation59_spill] sm:$0xff] %v17739_v49 }
 0x6e8   :  { %9227 = vmatpush3.msra.mxu0 %v17534_v33  ;;  %9245 = vmatprep.subr.mxu1 %v17539_v10  ;;  %18743 = vst [vmem:[#allocation27_spill] sm:$0xff] %v17574_v15  ;;  %v17592_v10 = vld [vmem:[%s18411_s8 + $0x1a0] sm:$0xff] }
 0x6e9   :  { %9228 = vmatprep.subr.mxu0 %v17546_v58  ;;  %9246 = vmatpush3.msra.mxu1 %v17551_v54  ;;  %v17604_v54 = vld [vmem:[%s18411_s8 + $0x120] sm:$0xff] }
 0x6ea   :  { %9229 = vmatpush3.msra.mxu0 %v17557_v62  ;;  %9247 = vmatprep.subr.mxu1 %v17562_v53  ;;  %v17616_v53 = vld [vmem:[%s18411_s8 + $0x198] sm:$0xff] }
 0x6eb   :  { %9230 = vmatprep.subr.mxu0 %v17568_v40  ;;  %9248 = vmatpush3.msra.mxu1 %v17574_v15  ;;  %v17628_v15 = vld [vmem:[%s18411_s8 + $0x118] sm:$0xff] }
 0x6ec   :  { %9231 = vmatpush3.msra.mxu0 %v17580_v13  ;;  %9249 = vmatprep.subr.mxu1 %v17586_v27  ;;  %v17640_v27 = vld [vmem:[%s18411_s8 + $0x190] sm:$0xff] }
 0x6ed   :  { %9232 = vmatprep.subr.mxu0 %v17592_v10  ;;  %9250 = vmatpush3.msra.mxu1 %v17598_v63  ;;  %v17658_v63 = vld [vmem:[%s18411_s8 + $0x2d0] sm:$0xff] }
 0x6ee   :  { %9233 = vmatpush3.msra.mxu0 %v17604_v54  ;;  %9251 = vmatprep.subr.mxu1 %v17610_v16  ;;  %18750 = vst [vmem:[#allocation42_spill] sm:$0xff] %v17658_v63  ;;  %v17664_v16 = vld [vmem:[%s18411_s8 + $0x188] sm:$0xff] }
 0x6ef   :  { %9234 = vmatprep.subr.mxu0 %v17616_v53  ;;  %9252 = vmatpush3.msra.mxu1 %v17622_v14  ;;  %v17676_v14 = vld [vmem:[%s18411_s8 + $0x108] sm:$0xff] }
 0x6f0   :  { %9235 = vmatpush3.msra.mxu0 %v17628_v15  ;;  %9253 = vmatprep.subr.mxu1 %v17634_v44  ;;  %v17688_v44 = vld [vmem:[%s18411_s8 + $0x180] sm:$0xff] }
 0x6f1   :  { %9236 = vmatprep.subr.mxu0 %v17640_v27  ;;  %9254 = vmatpush3.msra.mxu1 %v17646_v51  ;;  %v17700_v51 = vld [vmem:[%s18411_s8 + $0x100] sm:$0xff] }
 0x6f2   :  { %9237 = vmatpush3.msra.mxu0 %v17652_v25  ;;  %9255 = vmatprep.subr.mxu1 %v17658_v63  ;;  %v17713_v63 = vld [vmem:[%s18411_s8 + $0x240] sm:$0xff] }
 0x6f3   :  { %9238 = vmatprep.subr.mxu0 %v17664_v16  ;;  %9256 = vmatpush3.msra.mxu1 %v17670_v32  ;;  %18755 = vst [vmem:[#allocation52_spill] sm:$0xff] %v17713_v63  ;;  %v17720_v32 = vld [vmem:[%s18411_s8 + $0x2b8] sm:$0xff] }
 0x6f4   :  { %9239 = vmatpush3.msra.mxu0 %v17676_v14  ;;  %9257 = vmatprep.subr.mxu1 %v17682_v30  ;;  %18756 = vst [vmem:[#allocation54_spill] sm:$0xff] %v17720_v32  ;;  %v17727_v30 = vld [vmem:[%s18411_s8 + $0x238] sm:$0xff] }
 0x6f5   :  { %9240 = vmatprep.subr.mxu0 %v17688_v44  ;;  %9258 = vmatpush3.msra.mxu1 %v17694_v56  ;;  %18757 = vst [vmem:[#allocation56_spill] sm:$0xff] %v17727_v30 }
 0x6f6   :  { %9241 = vmatpush3.msra.mxu0 %v17700_v51  ;;  %9259 = vmatprep.subr.mxu1 %v17706_v21 }
 0x6f7   :  { %7184 = vmatmul.mubr.f32.vlgmr.msra.gmra.mxu0 %v6960_v46  ;;  %9260 = vmatpush3.msra.mxu1 %v17713_v63  ;;  %v17746_v46 = vld [vmem:[%s18411_s8 + $0x2a8] sm:$0xff]  ;;  %v17758_v63 = vld [vmem:[%s18411_s8 + $0x2a0] sm:$0xff] }
 0x6f8   :  { %9261 = vmatprep.subr.mxu1 %v17720_v32  ;;  %9505 = vmatprep.subr.mxu0 %v18574_v42  ;;  %18760 = vst [vmem:[#allocation60_spill] sm:$0xff] %v17746_v46  ;;  %v17752_v32 = vld [vmem:[%s18411_s8 + $0x228] sm:$0xff]  ;;  %18762 = vst [vmem:[#allocation62_spill] sm:$0xff] %v17758_v63 }
 0x6f9   :  { %9262 = vmatpush3.msra.mxu1 %v17727_v30  ;;  %18761 = vst [vmem:[#allocation61_spill] sm:$0xff] %v17752_v32  ;;  %v17764_v30 = vld [vmem:[%s18411_s8 + $0x220] sm:$0xff]  ;;  %9509 = vmatprep.mubr.msk.f32.mxu0 %vm9626_vm6, %v18574_v42 }
 0x6fa   :  { %9263 = vmatprep.subr.mxu1 %v17733_v17  ;;  %18763 = vst [vmem:[#allocation63_spill] sm:$0xff] %v17764_v30  ;;  %v17770_v17 = vld [vmem:[%s18411_s8 + $0x298] sm:$0xff] }
 0x6fb   :  { %9264 = vmatpush3.msra.mxu1 %v17739_v49  ;;  %18764 = vst [vmem:[#allocation64_spill] sm:$0xff] %v17770_v17  ;;  %v17776_v49 = vld [vmem:[%s18411_s8 + $0x218] sm:$0xff] }
 0x6fc   :  { %9265 = vmatprep.subr.mxu1 %v17746_v46  ;;  %18765 = vst [vmem:[#allocation65_spill] sm:$0xff] %v17776_v49  ;;  %v17782_v46 = vld [vmem:[%s18411_s8 + $0x290] sm:$0xff] }
 0x6fd   :  { %9266 = vmatpush3.msra.mxu1 %v17752_v32  ;;  %18766 = vst [vmem:[#allocation66_spill] sm:$0xff] %v17782_v46  ;;  %v17788_v32 = vld [vmem:[%s18411_s8 + $0x210] sm:$0xff] }
 0x6fe   :  { %9267 = vmatprep.subr.mxu1 %v17758_v63  ;;  %18767 = vst [vmem:[#allocation67_spill] sm:$0xff] %v17788_v32  ;;  %v17794_v63 = vld [vmem:[%s18411_s8 + $0x288] sm:$0xff] }
 0x6ff   :  { %9268 = vmatpush3.msra.mxu1 %v17764_v30  ;;  %18768 = vst [vmem:[#allocation68_spill] sm:$0xff] %v17794_v63  ;;  %v17800_v30 = vld [vmem:[%s18411_s8 + $0x208] sm:$0xff] }
 0x700   :  { %9269 = vmatprep.subr.mxu1 %v17770_v17  ;;  %18769 = vst [vmem:[#allocation69_spill] sm:$0xff] %v17800_v30  ;;  %v17806_v17 = vld [vmem:[%s18411_s8 + $0x280] sm:$0xff] }
 0x701   :  { %9270 = vmatpush3.msra.mxu1 %v17776_v49  ;;  %18770 = vst [vmem:[#allocation70_spill] sm:$0xff] %v17806_v17  ;;  %v17812_v49 = vld [vmem:[%s18411_s8 + $0x200] sm:$0xff] }
 0x702   :  { %9271 = vmatprep.subr.mxu1 %v17782_v46  ;;  %18771 = vst [vmem:[#allocation71_spill] sm:$0xff] %v17812_v49  ;;  %v6993_v46 = vmul.f32 %v17146_v35, %v17146_v35 }
 0x703   :  { %9272 = vmatpush3.msra.mxu1 %v17788_v32  ;;  %v17821_v32 = vld [vmem:[%s18411_s8 + $0x308] sm:$0xff] }
 0x704   :  { %9273 = vmatprep.subr.mxu1 %v17794_v63  ;;  %9506 = vmatpush3.msra.mxu0 %v17821_v32  ;;  %v17828_v63 = vld [vmem:[%s18411_s8 + $0x300] sm:$0xff]  ;;  %v7018_v59 = vsel %vm2653_vm1, %v6993_v46, 0.0 }
 0x705   :  { %9274 = vmatpush3.msra.mxu1 %v17800_v30  ;;  %9507 = vmatprep.subr.mxu0 %v18574_v42  ;;  %v7019_v50 = vrot.slane %v7018_v59, 4 }
 0x706   :  { %9275 = vmatprep.subr.mxu1 %v17806_v17  ;;  %9508 = vmatpush3.msra.mxu0 %v17828_v63  ;;  %v6258_v17 = vpop.f32.mrf.mxu1 }
 0x707   :  { %9276 = vmatpush3.msra.mxu1 %v17812_v49  ;;  %9283 = vmatprep.subr.mxu0 %v17193_v41  ;;  %v7020_v7 = vadd.f32 %v7019_v50, %v7018_v59 }
 0x708   :  { %9318 = vmatprep.subr.mxu1 %v17336_v0  ;;  %v6187_v0 = vpop.f32.mrf.mxu0  ;;  %v6260_v56 = vpop.f32.mrf.mxu1 }
 0x709   :  { %v6259_v21 = vadd.f32 %v6258_v17, %v6187_v0 }
 0x70a   :  { %v6189_v49 = vpop.f32.mrf.mxu0 }
 0x70b   :  { %v6261_v37 = vadd.f32 %v6260_v56, %v6189_v49 }
 0x71f   :  { %v6400_v19 = vpop.f32.mrf.mxu1 }
 0x721   :  { %v6402_v6 = vpop.f32.mrf.mxu1 }
 0x724   :  { %v6329_v30 = vpop.f32.mrf.mxu0 }
 0x725   :  { %v6330_v61 = vadd.f32 %v6329_v30, %v6259_v21 }
 0x726   :  { %v6331_v39 = vpop.f32.mrf.mxu0 }
 0x727   :  { %v6332_v47 = vadd.f32 %v6331_v39, %v6261_v37  ;;  %v6401_v9 = vadd.f32 %v6400_v19, %v6330_v61  ;;  %v7021_v39 = vrot.slane %v7020_v7, 2 }
 0x729   :  { %v6403_v31 = vadd.f32 %v6402_v6, %v6332_v47  ;;  %v7022_v46 = vadd.f32 %v7021_v39, %v7020_v7 }
 0x72b   :  { %v7023_v59 = vrot.slane %v7022_v46, 1 }
 0x74c   :  { %v6471_v41 = vpop.f32.mrf.mxu0 }
 0x74d   :  { %v17837_v43 = vadd.f32 %v6471_v41, %v6401_v9 }
 0x74e   :  { %v6473_v36 = vpop.f32.mrf.mxu0 }
 0x74f   :  { %v6968_v17 = vsel %vm2653_vm1, %v17837_v43, 0.0  ;;  %v17841_v0 = vadd.f32 %v6473_v36, %v6403_v31  ;;  %v7024_v36 = vadd.f32 %v7023_v59, %v7022_v46  ;;  %v6992_v31 = vmul.f32 %v17398_v34, %v17398_v34 }
 0x750   :  { %v6969_v56 = vrot.slane %v6968_v17, 4 }
 0x751   :  { %v6975_v21 = vsel %vm2653_vm1, %v17841_v0, 0.0  ;;  %v7011_v7 = vsel %vm2653_vm1, %v6992_v31, 0.0  ;;  %v6995_v59 = vmul.f32 %v17841_v0, %v17841_v0  ;;  %v18774_v31 = vld [vmem:[#allocation16_spill] sm:$0xff] }
 0x752   :  { %v6970_v30 = vadd.f32 %v6969_v56, %v6968_v17  ;;  %v6976_v37 = vrot.slane %v6975_v21, 4 }
 0x754   :  { %v6971_v19 = vrot.slane %v6970_v30, 2  ;;  %v6977_v61 = vadd.f32 %v6976_v37, %v6975_v21 }
 0x756   :  { %v6972_v49 = vadd.f32 %v6971_v19, %v6970_v30  ;;  %v6978_v9 = vrot.slane %v6977_v61, 2 }
 0x758   :  { %v6979_v6 = vadd.f32 %v6978_v9, %v6977_v61  ;;  %v6973_v47 = vrot.slane %v6972_v49, 1 }
 0x75a   :  { %v6980_v50 = vrot.slane %v6979_v6, 1  ;;  %v6974_v35 = vadd.f32 %v6973_v47, %v6972_v49 }
 0x75c   :  { %v6981_v41 = vadd.f32 %v6980_v50, %v6979_v6  ;;  %v6990_v50 = vmul.f32 %v17244_v26, %v17244_v26 }
 0x75e   :  { %7253 = vmatprep.mubr.f32.mxu1 %v6981_v41  ;;  %v18773_v41 = vld [vmem:[#allocation15_spill] sm:$0xff] }
 0x75f   :  { %7254 = vmatmul.mubr.f32.vlgmr.msra.gmra.mxu1 %v6974_v35  ;;  %v7012_v35 = vrot.slane %v7011_v7, 4 }
 0x760   :  { %9319 = vmatpush3.msra.mxu1 %v17347_v60  ;;  %7466 = vmatprep.mubr.f32.mxu1 %v7024_v36  ;;  %v7032_v36 = vsel %vm2653_vm1, %v6995_v59, 0.0  ;;  %v18805_v59 = vld [vmem:[#allocation36_spill] sm:$0xff] }
 0x761   :  { %9320 = vmatprep.subr.mxu1 %v17360_v3  ;;  %v7013_v60 = vadd.f32 %v7012_v35, %v7011_v7  ;;  %v18776_v35 = vld [vmem:[#allocation19_spill] sm:$0xff] }
 0x762   :  { %9321 = vmatpush3.msra.mxu1 %v17372_v28 }
 0x763   :  { %9322 = vmatprep.subr.mxu1 %v17383_v55  ;;  %v7014_v3 = vrot.slane %v7013_v60, 2 }
 0x764   :  { %9323 = vmatpush3.msra.mxu1 %v17395_v29 }
 0x765   :  { %9324 = vmatprep.subr.mxu1 %v17410_v4  ;;  %v7015_v28 = vadd.f32 %v7014_v3, %v7013_v60  ;;  %v9067_v4 = vpop.f32.mrf.mxu1  ;;  %v7033_v60 = vrot.slane %v7032_v36, 4  ;;  %v18777_v3 = vld [vmem:[#allocation20_spill] sm:$0xff] }
 0x766   :  { %9325 = vmatpush3.msra.mxu1 %v17422_v38 }
 0x767   :  { %9326 = vmatprep.subr.mxu1 %v17434_v8  ;;  %v7016_v55 = vrot.slane %v7015_v28, 1  ;;  %v9068_v38 = vpop.f32.mrf.mxu1 }
 0x768   :  { %9327 = vmatpush3.msra.mxu1 %v17446_v1 }
 0x769   :  { %9328 = vmatprep.subr.mxu1 %v17460_v57  ;;  %v7017_v29 = vadd.f32 %v7016_v55, %v7015_v28  ;;  %v9102_v8 = vpop.f32.mrf.mxu1  ;;  %v6991_v57 = vmul.f32 %v17053_v11, %v17053_v11  ;;  %v18779_v28 = vld [vmem:[#allocation22_spill] sm:$0xff] }
 0x76a   :  { %9329 = vmatpush3.msra.mxu1 %v17472_v52 }
 0x76b   :  { %9330 = vmatprep.subr.mxu1 %v17484_v5  ;;  %v9103_v1 = vpop.f32.mrf.mxu1  ;;  %v7004_v5 = vsel %vm2653_vm1, %v6991_v57, 0.0  ;;  %v18783_v57 = vld [vmem:[#allocation33_spill] sm:$0xff] }
 0x76c   :  { %9331 = vmatpush3.msra.mxu1 %v17496_v45  ;;  %v9069_v45 = vadd.f32 %v9068_v38, %v9067_v4  ;;  %v18781_v4 = vld [vmem:[#allocation28_spill] sm:$0xff]  ;;  %v7034_v38 = vadd.f32 %v7033_v60, %v7032_v36  ;;  %v18808_v36 = vld [vmem:[#allocation42_spill] sm:$0xff] }
 0x76d   :  { %9332 = vmatprep.subr.mxu1 %v17508_v24  ;;  %v7005_v24 = vrot.slane %v7004_v5, 4  ;;  %v18812_v60 = vld [vmem:[#allocation50_spill] sm:$0xff] }
 0x76e   :  { %9333 = vmatpush3.msra.mxu1 %v17520_v20 }
 0x76f   :  { %9334 = vmatprep.subr.mxu1 %v17527_v23 }
 0x770   :  { %9335 = vmatpush3.msra.mxu1 %v17534_v33 }
 0x771   :  { %9336 = vmatprep.subr.mxu1 %v17546_v58 }
 0x772   :  { %9337 = vmatpush3.msra.mxu1 %v17557_v62 }
 0x773   :  { %9338 = vmatprep.subr.mxu1 %v17568_v40 }
 0x774   :  { %9339 = vmatpush3.msra.mxu1 %v17580_v13 }
 0x775   :  { %9340 = vmatprep.subr.mxu1 %v17592_v10 }
 0x776   :  { %9341 = vmatpush3.msra.mxu1 %v17604_v54 }
 0x777   :  { %9342 = vmatprep.subr.mxu1 %v17616_v53 }
 0x778   :  { %9343 = vmatpush3.msra.mxu1 %v17628_v15 }
 0x779   :  { %9344 = vmatprep.subr.mxu1 %v17640_v27 }
 0x77a   :  { %9345 = vmatpush3.msra.mxu1 %v17652_v25 }
 0x77b   :  { %9346 = vmatprep.subr.mxu1 %v17664_v16  ;;  %v9104_v16 = vadd.f32 %v9103_v1, %v9102_v8  ;;  %v18782_v8 = vld [vmem:[#allocation30_spill] sm:$0xff] }
 0x77c   :  { %9347 = vmatpush3.msra.mxu1 %v17676_v14 }
 0x77d   :  { %9348 = vmatprep.subr.mxu1 %v17688_v44  ;;  %v9137_v44 = vpop.f32.mrf.mxu0  ;;  %v6613_v13 = vadd.f32 %v9104_v16, %v9069_v45 }
 0x77e   :  { %9349 = vmatpush3.msra.mxu1 %v17700_v51 }
 0x77f   :  { %7467 = vmatmul.mubr.f32.vlgmr.msra.gmra.mxu1 %v7017_v29  ;;  %9512 = vmatprep.subr.mxu1 %v18574_v42  ;;  %v9138_v52 = vpop.f32.mrf.mxu0  ;;  %v18780_v29 = vld [vmem:[#allocation25_spill] sm:$0xff] }
 0x780   :  { %9513 = vmatpush3.msra.mxu1 %v17821_v32  ;;  %9516 = vmatprep.mubr.msk.f32.mxu1 %vm9626_vm6, %v18574_v42  ;;  %v9139_v27 = vadd.f32 %v9138_v52, %v9137_v44  ;;  %v18784_v52 = vld [vmem:[#allocation35_spill] sm:$0xff] }
 0x781   :  { %9514 = vmatprep.subr.mxu1 %v18574_v42 }
 0x782   :  { %9515 = vmatpush3.msra.mxu1 %v17828_v63  ;;  %v6683_v23 = vadd.f32 %v9139_v27, %v6613_v13  ;;  %v7006_v63 = vadd.f32 %v7005_v24, %v7004_v5  ;;  %v18785_v5 = vld [vmem:[#allocation37_spill] sm:$0xff]  ;;  %v18786_v24 = vld [vmem:[#allocation39_spill] sm:$0xff] }
 0x783   :  { %v18787_v13 = vld [vmem:[#allocation41_spill] sm:$0xff] }
 0x784   :  { %v7007_v40 = vrot.slane %v7006_v63, 2 }
 0x785   :  { %v9172_v14 = vpop.f32.mrf.mxu1 }
 0x786   :  { %v7008_v56 = vadd.f32 %v7007_v40, %v7006_v63  ;;  %v18789_v63 = vld [vmem:[#allocation45_spill] sm:$0xff] }
 0x787   :  { %v9173_v32 = vpop.f32.mrf.mxu1 }
 0x788   :  { %v9174_v20 = vadd.f32 %v9173_v32, %v9172_v14  ;;  %v7009_v19 = vrot.slane %v7008_v56, 1  ;;  %v7035_v32 = vrot.slane %v7034_v38, 2 }
 0x78a   :  { %v6753_v33 = vadd.f32 %v9174_v20, %v6683_v23  ;;  %v7010_v6 = vadd.f32 %v7009_v19, %v7008_v56  ;;  %v18788_v23 = vld [vmem:[#allocation43_spill] sm:$0xff]  ;;  %v18796_v56 = vld [vmem:[#allocation17_spill] sm:$0xff] }
 0x78b   :  { %v18799_v19 = vld [vmem:[#allocation31_spill] sm:$0xff] }
 0x796   :  { %v6822_v10 = vpop.f32.mrf.mxu0 }
 0x797   :  { %v17888_v58 = vadd.f32 %v6822_v10, %v6753_v33  ;;  %v7036_v10 = vadd.f32 %v7035_v32, %v7034_v38  ;;  %v18819_v38 = vld [vmem:[#allocation61_spill] sm:$0xff]  ;;  %v18826_v32 = vld [vmem:[#allocation68_spill] sm:$0xff] }
 0x798   :  { %v6824_v54 = vpop.f32.mrf.mxu0 }
 0x799   :  { %v6983_v62 = vsel %vm6982_vm7, %v17888_v58, 0.0  ;;  %v6996_v53 = vmul.f32 %v17888_v58, %v17888_v58  ;;  %v18790_v54 = vld [vmem:[#allocation47_spill] sm:$0xff] }
 0x79a   :  { %v6984_v15 = vrot.slane %v6983_v62, 4 }
 0x79b   :  { %v7039_v51 = vsel %vm6982_vm7, %v6996_v53, 0.0  ;;  %v18792_v53 = vld [vmem:[#allocation51_spill] sm:$0xff] }
 0x79c   :  { %v6985_v25 = vadd.f32 %v6984_v15, %v6983_v62  ;;  %v7040_v17 = vrot.slane %v7039_v51, 4  ;;  %v18791_v62 = vld [vmem:[#allocation49_spill] sm:$0xff] }
 0x79d   :  { %v18793_v15 = vld [vmem:[#allocation53_spill] sm:$0xff] }
 0x79e   :  { %v6986_v21 = vrot.slane %v6985_v25, 2  ;;  %v7041_v30 = vadd.f32 %v7040_v17, %v7039_v51  ;;  %v7037_v51 = vrot.slane %v7036_v10, 1  ;;  %v18795_v17 = vld [vmem:[#allocation57_spill] sm:$0xff] }
 0x7a0   :  { %v6987_v37 = vadd.f32 %v6986_v21, %v6985_v25  ;;  %v7042_v39 = vrot.slane %v7041_v30, 2  ;;  %v18794_v25 = vld [vmem:[#allocation55_spill] sm:$0xff] }
 0x7a2   :  { %v6988_v61 = vrot.slane %v6987_v37, 1  ;;  %v7043_v49 = vadd.f32 %v7042_v39, %v7041_v30  ;;  %v18797_v30 = vld [vmem:[#allocation23_spill] sm:$0xff]  ;;  %v18798_v39 = vld [vmem:[#allocation24_spill] sm:$0xff] }
 0x7a4   :  { %v6989_v9 = vadd.f32 %v6988_v61, %v6987_v37  ;;  %v7044_v46 = vrot.slane %v7043_v49, 1  ;;  %v7038_v37 = vadd.f32 %v7037_v51, %v7036_v10  ;;  %v18800_v61 = vld [vmem:[#allocation26_spill] sm:$0xff] }
 0x7a6   :  { %9510 = vmatmul.mubr.msk.f32.vlgmr.msra.gmra.mxu0 %vm1071_vm0, %v6989_v9  ;;  %v7045_v47 = vadd.f32 %v7044_v46, %v7043_v49  ;;  %v6994_v49 = vmul.f32 %v17837_v43, %v17837_v43  ;;  %v18801_v9 = vld [vmem:[#allocation27_spill] sm:$0xff]  ;;  %v18802_v46 = vld [vmem:[#allocation29_spill] sm:$0xff] }
 0x7a7   :  { %9284 = vmatpush3.msra.mxu0 %v17202_v48  ;;  %7396 = vmatprep.mubr.f32.mxu0 %v7010_v6  ;;  %v18772_v48 = vld [vmem:[#allocation14_spill] sm:$0xff]  ;;  %v18803_v6 = vld [vmem:[#allocation32_spill] sm:$0xff] }
 0x7a8   :  { %9285 = vmatprep.subr.mxu0 %v17209_v22  ;;  %9517 = vmatmul.mubr.msk.f32.vlgmr.msra.gmra.mxu1 %vm1071_vm0, %v7045_v47  ;;  %v6997_v22 = vsel %vm2653_vm1, %v6990_v50, 0.0  ;;  %v18804_v47 = vld [vmem:[#allocation34_spill] sm:$0xff]  ;;  %v7025_v50 = vsel %vm2653_vm1, %v6994_v49, 0.0 }
 0x7a9   :  { %9286 = vmatpush3.msra.mxu0 %v17218_v2  ;;  %7688 = vmatprep.mubr.f32.mxu1 %v18574_v42  ;;  %v18775_v2 = vld [vmem:[#allocation18_spill] sm:$0xff]  ;;  %v6998_v7 = vrot.slane %v6997_v22, 4 }
 0x7aa   :  { %9287 = vmatprep.subr.mxu0 %v17224_v12  ;;  %v18778_v12 = vld [vmem:[#allocation21_spill] sm:$0xff] }
 0x7ab   :  { %9288 = vmatpush3.msra.mxu0 %v17235_v18  ;;  %v9207_v18 = vpop.f32.mrf.mxu1  ;;  %v6999_v55 = vadd.f32 %v6998_v7, %v6997_v22  ;;  %v18807_v22 = vld [vmem:[#allocation40_spill] sm:$0xff] }
 0x7ac   :  { %9289 = vmatprep.subr.mxu0 %v18772_v48  ;;  %v18806_v48 = vld [vmem:[#allocation38_spill] sm:$0xff]  ;;  %v18811_v7 = vld [vmem:[#allocation48_spill] sm:$0xff] }
 0x7ad   :  { %9290 = vmatpush3.msra.mxu0 %v18773_v41  ;;  %v9208_v1 = vpop.f32.mrf.mxu1  ;;  %v7000_v14 = vrot.slane %v6999_v55, 2  ;;  %v7026_v41 = vrot.slane %v7025_v50, 4 }
 0x7ae   :  { %9291 = vmatprep.subr.mxu0 %v18774_v31  ;;  %v9209_v45 = vadd.f32 %v9208_v1, %v9207_v18  ;;  %v18809_v31 = vld [vmem:[#allocation44_spill] sm:$0xff] }
 0x7af   :  { %9292 = vmatpush3.msra.mxu0 %v18775_v2  ;;  %v7001_v33 = vadd.f32 %v7000_v14, %v6999_v55  ;;  %v18810_v2 = vld [vmem:[#allocation46_spill] sm:$0xff]  ;;  %v18815_v18 = vld [vmem:[#allocation56_spill] sm:$0xff]  ;;  %v18823_v14 = vld [vmem:[#allocation65_spill] sm:$0xff] }
 0x7b0   :  { %9293 = vmatprep.subr.mxu0 %v18776_v35  ;;  %v7027_v35 = vadd.f32 %v7026_v41, %v7025_v50  ;;  %v18816_v55 = vld [vmem:[#allocation58_spill] sm:$0xff] }
 0x7b1   :  { %9294 = vmatpush3.msra.mxu0 %v18777_v3  ;;  %v7002_v40 = vrot.slane %v7001_v33, 1  ;;  %v18813_v3 = vld [vmem:[#allocation52_spill] sm:$0xff] }
 0x7b2   :  { %9295 = vmatprep.subr.mxu0 %v18778_v12  ;;  %v18814_v12 = vld [vmem:[#allocation54_spill] sm:$0xff] }
 0x7b3   :  { %9296 = vmatpush3.msra.mxu0 %v18779_v28  ;;  %v7003_v21 = vadd.f32 %v7002_v40, %v7001_v33  ;;  %v7028_v28 = vrot.slane %v7027_v35, 2  ;;  %v17999_v40 = vld [vmem:[%s18410_s7] sm:$0xff] }
 0x7b4   :  { %9297 = vmatprep.subr.mxu0 %v18780_v29  ;;  %v18817_v29 = vld [vmem:[#allocation59_spill] sm:$0xff] }
 0x7b5   :  { %9298 = vmatpush3.msra.mxu0 %v18781_v4  ;;  %v18818_v4 = vld [vmem:[#allocation60_spill] sm:$0xff]  ;;  %v7029_v1 = vadd.f32 %v7028_v28, %v7027_v35  ;;  %v6828_v28 = vld [vmem:[%s18410_s7 + $0x10] sm:$0xff] }
 0x7b6   :  { %9299 = vmatprep.subr.mxu0 %v18782_v8  ;;  %v18820_v8 = vld [vmem:[#allocation62_spill] sm:$0xff] }
 0x7b7   :  { %v9242_v44 = vpop.f32.mrf.mxu0  ;;  %9300 = vmatpush3.msra.mxu0 %v18783_v57  ;;  %v18822_v57 = vld [vmem:[#allocation64_spill] sm:$0xff] }
 0x7b8   :  { %9301 = vmatprep.subr.mxu0 %v18784_v52  ;;  %v18824_v52 = vld [vmem:[#allocation66_spill] sm:$0xff] }
 0x7b9   :  { %v9243_v16 = vpop.f32.mrf.mxu0  ;;  %9302 = vmatpush3.msra.mxu0 %v18785_v5  ;;  %v18825_v5 = vld [vmem:[#allocation67_spill] sm:$0xff] }
 0x7ba   :  { %v9244_v27 = vadd.f32 %v9243_v16, %v9242_v44  ;;  %9303 = vmatprep.subr.mxu0 %v18786_v24  ;;  %v18821_v44 = vld [vmem:[#allocation63_spill] sm:$0xff]  ;;  %v7030_v16 = vrot.slane %v7029_v1, 1 }
 0x7bb   :  { %9304 = vmatpush3.msra.mxu0 %v18787_v13  ;;  %v18829_v13 = vld [vmem:[#allocation71_spill] sm:$0xff] }
 0x7bc   :  { %v17923_v20 = vadd.f32 %v9244_v27, %v9209_v45  ;;  %9305 = vmatprep.subr.mxu0 %v18788_v23  ;;  %v18827_v45 = vld [vmem:[#allocation69_spill] sm:$0xff]  ;;  %v18828_v27 = vld [vmem:[#allocation70_spill] sm:$0xff]  ;;  %v7031_v24 = vadd.f32 %v7030_v16, %v7029_v1  ;;  %v6830_v1 = vld [vmem:[%s18410_s7 + $0x20] sm:$0xff] }
 0x7bd   :  { %9306 = vmatpush3.msra.mxu0 %v18789_v63  ;;  %v8331_v16 = vld [vmem:[%s18414_s11 + $0x1e8] sm:$0xff] }
 0x7be   :  { %9307 = vmatprep.subr.mxu0 %v18790_v54  ;;  %v17977_v54 = vld [vmem:[%s18410_s7 + $0x40] sm:$0xff] }
 0x7bf   :  { %9308 = vmatpush3.msra.mxu0 %v18791_v62  ;;  %v17982_v62 = vld [vmem:[%s18410_s7 + $0x38] sm:$0xff]  ;;  %7652 = vmatprep.subr.mxu1 %v17977_v54 }
 0x7c0   :  { %9309 = vmatprep.subr.mxu0 %v18792_v53  ;;  %v17987_v53 = vld [vmem:[%s18410_s7 + $0x68] sm:$0xff]  ;;  %7653 = vmatpush1.msra.mxu1 %v17982_v62 }
 0x7c1   :  { %9310 = vmatpush3.msra.mxu0 %v18793_v15  ;;  %v18004_v15 = vld [vmem:[%s18410_s7 + $0x30] sm:$0xff] }
 0x7c2   :  { %9311 = vmatprep.subr.mxu0 %v18794_v25 }
 0x7c3   :  { %9312 = vmatpush3.msra.mxu0 %v18795_v17 }
 0x7c4   :  { %9313 = vmatprep.subr.mxu0 %v18796_v56  ;;  %v6836_v56 = vld [vmem:[%s18410_s7 + $0x50] sm:$0xff] }
 0x7c5   :  { %9314 = vmatpush3.msra.mxu0 %v18797_v30 }
 0x7c6   :  { %7397 = vmatmul.mubr.f32.vlgmr.msra.gmra.mxu0 %v7003_v21  ;;  %9353 = vmatprep.subr.mxu0 %v18798_v39 }
 0x7c7   :  { %9354 = vmatpush3.msra.mxu0 %v18799_v19  ;;  %7536 = vmatprep.mubr.f32.mxu0 %v7038_v37 }
 0x7c8   :  { %9355 = vmatprep.subr.mxu0 %v18800_v61 }
 0x7c9   :  { %9356 = vmatpush3.msra.mxu0 %v18801_v9 }
 0x7ca   :  { %9357 = vmatprep.subr.mxu0 %v18802_v46 }
 0x7cb   :  { %9358 = vmatpush3.msra.mxu0 %v18803_v6 }
 0x7cc   :  { %9359 = vmatprep.subr.mxu0 %v18804_v47 }
 0x7cd   :  { %9360 = vmatpush3.msra.mxu0 %v18805_v59 }
 0x7ce   :  { %9361 = vmatprep.subr.mxu0 %v18806_v48 }
 0x7cf   :  { %9362 = vmatpush3.msra.mxu0 %v18807_v22 }
 0x7d0   :  { %9363 = vmatprep.subr.mxu0 %v18808_v36 }
 0x7d1   :  { %9364 = vmatpush3.msra.mxu0 %v18809_v31 }
 0x7d2   :  { %9365 = vmatprep.subr.mxu0 %v18810_v2 }
 0x7d3   :  { %9366 = vmatpush3.msra.mxu0 %v18811_v7  ;;  %v6938_v7 = vld [vmem:[%s18412_s9] sm:$0x1] }
 0x7d4   :  { %9367 = vmatprep.subr.mxu0 %v18812_v60 }
 0x7d5   :  { %9368 = vmatpush3.msra.mxu0 %v18813_v3  ;;  %v6835_v3 = vld [vmem:[%s18410_s7 + $0x48] sm:$0xff] }
 0x7d6   :  { %9369 = vmatprep.subr.mxu0 %v18814_v12  ;;  %v6829_v12 = vld [vmem:[%s18410_s7 + $0x18] sm:$0xff] }
 0x7d7   :  { %9370 = vmatpush3.msra.mxu0 %v18815_v18  ;;  %v6939_v18 = vld [vmem:[%s18413_s10] sm:$0x1] }
 0x7d8   :  { %9371 = vmatprep.subr.mxu0 %v18816_v55 }
 0x7d9   :  { %9372 = vmatpush3.msra.mxu0 %v18817_v29  ;;  %v6838_v29 = vld [vmem:[%s18410_s7 + $0x60] sm:$0xff] }
 0x7da   :  { %9373 = vmatprep.subr.mxu0 %v18818_v4 }
 0x7db   :  { %9374 = vmatpush3.msra.mxu0 %v18819_v38  ;;  %v6837_v38 = vld [vmem:[%s18410_s7 + $0x58] sm:$0xff] }
 0x7dc   :  { %9375 = vmatprep.subr.mxu0 %v18820_v8  ;;  %v6831_v8 = vld [vmem:[%s18410_s7 + $0x28] sm:$0xff] }
 0x7dd   :  { %9376 = vmatpush3.msra.mxu0 %v18821_v44  ;;  %v8333_v44 = vld [vmem:[%s18414_s11 + $0x1f8] sm:$0xff] }
 0x7de   :  { %9377 = vmatprep.subr.mxu0 %v18822_v57  ;;  %v8317_v57 = vld [vmem:[%s18414_s11 + $0x178] sm:$0xff] }
 0x7df   :  { %9378 = vmatpush3.msra.mxu0 %v18823_v14  ;;  %v8332_v14 = vld [vmem:[%s18414_s11 + $0x1f0] sm:$0xff] }
 0x7e0   :  { %9379 = vmatprep.subr.mxu0 %v18824_v52  ;;  %v8316_v52 = vld [vmem:[%s18414_s11 + $0x170] sm:$0xff] }
 0x7e1   :  { %9380 = vmatpush3.msra.mxu0 %v18825_v5  ;;  %v8301_v5 = vld [vmem:[%s18414_s11 + $0xf8] sm:$0xff] }
 0x7e2   :  { %9381 = vmatprep.subr.mxu0 %v18826_v32  ;;  %v8315_v32 = vld [vmem:[%s18414_s11 + $0x168] sm:$0xff] }
 0x7e3   :  { %9382 = vmatpush3.msra.mxu0 %v18827_v45  ;;  %v8285_v45 = vld [vmem:[%s18414_s11 + $0x78] sm:$0xff] }
 0x7e4   :  { %9383 = vmatprep.subr.mxu0 %v18828_v27  ;;  %v8330_v27 = vld [vmem:[%s18414_s11 + $0x1e0] sm:$0xff] }
 0x7e5   :  { %9384 = vmatpush3.msra.mxu0 %v18829_v13  ;;  %v8314_v13 = vld [vmem:[%s18414_s11 + $0x160] sm:$0xff] }
 0x7e6   :  { %7537 = vmatmul.mubr.f32.vlgmr.msra.gmra.mxu0 %v7031_v24  ;;  %9519 = vmatprep.subr.mxu0 %v18574_v42  ;;  %v8300_v24 = vld [vmem:[%s18414_s11 + $0xf0] sm:$0xff] }
 0x7e7   :  { %9523 = vmatprep.mubr.msk.f32.mxu0 %vm9626_vm6, %v18574_v42  ;;  %9520 = vmatpush3.msra.mxu0 %v17987_v53 }
 0x7e8   :  { %9521 = vmatprep.subr.mxu0 %v18574_v42 }
 0x7e9   :  { %9522 = vmatpush3.msra.mxu0 %v18004_v15 }
 0x7ea   :  { %8009 = vmatprep.subr.mxu0 %v6836_v56 }
 0x81f   :  { %v9277_v23 = vpop.f32.mrf.mxu1 }
 0x821   :  { %v9278_v33 = vpop.f32.mrf.mxu1 }
 0x822   :  { %v9279_v63 = vadd.f32 %v9278_v33, %v9277_v23  ;;  %v8284_v23 = vld [vmem:[%s18414_s11 + $0x70] sm:$0xff]  ;;  %v8329_v33 = vld [vmem:[%s18414_s11 + $0x1d8] sm:$0xff] }
 0x824   :  { %v7256_v10 = vadd.f32 %v9279_v63, %v17923_v20  ;;  %v17994_v20 = vld [vmem:[%s18410_s7 + $0x8] sm:$0xff] }
 0x825   :  { %7654 = vmatprep.subr.mxu1 %v17994_v20  ;;  %v8299_v63 = vld [vmem:[%s18414_s11 + $0xe8] sm:$0xff] }
 0x826   :  { %7655 = vmatpush1.msra.mxu1 %v17999_v40 }
 0x827   :  { %7723 = vmatprep.subr.mxu1 %v6836_v56  ;;  %v8326_v56 = vld [vmem:[%s18414_s11 + $0x1c0] sm:$0xff] }
 0x83f   :  { %v9350_v51 = vpop.f32.mrf.mxu1 }
 0x841   :  { %v9351_v25 = vpop.f32.mrf.mxu1 }
 0x842   :  { %v9352_v17 = vadd.f32 %v9351_v25, %v9350_v51  ;;  %v8297_v51 = vld [vmem:[%s18414_s11 + $0xd8] sm:$0xff]  ;;  %v8311_v25 = vld [vmem:[%s18414_s11 + $0x148] sm:$0xff] }
 0x866   :  { %v7325_v21 = vpop.f32.mrf.mxu0 }
 0x867   :  { %v7326_v30 = vadd.f32 %v7325_v21, %v7256_v10  ;;  %v8313_v10 = vld [vmem:[%s18414_s11 + $0x158] sm:$0xff]  ;;  %v8296_v21 = vld [vmem:[%s18414_s11 + $0xd0] sm:$0xff] }
 0x868   :  { %v9511_v37 = vpop.f32.mrf.mxu0  ;;  %v7608_v39 = vpop.f32.mrf.mxu1 }
 0x869   :  { %v7612_v59 = vmul.f32 0.010204081, %v7326_v30  ;;  %v8310_v30 = vld [vmem:[%s18414_s11 + $0x140] sm:$0xff]  ;;  %v8280_v37 = vld [vmem:[%s18414_s11 + $0x50] sm:$0xff] }
 0x86a   :  { %v9518_v19 = vpop.f32.mrf.mxu1 }
 0x86b   :  { %v7614_v41 = vmul.f32 %v7612_v59, %v7612_v59  ;;  %v8295_v19 = vld [vmem:[%s18414_s11 + $0xc8] sm:$0xff] }
 0x886   :  { %v9315_v61 = vpop.f32.mrf.mxu0 }
 0x888   :  { %v9316_v49 = vpop.f32.mrf.mxu0 }
 0x889   :  { %v9317_v9 = vadd.f32 %v9316_v49, %v9315_v61  ;;  %v8309_v61 = vld [vmem:[%s18414_s11 + $0x138] sm:$0xff]  ;;  %v8279_v49 = vld [vmem:[%s18414_s11 + $0x48] sm:$0xff] }
 0x88b   :  { %v7469_v47 = vadd.f32 %v9352_v17, %v9317_v9  ;;  %v8281_v17 = vld [vmem:[%s18414_s11 + $0x58] sm:$0xff]  ;;  %v8324_v9 = vld [vmem:[%s18414_s11 + $0x1b0] sm:$0xff] }
 0x8a6   :  { %v9385_v46 = vpop.f32.mrf.mxu0 }
 0x8a8   :  { %v9386_v6 = vpop.f32.mrf.mxu0 }
 0x8a9   :  { %v9387_v50 = vadd.f32 %v9386_v6, %v9385_v46  ;;  %v8294_v46 = vld [vmem:[%s18414_s11 + $0xc0] sm:$0xff]  ;;  %v8308_v6 = vld [vmem:[%s18414_s11 + $0x130] sm:$0xff] }
 0x8ab   :  { %v7539_v48 = vadd.f32 %v9387_v50, %v7469_v47  ;;  %v8278_v47 = vld [vmem:[%s18414_s11 + $0x40] sm:$0xff]  ;;  %v8323_v50 = vld [vmem:[%s18414_s11 + $0x1a8] sm:$0xff] }
 0x8ad   :  { %v7609_v22 = vadd.f32 %v7608_v39, %v7539_v48  ;;  %v8325_v39 = vld [vmem:[%s18414_s11 + $0x1b8] sm:$0xff]  ;;  %v8307_v48 = vld [vmem:[%s18414_s11 + $0x128] sm:$0xff] }
 0x8af   :  { %v7613_v36 = vmul.f32 0.010204081, %v7609_v22  ;;  %v8277_v22 = vld [vmem:[%s18414_s11 + $0x38] sm:$0xff] }
 0x8b1   :  { %v7615_v31 = vsub.f32 %v7613_v36, %v7614_v41  ;;  %v8322_v41 = vld [vmem:[%s18414_s11 + $0x1a0] sm:$0xff]  ;;  %v8292_v36 = vld [vmem:[%s18414_s11 + $0xb0] sm:$0xff] }
 0x8b3   :  { %v7616_v2 = vadd.f32 1e-05, %v7615_v31  ;;  %v8306_v31 = vld [vmem:[%s18414_s11 + $0x120] sm:$0xff] }
 0x8b5   :  { %9549 = vrsqrt.f32 %v7616_v2  ;;  %v8276_v2 = vld [vmem:[%s18414_s11 + $0x30] sm:$0xff] }
 0x8c2   :  { %v9550_v35 = vpop.eup %9549 }
 0x8c3   :  { %v7618_v60 = vmul.f32 %v9550_v35, %v6938_v7  ;;  %v8321_v7 = vld [vmem:[%s18414_s11 + $0x198] sm:$0xff]  ;;  %v8291_v35 = vld [vmem:[%s18414_s11 + $0xa8] sm:$0xff] }
 0x8c5   :  { %8745 = vmatmul.mubr.msk.f32.vlgmr.msra.gmra.mxu1 %vm1071_vm0, %v7618_v60  ;;  %9524 = vmatmul.mubr.msk.f32.vlgmr.msra.gmra.mxu0 %vm1071_vm0, %v7618_v60  ;;  %v7619_v55 = vmul.f32 %v7618_v60, %v7612_v59  ;;  %v8293_v59 = vld [vmem:[%s18414_s11 + $0xb8] sm:$0xff] }
 0x8c6   :  { %7724 = vmatpush1.msra.mxu1 %v6835_v3  ;;  %8010 = vmatpush1.msra.mxu0 %v6835_v3  ;;  %v8275_v3 = vld [vmem:[%s18414_s11 + $0x28] sm:$0xff] }
 0x8c7   :  { %7725 = vmatprep.subr.mxu1 %v6829_v12  ;;  %8011 = vmatprep.subr.mxu0 %v6829_v12  ;;  %v7620_v4 = vsub.f32 %v6939_v18, %v7619_v55  ;;  %v8320_v12 = vld [vmem:[%s18414_s11 + $0x190] sm:$0xff]  ;;  %v8290_v18 = vld [vmem:[%s18414_s11 + $0xa0] sm:$0xff] }
 0x8c8   :  { %7726 = vmatpush1.msra.mxu1 %v6828_v28  ;;  %7759 = vmatprep.mubr.f32.mxu1 %v18574_v42  ;;  %v8274_v55 = vld [vmem:[%s18414_s11 + $0x20] sm:$0xff] }
 0x8c9   :  { %8012 = vmatpush1.msra.mxu0 %v6828_v28  ;;  %8045 = vmatprep.mubr.f32.mxu0 %v18574_v42  ;;  %v8304_v28 = vld [vmem:[%s18414_s11 + $0x110] sm:$0xff] }
 0x8ca   :  { %8746 = vmatmul.mubr.msk.f32.vlgmr.msra.gmra.mxu1 %vm1071_vm0, %v7618_v60  ;;  %7794 = vmatprep.subr.mxu1 %v6838_v29 }
 0x8cb   :  { %8750 = vmatmul.mubr.msk.f32.vlgmr.msra.gmra.mxu0 %vm1071_vm0, %v7620_v4  ;;  %9526 = vmatprep.subr.mxu0 %v18574_v42 }
 0x8cc   :  { %7795 = vmatpush1.msra.mxu1 %v6837_v38  ;;  %9527 = vmatpush3.msra.mxu0 %v17987_v53  ;;  %v8298_v53 = vld [vmem:[%s18414_s11 + $0xe0] sm:$0xff] }
 0x8cd   :  { %7796 = vmatprep.subr.mxu1 %v6831_v8  ;;  %9528 = vmatprep.subr.mxu0 %v18574_v42 }
 0x8ce   :  { %7797 = vmatpush1.msra.mxu1 %v6830_v1  ;;  %7830 = vmatprep.mubr.f32.mxu1 %v18574_v42 }
 0x8cf   :  { %9529 = vmatpush3.msra.mxu0 %v18004_v15  ;;  %9530 = vmatprep.mubr.msk.f32.mxu0 %vm9626_vm6, %v18574_v42  ;;  %v8327_v15 = vld [vmem:[%s18414_s11 + $0x1c8] sm:$0xff] }
 0x8d0   :  { %8747 = vmatmul.mubr.msk.f32.vlgmr.msra.gmra.mxu1 %vm1071_vm0, %v7618_v60  ;;  %7938 = vmatprep.subr.mxu1 %v17977_v54  ;;  %v8283_v54 = vld [vmem:[%s18414_s11 + $0x68] sm:$0xff]  ;;  %v8305_v60 = vld [vmem:[%s18414_s11 + $0x118] sm:$0xff] }
 0x8d1   :  { %9531 = vmatmul.mubr.msk.f32.vlgmr.msra.gmra.mxu0 %vm1071_vm0, %v7620_v4  ;;  %7939 = vmatpush1.msra.mxu1 %v17982_v62  ;;  %v8328_v62 = vld [vmem:[%s18414_s11 + $0x1d0] sm:$0xff] }
 0x8d2   :  { %7940 = vmatprep.subr.mxu1 %v17994_v20  ;;  %7974 = vmatprep.mubr.f32.mxu1 %v18574_v42  ;;  %v8312_v20 = vld [vmem:[%s18414_s11 + $0x150] sm:$0xff] }
 0x8d3   :  { %7941 = vmatpush1.msra.mxu1 %v17999_v40  ;;  %9432 = vmatprep.subr.mxu0 %v8333_v44  ;;  %v8282_v40 = vld [vmem:[%s18414_s11 + $0x60] sm:$0xff]  ;;  %v8288_v44 = vld [vmem:[%s18414_s11 + $0x90] sm:$0xff] }
 0x8d4   :  { %8749 = vmatmul.mubr.msk.f32.vlgmr.msra.gmra.mxu1 %vm1071_vm0, %v7620_v4  ;;  %8080 = vmatprep.subr.mxu1 %v6838_v29  ;;  %v8319_v29 = vld [vmem:[%s18414_s11 + $0x188] sm:$0xff] }
 0x8d5   :  { %8081 = vmatpush1.msra.mxu1 %v6837_v38  ;;  %8116 = vmatprep.mubr.f32.mxu1 %v18574_v42  ;;  %v8303_v38 = vld [vmem:[%s18414_s11 + $0x108] sm:$0xff] }
 0x8d6   :  { %8082 = vmatprep.subr.mxu1 %v6831_v8  ;;  %9433 = vmatpush3.msra.mxu0 %v8317_v57  ;;  %v8273_v8 = vld [vmem:[%s18414_s11 + $0x18] sm:$0xff]  ;;  %v8302_v57 = vld [vmem:[%s18414_s11 + $0x100] sm:$0xff] }
 0x8d7   :  { %8083 = vmatpush1.msra.mxu1 %v6830_v1  ;;  %9434 = vmatprep.subr.mxu0 %v8332_v14  ;;  %v8318_v1 = vld [vmem:[%s18414_s11 + $0x180] sm:$0xff]  ;;  %v8272_v14 = vld [vmem:[%s18414_s11 + $0x10] sm:$0xff] }
 0x8d8   :  { %8751 = vmatmul.mubr.msk.f32.vlgmr.msra.gmra.mxu1 %vm1071_vm0, %v7620_v4  ;;  %9435 = vmatpush3.msra.mxu0 %v8316_v52  ;;  %v8289_v4 = vld [vmem:[%s18414_s11 + $0x98] sm:$0xff]  ;;  %v8287_v52 = vld [vmem:[%s18414_s11 + $0x88] sm:$0xff] }
 0x8d9   :  { %9436 = vmatprep.subr.mxu0 %v8331_v16  ;;  %9397 = vmatprep.subr.mxu1 %v8301_v5  ;;  %v8271_v16 = vld [vmem:[%s18414_s11 + $0x8] sm:$0xff]  ;;  %v8286_v5 = vld [vmem:[%s18414_s11 + $0x80] sm:$0xff] }
 0x8da   :  { %9437 = vmatpush3.msra.mxu0 %v8315_v32  ;;  %9398 = vmatpush3.msra.mxu1 %v8285_v45  ;;  %v8270_v32 = vld [vmem:[%s18414_s11] sm:$0xff]  ;;  %v8365_v45 = vld [vmem:[%s18414_s11 + $0x2f8] sm:$0xff] }
 0x8db   :  { %9438 = vmatprep.subr.mxu0 %v8330_v27  ;;  %9399 = vmatprep.subr.mxu1 %v8300_v24 }
 0x8dc   :  { %9439 = vmatpush3.msra.mxu0 %v8314_v13  ;;  %9400 = vmatpush3.msra.mxu1 %v8284_v23 }
 0x8dd   :  { %9440 = vmatprep.subr.mxu0 %v8329_v33  ;;  %9401 = vmatprep.subr.mxu1 %v8299_v63  ;;  %v18830_v63 = vld [vmem:[#allocation12_spill] sm:$0xff] }
 0x8de   :  { %9441 = vmatpush3.msra.mxu0 %v8313_v10  ;;  %9402 = vmatpush3.msra.mxu1 %v8283_v54 }
 0x8df   :  { %9442 = vmatprep.subr.mxu0 %v8328_v62  ;;  %9403 = vmatprep.subr.mxu1 %v8298_v53 }
 0x8e0   :  { %9443 = vmatpush3.msra.mxu0 %v8312_v20  ;;  %9404 = vmatpush3.msra.mxu1 %v8282_v40 }
 0x8e1   :  { %9444 = vmatprep.subr.mxu0 %v8327_v15  ;;  %9405 = vmatprep.subr.mxu1 %v8297_v51 }
 0x8e2   :  { %9445 = vmatpush3.msra.mxu0 %v8311_v25  ;;  %9406 = vmatpush3.msra.mxu1 %v8281_v17  ;;  %v18831_v25 = vld [vmem:[#allocation13_spill] sm:$0xff] }
 0x8e3   :  { %9446 = vmatprep.subr.mxu0 %v8326_v56  ;;  %9407 = vmatprep.subr.mxu1 %v8296_v21 }
 0x8e4   :  { %9447 = vmatpush3.msra.mxu0 %v8310_v30  ;;  %9408 = vmatpush3.msra.mxu1 %v8280_v37 }
 0x8e5   :  { %9448 = vmatprep.subr.mxu0 %v8325_v39  ;;  %9409 = vmatprep.subr.mxu1 %v8295_v19 }
 0x8e6   :  { %9449 = vmatpush3.msra.mxu0 %v8309_v61  ;;  %9410 = vmatpush3.msra.mxu1 %v8279_v49 }
 0x8e7   :  { %9450 = vmatprep.subr.mxu0 %v8324_v9  ;;  %9411 = vmatprep.subr.mxu1 %v8294_v46 }
 0x8e8   :  { %9451 = vmatpush3.msra.mxu0 %v8308_v6  ;;  %9412 = vmatpush3.msra.mxu1 %v8278_v47 }
 0x8e9   :  { %9452 = vmatprep.subr.mxu0 %v8323_v50  ;;  %9413 = vmatprep.subr.mxu1 %v8293_v59 }
 0x8ea   :  { %9453 = vmatpush3.msra.mxu0 %v8307_v48  ;;  %9414 = vmatpush3.msra.mxu1 %v8277_v22  ;;  %v8367_v48 = vld [vmem:[%s18414_s11 + $0x308] sm:$0xff] }
 0x8eb   :  { %9454 = vmatprep.subr.mxu0 %v8322_v41  ;;  %9415 = vmatprep.subr.mxu1 %v8292_v36  ;;  %v8366_v36 = vld [vmem:[%s18414_s11 + $0x300] sm:$0xff] }
 0x8ec   :  { %9455 = vmatpush3.msra.mxu0 %v8306_v31  ;;  %9416 = vmatpush3.msra.mxu1 %v8276_v2 }
 0x8ed   :  { %9456 = vmatprep.subr.mxu0 %v8321_v7  ;;  %9417 = vmatprep.subr.mxu1 %v8291_v35 }
 0x8ee   :  { %9457 = vmatpush3.msra.mxu0 %v8305_v60  ;;  %9418 = vmatpush3.msra.mxu1 %v8275_v3 }
 0x8ef   :  { %9458 = vmatprep.subr.mxu0 %v8320_v12  ;;  %9419 = vmatprep.subr.mxu1 %v8290_v18 }
 0x8f0   :  { %9459 = vmatpush3.msra.mxu0 %v8304_v28  ;;  %9420 = vmatpush3.msra.mxu1 %v8274_v55 }
 0x8f1   :  { %9460 = vmatprep.subr.mxu0 %v8319_v29  ;;  %9421 = vmatprep.subr.mxu1 %v8289_v4  ;;  %v8349_v29 = vld [vmem:[%s18414_s11 + $0x278] sm:$0xff] }
 0x8f2   :  { %9461 = vmatpush3.msra.mxu0 %v8303_v38  ;;  %9422 = vmatpush3.msra.mxu1 %v8273_v8  ;;  %v8348_v38 = vld [vmem:[%s18414_s11 + $0x270] sm:$0xff]  ;;  %v8363_v8 = vld [vmem:[%s18414_s11 + $0x2e8] sm:$0xff] }
 0x8f3   :  { %9462 = vmatprep.subr.mxu0 %v8318_v1  ;;  %9423 = vmatprep.subr.mxu1 %v8288_v44  ;;  %v8347_v1 = vld [vmem:[%s18414_s11 + $0x268] sm:$0xff]  ;;  %v8362_v44 = vld [vmem:[%s18414_s11 + $0x2e0] sm:$0xff] }
 0x8f4   :  { %9463 = vmatpush3.msra.mxu0 %v8302_v57  ;;  %9424 = vmatpush3.msra.mxu1 %v8272_v14  ;;  %v8346_v57 = vld [vmem:[%s18414_s11 + $0x260] sm:$0xff]  ;;  %v8361_v14 = vld [vmem:[%s18414_s11 + $0x2d8] sm:$0xff] }
 0x8f5   :  { %9533 = vmatprep.subr.mxu0 %v18574_v42  ;;  %9425 = vmatprep.subr.mxu1 %v8287_v52  ;;  %v8345_v52 = vld [vmem:[%s18414_s11 + $0x258] sm:$0xff] }
 0x8f6   :  { %9426 = vmatpush3.msra.mxu1 %v8271_v16  ;;  %v8360_v16 = vld [vmem:[%s18414_s11 + $0x2d0] sm:$0xff] }
 0x8f7   :  { %9427 = vmatprep.subr.mxu1 %v8286_v5  ;;  %v8344_v5 = vld [vmem:[%s18414_s11 + $0x250] sm:$0xff] }
 0x8f8   :  { %9428 = vmatpush3.msra.mxu1 %v8270_v32  ;;  %v8359_v32 = vld [vmem:[%s18414_s11 + $0x2c8] sm:$0xff] }
 0x8f9   :  { %9467 = vmatprep.subr.mxu1 %v8365_v45  ;;  %v8343_v45 = vld [vmem:[%s18414_s11 + $0x248] sm:$0xff] }
 0x985   :  { %v7690_v27 = vpop.f32.mrf.mxu1  ;;  %v7903_v24 = vpop.f32.mrf.mxu0 }
 0x986   :  { %v8220_v15 = vrot.slane %v7903_v24, %v18830_v63  ;;  %v8196_v19 = vrot.slane %v7690_v27, %v18830_v63  ;;  %v8358_v27 = vld [vmem:[%s18414_s11 + $0x2c0] sm:$0xff] }
 0x987   :  { %v7692_v13 = vpop.f32.mrf.mxu1  ;;  %v9525_v23 = vpop.f32.mrf.mxu0  ;;  %v8342_v24 = vld [vmem:[%s18414_s11 + $0x240] sm:$0xff] }
 0x988   :  { %v8200_v9 = vrot.slane %v7692_v13, %v18830_v63  ;;  %v8221_v41 = vmul.f32 %v8196_v19, %v17244_v26  ;;  %v8357_v13 = vld [vmem:[%s18414_s11 + $0x2b8] sm:$0xff] }
 0x989   :  { %v8341_v23 = vld [vmem:[%s18414_s11 + $0x238] sm:$0xff] }
 0x98a   :  { %v7761_v33 = vpop.f32.mrf.mxu1  ;;  %v8222_v31 = vmul.f32 %v8200_v9, %v17053_v11 }
 0x98b   :  { %v8204_v10 = vrot.slane %v7761_v33, %v18830_v63  ;;  %v8047_v54 = vpop.f32.mrf.mxu0  ;;  %v8356_v33 = vld [vmem:[%s18414_s11 + $0x2b0] sm:$0xff] }
 0x98c   :  { %v7763_v62 = vpop.f32.mrf.mxu1  ;;  %v8239_v51 = vrot.slane %v8047_v54, %v18830_v63  ;;  %v8355_v54 = vld [vmem:[%s18414_s11 + $0x2a8] sm:$0xff] }
 0x98d   :  { %v8223_v53 = vmul.f32 %v8204_v10, %v17398_v34  ;;  %v8208_v20 = vrot.slane %v7763_v62, %v18830_v63  ;;  %v8049_v40 = vpop.f32.mrf.mxu0  ;;  %v8227_v34 = vmul.f32 %v8220_v15, %v17888_v58  ;;  %v8340_v10 = vld [vmem:[%s18414_s11 + $0x230] sm:$0xff]  ;;  %v8339_v62 = vld [vmem:[%s18414_s11 + $0x228] sm:$0xff]  ;;  %v8353_v15 = vld [vmem:[%s18414_s11 + $0x298] sm:$0xff] }
 0x98e   :  { %v8243_v56 = vrot.slane %v8049_v40, %v18830_v63  ;;  %v8338_v40 = vld [vmem:[%s18414_s11 + $0x220] sm:$0xff] }
 0x98f   :  { %v8224_v17 = vmul.f32 %v8208_v20, %v18831_v25  ;;  %v8258_v21 = vadd.f32 %v8239_v51, %v8223_v53  ;;  %v8354_v53 = vld [vmem:[%s18414_s11 + $0x2a0] sm:$0xff]  ;;  %v8337_v25 = vld [vmem:[%s18414_s11 + $0x218] sm:$0xff] }
 0x990   :  { %v18267_v30 = vpop.f32.mrf.mxu1 }
 0x991   :  { %v8259_v37 = vadd.f32 %v8243_v56, %v8224_v17  ;;  %v8189_v39 = vpop.f32.mrf.mxu0  ;;  %v8265_v47 = vmax.f32 %v8258_v21, 0.0  ;;  %v8212_v20 = vrot.slane %v18267_v30, %v18830_v63  ;;  %v8352_v17 = vld [vmem:[%s18414_s11 + $0x290] sm:$0xff] }
 0x992   :  { %v8255_v61 = vrot.slane %v8189_v39, %v18830_v63  ;;  %v7834_v49 = vpop.f32.mrf.mxu1  ;;  %v8336_v21 = vld [vmem:[%s18414_s11 + $0x210] sm:$0xff]  ;;  %v8334_v39 = vld [vmem:[%s18414_s11 + $0x200] sm:$0xff] }
 0x993   :  { %v8266_v46 = vmax.f32 %v8259_v37, 0.0  ;;  %v9532_v6 = vpop.f32.mrf.mxu0  ;;  %v8216_v2 = vrot.slane %v7834_v49, %v18830_v63  ;;  %v8225_v56 = vmul.f32 %v8212_v20, %v17837_v43  ;;  %v8335_v37 = vld [vmem:[%s18414_s11 + $0x208] sm:$0xff]  ;;  %v8350_v43 = vld [vmem:[%s18414_s11 + $0x280] sm:$0xff] }
 0x994   :  { %v8262_v50 = vadd.f32 %v8255_v61, %v8227_v34  ;;  %v7976_v59 = vpop.f32.mrf.mxu1 }
 0x995   :  { %v8231_v22 = vrot.slane %v7976_v59, %v18830_v63  ;;  %8512 = vmatprep.mubr.f32.mxu0 %v8266_v46  ;;  %v8226_v11 = vmul.f32 %v8216_v2, %v17841_v0 }
 0x996   :  { %v7978_v58 = vpop.f32.mrf.mxu1  ;;  %8513 = vmatmul.mubr.f32.vlgmr.msra.gmra.mxu0 %v8265_v47  ;;  %v8269_v35 = vmax.f32 %v8262_v50, 0.0  ;;  %v8753_v50 = vld [vmem:[%s18415_s12] ss:$0 sm:$0xff] }
 0x997   :  { %v8235_v7 = vrot.slane %v7978_v58, %v18830_v63  ;;  %9534 = vmatpush3.msra.mxu0 %v8367_v48  ;;  %9537 = vmatprep.mubr.msk.f32.mxu0 %vm9626_vm6, %v18574_v42  ;;  %v8256_v60 = vadd.f32 %v8231_v22, %v8221_v41 }
 0x998   :  { %v18286_v3 = vpop.f32.mrf.mxu1  ;;  %9535 = vmatprep.subr.mxu0 %v18574_v42  ;;  %v8364_v42 = vld [vmem:[%s18414_s11 + $0x2f0] sm:$0xff] }
 0x999   :  { %v8257_v26 = vadd.f32 %v8235_v7, %v8222_v31  ;;  %9536 = vmatpush3.msra.mxu0 %v8366_v36  ;;  %v8263_v55 = vmax.f32 %v8256_v60, 0.0  ;;  %v8247_v51 = vrot.slane %v18286_v3, %v18830_v63 }
 0x99a   :  { %v8120_v12 = vpop.f32.mrf.mxu1  ;;  %9538 = vmatmul.mubr.msk.f32.vlgmr.msra.gmra.mxu0 %vm1071_vm0, %v8269_v35 }
 0x99b   :  { %v8264_v18 = vmax.f32 %v8257_v26, 0.0  ;;  %v8251_v28 = vrot.slane %v8120_v12, %v18830_v63  ;;  %v8351_v63 = vld [vmem:[%s18414_s11 + $0x288] sm:$0xff]  ;;  %v8260_v30 = vadd.f32 %v8247_v51, %v8225_v56  ;;  %s9627_s11 = smov [#allocation4]  }
 0x99c   :  { %s8690_s12 = sshll.u32 %s9627_s11, 4  ;;  %s8691_s12 = int_to_ptr.vmem [resolvable:$true] %s8690_s12 }
 0x99d   :  { %v8261_v4 = vadd.f32 %v8251_v28, %v8226_v11  ;;  %8442 = vmatprep.mubr.f32.mxu1 %v8264_v18  ;;  %v8267_v19 = vmax.f32 %v8260_v30, 0.0  ;;  %s9580_s1 = scalar_lea.vmem %s8691_s12, 32  ;;  %p9585_p1 = scmp.lt.s32.totalorder %s8691_s12, %s8691_s12 }
 0x99e   :  { %8443 = vmatmul.mubr.f32.vlgmr.msra.gmra.mxu1 %v8263_v55  ;;  %p9581_p0 = scmp.ne.s32.totalorder %s8691_s12, %s9580_s1  ;;  %p9586_p2 = scmp.lt.s32.totalorder %s9580_s1, %s9580_s1 }
 0x99f   :  { %v8268_v0 = vmax.f32 %v8261_v4, 0.0  ;;  %9468 = vmatpush3.msra.mxu1 %v8349_v29 }
 0x9a0   :  { %9469 = vmatprep.subr.mxu1 %v8364_v42  ;;  %p9587_p3 = por %p9586_p2, %p9585_p1 }
 0x9a1   :  { %9470 = vmatpush3.msra.mxu1 %v8348_v38  ;;  %8582 = vmatprep.mubr.f32.mxu1 %v8268_v0 }
 0x9a2   :  { %9471 = vmatprep.subr.mxu1 %v8363_v8  ;;  %p9588_p4 = pnand %p9587_p3, %p9581_p0 }
 0x9a3   :  { %9472 = vmatpush3.msra.mxu1 %v8347_v1 }
 0x9a4   :  { %9473 = vmatprep.subr.mxu1 %v8362_v44 }
 0x9a5   :  { %9474 = vmatpush3.msra.mxu1 %v8346_v57 }
 0x9a6   :  { %9475 = vmatprep.subr.mxu1 %v8361_v14 }
 0x9a7   :  { %9476 = vmatpush3.msra.mxu1 %v8345_v52 }
 0x9a8   :  { %9477 = vmatprep.subr.mxu1 %v8360_v16 }
 0x9a9   :  { %9478 = vmatpush3.msra.mxu1 %v8344_v5 }
 0x9aa   :  { %9479 = vmatprep.subr.mxu1 %v8359_v32 }
 0x9ab   :  { %9480 = vmatpush3.msra.mxu1 %v8343_v45 }
 0x9ac   :  { %9481 = vmatprep.subr.mxu1 %v8358_v27 }
 0x9ad   :  { %9482 = vmatpush3.msra.mxu1 %v8342_v24 }
 0x9ae   :  { %9483 = vmatprep.subr.mxu1 %v8357_v13 }
 0x9af   :  { %9484 = vmatpush3.msra.mxu1 %v8341_v23 }
 0x9b0   :  { %9485 = vmatprep.subr.mxu1 %v8356_v33 }
 0x9b1   :  { %9486 = vmatpush3.msra.mxu1 %v8340_v10 }
 0x9b2   :  { %9487 = vmatprep.subr.mxu1 %v8355_v54 }
 0x9b3   :  { %9488 = vmatpush3.msra.mxu1 %v8339_v62 }
 0x9b4   :  { %9489 = vmatprep.subr.mxu1 %v8354_v53 }
 0x9b5   :  { %9490 = vmatpush3.msra.mxu1 %v8338_v40 }
 0x9b6   :  { %9491 = vmatprep.subr.mxu1 %v8353_v15 }
 0x9b7   :  { %9492 = vmatpush3.msra.mxu1 %v8337_v25 }
 0x9b8   :  { %9493 = vmatprep.subr.mxu1 %v8352_v17 }
 0x9b9   :  { %9494 = vmatpush3.msra.mxu1 %v8336_v21 }
 0x9ba   :  { %9495 = vmatprep.subr.mxu1 %v8351_v63 }
 0x9bb   :  { %9496 = vmatpush3.msra.mxu1 %v8335_v37 }
 0x9bc   :  { %9497 = vmatprep.subr.mxu1 %v8350_v43 }
 0x9bd   :  { %9498 = vmatpush3.msra.mxu1 %v8334_v39 }
 0x9be   :  { %8583 = vmatmul.mubr.f32.vlgmr.msra.gmra.mxu1 %v8267_v19 }
 0xa56   :  { %v9464_v34 = vpop.f32.mrf.mxu0 }
 0xa58   :  { %v9465_v61 = vpop.f32.mrf.mxu0 }
 0xa59   :  { %v9466_v22 = vadd.f32 %v9465_v61, %v9464_v34 }
 0xa5a   :  { %v8654_v49 = vpop.f32.mrf.mxu0 }
 0xa5c   :  { %v9539_v9 = vpop.f32.mrf.mxu0 }
 0xa5e   :  { %v9429_v46 = vpop.f32.mrf.mxu1 }
 0xa60   :  { %v9430_v6 = vpop.f32.mrf.mxu1 }
 0xa61   :  { %v9431_v47 = vadd.f32 %v9430_v6, %v9429_v46 }
 0xa63   :  { %v8445_v59 = vadd.f32 %v9431_v47, %v8753_v50 }
 0xa65   :  { %v8515_v58 = vadd.f32 %v9466_v22, %v8445_v59 }
 0xa7e   :  { %v9499_v48 = vpop.f32.mrf.mxu1 }
 0xa80   :  { %v9500_v41 = vpop.f32.mrf.mxu1 }
 0xa81   :  { %v9501_v36 = vadd.f32 %v9500_v41, %v9499_v48 }
 0xa83   :  { %v8585_v31 = vadd.f32 %v9501_v36, %v8515_v58 }
 0xa85   :  { %v8655_v2 = vadd.f32 %v8654_v49, %v8585_v31 }
 0xa87   :  { %v8659_v7 = vsel %vm8658_vm8, %v8655_v2, -inf  ;;  %8671 = vst.msk [vmem:[#allocation4] sm:$0x3] %vm8658_vm8, %v8655_v2 }
 0xa88   :  { %8660 = vmax.xlane.f32.xlu0 %v8659_v7 }
 0xb11   :  { %v8661_v35 = vpop.xlane.xlu0 %8660 }
 0xb12   :  { %v8662_v60 = vsub.f32 %v8655_v2, %v8661_v35 }
 0xb14   :  { %v8663_v3 = vmul.f32 1.442695, %v8662_v60 }
 0xb16   :  { %9551 = vpow2.f32 %v8663_v3 }
 0xb23   :  { %v9552_v26 = vpop.eup %9551 }
 0xb24   :  { %v8665_v12 = vsel %vm8658_vm8, %v9552_v26, 0.0 }
 0xb25   :  { %8666 = vadd.xlane.f32.xlu0 %v8665_v12 }
 0xb26   :  { %9591 = shalt.err (!%p9588_p4)
}
 0xb27   :  { %8693 = dma.vmem_to_hbm [thread:$0]  %s8691_s12, 32, %s18417_s14, [#allocation5]  }
 0xb28   :  { %s9628_s4 = smov [#allocation2]  }
 0xb29   :  { %s8680_s27 = sshll.u32 %s9628_s4, 4  ;;  %s8681_s27 = int_to_ptr.vmem [resolvable:$true] %s8680_s27 }
 0xb2a   :  { %s9600_s28 = scalar_lea.vmem %s8681_s27, 32  ;;  %p9605_p6 = scmp.lt.s32.totalorder %s8681_s27, %s8681_s27 }
 0xb2b   :  { %p9601_p5 = scmp.ne.s32.totalorder %s8681_s27, %s9600_s28  ;;  %p9606_p7 = scmp.lt.s32.totalorder %s9600_s28, %s9600_s28 }
 0xb2d   :  { %p9607_p8 = por %p9606_p7, %p9605_p6 }
 0xb2f   :  { %p9608_p9 = pnand %p9607_p8, %p9601_p5 }
 0xbae   :  { %v8667_v11 = vpop.xlane.xlu0 %8666 }
 0xbaf   :  { %9553 = vlog2.f32 %v8667_v11 }
 0xbbc   :  { %v9554_v18 = vpop.eup %9553 }
 0xbbd   :  { %v8669_v28 = vmul.f32 0.6931472, %v9554_v18 }
 0xbbf   :  { %v8670_v55 = vadd.f32 %v8669_v28, %v8661_v35 }
 0xbc1   :  { %v8672_v29 = vsub.f32 %v8655_v2, %v8670_v55 }
 0xbc3   :  { %8673 = vst.msk [vmem:[#allocation2] sm:$0x3] %vm8658_vm8, %v8672_v29 }
 0xbc4   :  { %9611 = shalt.err (!%p9608_p9)
}
 0xbc5   :  { %8683 = dma.vmem_to_hbm [thread:$0]  %s8681_s27, 32, %s18416_s13, [#allocation3]  }
 0xbc6   :  { %9620 = dma.done.wait [#allocation3], 32  }
 0xbc7   :  { %9621 = vsyncadd [#allocation3], 4294967264 }
 0xbc8   :  { %9622 = dma.done.wait [#allocation5], 32  }
 0xbc9   :  { %9623 = vsyncadd [#allocation5], 4294967264 }
 0xbca   :  { %8700 = vsyncpa [#allocation3], 1 }
 0xbcb   :  { %8701 = vsyncpa [#allocation5], 1 }

</bundles_post_ra>
